<compile_context>
chip_gen: v5e
topology: v5e:2x2
jax: 0.10.0
libtpu: 0.0.40
codegen_flags: <defaults>
</compile_context>

<pallas_src>
import functools

import jax
import jax.numpy as jnp
from jax import lax
from jax.experimental import pallas as pl
from jax.experimental.pallas import tpu as pltpu

NEG_SLOPE = 0.2
BN_EPS = 1e-5
NUM_PART = 50


# ----------------------------------------------------------------------------
# Generation-dependent sizing (v5e/v6e: 128 MiB VMEM, v7x: 64 MiB)
# ----------------------------------------------------------------------------
def _vmem_capacity():
    try:
        cap = getattr(pltpu.get_tpu_info(), "vmem_capacity_bytes", None)
        if cap:
            return int(cap)
    except Exception:
        pass
    return 64 * 1024 * 1024                       # conservative (v7x-sized) fallback


_VMEM_CAP = _vmem_capacity()
VMEM_LIMIT = int(min((_VMEM_CAP * 3) // 4, 100 * 1024 * 1024))  # 48 MiB v7x, 96 MiB v5e/v6e
_BIG_VMEM = _VMEM_CAP >= 96 * 1024 * 1024
TG_TARGET = 1024 if _BIG_VMEM else 512            # edge-combine points per grid step
TM_TARGET = 1024 if _BIG_VMEM else 512            # per-point linear rows per grid step
TN_TARGET = 2048 if _BIG_VMEM else 1024           # points per step (global max / seg head)
KNN_TN_TARGET = 1024 if _BIG_VMEM else 512        # query rows per knn grid step


# ----------------------------------------------------------------------------
# Helpers
# ----------------------------------------------------------------------------
def _pick_tile(total, target):
    """Largest multiple-of-8 divisor of `total` that is <= target; if none,
    smallest multiple-of-8 divisor above target (bounded VMEM growth);
    falls back to `total` (always legal as a full-dim block)."""
    if total <= target:
        return total
    for t in range(min(target, total), 7, -1):
        if total % t == 0 and t % 8 == 0:
            return t
    for t in range(target + 1, total):
        if total % t == 0 and t % 8 == 0:
            return t
    return total


def _mosaic(dims):
    return pltpu.CompilerParams(dimension_semantics=dims,
                                vmem_limit_bytes=VMEM_LIMIT)


def _leaky(y, alpha):
    if alpha == 1.0:
        return y
    return jnp.where(y >= 0.0, y, alpha * y)


# ----------------------------------------------------------------------------
# Kernel 1: knn scores (bf16 matmul, f32 accumulation, |x_j|^2 precomputed)
# ----------------------------------------------------------------------------
def _knn_kernel(q_ref, k_ref, sq_ref, o_ref):
    q = q_ref[0].astype(jnp.bfloat16)                               # (tn, C)
    kk = k_ref[0].astype(jnp.bfloat16)                              # (N, C)
    inner = lax.dot_general(q, kk, (((1,), (1,)), ((), ())),
                            preferred_element_type=jnp.float32)     # (tn, N)
    # per-row |q|^2 is a constant w.r.t. the per-row top-k -> dropped
    o_ref[0] = 2.0 * inner - sq_ref[0]


def knn_scores(x_bnc, xsq):
    """x_bnc: (B, N, C) bf16, xsq: (B, 1, N) f32 -> (B, N, N) scores whose
    per-row top-k equals the knn of the original pairwise distances."""
    B, N, C = x_bnc.shape
    tn = _pick_tile(N, KNN_TN_TARGET)
    return pl.pallas_call(
        _knn_kernel,
        out_shape=jax.ShapeDtypeStruct((B, N, N), jnp.float32),
        grid=(B, N // tn),
        in_specs=[
            pl.BlockSpec((1, tn, C), lambda b, i: (b, i, 0)),
            pl.BlockSpec((1, N, C), lambda b, i: (b, 0, 0)),
            pl.BlockSpec((1, 1, N), lambda b, i: (b, 0, 0)),
        ],
        out_specs=pl.BlockSpec((1, tn, N), lambda b, i: (b, i, 0)),
        compiler_params=_mosaic(("parallel", "parallel")),
    )(x_bnc, x_bnc, xsq)


def knn_idx(x_bnc, k):
    B, N, _ = x_bnc.shape
    xf = x_bnc.astype(jnp.float32)
    xsq = jnp.sum(xf * xf, axis=-1).reshape(B, 1, N)
    scores = knn_scores(x_bnc, xsq)
    if N <= 128:
        _, idx = lax.top_k(scores, k)            # exact for tiny point clouds
    else:
        _, idx = lax.approx_max_k(scores, k)     # TPU-native, avoids full sort
    return idx                                   # (B, N, K) int32


# ----------------------------------------------------------------------------
# Kernel 2: per-point pre-matmul of the folded edge-conv first layer
#   A  = x @ (Wa * s)            (neighbor term)
#   Ct = x @ ((Wb - Wa) * s) + b (center term, BN bias folded in)
# ----------------------------------------------------------------------------
def _edge_pre_kernel(x_ref, wa_ref, wc_ref, b_ref, oa_ref, oc_ref):
    x = x_ref[...].astype(jnp.bfloat16)
    oa_ref[...] = jnp.dot(x, wa_ref[...],
                          preferred_element_type=jnp.float32).astype(oa_ref.dtype)
    yc = jnp.dot(x, wc_ref[...], preferred_element_type=jnp.float32) + b_ref[...]
    oc_ref[...] = yc.astype(oc_ref.dtype)


def edge_pre(x2d, wa, wc, b):
    M, Cin = x2d.shape
    C1 = wa.shape[1]
    tm = _pick_tile(M, TM_TARGET)
    return pl.pallas_call(
        _edge_pre_kernel,
        out_shape=(jax.ShapeDtypeStruct((M, C1), jnp.bfloat16),
                   jax.ShapeDtypeStruct((M, C1), jnp.bfloat16)),
        grid=(M // tm,),
        in_specs=[
            pl.BlockSpec((tm, Cin), lambda i: (i, 0)),
            pl.BlockSpec((Cin, C1), lambda i: (0, 0)),
            pl.BlockSpec((Cin, C1), lambda i: (0, 0)),
            pl.BlockSpec((1, C1), lambda i: (0, 0)),
        ],
        out_specs=(pl.BlockSpec((tm, C1), lambda i: (i, 0)),
                   pl.BlockSpec((tm, C1), lambda i: (i, 0))),
        compiler_params=_mosaic(("parallel",)),
    )(x2d, wa, wc, b.reshape(1, C1))


# ----------------------------------------------------------------------------
# Kernel 3: edge combine = add center + LeakyReLU [+ conv2 + BN + LeakyReLU]
#           + max over K, all fused (one long MXU matmul over tg*K rows)
# ----------------------------------------------------------------------------
def _edge_combine_kernel(n_ref, c_ref, *rest, alpha, has_l2):
    o_ref = rest[-1]
    tg, kk, c1 = n_ref.shape
    center = jnp.expand_dims(c_ref[...].astype(jnp.float32), 1)     # (tg, 1, C1)
    y = _leaky(n_ref[...].astype(jnp.float32) + center, alpha)      # (tg, K, C1)
    if has_l2:
        w2_ref, s2_ref, b2_ref = rest[0], rest[1], rest[2]
        c2 = w2_ref.shape[1]
        y2 = jnp.dot(y.reshape(tg * kk, c1).astype(jnp.bfloat16), w2_ref[...],
                     preferred_element_type=jnp.float32)            # (tg*K, C2)
        y2 = _leaky(y2 * s2_ref[...] + b2_ref[...], alpha)
        y = y2.reshape(tg, kk, c2)
    o_ref[...] = jnp.max(y, axis=1).astype(o_ref.dtype)


def edge_combine(neigh, ct, layer2, alpha=NEG_SLOPE):
    """neigh: (G, K, C1) bf16 gathered neighbor terms; ct: (G, C1) bf16 center
    terms.  Returns (G, Cout) bf16 = max over K of the edge-conv chain."""
    G, K, C1 = neigh.shape
    tg = _pick_tile(G, TG_TARGET)
    has_l2 = layer2 is not None
    c_out = layer2[0].shape[1] if has_l2 else C1
    in_specs = [pl.BlockSpec((tg, K, C1), lambda i: (i, 0, 0)),
                pl.BlockSpec((tg, C1), lambda i: (i, 0))]
    args = [neigh, ct]
    if has_l2:
        w2, s2, b2 = layer2
        in_specs += [pl.BlockSpec((C1, c_out), lambda i: (0, 0)),
                     pl.BlockSpec((1, c_out), lambda i: (0, 0)),
                     pl.BlockSpec((1, c_out), lambda i: (0, 0))]
        args += [w2, s2.reshape(1, c_out), b2.reshape(1, c_out)]
    return pl.pallas_call(
        functools.partial(_edge_combine_kernel, alpha=alpha, has_l2=has_l2),
        out_shape=jax.ShapeDtypeStruct((G, c_out), jnp.bfloat16),
        grid=(G // tg,),
        in_specs=in_specs,
        out_specs=pl.BlockSpec((tg, c_out), lambda i: (i, 0)),
        compiler_params=_mosaic(("parallel",)),
    )(*args)


# ----------------------------------------------------------------------------
# Kernel 4: tiled fused linear (matmul + folded BN + LeakyReLU)
# ----------------------------------------------------------------------------
def _linear_kernel(x_ref, w_ref, s_ref, b_ref, o_ref, *, alpha):
    y = jnp.dot(x_ref[...].astype(jnp.bfloat16), w_ref[...],
                preferred_element_type=jnp.float32)
    o_ref[...] = _leaky(y * s_ref[...] + b_ref[...], alpha)


def fused_linear(x2d, w, scale, bias, alpha=NEG_SLOPE):
    M, Cin = x2d.shape
    Cout = w.shape[1]
    tm = _pick_tile(M, TM_TARGET)
    return pl.pallas_call(
        functools.partial(_linear_kernel, alpha=alpha),
        out_shape=jax.ShapeDtypeStruct((M, Cout), jnp.float32),
        grid=(M // tm,),
        in_specs=[
            pl.BlockSpec((tm, Cin), lambda i: (i, 0)),
            pl.BlockSpec((Cin, Cout), lambda i: (0, 0)),
            pl.BlockSpec((1, Cout), lambda i: (0, 0)),
            pl.BlockSpec((1, Cout), lambda i: (0, 0)),
        ],
        out_specs=pl.BlockSpec((tm, Cout), lambda i: (i, 0)),
        compiler_params=_mosaic(("parallel",)),
    )(x2d, w, scale.reshape(1, Cout), bias.reshape(1, Cout))


# ----------------------------------------------------------------------------
# Kernel 5: per-batch linear + global max over points (conv6 / t_conv3)
# ----------------------------------------------------------------------------
def _global_max_kernel(x_ref, w_ref, s_ref, b_ref, o_ref, acc_ref, *, alpha):
    @pl.when(pl.program_id(1) == 0)
    def _():
        acc_ref[...] = jnp.full(acc_ref.shape, -jnp.inf, acc_ref.dtype)

    y = jnp.dot(x_ref[0].astype(jnp.bfloat16), w_ref[...],
                preferred_element_type=jnp.float32)
    y = _leaky(y * s_ref[...] + b_ref[...], alpha)
    acc_ref[...] = jnp.maximum(acc_ref[...], jnp.max(y, axis=0, keepdims=True))

    @pl.when(pl.program_id(1) == pl.num_programs(1) - 1)
    def _():
        o_ref[0] = acc_ref[...]


def global_linear_max(x_bnc, w, scale, bias, alpha=NEG_SLOPE):
    B, N, Cin = x_bnc.shape
    Cout = w.shape[1]
    tn = _pick_tile(N, TN_TARGET)
    out = pl.pallas_call(
        functools.partial(_global_max_kernel, alpha=alpha),
        out_shape=jax.ShapeDtypeStruct((B, 1, Cout), jnp.float32),
        grid=(B, N // tn),
        in_specs=[
            pl.BlockSpec((1, tn, Cin), lambda b, n: (b, n, 0)),
            pl.BlockSpec((Cin, Cout), lambda b, n: (0, 0)),
            pl.BlockSpec((1, Cout), lambda b, n: (0, 0)),
            pl.BlockSpec((1, Cout), lambda b, n: (0, 0)),
        ],
        out_specs=pl.BlockSpec((1, 1, Cout), lambda b, n: (b, 0, 0)),
        scratch_shapes=[pltpu.VMEM((1, Cout), jnp.float32)],
        compiler_params=_mosaic(("parallel", "arbitrary")),
    )(x_bnc, w, scale.reshape(1, Cout), bias.reshape(1, Cout))
    return out.reshape(B, Cout)


# ----------------------------------------------------------------------------
# Kernel 6: fused segmentation head (conv8..conv11, concat-free)
#   conv8 = cat(B,N,192) @ w8[1088:1280] + per-batch bias that already folds
#   the 1088-wide global part and BN8's bias.
# ----------------------------------------------------------------------------
def _seg_head_kernel(cat_ref, bias8_ref, w8_ref, s8_ref,
                     w9_ref, s9_ref, b9_ref,
                     w10_ref, s10_ref, b10_ref,
                     w11_ref, o_ref, *, alpha):
    bf16, f32 = jnp.bfloat16, jnp.float32
    y = jnp.dot(cat_ref[0].astype(bf16), w8_ref[...], preferred_element_type=f32)
    y = _leaky(y * s8_ref[...] + bias8_ref[0], alpha)
    # dp1: Dropout(p=0.5) is identity in eval mode
    y = jnp.dot(y.astype(bf16), w9_ref[...], preferred_element_type=f32)
    y = _leaky(y * s9_ref[...] + b9_ref[...], alpha)
    # dp2: identity
    y = jnp.dot(y.astype(bf16), w10_ref[...], preferred_element_type=f32)
    y = _leaky(y * s10_ref[...] + b10_ref[...], alpha)
    # conv11 output is 50-wide (masked lane stores); padding to 128 would give
    # lane-dense stores but costs an extra HBM slice round trip -- skipped.
    o_ref[0] = jnp.dot(y.astype(bf16), w11_ref[...], preferred_element_type=f32)


def seg_head(cat, bias8b, p, num_part):
    """cat: (B, N, 192) bf16; bias8b: (B, 256) f32 -> (B, N, num_part) f32."""
    B, N, _ = cat.shape
    tn = _pick_tile(N, TN_TARGET)
    w8, s8, _ = p["conv8"]
    w8_pt = w8[1088:1280]                       # (192, 256): [x1 | x2 | x3] rows
    w9, s9, b9 = p["conv9"]
    w10, s10, b10 = p["conv10"]
    w11 = p["conv11"][0]

    def _w(shape):
        return pl.BlockSpec(shape, lambda b, n: (0, 0))

    return pl.pallas_call(
        functools.partial(_seg_head_kernel, alpha=NEG_SLOPE),
        out_shape=jax.ShapeDtypeStruct((B, N, num_part), jnp.float32),
        grid=(B, N // tn),
        in_specs=[
            pl.BlockSpec((1, tn, 192), lambda b, n: (b, n, 0)),
            pl.BlockSpec((1, 1, 256), lambda b, n: (b, 0, 0)),
            _w((192, 256)), _w((1, 256)),
            _w((256, 256)), _w((1, 256)), _w((1, 256)),
            _w((256, 128)), _w((1, 128)), _w((1, 128)),
            _w((128, num_part)),
        ],
        out_specs=pl.BlockSpec((1, tn, num_part), lambda b, n: (b, n, 0)),
        compiler_params=_mosaic(("parallel", "parallel")),
    )(cat, bias8b.reshape(B, 1, 256), w8_pt,
      s8.reshape(1, 256),
      w9, s9.reshape(1, 256), b9.reshape(1, 256),
      w10, s10.reshape(1, 128), b10.reshape(1, 128),
      w11)


# ----------------------------------------------------------------------------
# Edge-conv stage glue (fold + 64-wide gather + fused combine)
# ----------------------------------------------------------------------------
def _fold_edge_first(layer):
    """conv([x_j - x_i, x_i]) == x_j @ Wa + x_i @ (Wb - Wa); BN scale folded."""
    w, s, b = layer
    w32 = w.astype(jnp.float32)
    c = w32.shape[0] // 2
    wa = (w32[:c] * s[None, :]).astype(jnp.bfloat16)
    wc = ((w32[c:] - w32[:c]) * s[None, :]).astype(jnp.bfloat16)
    return wa, wc, b


def edge_stage(x_bnc, idx, layer1, layer2):
    """One DGCNN edge-conv block: graph feature -> conv[-> conv] -> max over K.
    x_bnc: (B, N, C) bf16 point features; idx: (B, N, K) int32 knn indices."""
    B, N, C = x_bnc.shape
    G = B * N
    K = idx.shape[-1]
    wa, wc, b1 = _fold_edge_first(layer1)
    a, ct = edge_pre(x_bnc.reshape(G, C), wa, wc, b1)            # (G, C1) bf16 each
    c1 = a.shape[-1]
    # TODO(synk): fuse this 64-wide neighbor gather into edge_combine via
    # scalar-prefetched indices + manual VMEM gather to remove the last
    # XLA-side HBM round trip per stage.
    neigh = jax.vmap(lambda tbl, ix: tbl[ix])(a.reshape(B, N, c1), idx)  # (B,N,K,C1)
    out = edge_combine(neigh.reshape(G, K, c1), ct, layer2)      # (G, Cout) bf16
    return out.reshape(B, N, -1)


# ----------------------------------------------------------------------------
# Parameters (deterministic synthetic init; BN folded to (scale, bias); bf16 W)
# ----------------------------------------------------------------------------
def _bn_fold(key, cout):
    kg, kb, km, kv = jax.random.split(key, 4)
    gamma = 1.0 + 0.1 * jax.random.normal(kg, (cout,), jnp.float32)
    beta = 0.1 * jax.random.normal(kb, (cout,), jnp.float32)
    mean = 0.1 * jax.random.normal(km, (cout,), jnp.float32)
    var = 1.0 + 0.1 * jnp.abs(jax.random.normal(kv, (cout,), jnp.float32))
    scale = gamma / jnp.sqrt(var + BN_EPS)
    bias = beta - mean * scale
    return scale, bias


def _conv_bn(key, cin, cout):
    kw, kbn = jax.random.split(key)
    w = (jax.random.normal(kw, (cin, cout), jnp.float32)
         / jnp.sqrt(float(cin))).astype(jnp.bfloat16)
    scale, bias = _bn_fold(kbn, cout)
    return (w, scale, bias)


def init_params(key, num_part=NUM_PART):
    keys = jax.random.split(key, 16)
    p = {}
    # Transform_Net
    p["t_conv1"] = _conv_bn(keys[0], 6, 64)
    p["t_conv2"] = _conv_bn(keys[1], 64, 128)
    p["t_conv3"] = _conv_bn(keys[2], 128, 1024)
    p["t_lin1"] = _conv_bn(keys[3], 1024, 512)
    p["t_lin2"] = _conv_bn(keys[4], 512, 256)
    # transform head: weight = 0, bias = identity (matches the PyTorch init)
    p["t_transform"] = (jnp.zeros((256, 9), jnp.bfloat16),
                        jnp.ones((9,), jnp.float32),
                        jnp.eye(3, dtype=jnp.float32).reshape(9))
    # main network
    p["conv1"] = _conv_bn(keys[5], 6, 64)
    p["conv2"] = _conv_bn(keys[6], 64, 64)
    p["conv3"] = _conv_bn(keys[7], 128, 64)
    p["conv4"] = _conv_bn(keys[8], 64, 64)
    p["conv5"] = _conv_bn(keys[9], 128, 64)
    p["conv6"] = _conv_bn(keys[10], 192, 1024)
    p["conv7"] = _conv_bn(keys[11], 16, 64)
    p["conv8"] = _conv_bn(keys[12], 1280, 256)
    p["conv9"] = _conv_bn(keys[13], 256, 256)
    p["conv10"] = _conv_bn(keys[14], 256, 128)
    p["conv11"] = ((jax.random.normal(keys[15], (128, num_part), jnp.float32)
                    / jnp.sqrt(128.0)).astype(jnp.bfloat16),
                   jnp.ones((num_part,), jnp.float32),
                   jnp.zeros((num_part,), jnp.float32))
    return p


# ----------------------------------------------------------------------------
# Forward pass
# ----------------------------------------------------------------------------
def transform_net(x_bnc, idx, p):
    B, N, _ = x_bnc.shape
    h = edge_stage(x_bnc, idx, p["t_conv1"], p["t_conv2"])        # (B, N, 128) bf16
    hg = global_linear_max(h, *p["t_conv3"])                      # (B, 1024)  f32
    h = fused_linear(hg, *p["t_lin1"])                            # (B, 512)
    h = fused_linear(h, *p["t_lin2"])                             # (B, 256)
    tw, ts, tb = p["t_transform"]
    t = fused_linear(h, tw, ts, tb, alpha=1.0)                    # (B, 9): identity at init
    return t.reshape(B, 3, 3)


def forward(x_bcn, l_onehot, p, *, k, num_part=NUM_PART):
    # x_bcn: (B, 3, N) as in PyTorch; l_onehot: (B, 16)
    B, _, N = x_bcn.shape
    x = jnp.transpose(x_bcn, (0, 2, 1))                           # (B, N, 3) f32
    xb = x.astype(jnp.bfloat16)

    idx0 = knn_idx(xb, k)
    t = transform_net(xb, idx0, p)                                # (B, 3, 3)
    x = jnp.einsum("bnc,bcd->bnd", x, t)                          # trivial 3x3 bmm (XLA)
    xb = x.astype(jnp.bfloat16)

    idx1 = knn_idx(xb, k)
    x1 = edge_stage(xb, idx1, p["conv1"], p["conv2"])             # (B, N, 64) bf16
    idx2 = knn_idx(x1, k)
    x2 = edge_stage(x1, idx2, p["conv3"], p["conv4"])             # (B, N, 64) bf16
    idx3 = knn_idx(x2, k)
    x3 = edge_stage(x2, idx3, p["conv5"], None)                   # (B, N, 64) bf16

    cat = jnp.concatenate([x1, x2, x3], axis=-1)                  # (B, N, 192) bf16
    xg = global_linear_max(cat, *p["conv6"])                      # (B, 1024) f32
    lf = fused_linear(l_onehot, *p["conv7"])                      # (B, 64)   f32
    glob = jnp.concatenate([xg, lf], axis=-1)                     # (B, 1088)

    # fold the 1088-wide global part of conv8 + BN8 bias into a per-batch bias
    w8, s8, b8 = p["conv8"]
    glob8 = jnp.dot(glob.astype(jnp.bfloat16), w8[:1088],
                    preferred_element_type=jnp.float32)           # (B, 256)
    bias8b = glob8 * s8[None, :] + b8[None, :]                    # (B, 256) f32

    out = seg_head(cat, bias8b, p, num_part)                      # (B, N, num_part)
    trans_feat = None
    return out, trans_feat                                        # == x.transpose(1, 2)


# ----------------------------------------------------------------------------
if __name__ == "__main__":
    B, N, K = 2, 16, 4                      # batch, num_points, args.n_knn
    key = jax.random.PRNGKey(0)
    kx, kp = jax.random.split(key)

    x = jax.random.normal(kx, (B, 3, N), jnp.float32)          # point cloud (B, 3, N)
    labels = jnp.array([3, 7])
    l = jax.nn.one_hot(labels, 16, dtype=jnp.float32)          # category one-hot (B, 16)
    params = init_params(kp)

    fwd = jax.jit(functools.partial(forward, k=K))
    out, trans_feat = fwd(x, l, params)
    out = jax.block_until_ready(out)

    assert out.shape == (B, N, NUM_PART), out.shape
    assert trans_feat is None
    assert bool(jnp.all(jnp.isfinite(out)))
    print("KERNEL_OK")
</pallas_src>

<mosaic_0001>
module attributes {stable_mosaic.version = 11 : i64} {
  func.func @_edge_pre_kernel(%arg0: i32, %arg1: memref<32x3xbf16, #tpu.memory_space<vmem>>, %arg2: memref<3x64xbf16, #tpu.memory_space<vmem>>, %arg3: memref<3x64xbf16, #tpu.memory_space<vmem>>, %arg4: memref<1x64xf32, #tpu.memory_space<vmem>>, %arg5: memref<32x64xbf16, #tpu.memory_space<vmem>>, %arg6: memref<32x64xbf16, #tpu.memory_space<vmem>>) attributes {dimension_semantics = [#tpu.dimension_semantics<parallel>], iteration_bounds = array<i64: 1>, scalar_prefetch = 0 : i64, scratch_operands = 0 : i64, tpu.core_type = #tpu.core_type<tc>, window_params = [{transform_indices = @transform_0, window_bounds = array<i64: 32, 3>}, {pipeline_mode = #tpu.pipeline_mode<synchronous>, transform_indices = @transform_1, window_bounds = array<i64: 3, 64>}, {pipeline_mode = #tpu.pipeline_mode<synchronous>, transform_indices = @transform_2, window_bounds = array<i64: 3, 64>}, {pipeline_mode = #tpu.pipeline_mode<synchronous>, transform_indices = @transform_3, window_bounds = array<i64: 1, 64>}, {transform_indices = @transform_4, window_bounds = array<i64: 32, 64>}, {transform_indices = @transform_5, window_bounds = array<i64: 32, 64>}]} {
    %c0 = arith.constant 0 : index
    %c0_0 = arith.constant 0 : index
    %0 = vector.load %arg1[%c0, %c0_0] : memref<32x3xbf16, #tpu.memory_space<vmem>>, vector<32x3xbf16>
    %c0_1 = arith.constant 0 : index
    %c0_2 = arith.constant 0 : index
    %1 = vector.load %arg2[%c0_1, %c0_2] : memref<3x64xbf16, #tpu.memory_space<vmem>>, vector<3x64xbf16>
    %cst = arith.constant dense<0.000000e+00> : vector<32x64xf32>
    %2 = tpu.matmul %0, %1, %cst {dimension_numbers = #tpu.dot_dimension_numbers<[1], [0], [0], [1], [0, 0, 1, 1], [], []>} : vector<32x3xbf16>, vector<3x64xbf16>, vector<32x64xf32> -> vector<32x64xf32>
    %3 = arith.truncf %2 : vector<32x64xf32> to vector<32x64xbf16>
    %c0_3 = arith.constant 0 : index
    %c0_4 = arith.constant 0 : index
    %4 = vector.load %arg5[%c0_3, %c0_4] : memref<32x64xbf16, #tpu.memory_space<vmem>>, vector<32x64xbf16>
    tpu.vector_store %arg5[%c0_3, %c0_4], %3 {strides = array<i32>} : memref<32x64xbf16, #tpu.memory_space<vmem>>, vector<32x64xbf16>,
    %c0_5 = arith.constant 0 : index
    %c0_6 = arith.constant 0 : index
    %5 = vector.load %arg3[%c0_5, %c0_6] : memref<3x64xbf16, #tpu.memory_space<vmem>>, vector<3x64xbf16>
    %cst_7 = arith.constant dense<0.000000e+00> : vector<32x64xf32>
    %6 = tpu.matmul %0, %5, %cst_7 {dimension_numbers = #tpu.dot_dimension_numbers<[1], [0], [0], [1], [0, 0, 1, 1], [], []>} : vector<32x3xbf16>, vector<3x64xbf16>, vector<32x64xf32> -> vector<32x64xf32>
    %c0_8 = arith.constant 0 : index
    %c0_9 = arith.constant 0 : index
    %7 = vector.load %arg4[%c0_8, %c0_9] : memref<1x64xf32, #tpu.memory_space<vmem>>, vector<1x64xf32>
    %8 = vector.broadcast %7 : vector<1x64xf32> to vector<32x64xf32>
    %9 = arith.addf %6, %8 : vector<32x64xf32>
    %10 = arith.truncf %9 : vector<32x64xf32> to vector<32x64xbf16>
    %c0_10 = arith.constant 0 : index
    %c0_11 = arith.constant 0 : index
    %11 = vector.load %arg6[%c0_10, %c0_11] : memref<32x64xbf16, #tpu.memory_space<vmem>>, vector<32x64xbf16>
    tpu.vector_store %arg6[%c0_10, %c0_11], %10 {strides = array<i32>} : memref<32x64xbf16, #tpu.memory_space<vmem>>, vector<32x64xbf16>,
    return
  }
  func.func @transform_0(%arg0: i32) -> (i32, i32) {
    %c0_i32 = arith.constant 0 : i32
    %c0_i32_0 = arith.constant 0 : i32
    return %arg0, %c0_i32 : i32, i32
  }
  func.func @transform_1(%arg0: i32) -> (i32, i32) {
    %c0_i32 = arith.constant 0 : i32
    %c0_i32_0 = arith.constant 0 : i32
    %c0_i32_1 = arith.constant 0 : i32
    return %c0_i32, %c0_i32_0 : i32, i32
  }
  func.func @transform_2(%arg0: i32) -> (i32, i32) {
    %c0_i32 = arith.constant 0 : i32
    %c0_i32_0 = arith.constant 0 : i32
    %c0_i32_1 = arith.constant 0 : i32
    return %c0_i32, %c0_i32_0 : i32, i32
  }
  func.func @transform_3(%arg0: i32) -> (i32, i32) {
    %c0_i32 = arith.constant 0 : i32
    %c0_i32_0 = arith.constant 0 : i32
    %c0_i32_1 = arith.constant 0 : i32
    return %c0_i32, %c0_i32_0 : i32, i32
  }
  func.func @transform_4(%arg0: i32) -> (i32, i32) {
    %c0_i32 = arith.constant 0 : i32
    %c0_i32_0 = arith.constant 0 : i32
    return %arg0, %c0_i32 : i32, i32
  }
  func.func @transform_5(%arg0: i32) -> (i32, i32) {
    %c0_i32 = arith.constant 0 : i32
    %c0_i32_0 = arith.constant 0 : i32
    return %arg0, %c0_i32 : i32, i32
  }
}

module attributes {stable_mosaic.version = 11 : i64} {
  func.func @_knn_kernel(%arg0: i32, %arg1: i32, %arg2: memref<1x16x3xbf16, #tpu.memory_space<vmem>>, %arg3: memref<1x16x3xbf16, #tpu.memory_space<vmem>>, %arg4: memref<1x1x16xf32, #tpu.memory_space<vmem>>, %arg5: memref<1x16x16xf32, #tpu.memory_space<vmem>>) attributes {dimension_semantics = [#tpu.dimension_semantics<parallel>, #tpu.dimension_semantics<parallel>], iteration_bounds = array<i64: 2, 1>, scalar_prefetch = 0 : i64, scratch_operands = 0 : i64, tpu.core_type = #tpu.core_type<tc>, window_params = [{transform_indices = @transform_0, window_bounds = array<i64: 1, 16, 3>}, {transform_indices = @transform_1, window_bounds = array<i64: 1, 16, 3>}, {transform_indices = @transform_2, window_bounds = array<i64: 1, 1, 16>}, {transform_indices = @transform_3, window_bounds = array<i64: 1, 16, 16>}]} {
    %c0 = arith.constant 0 : index
    %c0_0 = arith.constant 0 : index
    %c0_1 = arith.constant 0 : index
    %0 = vector.load %arg2[%c0, %c0_0, %c0_1] : memref<1x16x3xbf16, #tpu.memory_space<vmem>>, vector<1x16x3xbf16>
    %1 = vector.shape_cast %0 : vector<1x16x3xbf16> to vector<16x3xbf16>
    %c0_2 = arith.constant 0 : index
    %c0_3 = arith.constant 0 : index
    %c0_4 = arith.constant 0 : index
    %2 = vector.load %arg3[%c0_2, %c0_3, %c0_4] : memref<1x16x3xbf16, #tpu.memory_space<vmem>>, vector<1x16x3xbf16>
    %3 = vector.shape_cast %2 : vector<1x16x3xbf16> to vector<16x3xbf16>
    %cst = arith.constant dense<0.000000e+00> : vector<16x16xf32>
    %4 = tpu.matmul %1, %3, %cst {dimension_numbers = #tpu.dot_dimension_numbers<[1], [1], [0], [0], [0, 0, 1, 0], [], []>} : vector<16x3xbf16>, vector<16x3xbf16>, vector<16x16xf32> -> vector<16x16xf32>
    %cst_5 = arith.constant 2.000000e+00 : f32
    %5 = vector.broadcast %cst_5 : f32 to vector<16x16xf32>
    %6 = arith.mulf %5, %4 : vector<16x16xf32>
    %c0_6 = arith.constant 0 : index
    %c0_7 = arith.constant 0 : index
    %c0_8 = arith.constant 0 : index
    %7 = vector.load %arg4[%c0_6, %c0_7, %c0_8] : memref<1x1x16xf32, #tpu.memory_space<vmem>>, vector<1x1x16xf32>
    %8 = vector.shape_cast %7 : vector<1x1x16xf32> to vector<1x16xf32>
    %9 = vector.broadcast %8 : vector<1x16xf32> to vector<16x16xf32>
    %10 = arith.subf %6, %9 : vector<16x16xf32>
    %c0_9 = arith.constant 0 : index
    %c0_10 = arith.constant 0 : index
    %c0_11 = arith.constant 0 : index
    %11 = vector.load %arg5[%c0_9, %c0_10, %c0_11] : memref<1x16x16xf32, #tpu.memory_space<vmem>>, vector<1x16x16xf32>
    %12 = vector.shape_cast %11 : vector<1x16x16xf32> to vector<16x16xf32>
    %13 = vector.shape_cast %10 : vector<16x16xf32> to vector<1x16x16xf32>
    tpu.vector_store %arg5[%c0_9, %c0_10, %c0_11], %13 {strides = array<i32>} : memref<1x16x16xf32, #tpu.memory_space<vmem>>, vector<1x16x16xf32>,
    return
  }
  func.func @transform_0(%arg0: i32, %arg1: i32) -> (i32, i32, i32) {
    %c0_i32 = arith.constant 0 : i32
    %c0_i32_0 = arith.constant 0 : i32
    return %arg0, %arg1, %c0_i32 : i32, i32, i32
  }
  func.func @transform_1(%arg0: i32, %arg1: i32) -> (i32, i32, i32) {
    %c0_i32 = arith.constant 0 : i32
    %c0_i32_0 = arith.constant 0 : i32
    %c0_i32_1 = arith.constant 0 : i32
    return %arg0, %c0_i32, %c0_i32_0 : i32, i32, i32
  }
  func.func @transform_2(%arg0: i32, %arg1: i32) -> (i32, i32, i32) {
    %c0_i32 = arith.constant 0 : i32
    %c0_i32_0 = arith.constant 0 : i32
    %c0_i32_1 = arith.constant 0 : i32
    return %arg0, %c0_i32, %c0_i32_0 : i32, i32, i32
  }
  func.func @transform_3(%arg0: i32, %arg1: i32) -> (i32, i32, i32) {
    %c0_i32 = arith.constant 0 : i32
    %c0_i32_0 = arith.constant 0 : i32
    return %arg0, %arg1, %c0_i32 : i32, i32, i32
  }
}

module attributes {stable_mosaic.version = 11 : i64} {
  func.func @_edge_combine_kernel(%arg0: i32, %arg1: memref<32x4x64xbf16, #tpu.memory_space<vmem>>, %arg2: memref<32x64xbf16, #tpu.memory_space<vmem>>, %arg3: memref<64x128xbf16, #tpu.memory_space<vmem>>, %arg4: memref<1x128xf32, #tpu.memory_space<vmem>>, %arg5: memref<1x128xf32, #tpu.memory_space<vmem>>, %arg6: memref<32x128xbf16, #tpu.memory_space<vmem>>) attributes {dimension_semantics = [#tpu.dimension_semantics<parallel>], iteration_bounds = array<i64: 1>, scalar_prefetch = 0 : i64, scratch_operands = 0 : i64, tpu.core_type = #tpu.core_type<tc>, window_params = [{transform_indices = @transform_0, window_bounds = array<i64: 32, 4, 64>}, {transform_indices = @transform_1, window_bounds = array<i64: 32, 64>}, {pipeline_mode = #tpu.pipeline_mode<synchronous>, transform_indices = @transform_2, window_bounds = array<i64: 64, 128>}, {pipeline_mode = #tpu.pipeline_mode<synchronous>, transform_indices = @transform_3, window_bounds = array<i64: 1, 128>}, {pipeline_mode = #tpu.pipeline_mode<synchronous>, transform_indices = @transform_4, window_bounds = array<i64: 1, 128>}, {transform_indices = @transform_5, window_bounds = array<i64: 32, 128>}]} {
    %c0 = arith.constant 0 : index
    %c0_0 = arith.constant 0 : index
    %0 = vector.load %arg2[%c0, %c0_0] : memref<32x64xbf16, #tpu.memory_space<vmem>>, vector<32x64xbf16>
    %1 = arith.extf %0 : vector<32x64xbf16> to vector<32x64xf32>
    %2 = vector.shape_cast %1 : vector<32x64xf32> to vector<32x1x64xf32>
    %c0_1 = arith.constant 0 : index
    %c0_2 = arith.constant 0 : index
    %c0_3 = arith.constant 0 : index
    %3 = vector.load %arg1[%c0_1, %c0_2, %c0_3] : memref<32x4x64xbf16, #tpu.memory_space<vmem>>, vector<32x4x64xbf16>
    %4 = arith.extf %3 : vector<32x4x64xbf16> to vector<32x4x64xf32>
    %5 = vector.broadcast %2 : vector<32x1x64xf32> to vector<32x4x64xf32>
    %6 = arith.addf %4, %5 : vector<32x4x64xf32>
    %cst = arith.constant 0.000000e+00 : f32
    %7 = vector.broadcast %cst : f32 to vector<32x4x64xf32>
    %8 = arith.cmpf oge, %6, %7 : vector<32x4x64xf32>
    %cst_4 = arith.constant 2.000000e-01 : f32
    %9 = vector.broadcast %cst_4 : f32 to vector<32x4x64xf32>
    %10 = arith.mulf %9, %6 : vector<32x4x64xf32>
    %11 = arith.select %8, %6, %10 : vector<32x4x64xi1>, vector<32x4x64xf32>
    %12 = vector.shape_cast %11 : vector<32x4x64xf32> to vector<128x64xf32>
    %13 = arith.truncf %12 : vector<128x64xf32> to vector<128x64xbf16>
    %c0_5 = arith.constant 0 : index
    %c0_6 = arith.constant 0 : index
    %14 = vector.load %arg3[%c0_5, %c0_6] : memref<64x128xbf16, #tpu.memory_space<vmem>>, vector<64x128xbf16>
    %cst_7 = arith.constant dense<0.000000e+00> : vector<128x128xf32>
    %15 = tpu.matmul %13, %14, %cst_7 {dimension_numbers = #tpu.dot_dimension_numbers<[1], [0], [0], [1], [0, 0, 1, 1], [], []>} : vector<128x64xbf16>, vector<64x128xbf16>, vector<128x128xf32> -> vector<128x128xf32>
    %c0_8 = arith.constant 0 : index
    %c0_9 = arith.constant 0 : index
    %16 = vector.load %arg4[%c0_8, %c0_9] : memref<1x128xf32, #tpu.memory_space<vmem>>, vector<1x128xf32>
    %17 = vector.broadcast %16 : vector<1x128xf32> to vector<128x128xf32>
    %18 = arith.mulf %15, %17 : vector<128x128xf32>
    %c0_10 = arith.constant 0 : index
    %c0_11 = arith.constant 0 : index
    %19 = vector.load %arg5[%c0_10, %c0_11] : memref<1x128xf32, #tpu.memory_space<vmem>>, vector<1x128xf32>
    %20 = vector.broadcast %19 : vector<1x128xf32> to vector<128x128xf32>
    %21 = arith.addf %18, %20 : vector<128x128xf32>
    %cst_12 = arith.constant 0.000000e+00 : f32
    %22 = vector.broadcast %cst_12 : f32 to vector<128x128xf32>
    %23 = arith.cmpf oge, %21, %22 : vector<128x128xf32>
    %cst_13 = arith.constant 2.000000e-01 : f32
    %24 = vector.broadcast %cst_13 : f32 to vector<128x128xf32>
    %25 = arith.mulf %24, %21 : vector<128x128xf32>
    %26 = arith.select %23, %21, %25 : vector<128x128xi1>, vector<128x128xf32>
    %27 = vector.shape_cast %26 : vector<128x128xf32> to vector<32x4x128xf32>
    %cst_14 = arith.constant dense<0xFF800000> : vector<32x128xf32>
    %28 = vector.multi_reduction <maximumf>, %27, %cst_14 [1] : vector<32x4x128xf32> to vector<32x128xf32>
    %29 = arith.truncf %28 : vector<32x128xf32> to vector<32x128xbf16>
    %c0_15 = arith.constant 0 : index
    %c0_16 = arith.constant 0 : index
    %30 = vector.load %arg6[%c0_15, %c0_16] : memref<32x128xbf16, #tpu.memory_space<vmem>>, vector<32x128xbf16>
    tpu.vector_store %arg6[%c0_15, %c0_16], %29 {strides = array<i32>} : memref<32x128xbf16, #tpu.memory_space<vmem>>, vector<32x128xbf16>,
    return
  }
  func.func @transform_0(%arg0: i32) -> (i32, i32, i32) {
    %c0_i32 = arith.constant 0 : i32
    %c0_i32_0 = arith.constant 0 : i32
    %c0_i32_1 = arith.constant 0 : i32
    return %arg0, %c0_i32, %c0_i32_0 : i32, i32, i32
  }
  func.func @transform_1(%arg0: i32) -> (i32, i32) {
    %c0_i32 = arith.constant 0 : i32
    %c0_i32_0 = arith.constant 0 : i32
    return %arg0, %c0_i32 : i32, i32
  }
  func.func @transform_2(%arg0: i32) -> (i32, i32) {
    %c0_i32 = arith.constant 0 : i32
    %c0_i32_0 = arith.constant 0 : i32
    %c0_i32_1 = arith.constant 0 : i32
    return %c0_i32, %c0_i32_0 : i32, i32
  }
  func.func @transform_3(%arg0: i32) -> (i32, i32) {
    %c0_i32 = arith.constant 0 : i32
    %c0_i32_0 = arith.constant 0 : i32
    %c0_i32_1 = arith.constant 0 : i32
    return %c0_i32, %c0_i32_0 : i32, i32
  }
  func.func @transform_4(%arg0: i32) -> (i32, i32) {
    %c0_i32 = arith.constant 0 : i32
    %c0_i32_0 = arith.constant 0 : i32
    %c0_i32_1 = arith.constant 0 : i32
    return %c0_i32, %c0_i32_0 : i32, i32
  }
  func.func @transform_5(%arg0: i32) -> (i32, i32) {
    %c0_i32 = arith.constant 0 : i32
    %c0_i32_0 = arith.constant 0 : i32
    return %arg0, %c0_i32 : i32, i32
  }
}

module attributes {stable_mosaic.version = 11 : i64} {
  func.func @_linear_kernel(%arg0: i32, %arg1: memref<2x1024xf32, #tpu.memory_space<vmem>>, %arg2: memref<1024x512xbf16, #tpu.memory_space<vmem>>, %arg3: memref<1x512xf32, #tpu.memory_space<vmem>>, %arg4: memref<1x512xf32, #tpu.memory_space<vmem>>, %arg5: memref<2x512xf32, #tpu.memory_space<vmem>>) attributes {dimension_semantics = [#tpu.dimension_semantics<parallel>], iteration_bounds = array<i64: 1>, scalar_prefetch = 0 : i64, scratch_operands = 0 : i64, tpu.core_type = #tpu.core_type<tc>, window_params = [{transform_indices = @transform_0, window_bounds = array<i64: 2, 1024>}, {pipeline_mode = #tpu.pipeline_mode<synchronous>, transform_indices = @transform_1, window_bounds = array<i64: 1024, 512>}, {pipeline_mode = #tpu.pipeline_mode<synchronous>, transform_indices = @transform_2, window_bounds = array<i64: 1, 512>}, {pipeline_mode = #tpu.pipeline_mode<synchronous>, transform_indices = @transform_3, window_bounds = array<i64: 1, 512>}, {transform_indices = @transform_4, window_bounds = array<i64: 2, 512>}]} {
    %c0 = arith.constant 0 : index
    %c0_0 = arith.constant 0 : index
    %0 = vector.load %arg1[%c0, %c0_0] : memref<2x1024xf32, #tpu.memory_space<vmem>>, vector<2x1024xf32>
    %1 = arith.truncf %0 : vector<2x1024xf32> to vector<2x1024xbf16>
    %c0_1 = arith.constant 0 : index
    %c0_2 = arith.constant 0 : index
    %2 = vector.load %arg2[%c0_1, %c0_2] : memref<1024x512xbf16, #tpu.memory_space<vmem>>, vector<1024x512xbf16>
    %cst = arith.constant dense<0.000000e+00> : vector<2x512xf32>
    %3 = tpu.matmul %1, %2, %cst {dimension_numbers = #tpu.dot_dimension_numbers<[1], [0], [0], [1], [0, 0, 1, 1], [], []>} : vector<2x1024xbf16>, vector<1024x512xbf16>, vector<2x512xf32> -> vector<2x512xf32>
    %c0_3 = arith.constant 0 : index
    %c0_4 = arith.constant 0 : index
    %4 = vector.load %arg3[%c0_3, %c0_4] : memref<1x512xf32, #tpu.memory_space<vmem>>, vector<1x512xf32>
    %5 = vector.broadcast %4 : vector<1x512xf32> to vector<2x512xf32>
    %6 = arith.mulf %3, %5 : vector<2x512xf32>
    %c0_5 = arith.constant 0 : index
    %c0_6 = arith.constant 0 : index
    %7 = vector.load %arg4[%c0_5, %c0_6] : memref<1x512xf32, #tpu.memory_space<vmem>>, vector<1x512xf32>
    %8 = vector.broadcast %7 : vector<1x512xf32> to vector<2x512xf32>
    %9 = arith.addf %6, %8 : vector<2x512xf32>
    %cst_7 = arith.constant 0.000000e+00 : f32
    %10 = vector.broadcast %cst_7 : f32 to vector<2x512xf32>
    %11 = arith.cmpf oge, %9, %10 : vector<2x512xf32>
    %cst_8 = arith.constant 2.000000e-01 : f32
    %12 = vector.broadcast %cst_8 : f32 to vector<2x512xf32>
    %13 = arith.mulf %12, %9 : vector<2x512xf32>
    %14 = arith.select %11, %9, %13 : vector<2x512xi1>, vector<2x512xf32>
    %c0_9 = arith.constant 0 : index
    %c0_10 = arith.constant 0 : index
    %15 = vector.load %arg5[%c0_9, %c0_10] : memref<2x512xf32, #tpu.memory_space<vmem>>, vector<2x512xf32>
    tpu.vector_store %arg5[%c0_9, %c0_10], %14 {strides = array<i32>} : memref<2x512xf32, #tpu.memory_space<vmem>>, vector<2x512xf32>,
    return
  }
  func.func @transform_0(%arg0: i32) -> (i32, i32) {
    %c0_i32 = arith.constant 0 : i32
    %c0_i32_0 = arith.constant 0 : i32
    return %arg0, %c0_i32 : i32, i32
  }
  func.func @transform_1(%arg0: i32) -> (i32, i32) {
    %c0_i32 = arith.constant 0 : i32
    %c0_i32_0 = arith.constant 0 : i32
    %c0_i32_1 = arith.constant 0 : i32
    return %c0_i32, %c0_i32_0 : i32, i32
  }
  func.func @transform_2(%arg0: i32) -> (i32, i32) {
    %c0_i32 = arith.constant 0 : i32
    %c0_i32_0 = arith.constant 0 : i32
    %c0_i32_1 = arith.constant 0 : i32
    return %c0_i32, %c0_i32_0 : i32, i32
  }
  func.func @transform_3(%arg0: i32) -> (i32, i32) {
    %c0_i32 = arith.constant 0 : i32
    %c0_i32_0 = arith.constant 0 : i32
    %c0_i32_1 = arith.constant 0 : i32
    return %c0_i32, %c0_i32_0 : i32, i32
  }
  func.func @transform_4(%arg0: i32) -> (i32, i32) {
    %c0_i32 = arith.constant 0 : i32
    %c0_i32_0 = arith.constant 0 : i32
    return %arg0, %c0_i32 : i32, i32
  }
}

module attributes {stable_mosaic.version = 11 : i64} {
  func.func @_global_max_kernel(%arg0: i32, %arg1: i32, %arg2: memref<1x16x128xbf16, #tpu.memory_space<vmem>>, %arg3: memref<128x1024xbf16, #tpu.memory_space<vmem>>, %arg4: memref<1x1024xf32, #tpu.memory_space<vmem>>, %arg5: memref<1x1024xf32, #tpu.memory_space<vmem>>, %arg6: memref<1x1x1024xf32, #tpu.memory_space<vmem>>, %arg7: memref<1x1024xf32, #tpu.memory_space<vmem>>) attributes {dimension_semantics = [#tpu.dimension_semantics<parallel>, #tpu.dimension_semantics<arbitrary>], iteration_bounds = array<i64: 2, 1>, scalar_prefetch = 0 : i64, scratch_operands = 1 : i64, tpu.core_type = #tpu.core_type<tc>, window_params = [{transform_indices = @transform_0, window_bounds = array<i64: 1, 16, 128>}, {pipeline_mode = #tpu.pipeline_mode<synchronous>, transform_indices = @transform_1, window_bounds = array<i64: 128, 1024>}, {pipeline_mode = #tpu.pipeline_mode<synchronous>, transform_indices = @transform_2, window_bounds = array<i64: 1, 1024>}, {pipeline_mode = #tpu.pipeline_mode<synchronous>, transform_indices = @transform_3, window_bounds = array<i64: 1, 1024>}, {transform_indices = @transform_4, window_bounds = array<i64: 1, 1, 1024>}]} {
    %c0_i32 = arith.constant 0 : i32
    %0 = arith.cmpi eq, %arg1, %c0_i32 : i32
    %1 = arith.extui %0 : i1 to i32
    %c0_i32_0 = arith.constant 0 : i32
    %2 = arith.cmpi ne, %1, %c0_i32_0 : i32
    scf.if %2 {
      %cst_18 = arith.constant 0xFF800000 : f32
      %26 = vector.broadcast %cst_18 : f32 to vector<1x1024xf32>
      %c0_19 = arith.constant 0 : index
      %c0_20 = arith.constant 0 : index
      %27 = vector.load %arg7[%c0_19, %c0_20] : memref<1x1024xf32, #tpu.memory_space<vmem>>, vector<1x1024xf32>
      tpu.vector_store %arg7[%c0_19, %c0_20], %26 {strides = array<i32>} : memref<1x1024xf32, #tpu.memory_space<vmem>>, vector<1x1024xf32>,
    } else {
    }
    %c0 = arith.constant 0 : index
    %c0_1 = arith.constant 0 : index
    %c0_2 = arith.constant 0 : index
    %3 = vector.load %arg2[%c0, %c0_1, %c0_2] : memref<1x16x128xbf16, #tpu.memory_space<vmem>>, vector<1x16x128xbf16>
    %4 = vector.shape_cast %3 : vector<1x16x128xbf16> to vector<16x128xbf16>
    %c0_3 = arith.constant 0 : index
    %c0_4 = arith.constant 0 : index
    %5 = vector.load %arg3[%c0_3, %c0_4] : memref<128x1024xbf16, #tpu.memory_space<vmem>>, vector<128x1024xbf16>
    %cst = arith.constant dense<0.000000e+00> : vector<16x1024xf32>
    %6 = tpu.matmul %4, %5, %cst {dimension_numbers = #tpu.dot_dimension_numbers<[1], [0], [0], [1], [0, 0, 1, 1], [], []>} : vector<16x128xbf16>, vector<128x1024xbf16>, vector<16x1024xf32> -> vector<16x1024xf32>
    %c0_5 = arith.constant 0 : index
    %c0_6 = arith.constant 0 : index
    %7 = vector.load %arg4[%c0_5, %c0_6] : memref<1x1024xf32, #tpu.memory_space<vmem>>, vector<1x1024xf32>
    %8 = vector.broadcast %7 : vector<1x1024xf32> to vector<16x1024xf32>
    %9 = arith.mulf %6, %8 : vector<16x1024xf32>
    %c0_7 = arith.constant 0 : index
    %c0_8 = arith.constant 0 : index
    %10 = vector.load %arg5[%c0_7, %c0_8] : memref<1x1024xf32, #tpu.memory_space<vmem>>, vector<1x1024xf32>
    %11 = vector.broadcast %10 : vector<1x1024xf32> to vector<16x1024xf32>
    %12 = arith.addf %9, %11 : vector<16x1024xf32>
    %cst_9 = arith.constant 0.000000e+00 : f32
    %13 = vector.broadcast %cst_9 : f32 to vector<16x1024xf32>
    %14 = arith.cmpf oge, %12, %13 : vector<16x1024xf32>
    %cst_10 = arith.constant 2.000000e-01 : f32
    %15 = vector.broadcast %cst_10 : f32 to vector<16x1024xf32>
    %16 = arith.mulf %15, %12 : vector<16x1024xf32>
    %17 = arith.select %14, %12, %16 : vector<16x1024xi1>, vector<16x1024xf32>
    %c0_11 = arith.constant 0 : index
    %c0_12 = arith.constant 0 : index
    %18 = vector.load %arg7[%c0_11, %c0_12] : memref<1x1024xf32, #tpu.memory_space<vmem>>, vector<1x1024xf32>
    %cst_13 = arith.constant dense<0xFF800000> : vector<1024xf32>
    %19 = vector.multi_reduction <maximumf>, %17, %cst_13 [0] : vector<16x1024xf32> to vector<1024xf32>
    %20 = vector.shape_cast %19 : vector<1024xf32> to vector<1x1024xf32>
    %21 = arith.maximumf %18, %20 : vector<1x1024xf32>
    %c0_14 = arith.constant 0 : index
    %c0_15 = arith.constant 0 : index
    %22 = vector.load %arg7[%c0_14, %c0_15] : memref<1x1024xf32, #tpu.memory_space<vmem>>, vector<1x1024xf32>
    tpu.vector_store %arg7[%c0_14, %c0_15], %21 {strides = array<i32>} : memref<1x1024xf32, #tpu.memory_space<vmem>>, vector<1x1024xf32>,
    %c0_i32_16 = arith.constant 0 : i32
    %23 = arith.cmpi eq, %arg1, %c0_i32_16 : i32
    %24 = arith.extui %23 : i1 to i32
    %c0_i32_17 = arith.constant 0 : i32
    %25 = arith.cmpi ne, %24, %c0_i32_17 : i32
    scf.if %25 {
      %c0_18 = arith.constant 0 : index
      %c0_19 = arith.constant 0 : index
      %26 = vector.load %arg7[%c0_18, %c0_19] : memref<1x1024xf32, #tpu.memory_space<vmem>>, vector<1x1024xf32>
      %c0_20 = arith.constant 0 : index
      %c0_21 = arith.constant 0 : index
      %c0_22 = arith.constant 0 : index
      %27 = vector.load %arg6[%c0_20, %c0_21, %c0_22] : memref<1x1x1024xf32, #tpu.memory_space<vmem>>, vector<1x1x1024xf32>
      %28 = vector.shape_cast %27 : vector<1x1x1024xf32> to vector<1x1024xf32>
      %29 = vector.shape_cast %26 : vector<1x1024xf32> to vector<1x1x1024xf32>
      tpu.vector_store %arg6[%c0_20, %c0_21, %c0_22], %29 {strides = array<i32>} : memref<1x1x1024xf32, #tpu.memory_space<vmem>>, vector<1x1x1024xf32>,
    } else {
    }
    return
  }
  func.func @transform_0(%arg0: i32, %arg1: i32) -> (i32, i32, i32) {
    %c0_i32 = arith.constant 0 : i32
    %c0_i32_0 = arith.constant 0 : i32
    return %arg0, %arg1, %c0_i32 : i32, i32, i32
  }
  func.func @transform_1(%arg0: i32, %arg1: i32) -> (i32, i32) {
    %c0_i32 = arith.constant 0 : i32
    %c0_i32_0 = arith.constant 0 : i32
    %c0_i32_1 = arith.constant 0 : i32
    return %c0_i32, %c0_i32_0 : i32, i32
  }
  func.func @transform_2(%arg0: i32, %arg1: i32) -> (i32, i32) {
    %c0_i32 = arith.constant 0 : i32
    %c0_i32_0 = arith.constant 0 : i32
    %c0_i32_1 = arith.constant 0 : i32
    return %c0_i32, %c0_i32_0 : i32, i32
  }
  func.func @transform_3(%arg0: i32, %arg1: i32) -> (i32, i32) {
    %c0_i32 = arith.constant 0 : i32
    %c0_i32_0 = arith.constant 0 : i32
    %c0_i32_1 = arith.constant 0 : i32
    return %c0_i32, %c0_i32_0 : i32, i32
  }
  func.func @transform_4(%arg0: i32, %arg1: i32) -> (i32, i32, i32) {
    %c0_i32 = arith.constant 0 : i32
    %c0_i32_0 = arith.constant 0 : i32
    %c0_i32_1 = arith.constant 0 : i32
    return %arg0, %c0_i32, %c0_i32_0 : i32, i32, i32
  }
}

module attributes {stable_mosaic.version = 11 : i64} {
  func.func @_linear_kernel(%arg0: i32, %arg1: memref<2x512xf32, #tpu.memory_space<vmem>>, %arg2: memref<512x256xbf16, #tpu.memory_space<vmem>>, %arg3: memref<1x256xf32, #tpu.memory_space<vmem>>, %arg4: memref<1x256xf32, #tpu.memory_space<vmem>>, %arg5: memref<2x256xf32, #tpu.memory_space<vmem>>) attributes {dimension_semantics = [#tpu.dimension_semantics<parallel>], iteration_bounds = array<i64: 1>, scalar_prefetch = 0 : i64, scratch_operands = 0 : i64, tpu.core_type = #tpu.core_type<tc>, window_params = [{transform_indices = @transform_0, window_bounds = array<i64: 2, 512>}, {pipeline_mode = #tpu.pipeline_mode<synchronous>, transform_indices = @transform_1, window_bounds = array<i64: 512, 256>}, {pipeline_mode = #tpu.pipeline_mode<synchronous>, transform_indices = @transform_2, window_bounds = array<i64: 1, 256>}, {pipeline_mode = #tpu.pipeline_mode<synchronous>, transform_indices = @transform_3, window_bounds = array<i64: 1, 256>}, {transform_indices = @transform_4, window_bounds = array<i64: 2, 256>}]} {
    %c0 = arith.constant 0 : index
    %c0_0 = arith.constant 0 : index
    %0 = vector.load %arg1[%c0, %c0_0] : memref<2x512xf32, #tpu.memory_space<vmem>>, vector<2x512xf32>
    %1 = arith.truncf %0 : vector<2x512xf32> to vector<2x512xbf16>
    %c0_1 = arith.constant 0 : index
    %c0_2 = arith.constant 0 : index
    %2 = vector.load %arg2[%c0_1, %c0_2] : memref<512x256xbf16, #tpu.memory_space<vmem>>, vector<512x256xbf16>
    %cst = arith.constant dense<0.000000e+00> : vector<2x256xf32>
    %3 = tpu.matmul %1, %2, %cst {dimension_numbers = #tpu.dot_dimension_numbers<[1], [0], [0], [1], [0, 0, 1, 1], [], []>} : vector<2x512xbf16>, vector<512x256xbf16>, vector<2x256xf32> -> vector<2x256xf32>
    %c0_3 = arith.constant 0 : index
    %c0_4 = arith.constant 0 : index
    %4 = vector.load %arg3[%c0_3, %c0_4] : memref<1x256xf32, #tpu.memory_space<vmem>>, vector<1x256xf32>
    %5 = vector.broadcast %4 : vector<1x256xf32> to vector<2x256xf32>
    %6 = arith.mulf %3, %5 : vector<2x256xf32>
    %c0_5 = arith.constant 0 : index
    %c0_6 = arith.constant 0 : index
    %7 = vector.load %arg4[%c0_5, %c0_6] : memref<1x256xf32, #tpu.memory_space<vmem>>, vector<1x256xf32>
    %8 = vector.broadcast %7 : vector<1x256xf32> to vector<2x256xf32>
    %9 = arith.addf %6, %8 : vector<2x256xf32>
    %cst_7 = arith.constant 0.000000e+00 : f32
    %10 = vector.broadcast %cst_7 : f32 to vector<2x256xf32>
    %11 = arith.cmpf oge, %9, %10 : vector<2x256xf32>
    %cst_8 = arith.constant 2.000000e-01 : f32
    %12 = vector.broadcast %cst_8 : f32 to vector<2x256xf32>
    %13 = arith.mulf %12, %9 : vector<2x256xf32>
    %14 = arith.select %11, %9, %13 : vector<2x256xi1>, vector<2x256xf32>
    %c0_9 = arith.constant 0 : index
    %c0_10 = arith.constant 0 : index
    %15 = vector.load %arg5[%c0_9, %c0_10] : memref<2x256xf32, #tpu.memory_space<vmem>>, vector<2x256xf32>
    tpu.vector_store %arg5[%c0_9, %c0_10], %14 {strides = array<i32>} : memref<2x256xf32, #tpu.memory_space<vmem>>, vector<2x256xf32>,
    return
  }
  func.func @transform_0(%arg0: i32) -> (i32, i32) {
    %c0_i32 = arith.constant 0 : i32
    %c0_i32_0 = arith.constant 0 : i32
    return %arg0, %c0_i32 : i32, i32
  }
  func.func @transform_1(%arg0: i32) -> (i32, i32) {
    %c0_i32 = arith.constant 0 : i32
    %c0_i32_0 = arith.constant 0 : i32
    %c0_i32_1 = arith.constant 0 : i32
    return %c0_i32, %c0_i32_0 : i32, i32
  }
  func.func @transform_2(%arg0: i32) -> (i32, i32) {
    %c0_i32 = arith.constant 0 : i32
    %c0_i32_0 = arith.constant 0 : i32
    %c0_i32_1 = arith.constant 0 : i32
    return %c0_i32, %c0_i32_0 : i32, i32
  }
  func.func @transform_3(%arg0: i32) -> (i32, i32) {
    %c0_i32 = arith.constant 0 : i32
    %c0_i32_0 = arith.constant 0 : i32
    %c0_i32_1 = arith.constant 0 : i32
    return %c0_i32, %c0_i32_0 : i32, i32
  }
  func.func @transform_4(%arg0: i32) -> (i32, i32) {
    %c0_i32 = arith.constant 0 : i32
    %c0_i32_0 = arith.constant 0 : i32
    return %arg0, %c0_i32 : i32, i32
  }
}

module attributes {stable_mosaic.version = 11 : i64} {
  func.func @_linear_kernel(%arg0: i32, %arg1: memref<2x256xf32, #tpu.memory_space<vmem>>, %arg2: memref<256x9xbf16, #tpu.memory_space<vmem>>, %arg3: memref<1x9xf32, #tpu.memory_space<vmem>>, %arg4: memref<1x9xf32, #tpu.memory_space<vmem>>, %arg5: memref<2x9xf32, #tpu.memory_space<vmem>>) attributes {dimension_semantics = [#tpu.dimension_semantics<parallel>], iteration_bounds = array<i64: 1>, scalar_prefetch = 0 : i64, scratch_operands = 0 : i64, tpu.core_type = #tpu.core_type<tc>, window_params = [{transform_indices = @transform_0, window_bounds = array<i64: 2, 256>}, {pipeline_mode = #tpu.pipeline_mode<synchronous>, transform_indices = @transform_1, window_bounds = array<i64: 256, 9>}, {pipeline_mode = #tpu.pipeline_mode<synchronous>, transform_indices = @transform_2, window_bounds = array<i64: 1, 9>}, {pipeline_mode = #tpu.pipeline_mode<synchronous>, transform_indices = @transform_3, window_bounds = array<i64: 1, 9>}, {transform_indices = @transform_4, window_bounds = array<i64: 2, 9>}]} {
    %c0 = arith.constant 0 : index
    %c0_0 = arith.constant 0 : index
    %0 = vector.load %arg1[%c0, %c0_0] : memref<2x256xf32, #tpu.memory_space<vmem>>, vector<2x256xf32>
    %1 = arith.truncf %0 : vector<2x256xf32> to vector<2x256xbf16>
    %c0_1 = arith.constant 0 : index
    %c0_2 = arith.constant 0 : index
    %2 = vector.load %arg2[%c0_1, %c0_2] : memref<256x9xbf16, #tpu.memory_space<vmem>>, vector<256x9xbf16>
    %cst = arith.constant dense<0.000000e+00> : vector<2x9xf32>
    %3 = tpu.matmul %1, %2, %cst {dimension_numbers = #tpu.dot_dimension_numbers<[1], [0], [0], [1], [0, 0, 1, 1], [], []>} : vector<2x256xbf16>, vector<256x9xbf16>, vector<2x9xf32> -> vector<2x9xf32>
    %c0_3 = arith.constant 0 : index
    %c0_4 = arith.constant 0 : index
    %4 = vector.load %arg3[%c0_3, %c0_4] : memref<1x9xf32, #tpu.memory_space<vmem>>, vector<1x9xf32>
    %5 = vector.broadcast %4 : vector<1x9xf32> to vector<2x9xf32>
    %6 = arith.mulf %3, %5 : vector<2x9xf32>
    %c0_5 = arith.constant 0 : index
    %c0_6 = arith.constant 0 : index
    %7 = vector.load %arg4[%c0_5, %c0_6] : memref<1x9xf32, #tpu.memory_space<vmem>>, vector<1x9xf32>
    %8 = vector.broadcast %7 : vector<1x9xf32> to vector<2x9xf32>
    %9 = arith.addf %6, %8 : vector<2x9xf32>
    %c0_7 = arith.constant 0 : index
    %c0_8 = arith.constant 0 : index
    %10 = vector.load %arg5[%c0_7, %c0_8] : memref<2x9xf32, #tpu.memory_space<vmem>>, vector<2x9xf32>
    tpu.vector_store %arg5[%c0_7, %c0_8], %9 {strides = array<i32>} : memref<2x9xf32, #tpu.memory_space<vmem>>, vector<2x9xf32>,
    return
  }
  func.func @transform_0(%arg0: i32) -> (i32, i32) {
    %c0_i32 = arith.constant 0 : i32
    %c0_i32_0 = arith.constant 0 : i32
    return %arg0, %c0_i32 : i32, i32
  }
  func.func @transform_1(%arg0: i32) -> (i32, i32) {
    %c0_i32 = arith.constant 0 : i32
    %c0_i32_0 = arith.constant 0 : i32
    %c0_i32_1 = arith.constant 0 : i32
    return %c0_i32, %c0_i32_0 : i32, i32
  }
  func.func @transform_2(%arg0: i32) -> (i32, i32) {
    %c0_i32 = arith.constant 0 : i32
    %c0_i32_0 = arith.constant 0 : i32
    %c0_i32_1 = arith.constant 0 : i32
    return %c0_i32, %c0_i32_0 : i32, i32
  }
  func.func @transform_3(%arg0: i32) -> (i32, i32) {
    %c0_i32 = arith.constant 0 : i32
    %c0_i32_0 = arith.constant 0 : i32
    %c0_i32_1 = arith.constant 0 : i32
    return %c0_i32, %c0_i32_0 : i32, i32
  }
  func.func @transform_4(%arg0: i32) -> (i32, i32) {
    %c0_i32 = arith.constant 0 : i32
    %c0_i32_0 = arith.constant 0 : i32
    return %arg0, %c0_i32 : i32, i32
  }
}

module attributes {stable_mosaic.version = 11 : i64} {
  func.func @_edge_combine_kernel(%arg0: i32, %arg1: memref<32x4x64xbf16, #tpu.memory_space<vmem>>, %arg2: memref<32x64xbf16, #tpu.memory_space<vmem>>, %arg3: memref<64x64xbf16, #tpu.memory_space<vmem>>, %arg4: memref<1x64xf32, #tpu.memory_space<vmem>>, %arg5: memref<1x64xf32, #tpu.memory_space<vmem>>, %arg6: memref<32x64xbf16, #tpu.memory_space<vmem>>) attributes {dimension_semantics = [#tpu.dimension_semantics<parallel>], iteration_bounds = array<i64: 1>, scalar_prefetch = 0 : i64, scratch_operands = 0 : i64, tpu.core_type = #tpu.core_type<tc>, window_params = [{transform_indices = @transform_0, window_bounds = array<i64: 32, 4, 64>}, {transform_indices = @transform_1, window_bounds = array<i64: 32, 64>}, {pipeline_mode = #tpu.pipeline_mode<synchronous>, transform_indices = @transform_2, window_bounds = array<i64: 64, 64>}, {pipeline_mode = #tpu.pipeline_mode<synchronous>, transform_indices = @transform_3, window_bounds = array<i64: 1, 64>}, {pipeline_mode = #tpu.pipeline_mode<synchronous>, transform_indices = @transform_4, window_bounds = array<i64: 1, 64>}, {transform_indices = @transform_5, window_bounds = array<i64: 32, 64>}]} {
    %c0 = arith.constant 0 : index
    %c0_0 = arith.constant 0 : index
    %0 = vector.load %arg2[%c0, %c0_0] : memref<32x64xbf16, #tpu.memory_space<vmem>>, vector<32x64xbf16>
    %1 = arith.extf %0 : vector<32x64xbf16> to vector<32x64xf32>
    %2 = vector.shape_cast %1 : vector<32x64xf32> to vector<32x1x64xf32>
    %c0_1 = arith.constant 0 : index
    %c0_2 = arith.constant 0 : index
    %c0_3 = arith.constant 0 : index
    %3 = vector.load %arg1[%c0_1, %c0_2, %c0_3] : memref<32x4x64xbf16, #tpu.memory_space<vmem>>, vector<32x4x64xbf16>
    %4 = arith.extf %3 : vector<32x4x64xbf16> to vector<32x4x64xf32>
    %5 = vector.broadcast %2 : vector<32x1x64xf32> to vector<32x4x64xf32>
    %6 = arith.addf %4, %5 : vector<32x4x64xf32>
    %cst = arith.constant 0.000000e+00 : f32
    %7 = vector.broadcast %cst : f32 to vector<32x4x64xf32>
    %8 = arith.cmpf oge, %6, %7 : vector<32x4x64xf32>
    %cst_4 = arith.constant 2.000000e-01 : f32
    %9 = vector.broadcast %cst_4 : f32 to vector<32x4x64xf32>
    %10 = arith.mulf %9, %6 : vector<32x4x64xf32>
    %11 = arith.select %8, %6, %10 : vector<32x4x64xi1>, vector<32x4x64xf32>
    %12 = vector.shape_cast %11 : vector<32x4x64xf32> to vector<128x64xf32>
    %13 = arith.truncf %12 : vector<128x64xf32> to vector<128x64xbf16>
    %c0_5 = arith.constant 0 : index
    %c0_6 = arith.constant 0 : index
    %14 = vector.load %arg3[%c0_5, %c0_6] : memref<64x64xbf16, #tpu.memory_space<vmem>>, vector<64x64xbf16>
    %cst_7 = arith.constant dense<0.000000e+00> : vector<128x64xf32>
    %15 = tpu.matmul %13, %14, %cst_7 {dimension_numbers = #tpu.dot_dimension_numbers<[1], [0], [0], [1], [0, 0, 1, 1], [], []>} : vector<128x64xbf16>, vector<64x64xbf16>, vector<128x64xf32> -> vector<128x64xf32>
    %c0_8 = arith.constant 0 : index
    %c0_9 = arith.constant 0 : index
    %16 = vector.load %arg4[%c0_8, %c0_9] : memref<1x64xf32, #tpu.memory_space<vmem>>, vector<1x64xf32>
    %17 = vector.broadcast %16 : vector<1x64xf32> to vector<128x64xf32>
    %18 = arith.mulf %15, %17 : vector<128x64xf32>
    %c0_10 = arith.constant 0 : index
    %c0_11 = arith.constant 0 : index
    %19 = vector.load %arg5[%c0_10, %c0_11] : memref<1x64xf32, #tpu.memory_space<vmem>>, vector<1x64xf32>
    %20 = vector.broadcast %19 : vector<1x64xf32> to vector<128x64xf32>
    %21 = arith.addf %18, %20 : vector<128x64xf32>
    %cst_12 = arith.constant 0.000000e+00 : f32
    %22 = vector.broadcast %cst_12 : f32 to vector<128x64xf32>
    %23 = arith.cmpf oge, %21, %22 : vector<128x64xf32>
    %cst_13 = arith.constant 2.000000e-01 : f32
    %24 = vector.broadcast %cst_13 : f32 to vector<128x64xf32>
    %25 = arith.mulf %24, %21 : vector<128x64xf32>
    %26 = arith.select %23, %21, %25 : vector<128x64xi1>, vector<128x64xf32>
    %27 = vector.shape_cast %26 : vector<128x64xf32> to vector<32x4x64xf32>
    %cst_14 = arith.constant dense<0xFF800000> : vector<32x64xf32>
    %28 = vector.multi_reduction <maximumf>, %27, %cst_14 [1] : vector<32x4x64xf32> to vector<32x64xf32>
    %29 = arith.truncf %28 : vector<32x64xf32> to vector<32x64xbf16>
    %c0_15 = arith.constant 0 : index
    %c0_16 = arith.constant 0 : index
    %30 = vector.load %arg6[%c0_15, %c0_16] : memref<32x64xbf16, #tpu.memory_space<vmem>>, vector<32x64xbf16>
    tpu.vector_store %arg6[%c0_15, %c0_16], %29 {strides = array<i32>} : memref<32x64xbf16, #tpu.memory_space<vmem>>, vector<32x64xbf16>,
    return
  }
  func.func @transform_0(%arg0: i32) -> (i32, i32, i32) {
    %c0_i32 = arith.constant 0 : i32
    %c0_i32_0 = arith.constant 0 : i32
    %c0_i32_1 = arith.constant 0 : i32
    return %arg0, %c0_i32, %c0_i32_0 : i32, i32, i32
  }
  func.func @transform_1(%arg0: i32) -> (i32, i32) {
    %c0_i32 = arith.constant 0 : i32
    %c0_i32_0 = arith.constant 0 : i32
    return %arg0, %c0_i32 : i32, i32
  }
  func.func @transform_2(%arg0: i32) -> (i32, i32) {
    %c0_i32 = arith.constant 0 : i32
    %c0_i32_0 = arith.constant 0 : i32
    %c0_i32_1 = arith.constant 0 : i32
    return %c0_i32, %c0_i32_0 : i32, i32
  }
  func.func @transform_3(%arg0: i32) -> (i32, i32) {
    %c0_i32 = arith.constant 0 : i32
    %c0_i32_0 = arith.constant 0 : i32
    %c0_i32_1 = arith.constant 0 : i32
    return %c0_i32, %c0_i32_0 : i32, i32
  }
  func.func @transform_4(%arg0: i32) -> (i32, i32) {
    %c0_i32 = arith.constant 0 : i32
    %c0_i32_0 = arith.constant 0 : i32
    %c0_i32_1 = arith.constant 0 : i32
    return %c0_i32, %c0_i32_0 : i32, i32
  }
  func.func @transform_5(%arg0: i32) -> (i32, i32) {
    %c0_i32 = arith.constant 0 : i32
    %c0_i32_0 = arith.constant 0 : i32
    return %arg0, %c0_i32 : i32, i32
  }
}

module attributes {stable_mosaic.version = 11 : i64} {
  func.func @_knn_kernel(%arg0: i32, %arg1: i32, %arg2: memref<1x16x64xbf16, #tpu.memory_space<vmem>>, %arg3: memref<1x16x64xbf16, #tpu.memory_space<vmem>>, %arg4: memref<1x1x16xf32, #tpu.memory_space<vmem>>, %arg5: memref<1x16x16xf32, #tpu.memory_space<vmem>>) attributes {dimension_semantics = [#tpu.dimension_semantics<parallel>, #tpu.dimension_semantics<parallel>], iteration_bounds = array<i64: 2, 1>, scalar_prefetch = 0 : i64, scratch_operands = 0 : i64, tpu.core_type = #tpu.core_type<tc>, window_params = [{transform_indices = @transform_0, window_bounds = array<i64: 1, 16, 64>}, {transform_indices = @transform_1, window_bounds = array<i64: 1, 16, 64>}, {transform_indices = @transform_2, window_bounds = array<i64: 1, 1, 16>}, {transform_indices = @transform_3, window_bounds = array<i64: 1, 16, 16>}]} {
    %c0 = arith.constant 0 : index
    %c0_0 = arith.constant 0 : index
    %c0_1 = arith.constant 0 : index
    %0 = vector.load %arg2[%c0, %c0_0, %c0_1] : memref<1x16x64xbf16, #tpu.memory_space<vmem>>, vector<1x16x64xbf16>
    %1 = vector.shape_cast %0 : vector<1x16x64xbf16> to vector<16x64xbf16>
    %c0_2 = arith.constant 0 : index
    %c0_3 = arith.constant 0 : index
    %c0_4 = arith.constant 0 : index
    %2 = vector.load %arg3[%c0_2, %c0_3, %c0_4] : memref<1x16x64xbf16, #tpu.memory_space<vmem>>, vector<1x16x64xbf16>
    %3 = vector.shape_cast %2 : vector<1x16x64xbf16> to vector<16x64xbf16>
    %cst = arith.constant dense<0.000000e+00> : vector<16x16xf32>
    %4 = tpu.matmul %1, %3, %cst {dimension_numbers = #tpu.dot_dimension_numbers<[1], [1], [0], [0], [0, 0, 1, 0], [], []>} : vector<16x64xbf16>, vector<16x64xbf16>, vector<16x16xf32> -> vector<16x16xf32>
    %cst_5 = arith.constant 2.000000e+00 : f32
    %5 = vector.broadcast %cst_5 : f32 to vector<16x16xf32>
    %6 = arith.mulf %5, %4 : vector<16x16xf32>
    %c0_6 = arith.constant 0 : index
    %c0_7 = arith.constant 0 : index
    %c0_8 = arith.constant 0 : index
    %7 = vector.load %arg4[%c0_6, %c0_7, %c0_8] : memref<1x1x16xf32, #tpu.memory_space<vmem>>, vector<1x1x16xf32>
    %8 = vector.shape_cast %7 : vector<1x1x16xf32> to vector<1x16xf32>
    %9 = vector.broadcast %8 : vector<1x16xf32> to vector<16x16xf32>
    %10 = arith.subf %6, %9 : vector<16x16xf32>
    %c0_9 = arith.constant 0 : index
    %c0_10 = arith.constant 0 : index
    %c0_11 = arith.constant 0 : index
    %11 = vector.load %arg5[%c0_9, %c0_10, %c0_11] : memref<1x16x16xf32, #tpu.memory_space<vmem>>, vector<1x16x16xf32>
    %12 = vector.shape_cast %11 : vector<1x16x16xf32> to vector<16x16xf32>
    %13 = vector.shape_cast %10 : vector<16x16xf32> to vector<1x16x16xf32>
    tpu.vector_store %arg5[%c0_9, %c0_10, %c0_11], %13 {strides = array<i32>} : memref<1x16x16xf32, #tpu.memory_space<vmem>>, vector<1x16x16xf32>,
    return
  }
  func.func @transform_0(%arg0: i32, %arg1: i32) -> (i32, i32, i32) {
    %c0_i32 = arith.constant 0 : i32
    %c0_i32_0 = arith.constant 0 : i32
    return %arg0, %arg1, %c0_i32 : i32, i32, i32
  }
  func.func @transform_1(%arg0: i32, %arg1: i32) -> (i32, i32, i32) {
    %c0_i32 = arith.constant 0 : i32
    %c0_i32_0 = arith.constant 0 : i32
    %c0_i32_1 = arith.constant 0 : i32
    return %arg0, %c0_i32, %c0_i32_0 : i32, i32, i32
  }
  func.func @transform_2(%arg0: i32, %arg1: i32) -> (i32, i32, i32) {
    %c0_i32 = arith.constant 0 : i32
    %c0_i32_0 = arith.constant 0 : i32
    %c0_i32_1 = arith.constant 0 : i32
    return %arg0, %c0_i32, %c0_i32_0 : i32, i32, i32
  }
  func.func @transform_3(%arg0: i32, %arg1: i32) -> (i32, i32, i32) {
    %c0_i32 = arith.constant 0 : i32
    %c0_i32_0 = arith.constant 0 : i32
    return %arg0, %arg1, %c0_i32 : i32, i32, i32
  }
}

module attributes {stable_mosaic.version = 11 : i64} {
  func.func @_edge_pre_kernel(%arg0: i32, %arg1: memref<32x64xbf16, #tpu.memory_space<vmem>>, %arg2: memref<64x64xbf16, #tpu.memory_space<vmem>>, %arg3: memref<64x64xbf16, #tpu.memory_space<vmem>>, %arg4: memref<1x64xf32, #tpu.memory_space<vmem>>, %arg5: memref<32x64xbf16, #tpu.memory_space<vmem>>, %arg6: memref<32x64xbf16, #tpu.memory_space<vmem>>) attributes {dimension_semantics = [#tpu.dimension_semantics<parallel>], iteration_bounds = array<i64: 1>, scalar_prefetch = 0 : i64, scratch_operands = 0 : i64, tpu.core_type = #tpu.core_type<tc>, window_params = [{transform_indices = @transform_0, window_bounds = array<i64: 32, 64>}, {pipeline_mode = #tpu.pipeline_mode<synchronous>, transform_indices = @transform_1, window_bounds = array<i64: 64, 64>}, {pipeline_mode = #tpu.pipeline_mode<synchronous>, transform_indices = @transform_2, window_bounds = array<i64: 64, 64>}, {pipeline_mode = #tpu.pipeline_mode<synchronous>, transform_indices = @transform_3, window_bounds = array<i64: 1, 64>}, {transform_indices = @transform_4, window_bounds = array<i64: 32, 64>}, {transform_indices = @transform_5, window_bounds = array<i64: 32, 64>}]} {
    %c0 = arith.constant 0 : index
    %c0_0 = arith.constant 0 : index
    %0 = vector.load %arg1[%c0, %c0_0] : memref<32x64xbf16, #tpu.memory_space<vmem>>, vector<32x64xbf16>
    %c0_1 = arith.constant 0 : index
    %c0_2 = arith.constant 0 : index
    %1 = vector.load %arg2[%c0_1, %c0_2] : memref<64x64xbf16, #tpu.memory_space<vmem>>, vector<64x64xbf16>
    %cst = arith.constant dense<0.000000e+00> : vector<32x64xf32>
    %2 = tpu.matmul %0, %1, %cst {dimension_numbers = #tpu.dot_dimension_numbers<[1], [0], [0], [1], [0, 0, 1, 1], [], []>} : vector<32x64xbf16>, vector<64x64xbf16>, vector<32x64xf32> -> vector<32x64xf32>
    %3 = arith.truncf %2 : vector<32x64xf32> to vector<32x64xbf16>
    %c0_3 = arith.constant 0 : index
    %c0_4 = arith.constant 0 : index
    %4 = vector.load %arg5[%c0_3, %c0_4] : memref<32x64xbf16, #tpu.memory_space<vmem>>, vector<32x64xbf16>
    tpu.vector_store %arg5[%c0_3, %c0_4], %3 {strides = array<i32>} : memref<32x64xbf16, #tpu.memory_space<vmem>>, vector<32x64xbf16>,
    %c0_5 = arith.constant 0 : index
    %c0_6 = arith.constant 0 : index
    %5 = vector.load %arg3[%c0_5, %c0_6] : memref<64x64xbf16, #tpu.memory_space<vmem>>, vector<64x64xbf16>
    %cst_7 = arith.constant dense<0.000000e+00> : vector<32x64xf32>
    %6 = tpu.matmul %0, %5, %cst_7 {dimension_numbers = #tpu.dot_dimension_numbers<[1], [0], [0], [1], [0, 0, 1, 1], [], []>} : vector<32x64xbf16>, vector<64x64xbf16>, vector<32x64xf32> -> vector<32x64xf32>
    %c0_8 = arith.constant 0 : index
    %c0_9 = arith.constant 0 : index
    %7 = vector.load %arg4[%c0_8, %c0_9] : memref<1x64xf32, #tpu.memory_space<vmem>>, vector<1x64xf32>
    %8 = vector.broadcast %7 : vector<1x64xf32> to vector<32x64xf32>
    %9 = arith.addf %6, %8 : vector<32x64xf32>
    %10 = arith.truncf %9 : vector<32x64xf32> to vector<32x64xbf16>
    %c0_10 = arith.constant 0 : index
    %c0_11 = arith.constant 0 : index
    %11 = vector.load %arg6[%c0_10, %c0_11] : memref<32x64xbf16, #tpu.memory_space<vmem>>, vector<32x64xbf16>
    tpu.vector_store %arg6[%c0_10, %c0_11], %10 {strides = array<i32>} : memref<32x64xbf16, #tpu.memory_space<vmem>>, vector<32x64xbf16>,
    return
  }
  func.func @transform_0(%arg0: i32) -> (i32, i32) {
    %c0_i32 = arith.constant 0 : i32
    %c0_i32_0 = arith.constant 0 : i32
    return %arg0, %c0_i32 : i32, i32
  }
  func.func @transform_1(%arg0: i32) -> (i32, i32) {
    %c0_i32 = arith.constant 0 : i32
    %c0_i32_0 = arith.constant 0 : i32
    %c0_i32_1 = arith.constant 0 : i32
    return %c0_i32, %c0_i32_0 : i32, i32
  }
  func.func @transform_2(%arg0: i32) -> (i32, i32) {
    %c0_i32 = arith.constant 0 : i32
    %c0_i32_0 = arith.constant 0 : i32
    %c0_i32_1 = arith.constant 0 : i32
    return %c0_i32, %c0_i32_0 : i32, i32
  }
  func.func @transform_3(%arg0: i32) -> (i32, i32) {
    %c0_i32 = arith.constant 0 : i32
    %c0_i32_0 = arith.constant 0 : i32
    %c0_i32_1 = arith.constant 0 : i32
    return %c0_i32, %c0_i32_0 : i32, i32
  }
  func.func @transform_4(%arg0: i32) -> (i32, i32) {
    %c0_i32 = arith.constant 0 : i32
    %c0_i32_0 = arith.constant 0 : i32
    return %arg0, %c0_i32 : i32, i32
  }
  func.func @transform_5(%arg0: i32) -> (i32, i32) {
    %c0_i32 = arith.constant 0 : i32
    %c0_i32_0 = arith.constant 0 : i32
    return %arg0, %c0_i32 : i32, i32
  }
}

module attributes {stable_mosaic.version = 11 : i64} {
  func.func @_edge_combine_kernel(%arg0: i32, %arg1: memref<32x4x64xbf16, #tpu.memory_space<vmem>>, %arg2: memref<32x64xbf16, #tpu.memory_space<vmem>>, %arg3: memref<32x64xbf16, #tpu.memory_space<vmem>>) attributes {dimension_semantics = [#tpu.dimension_semantics<parallel>], iteration_bounds = array<i64: 1>, scalar_prefetch = 0 : i64, scratch_operands = 0 : i64, tpu.core_type = #tpu.core_type<tc>, window_params = [{transform_indices = @transform_0, window_bounds = array<i64: 32, 4, 64>}, {transform_indices = @transform_1, window_bounds = array<i64: 32, 64>}, {transform_indices = @transform_2, window_bounds = array<i64: 32, 64>}]} {
    %c0 = arith.constant 0 : index
    %c0_0 = arith.constant 0 : index
    %0 = vector.load %arg2[%c0, %c0_0] : memref<32x64xbf16, #tpu.memory_space<vmem>>, vector<32x64xbf16>
    %1 = arith.extf %0 : vector<32x64xbf16> to vector<32x64xf32>
    %2 = vector.shape_cast %1 : vector<32x64xf32> to vector<32x1x64xf32>
    %c0_1 = arith.constant 0 : index
    %c0_2 = arith.constant 0 : index
    %c0_3 = arith.constant 0 : index
    %3 = vector.load %arg1[%c0_1, %c0_2, %c0_3] : memref<32x4x64xbf16, #tpu.memory_space<vmem>>, vector<32x4x64xbf16>
    %4 = arith.extf %3 : vector<32x4x64xbf16> to vector<32x4x64xf32>
    %5 = vector.broadcast %2 : vector<32x1x64xf32> to vector<32x4x64xf32>
    %6 = arith.addf %4, %5 : vector<32x4x64xf32>
    %cst = arith.constant 0.000000e+00 : f32
    %7 = vector.broadcast %cst : f32 to vector<32x4x64xf32>
    %8 = arith.cmpf oge, %6, %7 : vector<32x4x64xf32>
    %cst_4 = arith.constant 2.000000e-01 : f32
    %9 = vector.broadcast %cst_4 : f32 to vector<32x4x64xf32>
    %10 = arith.mulf %9, %6 : vector<32x4x64xf32>
    %11 = arith.select %8, %6, %10 : vector<32x4x64xi1>, vector<32x4x64xf32>
    %cst_5 = arith.constant dense<0xFF800000> : vector<32x64xf32>
    %12 = vector.multi_reduction <maximumf>, %11, %cst_5 [1] : vector<32x4x64xf32> to vector<32x64xf32>
    %13 = arith.truncf %12 : vector<32x64xf32> to vector<32x64xbf16>
    %c0_6 = arith.constant 0 : index
    %c0_7 = arith.constant 0 : index
    %14 = vector.load %arg3[%c0_6, %c0_7] : memref<32x64xbf16, #tpu.memory_space<vmem>>, vector<32x64xbf16>
    tpu.vector_store %arg3[%c0_6, %c0_7], %13 {strides = array<i32>} : memref<32x64xbf16, #tpu.memory_space<vmem>>, vector<32x64xbf16>,
    return
  }
  func.func @transform_0(%arg0: i32) -> (i32, i32, i32) {
    %c0_i32 = arith.constant 0 : i32
    %c0_i32_0 = arith.constant 0 : i32
    %c0_i32_1 = arith.constant 0 : i32
    return %arg0, %c0_i32, %c0_i32_0 : i32, i32, i32
  }
  func.func @transform_1(%arg0: i32) -> (i32, i32) {
    %c0_i32 = arith.constant 0 : i32
    %c0_i32_0 = arith.constant 0 : i32
    return %arg0, %c0_i32 : i32, i32
  }
  func.func @transform_2(%arg0: i32) -> (i32, i32) {
    %c0_i32 = arith.constant 0 : i32
    %c0_i32_0 = arith.constant 0 : i32
    return %arg0, %c0_i32 : i32, i32
  }
}

module attributes {stable_mosaic.version = 11 : i64} {
  func.func @_global_max_kernel(%arg0: i32, %arg1: i32, %arg2: memref<1x16x192xbf16, #tpu.memory_space<vmem>>, %arg3: memref<192x1024xbf16, #tpu.memory_space<vmem>>, %arg4: memref<1x1024xf32, #tpu.memory_space<vmem>>, %arg5: memref<1x1024xf32, #tpu.memory_space<vmem>>, %arg6: memref<1x1x1024xf32, #tpu.memory_space<vmem>>, %arg7: memref<1x1024xf32, #tpu.memory_space<vmem>>) attributes {dimension_semantics = [#tpu.dimension_semantics<parallel>, #tpu.dimension_semantics<arbitrary>], iteration_bounds = array<i64: 2, 1>, scalar_prefetch = 0 : i64, scratch_operands = 1 : i64, tpu.core_type = #tpu.core_type<tc>, window_params = [{transform_indices = @transform_0, window_bounds = array<i64: 1, 16, 192>}, {pipeline_mode = #tpu.pipeline_mode<synchronous>, transform_indices = @transform_1, window_bounds = array<i64: 192, 1024>}, {pipeline_mode = #tpu.pipeline_mode<synchronous>, transform_indices = @transform_2, window_bounds = array<i64: 1, 1024>}, {pipeline_mode = #tpu.pipeline_mode<synchronous>, transform_indices = @transform_3, window_bounds = array<i64: 1, 1024>}, {transform_indices = @transform_4, window_bounds = array<i64: 1, 1, 1024>}]} {
    %c0_i32 = arith.constant 0 : i32
    %0 = arith.cmpi eq, %arg1, %c0_i32 : i32
    %1 = arith.extui %0 : i1 to i32
    %c0_i32_0 = arith.constant 0 : i32
    %2 = arith.cmpi ne, %1, %c0_i32_0 : i32
    scf.if %2 {
      %cst_18 = arith.constant 0xFF800000 : f32
      %26 = vector.broadcast %cst_18 : f32 to vector<1x1024xf32>
      %c0_19 = arith.constant 0 : index
      %c0_20 = arith.constant 0 : index
      %27 = vector.load %arg7[%c0_19, %c0_20] : memref<1x1024xf32, #tpu.memory_space<vmem>>, vector<1x1024xf32>
      tpu.vector_store %arg7[%c0_19, %c0_20], %26 {strides = array<i32>} : memref<1x1024xf32, #tpu.memory_space<vmem>>, vector<1x1024xf32>,
    } else {
    }
    %c0 = arith.constant 0 : index
    %c0_1 = arith.constant 0 : index
    %c0_2 = arith.constant 0 : index
    %3 = vector.load %arg2[%c0, %c0_1, %c0_2] : memref<1x16x192xbf16, #tpu.memory_space<vmem>>, vector<1x16x192xbf16>
    %4 = vector.shape_cast %3 : vector<1x16x192xbf16> to vector<16x192xbf16>
    %c0_3 = arith.constant 0 : index
    %c0_4 = arith.constant 0 : index
    %5 = vector.load %arg3[%c0_3, %c0_4] : memref<192x1024xbf16, #tpu.memory_space<vmem>>, vector<192x1024xbf16>
    %cst = arith.constant dense<0.000000e+00> : vector<16x1024xf32>
    %6 = tpu.matmul %4, %5, %cst {dimension_numbers = #tpu.dot_dimension_numbers<[1], [0], [0], [1], [0, 0, 1, 1], [], []>} : vector<16x192xbf16>, vector<192x1024xbf16>, vector<16x1024xf32> -> vector<16x1024xf32>
    %c0_5 = arith.constant 0 : index
    %c0_6 = arith.constant 0 : index
    %7 = vector.load %arg4[%c0_5, %c0_6] : memref<1x1024xf32, #tpu.memory_space<vmem>>, vector<1x1024xf32>
    %8 = vector.broadcast %7 : vector<1x1024xf32> to vector<16x1024xf32>
    %9 = arith.mulf %6, %8 : vector<16x1024xf32>
    %c0_7 = arith.constant 0 : index
    %c0_8 = arith.constant 0 : index
    %10 = vector.load %arg5[%c0_7, %c0_8] : memref<1x1024xf32, #tpu.memory_space<vmem>>, vector<1x1024xf32>
    %11 = vector.broadcast %10 : vector<1x1024xf32> to vector<16x1024xf32>
    %12 = arith.addf %9, %11 : vector<16x1024xf32>
    %cst_9 = arith.constant 0.000000e+00 : f32
    %13 = vector.broadcast %cst_9 : f32 to vector<16x1024xf32>
    %14 = arith.cmpf oge, %12, %13 : vector<16x1024xf32>
    %cst_10 = arith.constant 2.000000e-01 : f32
    %15 = vector.broadcast %cst_10 : f32 to vector<16x1024xf32>
    %16 = arith.mulf %15, %12 : vector<16x1024xf32>
    %17 = arith.select %14, %12, %16 : vector<16x1024xi1>, vector<16x1024xf32>
    %c0_11 = arith.constant 0 : index
    %c0_12 = arith.constant 0 : index
    %18 = vector.load %arg7[%c0_11, %c0_12] : memref<1x1024xf32, #tpu.memory_space<vmem>>, vector<1x1024xf32>
    %cst_13 = arith.constant dense<0xFF800000> : vector<1024xf32>
    %19 = vector.multi_reduction <maximumf>, %17, %cst_13 [0] : vector<16x1024xf32> to vector<1024xf32>
    %20 = vector.shape_cast %19 : vector<1024xf32> to vector<1x1024xf32>
    %21 = arith.maximumf %18, %20 : vector<1x1024xf32>
    %c0_14 = arith.constant 0 : index
    %c0_15 = arith.constant 0 : index
    %22 = vector.load %arg7[%c0_14, %c0_15] : memref<1x1024xf32, #tpu.memory_space<vmem>>, vector<1x1024xf32>
    tpu.vector_store %arg7[%c0_14, %c0_15], %21 {strides = array<i32>} : memref<1x1024xf32, #tpu.memory_space<vmem>>, vector<1x1024xf32>,
    %c0_i32_16 = arith.constant 0 : i32
    %23 = arith.cmpi eq, %arg1, %c0_i32_16 : i32
    %24 = arith.extui %23 : i1 to i32
    %c0_i32_17 = arith.constant 0 : i32
    %25 = arith.cmpi ne, %24, %c0_i32_17 : i32
    scf.if %25 {
      %c0_18 = arith.constant 0 : index
      %c0_19 = arith.constant 0 : index
      %26 = vector.load %arg7[%c0_18, %c0_19] : memref<1x1024xf32, #tpu.memory_space<vmem>>, vector<1x1024xf32>
      %c0_20 = arith.constant 0 : index
      %c0_21 = arith.constant 0 : index
      %c0_22 = arith.constant 0 : index
      %27 = vector.load %arg6[%c0_20, %c0_21, %c0_22] : memref<1x1x1024xf32, #tpu.memory_space<vmem>>, vector<1x1x1024xf32>
      %28 = vector.shape_cast %27 : vector<1x1x1024xf32> to vector<1x1024xf32>
      %29 = vector.shape_cast %26 : vector<1x1024xf32> to vector<1x1x1024xf32>
      tpu.vector_store %arg6[%c0_20, %c0_21, %c0_22], %29 {strides = array<i32>} : memref<1x1x1024xf32, #tpu.memory_space<vmem>>, vector<1x1x1024xf32>,
    } else {
    }
    return
  }
  func.func @transform_0(%arg0: i32, %arg1: i32) -> (i32, i32, i32) {
    %c0_i32 = arith.constant 0 : i32
    %c0_i32_0 = arith.constant 0 : i32
    return %arg0, %arg1, %c0_i32 : i32, i32, i32
  }
  func.func @transform_1(%arg0: i32, %arg1: i32) -> (i32, i32) {
    %c0_i32 = arith.constant 0 : i32
    %c0_i32_0 = arith.constant 0 : i32
    %c0_i32_1 = arith.constant 0 : i32
    return %c0_i32, %c0_i32_0 : i32, i32
  }
  func.func @transform_2(%arg0: i32, %arg1: i32) -> (i32, i32) {
    %c0_i32 = arith.constant 0 : i32
    %c0_i32_0 = arith.constant 0 : i32
    %c0_i32_1 = arith.constant 0 : i32
    return %c0_i32, %c0_i32_0 : i32, i32
  }
  func.func @transform_3(%arg0: i32, %arg1: i32) -> (i32, i32) {
    %c0_i32 = arith.constant 0 : i32
    %c0_i32_0 = arith.constant 0 : i32
    %c0_i32_1 = arith.constant 0 : i32
    return %c0_i32, %c0_i32_0 : i32, i32
  }
  func.func @transform_4(%arg0: i32, %arg1: i32) -> (i32, i32, i32) {
    %c0_i32 = arith.constant 0 : i32
    %c0_i32_0 = arith.constant 0 : i32
    %c0_i32_1 = arith.constant 0 : i32
    return %arg0, %c0_i32, %c0_i32_0 : i32, i32, i32
  }
}

module attributes {stable_mosaic.version = 11 : i64} {
  func.func @_linear_kernel(%arg0: i32, %arg1: memref<2x16xf32, #tpu.memory_space<vmem>>, %arg2: memref<16x64xbf16, #tpu.memory_space<vmem>>, %arg3: memref<1x64xf32, #tpu.memory_space<vmem>>, %arg4: memref<1x64xf32, #tpu.memory_space<vmem>>, %arg5: memref<2x64xf32, #tpu.memory_space<vmem>>) attributes {dimension_semantics = [#tpu.dimension_semantics<parallel>], iteration_bounds = array<i64: 1>, scalar_prefetch = 0 : i64, scratch_operands = 0 : i64, tpu.core_type = #tpu.core_type<tc>, window_params = [{transform_indices = @transform_0, window_bounds = array<i64: 2, 16>}, {pipeline_mode = #tpu.pipeline_mode<synchronous>, transform_indices = @transform_1, window_bounds = array<i64: 16, 64>}, {pipeline_mode = #tpu.pipeline_mode<synchronous>, transform_indices = @transform_2, window_bounds = array<i64: 1, 64>}, {pipeline_mode = #tpu.pipeline_mode<synchronous>, transform_indices = @transform_3, window_bounds = array<i64: 1, 64>}, {transform_indices = @transform_4, window_bounds = array<i64: 2, 64>}]} {
    %c0 = arith.constant 0 : index
    %c0_0 = arith.constant 0 : index
    %0 = vector.load %arg1[%c0, %c0_0] : memref<2x16xf32, #tpu.memory_space<vmem>>, vector<2x16xf32>
    %1 = arith.truncf %0 : vector<2x16xf32> to vector<2x16xbf16>
    %c0_1 = arith.constant 0 : index
    %c0_2 = arith.constant 0 : index
    %2 = vector.load %arg2[%c0_1, %c0_2] : memref<16x64xbf16, #tpu.memory_space<vmem>>, vector<16x64xbf16>
    %cst = arith.constant dense<0.000000e+00> : vector<2x64xf32>
    %3 = tpu.matmul %1, %2, %cst {dimension_numbers = #tpu.dot_dimension_numbers<[1], [0], [0], [1], [0, 0, 1, 1], [], []>} : vector<2x16xbf16>, vector<16x64xbf16>, vector<2x64xf32> -> vector<2x64xf32>
    %c0_3 = arith.constant 0 : index
    %c0_4 = arith.constant 0 : index
    %4 = vector.load %arg3[%c0_3, %c0_4] : memref<1x64xf32, #tpu.memory_space<vmem>>, vector<1x64xf32>
    %5 = vector.broadcast %4 : vector<1x64xf32> to vector<2x64xf32>
    %6 = arith.mulf %3, %5 : vector<2x64xf32>
    %c0_5 = arith.constant 0 : index
    %c0_6 = arith.constant 0 : index
    %7 = vector.load %arg4[%c0_5, %c0_6] : memref<1x64xf32, #tpu.memory_space<vmem>>, vector<1x64xf32>
    %8 = vector.broadcast %7 : vector<1x64xf32> to vector<2x64xf32>
    %9 = arith.addf %6, %8 : vector<2x64xf32>
    %cst_7 = arith.constant 0.000000e+00 : f32
    %10 = vector.broadcast %cst_7 : f32 to vector<2x64xf32>
    %11 = arith.cmpf oge, %9, %10 : vector<2x64xf32>
    %cst_8 = arith.constant 2.000000e-01 : f32
    %12 = vector.broadcast %cst_8 : f32 to vector<2x64xf32>
    %13 = arith.mulf %12, %9 : vector<2x64xf32>
    %14 = arith.select %11, %9, %13 : vector<2x64xi1>, vector<2x64xf32>
    %c0_9 = arith.constant 0 : index
    %c0_10 = arith.constant 0 : index
    %15 = vector.load %arg5[%c0_9, %c0_10] : memref<2x64xf32, #tpu.memory_space<vmem>>, vector<2x64xf32>
    tpu.vector_store %arg5[%c0_9, %c0_10], %14 {strides = array<i32>} : memref<2x64xf32, #tpu.memory_space<vmem>>, vector<2x64xf32>,
    return
  }
  func.func @transform_0(%arg0: i32) -> (i32, i32) {
    %c0_i32 = arith.constant 0 : i32
    %c0_i32_0 = arith.constant 0 : i32
    return %arg0, %c0_i32 : i32, i32
  }
  func.func @transform_1(%arg0: i32) -> (i32, i32) {
    %c0_i32 = arith.constant 0 : i32
    %c0_i32_0 = arith.constant 0 : i32
    %c0_i32_1 = arith.constant 0 : i32
    return %c0_i32, %c0_i32_0 : i32, i32
  }
  func.func @transform_2(%arg0: i32) -> (i32, i32) {
    %c0_i32 = arith.constant 0 : i32
    %c0_i32_0 = arith.constant 0 : i32
    %c0_i32_1 = arith.constant 0 : i32
    return %c0_i32, %c0_i32_0 : i32, i32
  }
  func.func @transform_3(%arg0: i32) -> (i32, i32) {
    %c0_i32 = arith.constant 0 : i32
    %c0_i32_0 = arith.constant 0 : i32
    %c0_i32_1 = arith.constant 0 : i32
    return %c0_i32, %c0_i32_0 : i32, i32
  }
  func.func @transform_4(%arg0: i32) -> (i32, i32) {
    %c0_i32 = arith.constant 0 : i32
    %c0_i32_0 = arith.constant 0 : i32
    return %arg0, %c0_i32 : i32, i32
  }
}

module attributes {stable_mosaic.version = 11 : i64} {
  func.func @_seg_head_kernel(%arg0: i32, %arg1: i32, %arg2: memref<1x16x192xbf16, #tpu.memory_space<vmem>>, %arg3: memref<1x1x256xf32, #tpu.memory_space<vmem>>, %arg4: memref<192x256xbf16, #tpu.memory_space<vmem>>, %arg5: memref<1x256xf32, #tpu.memory_space<vmem>>, %arg6: memref<256x256xbf16, #tpu.memory_space<vmem>>, %arg7: memref<1x256xf32, #tpu.memory_space<vmem>>, %arg8: memref<1x256xf32, #tpu.memory_space<vmem>>, %arg9: memref<256x128xbf16, #tpu.memory_space<vmem>>, %arg10: memref<1x128xf32, #tpu.memory_space<vmem>>, %arg11: memref<1x128xf32, #tpu.memory_space<vmem>>, %arg12: memref<128x50xbf16, #tpu.memory_space<vmem>>, %arg13: memref<1x16x50xf32, #tpu.memory_space<vmem>>) attributes {dimension_semantics = [#tpu.dimension_semantics<parallel>, #tpu.dimension_semantics<parallel>], iteration_bounds = array<i64: 2, 1>, scalar_prefetch = 0 : i64, scratch_operands = 0 : i64, tpu.core_type = #tpu.core_type<tc>, window_params = [{transform_indices = @transform_0, window_bounds = array<i64: 1, 16, 192>}, {transform_indices = @transform_1, window_bounds = array<i64: 1, 1, 256>}, {pipeline_mode = #tpu.pipeline_mode<synchronous>, transform_indices = @transform_2, window_bounds = array<i64: 192, 256>}, {pipeline_mode = #tpu.pipeline_mode<synchronous>, transform_indices = @transform_3, window_bounds = array<i64: 1, 256>}, {pipeline_mode = #tpu.pipeline_mode<synchronous>, transform_indices = @transform_4, window_bounds = array<i64: 256, 256>}, {pipeline_mode = #tpu.pipeline_mode<synchronous>, transform_indices = @transform_5, window_bounds = array<i64: 1, 256>}, {pipeline_mode = #tpu.pipeline_mode<synchronous>, transform_indices = @transform_6, window_bounds = array<i64: 1, 256>}, {pipeline_mode = #tpu.pipeline_mode<synchronous>, transform_indices = @transform_7, window_bounds = array<i64: 256, 128>}, {pipeline_mode = #tpu.pipeline_mode<synchronous>, transform_indices = @transform_8, window_bounds = array<i64: 1, 128>}, {pipeline_mode = #tpu.pipeline_mode<synchronous>, transform_indices = @transform_9, window_bounds = array<i64: 1, 128>}, {pipeline_mode = #tpu.pipeline_mode<synchronous>, transform_indices = @transform_10, window_bounds = array<i64: 128, 50>}, {transform_indices = @transform_11, window_bounds = array<i64: 1, 16, 50>}]} {
    %c0 = arith.constant 0 : index
    %c0_0 = arith.constant 0 : index
    %c0_1 = arith.constant 0 : index
    %0 = vector.load %arg2[%c0, %c0_0, %c0_1] : memref<1x16x192xbf16, #tpu.memory_space<vmem>>, vector<1x16x192xbf16>
    %1 = vector.shape_cast %0 : vector<1x16x192xbf16> to vector<16x192xbf16>
    %c0_2 = arith.constant 0 : index
    %c0_3 = arith.constant 0 : index
    %2 = vector.load %arg4[%c0_2, %c0_3] : memref<192x256xbf16, #tpu.memory_space<vmem>>, vector<192x256xbf16>
    %cst = arith.constant dense<0.000000e+00> : vector<16x256xf32>
    %3 = tpu.matmul %1, %2, %cst {dimension_numbers = #tpu.dot_dimension_numbers<[1], [0], [0], [1], [0, 0, 1, 1], [], []>} : vector<16x192xbf16>, vector<192x256xbf16>, vector<16x256xf32> -> vector<16x256xf32>
    %c0_4 = arith.constant 0 : index
    %c0_5 = arith.constant 0 : index
    %4 = vector.load %arg5[%c0_4, %c0_5] : memref<1x256xf32, #tpu.memory_space<vmem>>, vector<1x256xf32>
    %5 = vector.broadcast %4 : vector<1x256xf32> to vector<16x256xf32>
    %6 = arith.mulf %3, %5 : vector<16x256xf32>
    %c0_6 = arith.constant 0 : index
    %c0_7 = arith.constant 0 : index
    %c0_8 = arith.constant 0 : index
    %7 = vector.load %arg3[%c0_6, %c0_7, %c0_8] : memref<1x1x256xf32, #tpu.memory_space<vmem>>, vector<1x1x256xf32>
    %8 = vector.shape_cast %7 : vector<1x1x256xf32> to vector<1x256xf32>
    %9 = vector.broadcast %8 : vector<1x256xf32> to vector<16x256xf32>
    %10 = arith.addf %6, %9 : vector<16x256xf32>
    %cst_9 = arith.constant 0.000000e+00 : f32
    %11 = vector.broadcast %cst_9 : f32 to vector<16x256xf32>
    %12 = arith.cmpf oge, %10, %11 : vector<16x256xf32>
    %cst_10 = arith.constant 2.000000e-01 : f32
    %13 = vector.broadcast %cst_10 : f32 to vector<16x256xf32>
    %14 = arith.mulf %13, %10 : vector<16x256xf32>
    %15 = arith.select %12, %10, %14 : vector<16x256xi1>, vector<16x256xf32>
    %16 = arith.truncf %15 : vector<16x256xf32> to vector<16x256xbf16>
    %c0_11 = arith.constant 0 : index
    %c0_12 = arith.constant 0 : index
    %17 = vector.load %arg6[%c0_11, %c0_12] : memref<256x256xbf16, #tpu.memory_space<vmem>>, vector<256x256xbf16>
    %cst_13 = arith.constant dense<0.000000e+00> : vector<16x256xf32>
    %18 = tpu.matmul %16, %17, %cst_13 {dimension_numbers = #tpu.dot_dimension_numbers<[1], [0], [0], [1], [0, 0, 1, 1], [], []>} : vector<16x256xbf16>, vector<256x256xbf16>, vector<16x256xf32> -> vector<16x256xf32>
    %c0_14 = arith.constant 0 : index
    %c0_15 = arith.constant 0 : index
    %19 = vector.load %arg7[%c0_14, %c0_15] : memref<1x256xf32, #tpu.memory_space<vmem>>, vector<1x256xf32>
    %20 = vector.broadcast %19 : vector<1x256xf32> to vector<16x256xf32>
    %21 = arith.mulf %18, %20 : vector<16x256xf32>
    %c0_16 = arith.constant 0 : index
    %c0_17 = arith.constant 0 : index
    %22 = vector.load %arg8[%c0_16, %c0_17] : memref<1x256xf32, #tpu.memory_space<vmem>>, vector<1x256xf32>
    %23 = vector.broadcast %22 : vector<1x256xf32> to vector<16x256xf32>
    %24 = arith.addf %21, %23 : vector<16x256xf32>
    %cst_18 = arith.constant 0.000000e+00 : f32
    %25 = vector.broadcast %cst_18 : f32 to vector<16x256xf32>
    %26 = arith.cmpf oge, %24, %25 : vector<16x256xf32>
    %cst_19 = arith.constant 2.000000e-01 : f32
    %27 = vector.broadcast %cst_19 : f32 to vector<16x256xf32>
    %28 = arith.mulf %27, %24 : vector<16x256xf32>
    %29 = arith.select %26, %24, %28 : vector<16x256xi1>, vector<16x256xf32>
    %30 = arith.truncf %29 : vector<16x256xf32> to vector<16x256xbf16>
    %c0_20 = arith.constant 0 : index
    %c0_21 = arith.constant 0 : index
    %31 = vector.load %arg9[%c0_20, %c0_21] : memref<256x128xbf16, #tpu.memory_space<vmem>>, vector<256x128xbf16>
    %cst_22 = arith.constant dense<0.000000e+00> : vector<16x128xf32>
    %32 = tpu.matmul %30, %31, %cst_22 {dimension_numbers = #tpu.dot_dimension_numbers<[1], [0], [0], [1], [0, 0, 1, 1], [], []>} : vector<16x256xbf16>, vector<256x128xbf16>, vector<16x128xf32> -> vector<16x128xf32>
    %c0_23 = arith.constant 0 : index
    %c0_24 = arith.constant 0 : index
    %33 = vector.load %arg10[%c0_23, %c0_24] : memref<1x128xf32, #tpu.memory_space<vmem>>, vector<1x128xf32>
    %34 = vector.broadcast %33 : vector<1x128xf32> to vector<16x128xf32>
    %35 = arith.mulf %32, %34 : vector<16x128xf32>
    %c0_25 = arith.constant 0 : index
    %c0_26 = arith.constant 0 : index
    %36 = vector.load %arg11[%c0_25, %c0_26] : memref<1x128xf32, #tpu.memory_space<vmem>>, vector<1x128xf32>
    %37 = vector.broadcast %36 : vector<1x128xf32> to vector<16x128xf32>
    %38 = arith.addf %35, %37 : vector<16x128xf32>
    %cst_27 = arith.constant 0.000000e+00 : f32
    %39 = vector.broadcast %cst_27 : f32 to vector<16x128xf32>
    %40 = arith.cmpf oge, %38, %39 : vector<16x128xf32>
    %cst_28 = arith.constant 2.000000e-01 : f32
    %41 = vector.broadcast %cst_28 : f32 to vector<16x128xf32>
    %42 = arith.mulf %41, %38 : vector<16x128xf32>
    %43 = arith.select %40, %38, %42 : vector<16x128xi1>, vector<16x128xf32>
    %44 = arith.truncf %43 : vector<16x128xf32> to vector<16x128xbf16>
    %c0_29 = arith.constant 0 : index
    %c0_30 = arith.constant 0 : index
    %45 = vector.load %arg12[%c0_29, %c0_30] : memref<128x50xbf16, #tpu.memory_space<vmem>>, vector<128x50xbf16>
    %cst_31 = arith.constant dense<0.000000e+00> : vector<16x50xf32>
    %46 = tpu.matmul %44, %45, %cst_31 {dimension_numbers = #tpu.dot_dimension_numbers<[1], [0], [0], [1], [0, 0, 1, 1], [], []>} : vector<16x128xbf16>, vector<128x50xbf16>, vector<16x50xf32> -> vector<16x50xf32>
    %c0_32 = arith.constant 0 : index
    %c0_33 = arith.constant 0 : index
    %c0_34 = arith.constant 0 : index
    %47 = vector.load %arg13[%c0_32, %c0_33, %c0_34] : memref<1x16x50xf32, #tpu.memory_space<vmem>>, vector<1x16x50xf32>
    %48 = vector.shape_cast %47 : vector<1x16x50xf32> to vector<16x50xf32>
    %49 = vector.shape_cast %46 : vector<16x50xf32> to vector<1x16x50xf32>
    tpu.vector_store %arg13[%c0_32, %c0_33, %c0_34], %49 {strides = array<i32>} : memref<1x16x50xf32, #tpu.memory_space<vmem>>, vector<1x16x50xf32>,
    return
  }
  func.func @transform_0(%arg0: i32, %arg1: i32) -> (i32, i32, i32) {
    %c0_i32 = arith.constant 0 : i32
    %c0_i32_0 = arith.constant 0 : i32
    return %arg0, %arg1, %c0_i32 : i32, i32, i32
  }
  func.func @transform_1(%arg0: i32, %arg1: i32) -> (i32, i32, i32) {
    %c0_i32 = arith.constant 0 : i32
    %c0_i32_0 = arith.constant 0 : i32
    %c0_i32_1 = arith.constant 0 : i32
    return %arg0, %c0_i32, %c0_i32_0 : i32, i32, i32
  }
  func.func @transform_2(%arg0: i32, %arg1: i32) -> (i32, i32) {
    %c0_i32 = arith.constant 0 : i32
    %c0_i32_0 = arith.constant 0 : i32
    %c0_i32_1 = arith.constant 0 : i32
    return %c0_i32, %c0_i32_0 : i32, i32
  }
  func.func @transform_3(%arg0: i32, %arg1: i32) -> (i32, i32) {
    %c0_i32 = arith.constant 0 : i32
    %c0_i32_0 = arith.constant 0 : i32
    %c0_i32_1 = arith.constant 0 : i32
    return %c0_i32, %c0_i32_0 : i32, i32
  }
  func.func @transform_4(%arg0: i32, %arg1: i32) -> (i32, i32) {
    %c0_i32 = arith.constant 0 : i32
    %c0_i32_0 = arith.constant 0 : i32
    %c0_i32_1 = arith.constant 0 : i32
    return %c0_i32, %c0_i32_0 : i32, i32
  }
  func.func @transform_5(%arg0: i32, %arg1: i32) -> (i32, i32) {
    %c0_i32 = arith.constant 0 : i32
    %c0_i32_0 = arith.constant 0 : i32
    %c0_i32_1 = arith.constant 0 : i32
    return %c0_i32, %c0_i32_0 : i32, i32
  }
  func.func @transform_6(%arg0: i32, %arg1: i32) -> (i32, i32) {
    %c0_i32 = arith.constant 0 : i32
    %c0_i32_0 = arith.constant 0 : i32
    %c0_i32_1 = arith.constant 0 : i32
    return %c0_i32, %c0_i32_0 : i32, i32
  }
  func.func @transform_7(%arg0: i32, %arg1: i32) -> (i32, i32) {
    %c0_i32 = arith.constant 0 : i32
    %c0_i32_0 = arith.constant 0 : i32
    %c0_i32_1 = arith.constant 0 : i32
    return %c0_i32, %c0_i32_0 : i32, i32
  }
  func.func @transform_8(%arg0: i32, %arg1: i32) -> (i32, i32) {
    %c0_i32 = arith.constant 0 : i32
    %c0_i32_0 = arith.constant 0 : i32
    %c0_i32_1 = arith.constant 0 : i32
    return %c0_i32, %c0_i32_0 : i32, i32
  }
  func.func @transform_9(%arg0: i32, %arg1: i32) -> (i32, i32) {
    %c0_i32 = arith.constant 0 : i32
    %c0_i32_0 = arith.constant 0 : i32
    %c0_i32_1 = arith.constant 0 : i32
    return %c0_i32, %c0_i32_0 : i32, i32
  }
  func.func @transform_10(%arg0: i32, %arg1: i32) -> (i32, i32) {
    %c0_i32 = arith.constant 0 : i32
    %c0_i32_0 = arith.constant 0 : i32
    %c0_i32_1 = arith.constant 0 : i32
    return %c0_i32, %c0_i32_0 : i32, i32
  }
  func.func @transform_11(%arg0: i32, %arg1: i32) -> (i32, i32, i32) {
    %c0_i32 = arith.constant 0 : i32
    %c0_i32_0 = arith.constant 0 : i32
    return %arg0, %arg1, %c0_i32 : i32, i32, i32
  }
}

</mosaic_0001>

<bundles_post_ra>
// kernel: forward.20
= control target key start
LH: loop header
LB: loop body
LE: loop exit
PB: predicated region body
PF: predicated region fallthrough
CT: control target
= control target key end

     0   :  { %vm42_vm0 = vcmask 1040384   ;;  %vm43_vm1 = vcmask 1041408   ;;  %v138_v1 = vmov 65535   ;;  %vm35_vm2 = vcmask 23552   ;;  %s216_s1 = inlined_call_operand.vmem [shape: bf16[3,64], index: 1, kind: input, shape index: {}]   ;;  %s217_s2 = inlined_call_operand.vmem [shape: bf16[3,64], index: 2, kind: input, shape index: {}]   ;;  %s218_s0 = inlined_call_operand.vmem [shape: bf16[32,3], index: 0, kind: input, shape index: {}]   ;;  %s219_s3 = inlined_call_operand.vmem [shape: f32[1,64], index: 3, kind: input, shape index: {}]   ;;  %s220_s4 = inlined_call_operand.vmem [shape: bf16[32,64], index: 4, kind: output, shape index: {0}]   ;;  %s221_s5 = inlined_call_operand.vmem [shape: bf16[32,64], index: 5, kind: output, shape index: {1}]  }
   0x1   :  { %v24_v0 = vld [vmem:[%s216_s1] sm:$0x3]  ;;  %v44_v2 = vsel %vm42_vm0, 4294967295, %v138_v1  ;;  %v133_v8 = vld [vmem:[%s218_s0 + $0x8] sm:$0xff]  ;;  %vm72_vm3 = vcmask 519168  }
   0x2   :  { %v77_v3 = vld [vmem:[%s217_s2] sm:$0x3]  ;;  %v45_v4 = vsel %vm43_vm1, %v44_v2, 0 }
   0x3   :  { %v47_v5 = vand.u32 %v45_v4, %v24_v0  ;;  %v83_v6 = vand.u32 %v77_v3, %v45_v4  ;;  %v132_v7 = vld [vmem:[%s218_s0] sm:$0xff] }
   0x4   :  { %v137_v9 = vld [vmem:[%s219_s3] ss:$0 sm:$0xff] }
   0x5   :  { %56 = vmatpush.bf16.msra.mxu0 %v47_v5  ;;  %134 = vmatpush.bf16.msra.mxu2 %v47_v5 }
   0x6   :  { %92 = vmatpush.bf16.msra.mxu1 %v83_v6  ;;  %135 = vmatpush.bf16.msra.mxu3 %v83_v6 }
   0x8   :  { %128 = vmatmul.msk.bf16.vlgmr.msra.gmra.mxu0 %vm35_vm2, %v132_v7  ;;  %129 = vmatmul.msk.bf16.vlgmr.msra.gmra.mxu2 %vm35_vm2, %v133_v8 }
   0x9   :  { %130 = vmatmul.msk.bf16.vlgmr.msra.gmra.mxu1 %vm35_vm2, %v132_v7  ;;  %131 = vmatmul.msk.bf16.vlgmr.msra.gmra.mxu3 %vm35_vm2, %v133_v8 }
  0x85   :  { %v58_v10 = vpop.f32.mrf.mxu0 }
  0x86   :  { %v68_v11 = vpack.c.bf16 %v58_v10, %v58_v10  ;;  %v94_v12 = vpop.f32.mrf.mxu1 }
  0x87   :  { %v95_v13 = vadd.f32 %v137_v9, %v94_v12 }
  0x88   :  { %73 = vst.msk [vmem:[%s220_s4] sm:$0xf] %vm72_vm3, %v68_v11 }
  0x89   :  { %v104_v14 = vpack.c.bf16 %v95_v13, %v95_v13 }
  0x8b   :  { %108 = vst.msk [vmem:[%s221_s5] sm:$0xf] %vm72_vm3, %v104_v14  ;;  %v63_v15 = vpop.f32.mrf.mxu2 }
  0x8c   :  { %v70_v16 = vpack.c.bf16 %v63_v15, %v63_v15  ;;  %v99_v17 = vpop.f32.mrf.mxu3 }
  0x8d   :  { %v100_v18 = vadd.f32 %v137_v9, %v99_v17  ;;  %v60_v19 = vpop.f32.mrf.mxu0 }
  0x8e   :  { %75 = vst.msk [vmem:[%s220_s4 + $0x8] sm:$0xf] %vm72_vm3, %v70_v16  ;;  %v69_v20 = vpack.c.bf16 %v60_v19, %v60_v19  ;;  %v96_v21 = vpop.f32.mrf.mxu1 }
  0x8f   :  { %v106_v22 = vpack.c.bf16 %v100_v18, %v100_v18  ;;  %v97_v23 = vadd.f32 %v137_v9, %v96_v21 }
  0x90   :  { %74 = vst.msk [vmem:[%s220_s4 + $0x4] sm:$0xf] %vm72_vm3, %v69_v20 }
  0x91   :  { %110 = vst.msk [vmem:[%s221_s5 + $0x8] sm:$0xf] %vm72_vm3, %v106_v22  ;;  %v105_v24 = vpack.c.bf16 %v97_v23, %v97_v23 }
  0x93   :  { %109 = vst.msk [vmem:[%s221_s5 + $0x4] sm:$0xf] %vm72_vm3, %v105_v24  ;;  %v65_v25 = vpop.f32.mrf.mxu2 }
  0x94   :  { %v71_v26 = vpack.c.bf16 %v65_v25, %v65_v25  ;;  %v101_v27 = vpop.f32.mrf.mxu3 }
  0x95   :  { %v102_v28 = vadd.f32 %v137_v9, %v101_v27 }
  0x96   :  { %76 = vst.msk [vmem:[%s220_s4 + $0xc] sm:$0xf] %vm72_vm3, %v71_v26 }
  0x97   :  { %v107_v29 = vpack.c.bf16 %v102_v28, %v102_v28 }
  0x99   :  { %111 = vst.msk [vmem:[%s221_s5 + $0xc] sm:$0xf] %vm72_vm3, %v107_v29 }

// kernel: forward.19
= control target key start
LH: loop header
LB: loop body
LE: loop exit
PB: predicated region body
PF: predicated region fallthrough
CT: control target
= control target key end

     0   :  { %s495_s12 = smov 0   ;;  %s497_s13 = smov 0   ;;  %s534_s0 = inlined_call_operand.vmem [shape: bf16[2,16,3], index: 0, kind: input, shape index: {}, may-alias: {0,1}]   ;;  %s535_s1 = inlined_call_operand.vmem [shape: bf16[2,16,3], index: 1, kind: input, shape index: {}, may-alias: {0,1}]   ;;  %s536_s2 = inlined_call_operand.vmem [shape: f32[2,1,16], index: 2, kind: input, shape index: {}]   ;;  %s537_s3 = inlined_call_operand.vmem [shape: f32[2,16,16], index: 3, kind: output, shape index: {}]  }
   0x1   :  { %s499_s14 = smov 0  }
   0x2 LB: > { %s25_s15 = sadd.s32 1, %s469_s13  ;;  %p403_p0 = scmp.ge.s32.totalorder %s473_s14, 1  ;;  %s473_s14 = sphi %s499_s14, %s13_s14   ;;  %s469_s13 = sphi %s497_s13, %s539_s13   ;;  %s465_s12 = sphi %s495_s12, %s538_s12  }
   0x3   : > { %p27_p1 = scmp.ge.s32.totalorder %s25_s15, 2  ;;  %p176_p2 = scmp.lt.s32.totalorder %s473_s14, 3 }
   0x5   : > { %s541_s15 = smov (%p27_p1, %s25_s15), 0  ;;  %p177_p3 = pnand %p403_p0, %p176_p2 }
   0x6   : > { %p217_p4 = scmp.lt.s32.totalorder (!%p177_p3), %s465_s12, 1 }
   0x7   : > { %180 = sbr.rel (%p177_p3) target bundleno = 163 (0xa3), region = 32 }
   0xc   : > { %s543_s12 = smov (!%p217_p4, %s465_s12), 1  ;;  %vm259_vm0 = vcmask 23552   ;;  %vm288_vm1 = vcmask 130048  }
   0xd   : > { %s421_s16 = sshll.u32 %s543_s12, 3  ;;  %s233_s19 = scalar_lea.vmem %s536_s2, %s543_s12 }
   0xe   : > { %s230_s22 = scalar_lea.vmem %s535_s1, %s421_s16  ;;  %s224_s25 = scalar_lea.vmem %s534_s0, %s421_s16  ;;  %v450_v3 = vld [vmem:[%s233_s19] ss:$0 sm:$0xff] }
   0xf   : > { %v425_v0 = vld [vmem:[%s230_s22] sm:$0xff]  ;;  %s423_s26 = sshll.u32 %s543_s12, 4 }
  0x10   : > { %v264_v1 = vsel %vm259_vm0, %v425_v0, 0  ;;  %v424_v2 = vld [vmem:[%s224_s25] sm:$0xff]  ;;  %s242_s29 = scalar_lea.vmem %s537_s3, %s423_s26 }
  0x11   : > { %273 = vmatpush.bf16.xpose.msra.mxu0 %v264_v1 }
  0x18   : > { %418 = vmatmul.msk.bf16.vlgmr.msra.gmra.mxu0 %vm259_vm0, %v424_v2 }
  0x95   : > { %v275_v4 = vpop.f32.mrf.mxu0 }
  0x96   : > { %v280_v5 = vmul.f32 2.0, %v275_v4 }
  0x98   : > { %v286_v6 = vsub.f32 %v280_v5, %v450_v3 }
  0x9a   : > { %289 = vst.msk [vmem:[%s242_s29] sm:$0xff] %vm288_vm1, %v286_v6 }
  0x9d   : > { %v277_v7 = vpop.f32.mrf.mxu0 }
  0x9e   : > { %v281_v8 = vmul.f32 2.0, %v277_v7 }
  0xa0   : > { %v287_v9 = vsub.f32 %v281_v8, %v450_v3 }
  0xa2   : > { %290 = vst.msk [vmem:[%s242_s29 + $0x8] sm:$0xff] %vm288_vm1, %v287_v9 }
  0xa3 PF: > { %s13_s14 = sadd.s32 1, %s473_s14   ;;  %s538_s12 = smov %s469_s13 }
  0xa4   : > { %p10_p5 = scmp.ge.s32.totalorder %s13_s14, 4   ;;  %s539_s13 = smov %s541_s15 }
  0xa6   :  { %12 = sbr.rel (!%p10_p5) target bundleno = 2 (0x2), region = 68 }

// kernel: forward.22
= control target key start
LH: loop header
LB: loop body
LE: loop exit
PB: predicated region body
PF: predicated region fallthrough
CT: control target
= control target key end

     0   :  { %s1419_s15 = smov 0   ;;  %s1421_s16 = smov 0   ;;  %s1883_s0 = inlined_call_operand.vmem [shape: bf16[2,16,128], index: 0, kind: input, shape index: {}]   ;;  %s1884_s1 = inlined_call_operand.vmem [shape: bf16[128,1024], index: 1, kind: input, shape index: {}]   ;;  %s1885_s2 = inlined_call_operand.vmem [shape: f32[1,1024], index: 2, kind: input, shape index: {}]   ;;  %s1886_s3 = inlined_call_operand.vmem [shape: f32[1,1024], index: 3, kind: input, shape index: {}]   ;;  %s1887_s4 = inlined_call_operand.vmem [shape: f32[2,1,1024], index: 4, kind: output, shape index: {}]  }
   0x1   :  { %s1423_s17 = smov 0  }
   0x2 LB: > { %s26_s18 = sadd.s32 1, %s1388_s16  ;;  %p1014_p0 = scmp.ge.s32.totalorder %s1392_s17, 1  ;;  %s1392_s17 = sphi %s1423_s17, %s14_s17   ;;  %s1388_s16 = sphi %s1421_s16, %s1889_s16   ;;  %s1384_s15 = sphi %s1419_s15, %s1888_s15  }
   0x3   : > { %p28_p1 = scmp.ge.s32.totalorder %s26_s18, 2  ;;  %p181_p2 = scmp.lt.s32.totalorder %s1392_s17, 3 }
   0x5   : > { %s1891_s18 = smov (%p28_p1, %s26_s18), 0  ;;  %p182_p3 = pnand %p1014_p0, %p181_p2 }
   0x6   : > { %p211_p4 = scmp.lt.s32.totalorder (!%p182_p3), %s1384_s15, 1 }
   0x7   : > { %185 = sbr.rel (%p182_p3) target bundleno = 248 (0xf8), region = 36 }
   0xc   : > { %v1248_v0 = vld [vmem:[%s1884_s1 + $0x1c0] sm:$0xf]  ;;  %v1338_v2 = vld [vmem:[%s1884_s1 + $0x1c4] sm:$0xf]  ;;  %v1256_v5 = vld [vmem:[%s1884_s1 + $0x1c8] sm:$0xf] }
   0xd   : > { %v1342_v1 = vld [vmem:[%s1884_s1 + $0x1dc] sm:$0xf0]  ;;  %v1250_v4 = vld [vmem:[%s1884_s1 + $0x1e0] sm:$0xf0]  ;;  %v1343_v6 = vld [vmem:[%s1884_s1 + $0x1e4] sm:$0xf0] }
   0xe   : > { %v1249_v3 = vor.u32 %v1342_v1, %v1248_v0  ;;  %v1253_v7 = vor.u32 %v1338_v2, %v1250_v4  ;;  %v1257_v8 = vor.u32 %v1343_v6, %v1256_v5  ;;  %v1339_v9 = vld [vmem:[%s1884_s1 + $0x1cc] sm:$0xf]  ;;  %v1216_v11 = vld [vmem:[%s1884_s1 + $0x180] sm:$0xf]  ;;  %v1330_v14 = vld [vmem:[%s1884_s1 + $0x184] sm:$0xf] }
   0xf   : > { %v1258_v10 = vld [vmem:[%s1884_s1 + $0x1e8] sm:$0xf0]  ;;  %v1334_v13 = vld [vmem:[%s1884_s1 + $0x19c] sm:$0xf0]  ;;  %v1218_v15 = vld [vmem:[%s1884_s1 + $0x1a0] sm:$0xf0] }
  0x10   : > { %621 = vmatpush.bf16.msra.mxu0 %v1249_v3  ;;  %v1261_v12 = vor.u32 %v1339_v9, %v1258_v10  ;;  %635 = vmatpush.bf16.msra.mxu1 %v1253_v7  ;;  %v1217_v16 = vor.u32 %v1334_v13, %v1216_v11  ;;  %v1221_v17 = vor.u32 %v1330_v14, %v1218_v15  ;;  %v1224_v18 = vld [vmem:[%s1884_s1 + $0x188] sm:$0xf]  ;;  %v1331_v20 = vld [vmem:[%s1884_s1 + $0x18c] sm:$0xf]  ;;  %v1184_v23 = vld [vmem:[%s1884_s1 + $0x140] sm:$0xf] }
  0x11   : > { %649 = vmatpush.bf16.msra.mxu2 %v1257_v8  ;;  %v1335_v19 = vld [vmem:[%s1884_s1 + $0x1a4] sm:$0xf0]  ;;  %v1226_v22 = vld [vmem:[%s1884_s1 + $0x1a8] sm:$0xf0]  ;;  %v1326_v24 = vld [vmem:[%s1884_s1 + $0x15c] sm:$0xf0] }
  0x12   : > { %663 = vmatpush.bf16.msra.mxu3 %v1261_v12  ;;  %v1225_v21 = vor.u32 %v1335_v19, %v1224_v18  ;;  %v1229_v25 = vor.u32 %v1331_v20, %v1226_v22  ;;  %v1322_v26 = vld [vmem:[%s1884_s1 + $0x144] sm:$0xf]  ;;  %v1192_v28 = vld [vmem:[%s1884_s1 + $0x148] sm:$0xf]  ;;  %v1185_v29 = vor.u32 %v1326_v24, %v1184_v23  ;;  %v1323_v31 = vld [vmem:[%s1884_s1 + $0x14c] sm:$0xf] }
  0x13   : > { %v1186_v27 = vld [vmem:[%s1884_s1 + $0x160] sm:$0xf0]  ;;  %v1327_v30 = vld [vmem:[%s1884_s1 + $0x164] sm:$0xf0]  ;;  %v1194_v32 = vld [vmem:[%s1884_s1 + $0x168] sm:$0xf0] }
  0x14   : > { %622 = vmatpush.bf16.msra.mxu0 %v1217_v16  ;;  %636 = vmatpush.bf16.msra.mxu1 %v1221_v17  ;;  %v1189_v33 = vor.u32 %v1322_v26, %v1186_v27  ;;  %v1193_v34 = vor.u32 %v1327_v30, %v1192_v28  ;;  %v1152_v35 = vld [vmem:[%s1884_s1 + $0x100] sm:$0xf]  ;;  %v1314_v37 = vld [vmem:[%s1884_s1 + $0x104] sm:$0xf]  ;;  %v1197_v38 = vor.u32 %v1323_v31, %v1194_v32  ;;  %v1160_v40 = vld [vmem:[%s1884_s1 + $0x108] sm:$0xf] }
  0x15   : > { %650 = vmatpush.bf16.msra.mxu2 %v1225_v21  ;;  %v1318_v36 = vld [vmem:[%s1884_s1 + $0x11c] sm:$0xf0]  ;;  %v1154_v39 = vld [vmem:[%s1884_s1 + $0x120] sm:$0xf0]  ;;  %v1319_v41 = vld [vmem:[%s1884_s1 + $0x124] sm:$0xf0] }
  0x16   : > { %664 = vmatpush.bf16.msra.mxu3 %v1229_v25  ;;  %v1315_v42 = vld [vmem:[%s1884_s1 + $0x10c] sm:$0xf]  ;;  %v1153_v44 = vor.u32 %v1318_v36, %v1152_v35  ;;  %v1157_v45 = vor.u32 %v1314_v37, %v1154_v39  ;;  %v1161_v46 = vor.u32 %v1319_v41, %v1160_v40  ;;  %v1120_v47 = vld [vmem:[%s1884_s1 + $0xc0] sm:$0xf]  ;;  %v1306_v49 = vld [vmem:[%s1884_s1 + $0xc4] sm:$0xf] }
  0x17   : > { %v1162_v43 = vld [vmem:[%s1884_s1 + $0x128] sm:$0xf0]  ;;  %v1310_v48 = vld [vmem:[%s1884_s1 + $0xdc] sm:$0xf0]  ;;  %v1122_v51 = vld [vmem:[%s1884_s1 + $0xe0] sm:$0xf0] }
  0x18   : > { %623 = vmatpush.bf16.msra.mxu0 %v1185_v29  ;;  %637 = vmatpush.bf16.msra.mxu1 %v1189_v33  ;;  %v1165_v50 = vor.u32 %v1315_v42, %v1162_v43  ;;  %v1128_v52 = vld [vmem:[%s1884_s1 + $0xc8] sm:$0xf]  ;;  %v1307_v54 = vld [vmem:[%s1884_s1 + $0xcc] sm:$0xf]  ;;  %v1121_v56 = vor.u32 %v1310_v48, %v1120_v47  ;;  %v1125_v57 = vor.u32 %v1306_v49, %v1122_v51  ;;  %v1088_v59 = vld [vmem:[%s1884_s1 + $0x80] sm:$0xf] }
  0x19   : > { %651 = vmatpush.bf16.msra.mxu2 %v1193_v34  ;;  %v1311_v53 = vld [vmem:[%s1884_s1 + $0xe4] sm:$0xf0]  ;;  %v1130_v55 = vld [vmem:[%s1884_s1 + $0xe8] sm:$0xf0]  ;;  %v1302_v60 = vld [vmem:[%s1884_s1 + $0x9c] sm:$0xf0] }
  0x1a   : > { %665 = vmatpush.bf16.msra.mxu3 %v1197_v38  ;;  %v1129_v58 = vor.u32 %v1311_v53, %v1128_v52  ;;  %v1298_v61 = vld [vmem:[%s1884_s1 + $0x84] sm:$0xf]  ;;  %v1133_v62 = vor.u32 %v1307_v54, %v1130_v55  ;;  %v1096_v0 = vld [vmem:[%s1884_s1 + $0x88] sm:$0xf]  ;;  %v1299_v2 = vld [vmem:[%s1884_s1 + $0x8c] sm:$0xf]  ;;  %v1089_v4 = vor.u32 %v1302_v60, %v1088_v59 }
  0x1b   : > { %v1090_v63 = vld [vmem:[%s1884_s1 + $0xa0] sm:$0xf0]  ;;  %v1303_v1 = vld [vmem:[%s1884_s1 + $0xa4] sm:$0xf0]  ;;  %v1098_v3 = vld [vmem:[%s1884_s1 + $0xa8] sm:$0xf0] }
  0x1c   : > { %624 = vmatpush.bf16.msra.mxu0 %v1153_v44  ;;  %638 = vmatpush.bf16.msra.mxu1 %v1157_v45  ;;  %v1093_v5 = vor.u32 %v1298_v61, %v1090_v63  ;;  %v1097_v6 = vor.u32 %v1303_v1, %v1096_v0  ;;  %v1056_v7 = vld [vmem:[%s1884_s1 + $0x40] sm:$0xf]  ;;  %v1290_v9 = vld [vmem:[%s1884_s1 + $0x44] sm:$0xf]  ;;  %v1101_v10 = vor.u32 %v1299_v2, %v1098_v3  ;;  %v1064_v12 = vld [vmem:[%s1884_s1 + $0x48] sm:$0xf] }
  0x1d   : > { %652 = vmatpush.bf16.msra.mxu2 %v1161_v46  ;;  %v1294_v8 = vld [vmem:[%s1884_s1 + $0x5c] sm:$0xf0]  ;;  %v1058_v11 = vld [vmem:[%s1884_s1 + $0x60] sm:$0xf0]  ;;  %v1295_v13 = vld [vmem:[%s1884_s1 + $0x64] sm:$0xf0] }
  0x1e   : > { %666 = vmatpush.bf16.msra.mxu3 %v1165_v50  ;;  %v1291_v14 = vld [vmem:[%s1884_s1 + $0x4c] sm:$0xf]  ;;  %v1024_v16 = vld [vmem:[%s1884_s1] sm:$0xf]  ;;  %v1057_v17 = vor.u32 %v1294_v8, %v1056_v7  ;;  %v1282_v19 = vld [vmem:[%s1884_s1 + $0x4] sm:$0xf]  ;;  %v1061_v21 = vor.u32 %v1290_v9, %v1058_v11  ;;  %v1065_v22 = vor.u32 %v1295_v13, %v1064_v12 }
  0x1f   : > { %v1066_v15 = vld [vmem:[%s1884_s1 + $0x68] sm:$0xf0]  ;;  %v1286_v18 = vld [vmem:[%s1884_s1 + $0x1c] sm:$0xf0]  ;;  %v1026_v20 = vld [vmem:[%s1884_s1 + $0x20] sm:$0xf0] }
  0x20   : > { %625 = vmatpush.bf16.msra.mxu0 %v1121_v56  ;;  %639 = vmatpush.bf16.msra.mxu1 %v1125_v57  ;;  %v1032_v23 = vld [vmem:[%s1884_s1 + $0x8] sm:$0xf]  ;;  %v1069_v25 = vor.u32 %v1291_v14, %v1066_v15  ;;  %v1283_v26 = vld [vmem:[%s1884_s1 + $0xc] sm:$0xf]  ;;  %v1264_v28 = vld [vmem:[%s1884_s1 + $0x1d0] sm:$0xf]  ;;  %v1025_v31 = vor.u32 %v1286_v18, %v1024_v16  ;;  %v1029_v35 = vor.u32 %v1282_v19, %v1026_v20 }
  0x21   : > { %653 = vmatpush.bf16.msra.mxu2 %v1129_v58  ;;  %v1287_v24 = vld [vmem:[%s1884_s1 + $0x24] sm:$0xf0]  ;;  %v1034_v27 = vld [vmem:[%s1884_s1 + $0x28] sm:$0xf0]  ;;  %v1344_v29 = vld [vmem:[%s1884_s1 + $0x1ec] sm:$0xf0] }
  0x22   : > { %667 = vmatpush.bf16.msra.mxu3 %v1133_v62  ;;  %v1340_v30 = vld [vmem:[%s1884_s1 + $0x1d4] sm:$0xf]  ;;  %s1893_s15 = smov (!%p211_p4, %s1384_s15), 1  ;;  %v1272_v33 = vld [vmem:[%s1884_s1 + $0x1d8] sm:$0xf]  ;;  %v1033_v36 = vor.u32 %v1287_v24, %v1032_v23  ;;  %v1037_v39 = vor.u32 %v1283_v26, %v1034_v27  ;;  %v1265_v40 = vor.u32 %v1344_v29, %v1264_v28 }
  0x23   : > { %v1266_v32 = vld [vmem:[%s1884_s1 + $0x1f0] sm:$0xf0]  ;;  %v1345_v34 = vld [vmem:[%s1884_s1 + $0x1f4] sm:$0xf0]  ;;  %v1341_v37 = vld [vmem:[%s1884_s1 + $0x1dc] sm:$0xf] }
  0x24   : > { %626 = vmatpush.bf16.msra.mxu0 %v1089_v4  ;;  %640 = vmatpush.bf16.msra.mxu1 %v1093_v5  ;;  %v1274_v38 = vld [vmem:[%s1884_s1 + $0x1f8] sm:$0xf0]  ;;  %s1280_s5 = sshll.u32 %s1893_s15, 3  ;;  %v1232_v41 = vld [vmem:[%s1884_s1 + $0x190] sm:$0xf]  ;;  %v1269_v42 = vor.u32 %v1340_v30, %v1266_v32  ;;  %v1273_v43 = vor.u32 %v1345_v34, %v1272_v33 }
  0x25   : > { %654 = vmatpush.bf16.msra.mxu2 %v1097_v6  ;;  %s218_s8 = scalar_lea.vmem %s1883_s0, %s1280_s5  ;;  %v1336_v44 = vld [vmem:[%s1884_s1 + $0x1ac] sm:$0xf0]  ;;  %v1332_v45 = vld [vmem:[%s1884_s1 + $0x194] sm:$0xf]  ;;  %v1277_v47 = vor.u32 %v1341_v37, %v1274_v38  ;;  %v1240_v49 = vld [vmem:[%s1884_s1 + $0x198] sm:$0xf]  ;;  %s223_s26 = scalar_lea.vmem %s1887_s4, %s1280_s5 }
  0x26   : > { %668 = vmatpush.bf16.msra.mxu3 %v1101_v10  ;;  %v1234_v46 = vld [vmem:[%s1884_s1 + $0x1b0] sm:$0xf0]  ;;  %v1677_v48 = vld [vmem:[%s218_s8] sm:$0xff]  ;;  %v1337_v50 = vld [vmem:[%s1884_s1 + $0x1b4] sm:$0xf0]  ;;  %v1233_v53 = vor.u32 %v1336_v44, %v1232_v41 }
  0x27   : > { %v1333_v51 = vld [vmem:[%s1884_s1 + $0x19c] sm:$0xf]  ;;  %v1237_v54 = vor.u32 %v1332_v45, %v1234_v46  ;;  %v1241_v55 = vor.u32 %v1337_v50, %v1240_v49  ;;  %v1200_v56 = vld [vmem:[%s1884_s1 + $0x150] sm:$0xf]  ;;  %v1324_v58 = vld [vmem:[%s1884_s1 + $0x154] sm:$0xf] }
  0x28   : > { %627 = vmatpush.bf16.msra.mxu0 %v1057_v17  ;;  %641 = vmatpush.bf16.msra.mxu1 %v1061_v21  ;;  %v1242_v52 = vld [vmem:[%s1884_s1 + $0x1b8] sm:$0xf0]  ;;  %v1328_v57 = vld [vmem:[%s1884_s1 + $0x16c] sm:$0xf0]  ;;  %v1202_v60 = vld [vmem:[%s1884_s1 + $0x170] sm:$0xf0] }
  0x29   : > { %655 = vmatpush.bf16.msra.mxu2 %v1065_v22  ;;  %v1245_v59 = vor.u32 %v1333_v51, %v1242_v52  ;;  %v1208_v61 = vld [vmem:[%s1884_s1 + $0x158] sm:$0xf]  ;;  %v1325_v63 = vld [vmem:[%s1884_s1 + $0x15c] sm:$0xf]  ;;  %v1201_v1 = vor.u32 %v1328_v57, %v1200_v56  ;;  %v1205_v2 = vor.u32 %v1324_v58, %v1202_v60  ;;  %v1168_v4 = vld [vmem:[%s1884_s1 + $0x110] sm:$0xf] }
  0x2a   : > { %669 = vmatpush.bf16.msra.mxu3 %v1069_v25  ;;  %v1329_v62 = vld [vmem:[%s1884_s1 + $0x174] sm:$0xf0]  ;;  %v1210_v0 = vld [vmem:[%s1884_s1 + $0x178] sm:$0xf0]  ;;  %v1320_v5 = vld [vmem:[%s1884_s1 + $0x12c] sm:$0xf0] }
  0x2b   : > { %v1209_v3 = vor.u32 %v1329_v62, %v1208_v61  ;;  %v1316_v6 = vld [vmem:[%s1884_s1 + $0x114] sm:$0xf]  ;;  %v1213_v7 = vor.u32 %v1325_v63, %v1210_v0  ;;  %v1176_v9 = vld [vmem:[%s1884_s1 + $0x118] sm:$0xf]  ;;  %v1317_v11 = vld [vmem:[%s1884_s1 + $0x11c] sm:$0xf]  ;;  %v1169_v13 = vor.u32 %v1320_v5, %v1168_v4 }
  0x2c   : > { %628 = vmatpush.bf16.msra.mxu0 %v1025_v31  ;;  %642 = vmatpush.bf16.msra.mxu1 %v1029_v35  ;;  %v1170_v8 = vld [vmem:[%s1884_s1 + $0x130] sm:$0xf0]  ;;  %v1321_v10 = vld [vmem:[%s1884_s1 + $0x134] sm:$0xf0]  ;;  %v1178_v12 = vld [vmem:[%s1884_s1 + $0x138] sm:$0xf0] }
  0x2d   : > { %656 = vmatpush.bf16.msra.mxu2 %v1033_v36  ;;  %v1173_v14 = vor.u32 %v1316_v6, %v1170_v8  ;;  %v1177_v15 = vor.u32 %v1321_v10, %v1176_v9  ;;  %v1136_v16 = vld [vmem:[%s1884_s1 + $0xd0] sm:$0xf]  ;;  %v1308_v18 = vld [vmem:[%s1884_s1 + $0xd4] sm:$0xf]  ;;  %v1181_v19 = vor.u32 %v1317_v11, %v1178_v12  ;;  %v1144_v21 = vld [vmem:[%s1884_s1 + $0xd8] sm:$0xf] }
  0x2e   : > { %670 = vmatpush.bf16.msra.mxu3 %v1037_v39  ;;  %v1312_v17 = vld [vmem:[%s1884_s1 + $0xec] sm:$0xf0]  ;;  %v1138_v20 = vld [vmem:[%s1884_s1 + $0xf0] sm:$0xf0]  ;;  %v1313_v22 = vld [vmem:[%s1884_s1 + $0xf4] sm:$0xf0] }
  0x2f   : > { %643 = vmatmul.bf16.vlgmr.msra.gmra.mxu1 %v1677_v48  ;;  %629 = vmatmul.bf16.vlgmr.msra.gmra.mxu0 %v1677_v48  ;;  %v1309_v23 = vld [vmem:[%s1884_s1 + $0xdc] sm:$0xf]  ;;  %v1137_v25 = vor.u32 %v1312_v17, %v1136_v16  ;;  %v1141_v26 = vor.u32 %v1308_v18, %v1138_v20  ;;  %v1145_v27 = vor.u32 %v1313_v22, %v1144_v21  ;;  %v1104_v28 = vld [vmem:[%s1884_s1 + $0x90] sm:$0xf]  ;;  %v1300_v30 = vld [vmem:[%s1884_s1 + $0x94] sm:$0xf] }
  0x30   : > { %677 = vmatpush.bf16.msrb.mxu0 %v1265_v40  ;;  %691 = vmatpush.bf16.msrb.mxu1 %v1269_v42  ;;  %v1146_v24 = vld [vmem:[%s1884_s1 + $0xf8] sm:$0xf0]  ;;  %v1304_v29 = vld [vmem:[%s1884_s1 + $0xac] sm:$0xf0]  ;;  %v1106_v32 = vld [vmem:[%s1884_s1 + $0xb0] sm:$0xf0] }
  0x31   : > { %705 = vmatpush.bf16.msrb.mxu2 %v1273_v43  ;;  %671 = vmatmul.bf16.vlgmr.msra.gmra.mxu3 %v1677_v48  ;;  %v1149_v31 = vor.u32 %v1309_v23, %v1146_v24  ;;  %v1112_v33 = vld [vmem:[%s1884_s1 + $0x98] sm:$0xf]  ;;  %v1301_v35 = vld [vmem:[%s1884_s1 + $0x9c] sm:$0xf]  ;;  %v1105_v37 = vor.u32 %v1304_v29, %v1104_v28  ;;  %v1109_v38 = vor.u32 %v1300_v30, %v1106_v32  ;;  %v1072_v40 = vld [vmem:[%s1884_s1 + $0x50] sm:$0xf] }
  0x32   : > { %719 = vmatpush.bf16.msrb.mxu3 %v1277_v47  ;;  %657 = vmatmul.bf16.vlgmr.msra.gmra.mxu2 %v1677_v48  ;;  %v1305_v34 = vld [vmem:[%s1884_s1 + $0xb4] sm:$0xf0]  ;;  %v1114_v36 = vld [vmem:[%s1884_s1 + $0xb8] sm:$0xf0]  ;;  %v1296_v41 = vld [vmem:[%s1884_s1 + $0x6c] sm:$0xf0] }
  0x33   : > { %v1113_v39 = vor.u32 %v1305_v34, %v1112_v33  ;;  %v1292_v42 = vld [vmem:[%s1884_s1 + $0x54] sm:$0xf]  ;;  %v1117_v43 = vor.u32 %v1301_v35, %v1114_v36  ;;  %v1080_v45 = vld [vmem:[%s1884_s1 + $0x58] sm:$0xf]  ;;  %v1293_v47 = vld [vmem:[%s1884_s1 + $0x5c] sm:$0xf]  ;;  %v1073_v50 = vor.u32 %v1296_v41, %v1072_v40 }
  0x34   : > { %678 = vmatpush.bf16.msrb.mxu0 %v1233_v53  ;;  %692 = vmatpush.bf16.msrb.mxu1 %v1237_v54  ;;  %v1074_v44 = vld [vmem:[%s1884_s1 + $0x70] sm:$0xf0]  ;;  %v1297_v46 = vld [vmem:[%s1884_s1 + $0x74] sm:$0xf0]  ;;  %v1082_v49 = vld [vmem:[%s1884_s1 + $0x78] sm:$0xf0] }
  0x35   : > { %706 = vmatpush.bf16.msrb.mxu2 %v1241_v55  ;;  %v1077_v51 = vor.u32 %v1292_v42, %v1074_v44  ;;  %v1081_v52 = vor.u32 %v1297_v46, %v1080_v45  ;;  %v1040_v53 = vld [vmem:[%s1884_s1 + $0x10] sm:$0xf]  ;;  %v1284_v55 = vld [vmem:[%s1884_s1 + $0x14] sm:$0xf]  ;;  %v1085_v56 = vor.u32 %v1293_v47, %v1082_v49  ;;  %v1048_v58 = vld [vmem:[%s1884_s1 + $0x18] sm:$0xf] }
  0x36   : > { %720 = vmatpush.bf16.msrb.mxu3 %v1245_v59  ;;  %v1288_v54 = vld [vmem:[%s1884_s1 + $0x2c] sm:$0xf0]  ;;  %v1042_v57 = vld [vmem:[%s1884_s1 + $0x30] sm:$0xf0]  ;;  %v1289_v59 = vld [vmem:[%s1884_s1 + $0x34] sm:$0xf0] }
  0x37   : > { %v1285_v60 = vld [vmem:[%s1884_s1 + $0x1c] sm:$0xf]  ;;  %v1041_v62 = vor.u32 %v1288_v54, %v1040_v53  ;;  %v1045_v63 = vor.u32 %v1284_v55, %v1042_v57  ;;  %v1049_v0 = vor.u32 %v1289_v59, %v1048_v58  ;;  %v1846_v4 = vld [vmem:[%s1885_s2] sm:$0xff] }
  0x38   : > { %679 = vmatpush.bf16.msrb.mxu0 %v1201_v1  ;;  %693 = vmatpush.bf16.msrb.mxu1 %v1205_v2  ;;  %v1050_v61 = vld [vmem:[%s1884_s1 + $0x38] sm:$0xf0]  ;;  %v1852_v8 = vld [vmem:[%s1886_s3] sm:$0xff]  ;;  %v735_v12 = vperm.slane %v1846_v4, 0  ;;  %v740_v40 = vperm.slane %v1846_v4, 5 }
  0x39   : > { %707 = vmatpush.bf16.msrb.mxu2 %v1209_v3  ;;  %v1053_v1 = vor.u32 %v1285_v60, %v1050_v61  ;;  %v769_v18 = vperm.slane %v1852_v8, 0  ;;  %v771_v23 = vperm.slane %v1852_v8, 2  ;;  %v773_v53 = vperm.slane %v1852_v8, 4 }
  0x3a   : > { %721 = vmatpush.bf16.msrb.mxu3 %v1213_v7  ;;  %v736_v7 = vperm.slane %v1846_v4, 1  ;;  %v774_v57 = vperm.slane %v1852_v8, 5 }
  0x3c   : > { %680 = vmatpush.bf16.msrb.mxu0 %v1169_v13  ;;  %694 = vmatpush.bf16.msrb.mxu1 %v1173_v14  ;;  %v737_v13 = vperm.slane %v1846_v4, 2  ;;  %v738_v14 = vperm.slane %v1846_v4, 3 }
  0x3d   : > { %708 = vmatpush.bf16.msrb.mxu2 %v1177_v15 }
  0x3e   : > { %722 = vmatpush.bf16.msrb.mxu3 %v1181_v19 }
  0x40   : > { %681 = vmatpush.bf16.msrb.mxu0 %v1137_v25  ;;  %695 = vmatpush.bf16.msrb.mxu1 %v1141_v26  ;;  %v772_v26 = vperm.slane %v1852_v8, 3 }
  0x41   : > { %709 = vmatpush.bf16.msrb.mxu2 %v1145_v27 }
  0x42   : > { %723 = vmatpush.bf16.msrb.mxu3 %v1149_v31 }
  0x44   : > { %682 = vmatpush.bf16.msrb.mxu0 %v1105_v37  ;;  %696 = vmatpush.bf16.msrb.mxu1 %v1109_v38 }
  0x45   : > { %710 = vmatpush.bf16.msrb.mxu2 %v1113_v39  ;;  %v739_v39 = vperm.slane %v1846_v4, 4 }
  0x46   : > { %724 = vmatpush.bf16.msrb.mxu3 %v1117_v43 }
  0x48   : > { %683 = vmatpush.bf16.msrb.mxu0 %v1073_v50  ;;  %697 = vmatpush.bf16.msrb.mxu1 %v1077_v51 }
  0x49   : > { %711 = vmatpush.bf16.msrb.mxu2 %v1081_v52 }
  0x4a   : > { %725 = vmatpush.bf16.msrb.mxu3 %v1085_v56 }
  0x4c   : > { %684 = vmatpush.bf16.msrb.mxu0 %v1041_v62  ;;  %698 = vmatpush.bf16.msrb.mxu1 %v1045_v63 }
  0x4d   : > { %712 = vmatpush.bf16.msrb.mxu2 %v1049_v0  ;;  %v741_v0 = vperm.slane %v1846_v4, 6 }
  0x4e   : > { %726 = vmatpush.bf16.msrb.mxu3 %v1053_v1 }
  0x4f   : > { %685 = vmatmul.bf16.vlgmr.msrb.gmra.mxu0 %v1677_v48  ;;  %699 = vmatmul.bf16.vlgmr.msrb.gmra.mxu1 %v1677_v48 }
  0x50   : > { %713 = vmatmul.bf16.vlgmr.msrb.gmra.mxu2 %v1677_v48 }
  0x51   : > { %727 = vmatmul.bf16.vlgmr.msrb.gmra.mxu3 %v1677_v48  ;;  %v770_v48 = vperm.slane %v1852_v8, 1 }
  0xac   : > { %v644_v2 = vpop.f32.mrf.mxu1  ;;  %v630_v6 = vpop.f32.mrf.mxu0 }
  0xad   : > { %v752_v10 = vmul.f32 %v736_v7, %v644_v2  ;;  %v751_v21 = vmul.f32 %v735_v12, %v630_v6 }
  0xaf   : > { %v786_v17 = vadd.f32 %v770_v48, %v752_v10  ;;  %v785_v31 = vadd.f32 %v769_v18, %v751_v21 }
  0xb1   : > { %vm802_vm0 = vcmp.ge.f32.partialorder %v786_v17, 0.0  ;;  %v818_v29 = vmul.f32 0.2, %v786_v17  ;;  %v817_v41 = vmul.f32 0.2, %v785_v31  ;;  %vm801_vm6 = vcmp.ge.f32.partialorder %v785_v31, 0.0 }
  0xb3   : > { %v834_v37 = vsel %vm802_vm0, %v786_v17, %v818_v29  ;;  %v833_v58 = vsel %vm801_vm6, %v785_v31, %v817_v41  ;;  %vm923_vm0 = vcmask 1042434   ;;  %vm933_vm6 = vcmask 1043456  }
  0xb4   : > { %v672_v5 = vpop.f32.mrf.mxu3  ;;  %v646_v9 = vpop.f32.mrf.mxu1 }
  0xb5   : > { %v658_v3 = vpop.f32.mrf.mxu2  ;;  %v760_v11 = vmul.f32 %v736_v7, %v646_v9  ;;  %v632_v20 = vpop.f32.mrf.mxu0  ;;  %v754_v25 = vmul.f32 %v738_v14, %v672_v5  ;;  %v742_v5 = vperm.slane %v1846_v4, 7 }
  0xb6   : > { %v753_v22 = vmul.f32 %v737_v13, %v658_v3  ;;  %v759_v28 = vmul.f32 %v735_v12, %v632_v20 }
  0xb7   : > { %v794_v19 = vadd.f32 %v770_v48, %v760_v11  ;;  %v788_v34 = vadd.f32 %v772_v26, %v754_v25  ;;  %v775_v11 = vperm.slane %v1852_v8, 6 }
  0xb8   : > { %v787_v32 = vadd.f32 %v771_v23, %v753_v22  ;;  %v793_v36 = vadd.f32 %v769_v18, %v759_v28 }
  0xb9   : > { %v826_v30 = vmul.f32 0.2, %v794_v19  ;;  %vm810_vm1 = vcmp.ge.f32.partialorder %v794_v19, 0.0  ;;  %v820_v44 = vmul.f32 0.2, %v788_v34  ;;  %vm804_vm4 = vcmp.ge.f32.partialorder %v788_v34, 0.0 }
  0xba   : > { %v819_v42 = vmul.f32 0.2, %v787_v32  ;;  %vm803_vm2 = vcmp.ge.f32.partialorder %v787_v32, 0.0  ;;  %v825_v47 = vmul.f32 0.2, %v793_v36  ;;  %vm809_vm7 = vcmp.ge.f32.partialorder %v793_v36, 0.0 }
  0xbb   : > { %v842_v38 = vsel %vm810_vm1, %v794_v19, %v826_v30  ;;  %v836_v54 = vsel %vm804_vm4, %v788_v34, %v820_v44  ;;  %vm921_vm1 = vcmask 1040384   ;;  %vm925_vm4 = vcmask 1041408  }
  0xbc   : > { %v674_v16 = vpop.f32.mrf.mxu3  ;;  %v857_v46 = vmax.f32 %v834_v37, %v842_v38  ;;  %v835_v51 = vsel %vm803_vm2, %v787_v32, %v819_v42  ;;  %v841_v60 = vsel %vm809_vm7, %v793_v36, %v825_v47  ;;  %vm927_vm2 = vcmask 1044484  }
  0xbd   : > { %v660_v15 = vpop.f32.mrf.mxu2  ;;  %v762_v27 = vmul.f32 %v738_v14, %v674_v16  ;;  %v850_v1 = vmax.f32 %v833_v58, %v841_v60  ;;  %v776_v16 = vperm.slane %v1852_v8, 7 }
  0xbe   : > { %v761_v24 = vmul.f32 %v737_v13, %v660_v15  ;;  %v858_v59 = vrot.slane %v857_v46, 4 }
  0xbf   : > { %v796_v35 = vadd.f32 %v772_v26, %v762_v27  ;;  %v851_v18 = vrot.slane %v850_v1, 4 }
  0xc0   : > { %v795_v33 = vadd.f32 %v771_v23, %v761_v24  ;;  %v859_v6 = vmax.f32 %v857_v46, %v858_v59 }
  0xc1   : > { %v828_v45 = vmul.f32 0.2, %v796_v35  ;;  %vm812_vm5 = vcmp.ge.f32.partialorder %v796_v35, 0.0  ;;  %v852_v29 = vmax.f32 %v850_v1, %v851_v18 }
  0xc2   : > { %v827_v43 = vmul.f32 0.2, %v795_v33  ;;  %vm811_vm3 = vcmp.ge.f32.partialorder %v795_v33, 0.0  ;;  %v860_v22 = vrot.slane %v859_v6, 2 }
  0xc3   : > { %v844_v55 = vsel %vm812_vm5, %v796_v35, %v828_v45  ;;  %vm931_vm5 = vcmask 1045508  }
  0xc4   : > { %v843_v52 = vsel %vm811_vm3, %v795_v33, %v827_v43  ;;  %v871_v63 = vmax.f32 %v836_v54, %v844_v55  ;;  %v861_v38 = vmax.f32 %v859_v6, %v860_v22  ;;  %vm929_vm3 = vcmask 1046534  }
  0xc5   : > { %v864_v62 = vmax.f32 %v835_v51, %v843_v52 }
  0xc6   : > { %v872_v14 = vrot.slane %v871_v63, 4 }
  0xc7   : > { %v865_v48 = vrot.slane %v864_v62, 4 }
  0xc8   : > { %v873_v26 = vmax.f32 %v871_v63, %v872_v14  ;;  %v853_v63 = vrot.slane %v852_v29, 2 }
  0xc9   : > { %v866_v24 = vmax.f32 %v864_v62, %v865_v48 }
  0xca   : > { %v874_v42 = vrot.slane %v873_v26, 2  ;;  %v854_v48 = vmax.f32 %v852_v29, %v853_v63 }
  0xcc   : > { %v686_v49 = vpop.f32.mrf.mxu0  ;;  %v700_v50 = vpop.f32.mrf.mxu1  ;;  %v875_v55 = vmax.f32 %v873_v26, %v874_v42 }
  0xcd   : > { %v755_v56 = vmul.f32 %v739_v39, %v686_v49  ;;  %v756_v61 = vmul.f32 %v740_v40, %v700_v50 }
  0xce   : > { %v876_v6 = vrot.slane %v875_v55, 1 }
  0xcf   : > { %v789_v2 = vadd.f32 %v773_v53, %v755_v56  ;;  %v790_v7 = vadd.f32 %v774_v57, %v756_v61 }
  0xd1   : > { %v821_v19 = vmul.f32 0.2, %v789_v2  ;;  %vm805_vm8 = vcmp.ge.f32.partialorder %v789_v2, 0.0  ;;  %v822_v4 = vmul.f32 0.2, %v790_v7  ;;  %vm806_vm9 = vcmp.ge.f32.partialorder %v790_v7, 0.0 }
  0xd3   : > { %v714_v3 = vpop.f32.mrf.mxu2  ;;  %v837_v30 = vsel %vm805_vm8, %v789_v2, %v821_v19  ;;  %v838_v33 = vsel %vm806_vm9, %v790_v7, %v822_v4 }
  0xd4   : > { %v728_v9 = vpop.f32.mrf.mxu3  ;;  %v688_v10 = vpop.f32.mrf.mxu0  ;;  %v757_v15 = vmul.f32 %v741_v0, %v714_v3 }
  0xd5   : > { %v763_v12 = vmul.f32 %v739_v39, %v688_v10  ;;  %v702_v13 = vpop.f32.mrf.mxu1  ;;  %v758_v20 = vmul.f32 %v742_v5, %v728_v9  ;;  %v867_v39 = vrot.slane %v866_v24, 2  ;;  %v862_v9 = vrot.slane %v861_v38, 1 }
  0xd6   : > { %v764_v17 = vmul.f32 %v740_v40, %v702_v13  ;;  %v791_v27 = vadd.f32 %v775_v11, %v757_v15 }
  0xd7   : > { %v797_v21 = vadd.f32 %v773_v53, %v763_v12  ;;  %v792_v8 = vadd.f32 %v776_v16, %v758_v20  ;;  %v868_v52 = vmax.f32 %v866_v24, %v867_v39  ;;  %v863_v18 = vmax.f32 %v861_v38, %v862_v9 }
  0xd8   : > { %v798_v23 = vadd.f32 %v774_v57, %v764_v17  ;;  %v823_v43 = vmul.f32 0.2, %v791_v27  ;;  %vm807_vm12 = vcmp.ge.f32.partialorder %v791_v27, 0.0  ;;  %v855_v20 = vrot.slane %v854_v48, 1 }
  0xd9   : > { %vm813_vm10 = vcmp.ge.f32.partialorder %v797_v21, 0.0  ;;  %v829_v25 = vmul.f32 0.2, %v797_v21  ;;  %v824_v46 = vmul.f32 0.2, %v792_v8  ;;  %vm808_vm13 = vcmp.ge.f32.partialorder %v792_v8, 0.0 }
  0xda   : > { %vm814_vm11 = vcmp.ge.f32.partialorder %v798_v23, 0.0  ;;  %v830_v28 = vmul.f32 0.2, %v798_v23  ;;  %v839_v56 = vsel %vm807_vm12, %v791_v27, %v823_v43  ;;  %v914_v27 = vrot.slane %v863_v18, 7 }
  0xdb   : > { %v845_v31 = vsel %vm813_vm10, %v797_v21, %v829_v25  ;;  %v716_v32 = vpop.f32.mrf.mxu2  ;;  %v840_v59 = vsel %vm808_vm13, %v792_v8, %v824_v46  ;;  %v856_v29 = vmax.f32 %v854_v48, %v855_v20 }
  0xdc   : > { %v878_v34 = vmax.f32 %v837_v30, %v845_v31  ;;  %v846_v35 = vsel %vm814_vm11, %v798_v23, %v830_v28  ;;  %v765_v36 = vmul.f32 %v741_v0, %v716_v32  ;;  %v730_v37 = vpop.f32.mrf.mxu3 }
  0xdd   : > { %v885_v40 = vmax.f32 %v838_v33, %v846_v35  ;;  %v766_v41 = vmul.f32 %v742_v5, %v730_v37  ;;  %v869_v5 = vrot.slane %v868_v52, 1  ;;  %v922_v35 = vsel %vm921_vm1, %v856_v29, %v914_v27 }
  0xde   : > { %v879_v44 = vrot.slane %v878_v34, 4  ;;  %v799_v45 = vadd.f32 %v775_v11, %v765_v36 }
  0xdf   : > { %v886_v47 = vrot.slane %v885_v40, 4  ;;  %v800_v49 = vadd.f32 %v776_v16, %v766_v41  ;;  %v870_v15 = vmax.f32 %v868_v52, %v869_v5  ;;  %v877_v16 = vmax.f32 %v875_v55, %v876_v6 }
  0xe0   : > { %v880_v50 = vmax.f32 %v878_v34, %v879_v44  ;;  %vm815_vm14 = vcmp.ge.f32.partialorder %v799_v45, 0.0  ;;  %v831_v51 = vmul.f32 0.2, %v799_v45 }
  0xe1   : > { %v887_v53 = vmax.f32 %v885_v40, %v886_v47  ;;  %vm816_vm15 = vcmp.ge.f32.partialorder %v800_v49, 0.0  ;;  %v832_v54 = vmul.f32 0.2, %v800_v49  ;;  %v915_v24 = vrot.slane %v870_v15, 6 }
  0xe2   : > { %v881_v57 = vrot.slane %v880_v50, 2  ;;  %v847_v58 = vsel %vm815_vm14, %v799_v45, %v831_v51  ;;  %v916_v25 = vrot.slane %v877_v16, 5 }
  0xe3   : > { %v888_v60 = vrot.slane %v887_v53, 2  ;;  %v892_v61 = vmax.f32 %v839_v56, %v847_v58  ;;  %v848_v62 = vsel %vm816_vm15, %v800_v49, %v832_v54 }
  0xe4   : > { %v882_v0 = vmax.f32 %v880_v50, %v881_v57  ;;  %v899_v1 = vmax.f32 %v840_v59, %v848_v62  ;;  %v924_v33 = vsel %vm923_vm0, %v915_v24, %v916_v25 }
  0xe5   : > { %v889_v2 = vmax.f32 %v887_v53, %v888_v60  ;;  %v893_v3 = vrot.slane %v892_v61, 4  ;;  %v926_v38 = vsel %vm925_vm4, %v922_v35, %v924_v33 }
  0xe6   : > { %v900_v7 = vrot.slane %v899_v1, 4  ;;  %v883_v11 = vrot.slane %v882_v0, 1 }
  0xe7   : > { %v894_v10 = vmax.f32 %v892_v61, %v893_v3  ;;  %v890_v12 = vrot.slane %v889_v2, 1 }
  0xe8   : > { %v901_v13 = vmax.f32 %v899_v1, %v900_v7  ;;  %v884_v21 = vmax.f32 %v882_v0, %v883_v11 }
  0xe9   : > { %v895_v14 = vrot.slane %v894_v10, 2  ;;  %v891_v22 = vmax.f32 %v889_v2, %v890_v12 }
  0xea   : > { %v902_v17 = vrot.slane %v901_v13, 2  ;;  %v917_v30 = vrot.slane %v884_v21, 4 }
  0xeb   : > { %v896_v19 = vmax.f32 %v894_v10, %v895_v14  ;;  %v918_v8 = vrot.slane %v891_v22, 3 }
  0xec   : > { %v903_v4 = vmax.f32 %v901_v13, %v902_v17 }
  0xed   : > { %v897_v23 = vrot.slane %v896_v19, 1  ;;  %v928_v36 = vsel %vm927_vm2, %v917_v30, %v918_v8 }
  0xee   : > { %v904_v26 = vrot.slane %v903_v4, 1 }
  0xef   : > { %v898_v28 = vmax.f32 %v896_v19, %v897_v23 }
  0xf0   : > { %v905_v31 = vmax.f32 %v903_v4, %v904_v26 }
  0xf1   : > { %v919_v32 = vrot.slane %v898_v28, 2 }
  0xf2   : > { %v920_v34 = vrot.slane %v905_v31, 1 }
  0xf4   : > { %v930_v37 = vsel %vm929_vm3, %v919_v32, %v920_v34 }
  0xf5   : > { %v932_v39 = vsel %vm931_vm5, %v928_v36, %v930_v37 }
  0xf6   : > { %v934_v40 = vsel %vm933_vm6, %v926_v38, %v932_v39 }
  0xf7   : > { %942 = vst [vmem:[%s223_s26] sm:$0xff] %v934_v40 }
  0xf8 PF: > { %s14_s17 = sadd.s32 1, %s1392_s17   ;;  %s1888_s15 = smov %s1388_s16 }
  0xf9   : > { %p11_p5 = scmp.ge.s32.totalorder %s14_s17, 4   ;;  %s1889_s16 = smov %s1891_s18 }
  0xfb   :  { %13 = sbr.rel (!%p11_p5) target bundleno = 2 (0x2), region = 74 }

// kernel: forward.21
= control target key start
LH: loop header
LB: loop body
LE: loop exit
PB: predicated region body
PF: predicated region fallthrough
CT: control target
= control target key end

     0   :  { %vm460_vm4 = vcmask 523264   ;;  %s1444_s2 = inlined_call_operand.vmem [shape: bf16[64,128], index: 2, kind: input, shape index: {}]   ;;  %s1445_s0 = inlined_call_operand.vmem [shape: bf16[32,4,64], index: 0, kind: input, shape index: {}]   ;;  %s1446_s1 = inlined_call_operand.vmem [shape: bf16[32,64], index: 1, kind: input, shape index: {}]   ;;  %s1447_s3 = inlined_call_operand.vmem [shape: f32[1,128], index: 3, kind: input, shape index: {}]   ;;  %s1448_s4 = inlined_call_operand.vmem [shape: f32[1,128], index: 4, kind: input, shape index: {}]   ;;  %s1449_s5 = inlined_call_operand.vmem [shape: bf16[32,128], index: 5, kind: output, shape index: {}]  }
   0x1   :  { %v1069_v0 = vld [vmem:[%s1444_s2 + $0x18] sm:$0xff]  ;;  %v1068_v1 = vld [vmem:[%s1444_s2 + $0x10] sm:$0xff]  ;;  %v1071_v2 = vld [vmem:[%s1446_s1] sm:$0xff]  }
   0x2   :  { %v61_v3 = vld [vmem:[%s1445_s0] sm:$0x3]  ;;  %489 = vmatpush.bf16.msra.mxu0 %v1069_v0  ;;  %1079 = vmatpush.bf16.msra.mxu1 %v1069_v0  ;;  %v1135_v4 = vunpack.c.l.bf16 %v1071_v2  ;;  %v62_v5 = vld [vmem:[%s1445_s0 + $0x2] sm:$0x3]  ;;  %v63_v6 = vld [vmem:[%s1445_s0 + $0x4] sm:$0x3]  ;;  %v1146_v9 = vunpack.c.h.bf16 %v1071_v2 }
   0x3   :  { %v64_v7 = vld [vmem:[%s1445_s0 + $0x6] sm:$0x3]  ;;  %v93_v8 = vunpack.c.l.bf16 %v61_v3  ;;  %1080 = vmatpush.bf16.msra.mxu2 %v1069_v0  ;;  %v94_v10 = vunpack.c.l.bf16 %v62_v5  ;;  %v95_v11 = vunpack.c.l.bf16 %v63_v6  ;;  %v1151_v13 = vld [vmem:[%s1446_s1 + $0x8] sm:$0xff]   ;;  %1081 = vmatpush.bf16.msra.mxu3 %v1069_v0  ;;  %v1165_v21 = vld [vmem:[%s1445_s0 + $0x10] sm:$0x3] }
   0x4   :  { %v96_v12 = vunpack.c.l.bf16 %v64_v7  ;;  %v33_v14 = vrot.slane %v1135_v4, 1  ;;  %v34_v15 = vrot.slane %v1135_v4, 2  ;;  %v35_v16 = vrot.slane %v1135_v4, 3  ;;  %v1170_v22 = vld [vmem:[%s1445_s0 + $0x12] sm:$0x3]  ;;  %v1067_v23 = vld [vmem:[%s1444_s2 + $0x8] sm:$0xff] }
   0x5   :  { %v125_v17 = vperm.slane %v1135_v4, 0  ;;  %v1158_v18 = vunpack.c.l.bf16 %v1151_v13  ;;  %v40_v19 = vrot.slane %v1146_v9, 1  ;;  %v41_v20 = vrot.slane %v1146_v9, 2  ;;  %v71_v28 = vld [vmem:[%s1445_s0 + $0x14] sm:$0x3]  ;;  %v1066_v44 = vld [vmem:[%s1444_s2] sm:$0xff] }
   0x6   :  { %490 = vmatpush.bf16.msra.mxu0 %v1068_v1  ;;  %1082 = vmatpush.bf16.msra.mxu1 %v1068_v1  ;;  %v126_v24 = vperm.slane %v33_v14, 0  ;;  %v127_v25 = vperm.slane %v34_v15, 0  ;;  %v128_v26 = vperm.slane %v35_v16, 0  ;;  %v42_v29 = vrot.slane %v1146_v9, 3  ;;  %v72_v36 = vld [vmem:[%s1445_s0 + $0x16] sm:$0x3] }
   0x7   :  { %v189_v27 = vadd.f32 %v125_v17, %v93_v8  ;;  %1083 = vmatpush.bf16.msra.mxu2 %v1068_v1  ;;  %v47_v30 = vrot.slane %v1158_v18, 1  ;;  %v48_v31 = vrot.slane %v1158_v18, 2  ;;  %v49_v32 = vrot.slane %v1158_v18, 3  ;;  %1084 = vmatpush.bf16.msra.mxu3 %v1068_v1  ;;  %v77_v37 = vld [vmem:[%s1445_s0 + $0x20] sm:$0x3] }
   0x8   :  { %v190_v33 = vadd.f32 %v126_v24, %v94_v10  ;;  %v191_v34 = vadd.f32 %v127_v25, %v95_v11  ;;  %v192_v35 = vadd.f32 %v128_v26, %v96_v12  ;;  %v78_v39 = vld [vmem:[%s1445_s0 + $0x22] sm:$0x3]  ;;  %v79_v40 = vld [vmem:[%s1445_s0 + $0x24] sm:$0x3]  ;;  %v101_v41 = vunpack.c.l.bf16 %v1165_v21  ;;  %v80_v51 = vld [vmem:[%s1445_s0 + $0x26] sm:$0x3] }
   0x9   :  { %vm221_vm0 = vcmp.ge.f32.partialorder %v189_v27, 0.0  ;;  %v253_v38 = vmul.f32 0.2, %v189_v27  ;;  %v102_v42 = vunpack.c.l.bf16 %v1170_v22  ;;  %v103_v43 = vunpack.c.l.bf16 %v71_v28  ;;  %v85_v11 = vld [vmem:[%s1445_s0 + $0x30] sm:$0x3] }
   0xa   :  { %491 = vmatpush.bf16.msra.mxu0 %v1067_v23  ;;  %1085 = vmatpush.bf16.msra.mxu1 %v1067_v23  ;;  %vm222_vm1 = vcmp.ge.f32.partialorder %v190_v33, 0.0  ;;  %vm223_vm2 = vcmp.ge.f32.partialorder %v191_v34, 0.0  ;;  %vm224_vm3 = vcmp.ge.f32.partialorder %v192_v35, 0.0  ;;  %v254_v45 = vmul.f32 0.2, %v190_v33 }
   0xb   :  { %v255_v46 = vmul.f32 0.2, %v191_v34  ;;  %v256_v47 = vmul.f32 0.2, %v192_v35  ;;  %v285_v48 = vsel %vm221_vm0, %v189_v27, %v253_v38  ;;  %v104_v49 = vunpack.c.l.bf16 %v72_v36  ;;  %1086 = vmatpush.bf16.msra.mxu2 %v1067_v23  ;;  %1087 = vmatpush.bf16.msra.mxu3 %v1067_v23  ;;  %v86_v15 = vld [vmem:[%s1445_s0 + $0x32] sm:$0x3] }
   0xc   :  { %v286_v50 = vsel %vm222_vm1, %v190_v33, %v254_v45  ;;  %349 = vst [vmem:[#allocation1] ss:$2 sm:$0xff] %v285_v48  ;;  %v109_v52 = vunpack.c.l.bf16 %v77_v37  ;;  %v110_v53 = vunpack.c.l.bf16 %v78_v39  ;;  %v111_v54 = vunpack.c.l.bf16 %v79_v40  ;;  %v87_v23 = vld [vmem:[%s1445_s0 + $0x34] sm:$0x3]  ;;  %v65_v37 = vld [vmem:[%s1445_s0 + $0x8] sm:$0x3] }
   0xd   :  { %v287_v55 = vsel %vm223_vm2, %v191_v34, %v255_v46  ;;  %v288_v56 = vsel %vm224_vm3, %v192_v35, %v256_v47  ;;  %351 = vst [vmem:[#allocation1 + $0x1] ss:$2 sm:$0xff] %v286_v50  ;;  %v133_v57 = vperm.slane %v1146_v9, 0  ;;  %v134_v58 = vperm.slane %v40_v19, 0  ;;  %v67_v50 = vld [vmem:[%s1445_s0 + $0xc] sm:$0x3] }
   0xe   :  { %492 = vmatpush.bf16.msra.mxu0 %v1066_v44  ;;  %353 = vst [vmem:[#allocation1 + $0x10] ss:$2 sm:$0xff] %v287_v55  ;;  %1088 = vmatpush.bf16.msra.mxu1 %v1066_v44  ;;  %v135_v59 = vperm.slane %v41_v20, 0  ;;  %v136_v60 = vperm.slane %v42_v29, 0  ;;  %v141_v61 = vperm.slane %v1158_v18, 0  ;;  %v142_v62 = vperm.slane %v47_v30, 0 }
   0xf   :  { %355 = vst [vmem:[#allocation1 + $0x11] ss:$2 sm:$0xff] %v288_v56  ;;  %v112_v63 = vunpack.c.l.bf16 %v80_v51  ;;  %v143_v0 = vperm.slane %v48_v31, 0  ;;  %v197_v1 = vadd.f32 %v133_v57, %v101_v41  ;;  %v198_v2 = vadd.f32 %v134_v58, %v102_v42  ;;  %1089 = vmatpush.bf16.msra.mxu2 %v1066_v44  ;;  %1090 = vmatpush.bf16.msra.mxu3 %v1066_v44  ;;  %v68_v55 = vld [vmem:[%s1445_s0 + $0xe] sm:$0x3] }
  0x10   :  { %v144_v3 = vperm.slane %v49_v32, 0  ;;  %v199_v5 = vadd.f32 %v135_v59, %v103_v43  ;;  %v200_v6 = vadd.f32 %v136_v60, %v104_v49  ;;  %v205_v7 = vadd.f32 %v141_v61, %v109_v52  ;;  %v66_v49 = vld [vmem:[%s1445_s0 + $0xa] sm:$0x3] }
  0x11   :  { %v206_v8 = vadd.f32 %v142_v62, %v110_v53  ;;  %v1205_v10 = vadd.f32 %v143_v0, %v111_v54  ;;  %vm229_vm5 = vcmp.ge.f32.partialorder %v197_v1, 0.0  ;;  %vm230_vm6 = vcmp.ge.f32.partialorder %v198_v2, 0.0 }
  0x12   :  { %vm231_vm7 = vcmp.ge.f32.partialorder %v199_v5, 0.0  ;;  %vm232_vm8 = vcmp.ge.f32.partialorder %v200_v6, 0.0  ;;  %v261_v12 = vmul.f32 0.2, %v197_v1  ;;  %v262_v14 = vmul.f32 0.2, %v198_v2 }
  0x13   :  { %v1213_v17 = vadd.f32 %v144_v3, %v112_v63  ;;  %vm237_vm9 = vcmp.ge.f32.partialorder %v205_v7, 0.0  ;;  %v263_v19 = vmul.f32 0.2, %v199_v5  ;;  %v1216_v20 = vunpack.c.h.bf16 %v1151_v13  ;;  %v88_v13 = vld [vmem:[%s1445_s0 + $0x36] sm:$0x3] }
  0x14   :  { %v364_v16 = vld.sshfl [vmem:[#allocation1] sm:$0xff pattern:$0x75316420]  ;;  %vm238_vm10 = vcmp.ge.f32.partialorder %v206_v8, 0.0  ;;  %vm239_vm11 = vcmp.ge.f32.partialorder %v1205_v10, 0.0  ;;  %v293_v22 = vsel %vm229_vm5, %v197_v1, %v261_v12  ;;  %v294_v25 = vsel %vm230_vm6, %v198_v2, %v262_v14 }
  0x15   :  { %v264_v21 = vmul.f32 0.2, %v200_v6  ;;  %v295_v26 = vsel %vm231_vm7, %v199_v5, %v263_v19  ;;  %v54_v27 = vrot.slane %v1216_v20, 1  ;;  %v117_v28 = vunpack.c.l.bf16 %v85_v11  ;;  %368 = vst [vmem:[#allocation1] ss:$2 sm:$0xff] %v293_v22 }
  0x16   :  { %v365_v24 = vld.sshfl [vmem:[#allocation1 + $0x10] sm:$0xff pattern:$0x75316420]  ;;  %v269_v30 = vmul.f32 0.2, %v205_v7  ;;  %v55_v34 = vrot.slane %v1216_v20, 2  ;;  %v118_v36 = vunpack.c.l.bf16 %v86_v15  ;;  %v119_v39 = vunpack.c.l.bf16 %v87_v23 }
  0x17   :  { %v420_v29 = vpack.c.bf16 %v365_v24, %v364_v16  ;;  %v270_v31 = vmul.f32 0.2, %v206_v8  ;;  %v296_v32 = vsel %vm232_vm8, %v200_v6, %v264_v21  ;;  %v271_v33 = vmul.f32 0.2, %v1205_v10  ;;  %369 = vst [vmem:[#allocation1 + $0x1] ss:$2 sm:$0xff] %v294_v25 }
  0x18   :  { %v56_v35 = vrot.slane %v1216_v20, 3  ;;  %v272_v38 = vmul.f32 0.2, %v1213_v17  ;;  %370 = vst [vmem:[#allocation1 + $0x10] ss:$2 sm:$0xff] %v295_v26  ;;  %v120_v40 = vunpack.c.l.bf16 %v88_v13  ;;  %v149_v41 = vperm.slane %v1216_v20, 0 }
  0x19   :  { %1058 = vmatmul.msk.bf16.vlgmr.msra.gmra.mxu0 %vm460_vm4, %v420_v29  ;;  %vm240_vm12 = vcmp.ge.f32.partialorder %v1213_v17, 0.0  ;;  %371 = vst [vmem:[#allocation1 + $0x11] ss:$2 sm:$0xff] %v296_v32  ;;  %v150_v42 = vperm.slane %v54_v27, 0  ;;  %v151_v43 = vperm.slane %v55_v34, 0  ;;  %v301_v45 = vsel %vm237_vm9, %v205_v7, %v269_v30 }
  0x1a   :  { %v152_v44 = vperm.slane %v56_v35, 0  ;;  %v302_v46 = vsel %vm238_vm10, %v206_v8, %v270_v31  ;;  %v213_v47 = vadd.f32 %v149_v41, %v117_v28  ;;  %v36_v48 = vrot.slane %v1135_v4, 4  ;;  %v74_v23 = vld [vmem:[%s1445_s0 + $0x1a] sm:$0x3]  ;;  %v75_v24 = vld [vmem:[%s1445_s0 + $0x1c] sm:$0x3] }
  0x1b   :  { %v214_v51 = vadd.f32 %v150_v42, %v118_v36  ;;  %v215_v52 = vadd.f32 %v151_v43, %v119_v39  ;;  %v37_v53 = vrot.slane %v1135_v4, 5  ;;  %v38_v54 = vrot.slane %v1135_v4, 6  ;;  %v76_v13 = vld [vmem:[%s1445_s0 + $0x1e] sm:$0x3]  ;;  %v81_v28 = vld [vmem:[%s1445_s0 + $0x28] sm:$0x3] }
  0x1c   :  { %v216_v56 = vadd.f32 %v152_v44, %v120_v40  ;;  %vm245_vm13 = vcmp.ge.f32.partialorder %v213_v47, 0.0  ;;  %v39_v57 = vrot.slane %v1135_v4, 7  ;;  %v97_v58 = vunpack.c.l.bf16 %v65_v37  ;;  %v82_v43 = vld [vmem:[%s1445_s0 + $0x2a] sm:$0x3] }
  0x1d   :  { %vm246_vm14 = vcmp.ge.f32.partialorder %v214_v51, 0.0  ;;  %v277_v59 = vmul.f32 0.2, %v213_v47  ;;  %v98_v60 = vunpack.c.l.bf16 %v66_v49  ;;  %v99_v61 = vunpack.c.l.bf16 %v67_v50 }
  0x1e   :  { %v303_v62 = vsel %vm239_vm11, %v1205_v10, %v271_v33  ;;  %v376_v63 = vld.sshfl [vmem:[#allocation1] sm:$0xff pattern:$0x75316420]  ;;  %v278_v0 = vmul.f32 0.2, %v214_v51  ;;  %v100_v1 = vunpack.c.l.bf16 %v68_v55  ;;  %v129_v2 = vperm.slane %v36_v48, 0 }
  0x1f   :  { %v304_v3 = vsel %vm240_vm12, %v1213_v17, %v272_v38  ;;  %380 = vst [vmem:[#allocation1] ss:$2 sm:$0xff] %v301_v45  ;;  %v279_v5 = vmul.f32 0.2, %v215_v52  ;;  %v130_v4 = vperm.slane %v37_v53, 0  ;;  %v131_v6 = vperm.slane %v38_v54, 0 }
  0x20   :  { %v377_v7 = vld.sshfl [vmem:[#allocation1 + $0x10] sm:$0xff pattern:$0x75316420]  ;;  %381 = vst [vmem:[#allocation1 + $0x1] ss:$2 sm:$0xff] %v302_v46  ;;  %v132_v8 = vperm.slane %v39_v57, 0  ;;  %v193_v11 = vadd.f32 %v129_v2, %v97_v58  ;;  %v309_v25 = vsel %vm245_vm13, %v213_v47, %v277_v59  ;;  %v310_v26 = vsel %vm246_vm14, %v214_v51, %v278_v0 }
  0x21   :  { %382 = vst [vmem:[#allocation1 + $0x10] ss:$2 sm:$0xff] %v303_v62  ;;  %v422_v12 = vpack.c.bf16 %v377_v7, %v376_v63  ;;  %v280_v14 = vmul.f32 0.2, %v216_v56  ;;  %v194_v10 = vadd.f32 %v130_v4, %v98_v60  ;;  %v195_v15 = vadd.f32 %v131_v6, %v99_v61  ;;  %v73_v17 = vld [vmem:[%s1445_s0 + $0x18] sm:$0x3] }
  0x22   :  { %383 = vst [vmem:[#allocation1 + $0x11] ss:$2 sm:$0xff] %v304_v3  ;;  %vm247_vm15 = vcmp.ge.f32.partialorder %v215_v52, 0.0  ;;  %v196_v16 = vadd.f32 %v132_v8, %v100_v1  ;;  %vm225_vm0 = vcmp.ge.f32.partialorder %v193_v11, 0.0  ;;  %v257_v19 = vmul.f32 0.2, %v193_v11 }
  0x23   :  { %1060 = vmatmul.msk.bf16.vlgmr.msra.gmra.mxu1 %vm460_vm4, %v422_v12  ;;  %vm226_vm1 = vcmp.ge.f32.partialorder %v194_v10, 0.0  ;;  %vm227_vm2 = vcmp.ge.f32.partialorder %v195_v15, 0.0  ;;  %v258_v21 = vmul.f32 0.2, %v194_v10  ;;  %v259_v22 = vmul.f32 0.2, %v195_v15 }
  0x24   :  { %vm248_vm3 = vcmp.ge.f32.partialorder %v216_v56, 0.0  ;;  %v289_v27 = vsel %vm225_vm0, %v193_v11, %v257_v19  ;;  %v260_v29 = vmul.f32 0.2, %v196_v16  ;;  %v43_v32 = vrot.slane %v1146_v9, 4  ;;  %v83_v55 = vld [vmem:[%s1445_s0 + $0x2c] sm:$0x3] }
  0x25   :  { %v290_v30 = vsel %vm226_vm1, %v194_v10, %v258_v21  ;;  %v291_v31 = vsel %vm227_vm2, %v195_v15, %v259_v22  ;;  %357 = vst [vmem:[#allocation1 + $0x20] ss:$2 sm:$0xff] %v289_v27  ;;  %vm228_vm5 = vcmp.ge.f32.partialorder %v196_v16, 0.0  ;;  %v44_v33 = vrot.slane %v1146_v9, 5  ;;  %v84_v57 = vld [vmem:[%s1445_s0 + $0x2e] sm:$0x3] }
  0x26   :  { %359 = vst [vmem:[#allocation1 + $0x21] ss:$2 sm:$0xff] %v290_v30  ;;  %v45_v34 = vrot.slane %v1146_v9, 6  ;;  %v46_v35 = vrot.slane %v1146_v9, 7  ;;  %v311_v36 = vsel %vm247_vm15, %v215_v52, %v279_v5  ;;  %v312_v37 = vsel %vm248_vm3, %v216_v56, %v280_v14  ;;  %v90_v19 = vld [vmem:[%s1445_s0 + $0x3a] sm:$0x3] }
  0x27   :  { %v388_v38 = vld.sshfl [vmem:[#allocation1] sm:$0xff pattern:$0x75316420]  ;;  %361 = vst [vmem:[#allocation1 + $0x30] ss:$2 sm:$0xff] %v291_v31  ;;  %v50_v39 = vrot.slane %v1158_v18, 4  ;;  %v105_v40 = vunpack.c.l.bf16 %v73_v17  ;;  %v106_v44 = vunpack.c.l.bf16 %v74_v23  ;;  %v107_v9 = vunpack.c.l.bf16 %v75_v24 }
  0x28   :  { %392 = vst [vmem:[#allocation1] ss:$2 sm:$0xff] %v309_v25  ;;  %v51_v41 = vrot.slane %v1158_v18, 5  ;;  %v52_v42 = vrot.slane %v1158_v18, 6  ;;  %v292_v46 = vsel %vm228_vm5, %v196_v16, %v260_v29  ;;  %v108_v47 = vunpack.c.l.bf16 %v76_v13  ;;  %v89_v16 = vld [vmem:[%s1445_s0 + $0x38] sm:$0x3] }
  0x29   :  { %v389_v45 = vld.sshfl [vmem:[#allocation1 + $0x10] sm:$0xff pattern:$0x75316420]  ;;  %393 = vst [vmem:[#allocation1 + $0x1] ss:$2 sm:$0xff] %v310_v26  ;;  %v113_v48 = vunpack.c.l.bf16 %v81_v28  ;;  %v137_v49 = vperm.slane %v43_v32, 0  ;;  %v114_v61 = vunpack.c.l.bf16 %v82_v43  ;;  %v115_v63 = vunpack.c.l.bf16 %v83_v55 }
  0x2a   :  { %394 = vst [vmem:[#allocation1 + $0x10] ss:$2 sm:$0xff] %v311_v36  ;;  %v424_v50 = vpack.c.bf16 %v389_v45, %v388_v38  ;;  %v138_v51 = vperm.slane %v44_v33, 0  ;;  %v139_v52 = vperm.slane %v45_v34, 0  ;;  %v140_v53 = vperm.slane %v46_v35, 0 }
  0x2b   :  { %395 = vst [vmem:[#allocation1 + $0x11] ss:$2 sm:$0xff] %v312_v37  ;;  %v53_v54 = vrot.slane %v1158_v18, 7  ;;  %v145_v56 = vperm.slane %v50_v39, 0  ;;  %v201_v58 = vadd.f32 %v137_v49, %v105_v40  ;;  %v146_v0 = vperm.slane %v51_v41, 0 }
  0x2c   :  { %1062 = vmatmul.msk.bf16.vlgmr.msra.gmra.mxu2 %vm460_vm4, %v424_v50  ;;  %363 = vst [vmem:[#allocation1 + $0x31] ss:$2 sm:$0xff] %v292_v46  ;;  %v202_v59 = vadd.f32 %v138_v51, %v106_v44  ;;  %v203_v60 = vadd.f32 %v139_v52, %v107_v9  ;;  %v204_v62 = vadd.f32 %v140_v53, %v108_v47  ;;  %v147_v18 = vperm.slane %v52_v42, 0  ;;  %v91_v25 = vld [vmem:[%s1445_s0 + $0x3c] sm:$0x3] }
  0x2d   :  { %v209_v1 = vadd.f32 %v145_v56, %v113_v48  ;;  %v366_v2 = vld.sshfl [vmem:[#allocation1 + $0x20] sm:$0xff pattern:$0x75316420]  ;;  %v116_v3 = vunpack.c.l.bf16 %v84_v57  ;;  %v148_v5 = vperm.slane %v53_v54, 0  ;;  %vm233_vm6 = vcmp.ge.f32.partialorder %v201_v58, 0.0 }
  0x2e   :  { %vm234_vm7 = vcmp.ge.f32.partialorder %v202_v59, 0.0  ;;  %vm235_vm8 = vcmp.ge.f32.partialorder %v203_v60, 0.0  ;;  %vm236_vm9 = vcmp.ge.f32.partialorder %v204_v62, 0.0  ;;  %v265_v4 = vmul.f32 0.2, %v201_v58 }
  0x2f   :  { %v266_v6 = vmul.f32 0.2, %v202_v59  ;;  %v267_v7 = vmul.f32 0.2, %v203_v60  ;;  %v268_v8 = vmul.f32 0.2, %v204_v62  ;;  %v210_v12 = vadd.f32 %v146_v0, %v114_v61 }
  0x30   :  { %v57_v11 = vrot.slane %v1216_v20, 4  ;;  %v211_v14 = vadd.f32 %v147_v18, %v115_v63  ;;  %v273_v10 = vmul.f32 0.2, %v209_v1  ;;  %v297_v15 = vsel %vm233_vm6, %v201_v58, %v265_v4  ;;  %v400_v13 = vld.sshfl [vmem:[#allocation1] sm:$0xff pattern:$0x75316420] }
  0x31   :  { %v298_v21 = vsel %vm234_vm7, %v202_v59, %v266_v6  ;;  %v299_v22 = vsel %vm235_vm8, %v203_v60, %v267_v7  ;;  %v300_v23 = vsel %vm236_vm9, %v204_v62, %v268_v8  ;;  %372 = vst [vmem:[#allocation1 + $0x20] ss:$2 sm:$0xff] %v297_v15  ;;  %v58_v24 = vrot.slane %v1216_v20, 5  ;;  %v92_v28 = vld [vmem:[%s1445_s0 + $0x3e] sm:$0x3] }
  0x32   :  { %v212_v27 = vadd.f32 %v148_v5, %v116_v3  ;;  %vm241_vm10 = vcmp.ge.f32.partialorder %v209_v1, 0.0  ;;  %373 = vst [vmem:[#allocation1 + $0x21] ss:$2 sm:$0xff] %v298_v21  ;;  %v401_v29 = vld.sshfl [vmem:[#allocation1 + $0x10] sm:$0xff pattern:$0x75316420]  ;;  %v121_v31 = vunpack.c.l.bf16 %v89_v16  ;;  %v122_v37 = vunpack.c.l.bf16 %v90_v19 }
  0x33   :  { %v367_v17 = vld.sshfl [vmem:[#allocation1 + $0x30] sm:$0xff pattern:$0x75316420]  ;;  %v59_v30 = vrot.slane %v1216_v20, 6  ;;  %v274_v32 = vmul.f32 0.2, %v210_v12  ;;  %v426_v33 = vpack.c.bf16 %v401_v29, %v400_v13  ;;  %v123_v40 = vunpack.c.l.bf16 %v91_v25 }
  0x34   :  { %v421_v26 = vpack.c.bf16 %v367_v17, %v366_v2  ;;  %374 = vst [vmem:[#allocation1 + $0x30] ss:$2 sm:$0xff] %v299_v22  ;;  %v60_v34 = vrot.slane %v1216_v20, 7  ;;  %v153_v35 = vperm.slane %v57_v11, 0  ;;  %vm242_vm11 = vcmp.ge.f32.partialorder %v210_v12, 0.0 }
  0x35   :  { %375 = vst [vmem:[#allocation1 + $0x31] ss:$2 sm:$0xff] %v300_v23  ;;  %v275_v36 = vmul.f32 0.2, %v211_v14  ;;  %v154_v38 = vperm.slane %v58_v24, 0  ;;  %vm243_vm12 = vcmp.ge.f32.partialorder %v211_v14, 0.0  ;;  %1064 = vmatmul.msk.bf16.vlgmr.msra.gmra.mxu3 %vm460_vm4, %v426_v33  ;;  %v305_v42 = vsel %vm241_vm10, %v209_v1, %v273_v10 }
  0x36   :  { %1059 = vmatmul.msk.bf16.gmra.mxu0 %vm460_vm4, %v421_v26  ;;  %v276_v39 = vmul.f32 0.2, %v212_v27  ;;  %v155_v41 = vperm.slane %v59_v30, 0  ;;  %vm244_vm13 = vcmp.ge.f32.partialorder %v212_v27, 0.0  ;;  %v124_v43 = vunpack.c.l.bf16 %v92_v28  ;;  %v1325_v2 = vld [vmem:[%s1447_s3] ss:$0 sm:$0xff] }
  0x37   :  { %v156_v44 = vperm.slane %v60_v34, 0  ;;  %v306_v9 = vsel %vm242_vm11, %v210_v12, %v274_v32  ;;  %v217_v45 = vadd.f32 %v153_v35, %v121_v31  ;;  %v307_v46 = vsel %vm243_vm12, %v211_v14, %v275_v36  ;;  %v1330_v3 = vld [vmem:[%s1448_s4] ss:$0 sm:$0xff] }
  0x38   :  { %v218_v47 = vadd.f32 %v154_v38, %v122_v37  ;;  %v308_v48 = vsel %vm244_vm13, %v212_v27, %v276_v39  ;;  %v219_v49 = vadd.f32 %v155_v41, %v123_v40  ;;  %vm670_vm3 = vcmask 1043456  }
  0x39   :  { %v378_v20 = vld.sshfl [vmem:[#allocation1 + $0x20] sm:$0xff pattern:$0x75316420]  ;;  %v220_v51 = vadd.f32 %v156_v44, %v124_v43  ;;  %v281_v53 = vmul.f32 0.2, %v217_v45  ;;  %vm249_vm14 = vcmp.ge.f32.partialorder %v217_v45, 0.0 }
  0x3a   :  { %384 = vst [vmem:[#allocation1 + $0x20] ss:$2 sm:$0xff] %v305_v42  ;;  %v282_v54 = vmul.f32 0.2, %v218_v47  ;;  %vm250_vm15 = vcmp.ge.f32.partialorder %v218_v47, 0.0  ;;  %vm251_vm0 = vcmp.ge.f32.partialorder %v219_v49, 0.0 }
  0x3b   :  { %385 = vst [vmem:[#allocation1 + $0x21] ss:$2 sm:$0xff] %v306_v9  ;;  %v283_v55 = vmul.f32 0.2, %v219_v49  ;;  %v284_v56 = vmul.f32 0.2, %v220_v51  ;;  %v313_v57 = vsel %vm249_vm14, %v217_v45, %v281_v53 }
  0x3c   :  { %v379_v50 = vld.sshfl [vmem:[#allocation1 + $0x30] sm:$0xff pattern:$0x75316420]  ;;  %vm252_vm1 = vcmp.ge.f32.partialorder %v220_v51, 0.0  ;;  %v314_v58 = vsel %vm250_vm15, %v218_v47, %v282_v54  ;;  %vm991_vm8 = vcmask 1041409   ;;  %vm993_vm10 = vcmask 1042434  }
  0x3d   :  { %386 = vst [vmem:[#allocation1 + $0x30] ss:$2 sm:$0xff] %v307_v46  ;;  %v423_v52 = vpack.c.bf16 %v379_v50, %v378_v20  ;;  %v315_v59 = vsel %vm251_vm0, %v219_v49, %v283_v55  ;;  %v316_v61 = vsel %vm252_vm1, %v220_v51, %v284_v56  ;;  %vm995_vm11 = vcmask 1043459  }
  0x3e   :  { %387 = vst [vmem:[#allocation1 + $0x31] ss:$2 sm:$0xff] %v308_v48  ;;  %vm997_vm14 = vcmask 1044484   ;;  %vm999_vm15 = vcmask 1045509   ;;  %vm1001_vm0 = vcmask 1046534  }
  0x3f   :  { %1061 = vmatmul.msk.bf16.gmra.mxu1 %vm460_vm4, %v423_v52 }
  0x42   :  { %v390_v60 = vld.sshfl [vmem:[#allocation1 + $0x20] sm:$0xff pattern:$0x75316420] }
  0x43   :  { %396 = vst [vmem:[#allocation1 + $0x20] ss:$2 sm:$0xff] %v313_v57 }
  0x44   :  { %397 = vst [vmem:[#allocation1 + $0x21] ss:$2 sm:$0xff] %v314_v58 }
  0x45   :  { %v391_v62 = vld.sshfl [vmem:[#allocation1 + $0x30] sm:$0xff pattern:$0x75316420] }
  0x46   :  { %398 = vst [vmem:[#allocation1 + $0x30] ss:$2 sm:$0xff] %v315_v59  ;;  %v425_v63 = vpack.c.bf16 %v391_v62, %v390_v60 }
  0x47   :  { %399 = vst [vmem:[#allocation1 + $0x31] ss:$2 sm:$0xff] %v316_v61 }
  0x48   :  { %1063 = vmatmul.msk.bf16.gmra.mxu2 %vm460_vm4, %v425_v63 }
  0x4b   :  { %v402_v0 = vld.sshfl [vmem:[#allocation1 + $0x20] sm:$0xff pattern:$0x75316420] }
  0x4e   :  { %v403_v18 = vld.sshfl [vmem:[#allocation1 + $0x30] sm:$0xff pattern:$0x75316420] }
  0x4f   :  { %v427_v1 = vpack.c.bf16 %v403_v18, %v402_v0 }
  0x51   :  { %1065 = vmatmul.msk.bf16.gmra.mxu3 %vm460_vm4, %v427_v1 }
  0x96   :  { %v494_v5 = vpop.f32.mrf.mxu0 }
  0x97   :  { %v538_v4 = vmul.f32 %v1325_v2, %v494_v5 }
  0x99   :  { %v558_v6 = vadd.f32 %v1330_v3, %v538_v4 }
  0x9b   :  { %vm574_vm2 = vcmp.ge.f32.partialorder %v558_v6, 0.0  ;;  %v590_v7 = vmul.f32 0.2, %v558_v6 }
  0x9d   :  { %v606_v8 = vsel %vm574_vm2, %v558_v6, %v590_v7 }
  0x9e   :  { %v638_v11 = vrot.slane %v606_v8, 4  ;;  %v671_v12 = vsel %vm670_vm3, %v606_v8, -inf  ;;  %v496_v14 = vpop.f32.mrf.mxu0 }
  0x9f   :  { %v672_v10 = vrot.slane %v671_v12, 4  ;;  %v539_v15 = vmul.f32 %v1325_v2, %v496_v14 }
  0xa0   :  { %v678_v16 = vsel %vm670_vm3, %v638_v11, -inf  ;;  %v504_v21 = vpop.f32.mrf.mxu1 }
  0xa1   :  { %v673_v19 = vmax.f32 %v671_v12, %v672_v10  ;;  %v679_v17 = vrot.slane %v678_v16, 4  ;;  %v559_v22 = vadd.f32 %v1330_v3, %v539_v15  ;;  %v542_v23 = vmul.f32 %v1325_v2, %v504_v21 }
  0xa3   :  { %vm575_vm4 = vcmp.ge.f32.partialorder %v559_v22, 0.0  ;;  %v591_v24 = vmul.f32 0.2, %v559_v22  ;;  %v680_v25 = vmax.f32 %v678_v16, %v679_v17  ;;  %v562_v26 = vadd.f32 %v1330_v3, %v542_v23 }
  0xa4   :  { %v674_v27 = vrot.slane %v673_v19, 2 }
  0xa5   :  { %v607_v13 = vsel %vm575_vm4, %v559_v22, %v591_v24  ;;  %vm578_vm5 = vcmp.ge.f32.partialorder %v562_v26, 0.0  ;;  %v594_v28 = vmul.f32 0.2, %v562_v26  ;;  %v681_v32 = vrot.slane %v680_v25, 2 }
  0xa6   :  { %v639_v29 = vrot.slane %v607_v13, 4  ;;  %v685_v30 = vsel %vm670_vm3, %v607_v13, -inf  ;;  %v675_v35 = vmax.f32 %v673_v19, %v674_v27  ;;  %vm1003_vm4 = vcmask 1047559  }
  0xa7   :  { %v686_v31 = vrot.slane %v685_v30, 4  ;;  %v610_v33 = vsel %vm578_vm5, %v562_v26, %v594_v28  ;;  %v682_v44 = vmax.f32 %v680_v25, %v681_v32 }
  0xa8   :  { %v692_v34 = vsel %vm670_vm3, %v639_v29, -inf  ;;  %v642_v36 = vrot.slane %v610_v33, 4  ;;  %v727_v37 = vsel %vm670_vm3, %v610_v33, -inf  ;;  %v506_v38 = vpop.f32.mrf.mxu1  ;;  %v676_v47 = vrot.slane %v675_v35, 1 }
  0xa9   :  { %v728_v39 = vrot.slane %v727_v37, 4  ;;  %v687_v40 = vmax.f32 %v685_v30, %v686_v31  ;;  %v693_v41 = vrot.slane %v692_v34, 4  ;;  %v543_v42 = vmul.f32 %v1325_v2, %v506_v38 }
  0xaa   :  { %v734_v43 = vsel %vm670_vm3, %v642_v36, -inf  ;;  %v683_v51 = vrot.slane %v682_v44, 1  ;;  %v677_v57 = vmax.f32 %v675_v35, %v676_v47 }
  0xab   :  { %v735_v9 = vrot.slane %v734_v43, 4  ;;  %v688_v45 = vrot.slane %v687_v40, 2  ;;  %v694_v46 = vmax.f32 %v692_v34, %v693_v41  ;;  %v563_v20 = vadd.f32 %v1330_v3, %v543_v42 }
  0xac   :  { %v729_v48 = vmax.f32 %v727_v37, %v728_v39  ;;  %v684_v63 = vmax.f32 %v682_v44, %v683_v51  ;;  %v895_v7 = vpack.c.bf16 %v677_v57, %v677_v57 }
  0xad   :  { %v736_v49 = vmax.f32 %v734_v43, %v735_v9  ;;  %vm579_vm6 = vcmp.ge.f32.partialorder %v563_v20, 0.0  ;;  %v595_v50 = vmul.f32 0.2, %v563_v20  ;;  %v689_v52 = vmax.f32 %v687_v40, %v688_v45 }
  0xae   :  { %v695_v53 = vrot.slane %v694_v46, 2  ;;  %v730_v58 = vrot.slane %v729_v48, 2  ;;  %v896_v16 = vpack.c.bf16 %v684_v63, %v684_v63  ;;  %v959_v27 = vunpack.c.l.b16 %v895_v7 }
  0xaf   :  { %v514_v54 = vpop.f32.mrf.mxu2  ;;  %v611_v55 = vsel %vm579_vm6, %v563_v20, %v595_v50  ;;  %v737_v59 = vrot.slane %v736_v49, 2  ;;  %v690_v0 = vrot.slane %v689_v52, 1 }
  0xb0   :  { %v546_v56 = vmul.f32 %v1325_v2, %v514_v54  ;;  %v643_v60 = vrot.slane %v611_v55, 4  ;;  %v741_v61 = vsel %vm670_vm3, %v611_v55, -inf  ;;  %v696_v18 = vmax.f32 %v694_v46, %v695_v53 }
  0xb1   :  { %v742_v5 = vrot.slane %v741_v61, 4  ;;  %v731_v8 = vmax.f32 %v729_v48, %v730_v58  ;;  %v738_v11 = vmax.f32 %v736_v49, %v737_v59  ;;  %v691_v19 = vmax.f32 %v689_v52, %v690_v0 }
  0xb2   :  { %v566_v62 = vadd.f32 %v1330_v3, %v546_v56  ;;  %v748_v4 = vsel %vm670_vm3, %v643_v60, -inf  ;;  %v697_v17 = vrot.slane %v696_v18, 1  ;;  %v960_v35 = vunpack.c.l.b16 %v896_v16 }
  0xb3   :  { %v499_v1 = vpop.f32.mrf.mxu0  ;;  %v743_v12 = vmax.f32 %v741_v61, %v742_v5  ;;  %v749_v14 = vrot.slane %v748_v4, 4  ;;  %v732_v24 = vrot.slane %v731_v8, 1  ;;  %v739_v25 = vrot.slane %v738_v11, 1 }
  0xb4   :  { %v540_v6 = vmul.f32 %v1325_v2, %v499_v1  ;;  %vm582_vm7 = vcmp.ge.f32.partialorder %v566_v62, 0.0  ;;  %v598_v15 = vmul.f32 0.2, %v566_v62  ;;  %v698_v30 = vmax.f32 %v696_v18, %v697_v17 }
  0xb5   :  { %v744_v21 = vrot.slane %v743_v12, 2  ;;  %v750_v22 = vmax.f32 %v748_v4, %v749_v14  ;;  %v897_v36 = vpack.c.bf16 %v691_v19, %v691_v19  ;;  %v733_v39 = vmax.f32 %v731_v8, %v732_v24 }
  0xb6   :  { %v560_v10 = vadd.f32 %v1330_v3, %v540_v6  ;;  %v614_v26 = vsel %vm582_vm7, %v566_v62, %v598_v15  ;;  %v740_v40 = vmax.f32 %v738_v11, %v739_v25  ;;  %v898_v20 = vpack.c.bf16 %v698_v30, %v698_v30 }
  0xb7   :  { %v751_v13 = vrot.slane %v750_v22, 2  ;;  %v646_v29 = vrot.slane %v614_v26, 4  ;;  %v745_v31 = vmax.f32 %v743_v12, %v744_v21  ;;  %v783_v38 = vsel %vm670_vm3, %v614_v26, -inf  ;;  %v516_v21 = vpop.f32.mrf.mxu2 }
  0xb8   :  { %vm576_vm9 = vcmp.ge.f32.partialorder %v560_v10, 0.0  ;;  %v592_v23 = vmul.f32 0.2, %v560_v10  ;;  %v784_v48 = vrot.slane %v783_v38, 4  ;;  %v961_v50 = vunpack.c.l.b16 %v897_v36 }
  0xb9   :  { %v752_v44 = vmax.f32 %v750_v22, %v751_v13  ;;  %v790_v46 = vsel %vm670_vm3, %v646_v29, -inf  ;;  %v746_v47 = vrot.slane %v745_v31, 1  ;;  %v992_v54 = vsel %vm991_vm8, %v960_v35, %v959_v27 }
  0xba   :  { %v608_v28 = vsel %vm576_vm9, %v560_v10, %v592_v23  ;;  %v903_v55 = vpack.c.bf16 %v733_v39, %v733_v39  ;;  %v791_v56 = vrot.slane %v790_v46, 4  ;;  %v904_v58 = vpack.c.bf16 %v740_v40, %v740_v40 }
  0xbb   :  { %v640_v32 = vrot.slane %v608_v28, 4  ;;  %v699_v33 = vsel %vm670_vm3, %v608_v28, -inf  ;;  %v501_v34 = vpop.f32.mrf.mxu0  ;;  %v753_v59 = vrot.slane %v752_v44, 1  ;;  %v747_v62 = vmax.f32 %v745_v31, %v746_v47 }
  0xbc   :  { %v700_v37 = vrot.slane %v699_v33, 4  ;;  %v509_v42 = vpop.f32.mrf.mxu1  ;;  %v541_v43 = vmul.f32 %v1325_v2, %v501_v34  ;;  %v785_v63 = vmax.f32 %v783_v38, %v784_v48  ;;  %v962_v18 = vunpack.c.l.b16 %v898_v20 }
  0xbd   :  { %v706_v41 = vsel %vm670_vm3, %v640_v32, -inf  ;;  %v544_v49 = vmul.f32 %v1325_v2, %v509_v42  ;;  %v994_v1 = vsel %vm993_vm10, %v961_v50, %v992_v54  ;;  %v792_v6 = vmax.f32 %v790_v46, %v791_v56 }
  0xbe   :  { %v701_v9 = vmax.f32 %v699_v33, %v700_v37  ;;  %v707_v45 = vrot.slane %v706_v41, 4  ;;  %v561_v53 = vadd.f32 %v1330_v3, %v541_v43  ;;  %v967_v11 = vunpack.c.l.b16 %v903_v55 }
  0xbf   :  { %v564_v57 = vadd.f32 %v1330_v3, %v544_v49  ;;  %v968_v12 = vunpack.c.l.b16 %v904_v58  ;;  %v754_v14 = vmax.f32 %v752_v44, %v753_v59  ;;  %v905_v15 = vpack.c.bf16 %v747_v62, %v747_v62 }
  0xc0   :  { %v702_v51 = vrot.slane %v701_v9, 2  ;;  %v708_v52 = vmax.f32 %v706_v41, %v707_v45  ;;  %vm577_vm13 = vcmp.ge.f32.partialorder %v561_v53, 0.0  ;;  %v593_v8 = vmul.f32 0.2, %v561_v53 }
  0xc1   :  { %vm580_vm12 = vcmp.ge.f32.partialorder %v564_v57, 0.0  ;;  %v596_v0 = vmul.f32 0.2, %v564_v57  ;;  %v786_v16 = vrot.slane %v785_v63, 2  ;;  %v996_v22 = vsel %vm995_vm11, %v962_v18, %v994_v1 }
  0xc2   :  { %v703_v60 = vmax.f32 %v701_v9, %v702_v51  ;;  %v709_v61 = vrot.slane %v708_v52, 2  ;;  %v609_v17 = vsel %vm577_vm13, %v561_v53, %v593_v8  ;;  %v793_v27 = vrot.slane %v792_v6, 2  ;;  %v524_v9 = vpop.f32.mrf.mxu3 }
  0xc3   :  { %v612_v7 = vsel %vm580_vm12, %v564_v57, %v596_v0  ;;  %v641_v28 = vrot.slane %v609_v17, 4  ;;  %v906_v29 = vpack.c.bf16 %v754_v14, %v754_v14  ;;  %v713_v31 = vsel %vm670_vm3, %v609_v17, -inf }
  0xc4   :  { %v710_v5 = vmax.f32 %v708_v52, %v709_v61  ;;  %v704_v4 = vrot.slane %v703_v60, 1  ;;  %v644_v10 = vrot.slane %v612_v7, 4  ;;  %v755_v19 = vsel %vm670_vm3, %v612_v7, -inf  ;;  %v511_v55 = vpop.f32.mrf.mxu1 }
  0xc5   :  { %v756_v24 = vrot.slane %v755_v19, 4  ;;  %v547_v32 = vmul.f32 %v1325_v2, %v516_v21  ;;  %v969_v33 = vunpack.c.l.b16 %v905_v15  ;;  %v787_v34 = vmax.f32 %v785_v63, %v786_v16 }
  0xc6   :  { %v711_v23 = vrot.slane %v710_v5, 1  ;;  %v762_v25 = vsel %vm670_vm3, %v644_v10, -inf  ;;  %v705_v26 = vmax.f32 %v703_v60, %v704_v4  ;;  %v714_v36 = vrot.slane %v713_v31, 4 }
  0xc7   :  { %v763_v13 = vrot.slane %v762_v25, 4  ;;  %v757_v30 = vmax.f32 %v755_v19, %v756_v24  ;;  %v1005_v37 = vsel %vm991_vm8, %v968_v12, %v967_v11  ;;  %v720_v40 = vsel %vm670_vm3, %v641_v28, -inf }
  0xc8   :  { %v712_v38 = vmax.f32 %v710_v5, %v711_v23  ;;  %v899_v41 = vpack.c.bf16 %v705_v26, %v705_v26  ;;  %v794_v42 = vmax.f32 %v792_v6, %v793_v27  ;;  %v715_v43 = vmax.f32 %v713_v31, %v714_v36 }
  0xc9   :  { %v764_v35 = vmax.f32 %v762_v25, %v763_v13  ;;  %v758_v39 = vrot.slane %v757_v30, 2  ;;  %v721_v44 = vrot.slane %v720_v40, 4  ;;  %v970_v45 = vunpack.c.l.b16 %v906_v29 }
  0xca   :  { %v567_v47 = vadd.f32 %v1330_v3, %v547_v32  ;;  %v1006_v48 = vsel %vm993_vm10, %v969_v33, %v1005_v37  ;;  %v788_v49 = vrot.slane %v787_v34, 1  ;;  %v716_v50 = vrot.slane %v715_v43, 2 }
  0xcb   :  { %v759_v46 = vmax.f32 %v757_v30, %v758_v39  ;;  %v765_v20 = vrot.slane %v764_v35, 2  ;;  %v722_v51 = vmax.f32 %v720_v40, %v721_v44  ;;  %v900_v52 = vpack.c.bf16 %v712_v38, %v712_v38  ;;  %v519_v10 = vpop.f32.mrf.mxu2 }
  0xcc   :  { %vm583_vm1 = vcmp.ge.f32.partialorder %v567_v47, 0.0  ;;  %v599_v53 = vmul.f32 0.2, %v567_v47  ;;  %v550_v54 = vmul.f32 %v1325_v2, %v524_v9  ;;  %v963_v56 = vunpack.c.l.b16 %v899_v41 }
  0xcd   :  { %v795_v57 = vrot.slane %v794_v42, 1  ;;  %v717_v58 = vmax.f32 %v715_v43, %v716_v50  ;;  %v723_v59 = vrot.slane %v722_v51, 2  ;;  %v760_v60 = vrot.slane %v759_v46, 1 }
  0xce   :  { %v766_v61 = vmax.f32 %v764_v35, %v765_v20  ;;  %v615_v62 = vsel %vm583_vm1, %v567_v47, %v599_v53  ;;  %v570_v63 = vadd.f32 %v1330_v3, %v550_v54  ;;  %v545_v5 = vmul.f32 %v1325_v2, %v511_v55 }
  0xcf   :  { %v718_v0 = vrot.slane %v717_v58, 1  ;;  %v724_v18 = vmax.f32 %v722_v51, %v723_v59  ;;  %v647_v1 = vrot.slane %v615_v62, 4  ;;  %v964_v4 = vunpack.c.l.b16 %v900_v52 }
  0xd0   :  { %v797_v6 = vsel %vm670_vm3, %v615_v62, -inf  ;;  %vm586_vm2 = vcmp.ge.f32.partialorder %v570_v63, 0.0  ;;  %v602_v7 = vmul.f32 0.2, %v570_v63  ;;  %v998_v8 = vsel %vm997_vm14, %v963_v56, %v996_v22 }
  0xd1   :  { %v719_v11 = vmax.f32 %v717_v58, %v718_v0  ;;  %v725_v12 = vrot.slane %v724_v18, 1  ;;  %v798_v14 = vrot.slane %v797_v6, 4  ;;  %v761_v15 = vmax.f32 %v759_v46, %v760_v60 }
  0xd2   :  { %v767_v16 = vrot.slane %v766_v61, 1  ;;  %v804_v19 = vsel %vm670_vm3, %v647_v1, -inf  ;;  %v618_v17 = vsel %vm586_vm2, %v570_v63, %v602_v7  ;;  %v565_v25 = vadd.f32 %v1330_v3, %v545_v5 }
  0xd3   :  { %v726_v21 = vmax.f32 %v724_v18, %v725_v12  ;;  %v901_v23 = vpack.c.bf16 %v719_v11, %v719_v11  ;;  %v799_v24 = vmax.f32 %v797_v6, %v798_v14  ;;  %v1000_v26 = vsel %vm999_vm15, %v964_v4, %v998_v8 }
  0xd4   :  { %v789_v27 = vmax.f32 %v787_v34, %v788_v49  ;;  %v796_v13 = vmax.f32 %v794_v42, %v795_v57  ;;  %v548_v22 = vmul.f32 %v1325_v2, %v519_v10  ;;  %v805_v30 = vrot.slane %v804_v19, 4 }
  0xd5   :  { %v902_v28 = vpack.c.bf16 %v726_v21, %v726_v21  ;;  %v965_v29 = vunpack.c.l.b16 %v901_v23  ;;  %v650_v31 = vrot.slane %v618_v17, 4  ;;  %v1007_v32 = vsel %vm995_vm11, %v970_v45, %v1006_v48  ;;  %v526_v45 = vpop.f32.mrf.mxu3 }
  0xd6   :  { %v768_v33 = vmax.f32 %v766_v61, %v767_v16  ;;  %v907_v35 = vpack.c.bf16 %v761_v15, %v761_v15  ;;  %v800_v38 = vrot.slane %v799_v24, 2  ;;  %vm581_vm5 = vcmp.ge.f32.partialorder %v565_v25, 0.0 }
  0xd7   :  { %v966_v36 = vunpack.c.l.b16 %v902_v28  ;;  %v1002_v37 = vsel %vm1001_vm0, %v965_v29, %v1000_v26  ;;  %v911_v39 = vpack.c.bf16 %v789_v27, %v789_v27  ;;  %v839_v34 = vsel %vm670_vm3, %v618_v17, -inf }
  0xd8   :  { %v597_v40 = vmul.f32 0.2, %v565_v25  ;;  %v568_v41 = vadd.f32 %v1330_v3, %v548_v22  ;;  %v912_v42 = vpack.c.bf16 %v796_v13, %v796_v13  ;;  %v806_v44 = vmax.f32 %v804_v19, %v805_v30 }
  0xd9   :  { %v1004_v43 = vsel %vm1003_vm4, %v966_v36, %v1002_v37  ;;  %v846_v9 = vsel %vm670_vm3, %v650_v31, -inf  ;;  %v908_v46 = vpack.c.bf16 %v768_v33, %v768_v33  ;;  %v971_v20 = vunpack.c.l.b16 %v907_v35 }
  0xda   :  { %v1026_v47 = vpack.c.b16 %v1004_v43, %v1004_v43  ;;  %v613_v48 = vsel %vm581_vm5, %v565_v25, %v597_v40  ;;  %v801_v49 = vmax.f32 %v799_v24, %v800_v38  ;;  %v840_v50 = vrot.slane %v839_v34, 4  ;;  %v521_v25 = vpop.f32.mrf.mxu2 }
  0xdb   :  { %v645_v51 = vrot.slane %v613_v48, 4  ;;  %v769_v52 = vsel %vm670_vm3, %v613_v48, -inf  ;;  %v847_v53 = vrot.slane %v846_v9, 4  ;;  %vm584_vm6 = vcmp.ge.f32.partialorder %v568_v41, 0.0 }
  0xdc   :  { %1034 = vst [vmem:[%s1449_s5] sm:$0xf] %v1026_v47  ;;  %v770_v54 = vrot.slane %v769_v52, 4  ;;  %v551_v55 = vmul.f32 %v1325_v2, %v526_v45  ;;  %v975_v56 = vunpack.c.l.b16 %v911_v39  ;;  %v807_v57 = vrot.slane %v806_v44, 2 }
  0xdd   :  { %v776_v58 = vsel %vm670_vm3, %v645_v51, -inf  ;;  %v600_v59 = vmul.f32 0.2, %v568_v41  ;;  %v976_v60 = vunpack.c.l.b16 %v912_v42  ;;  %v972_v61 = vunpack.c.l.b16 %v908_v46  ;;  %v529_v26 = vpop.f32.mrf.mxu3 }
  0xde   :  { %v771_v62 = vmax.f32 %v769_v52, %v770_v54  ;;  %v777_v63 = vrot.slane %v776_v58, 4  ;;  %v1008_v0 = vsel %vm997_vm14, %v971_v20, %v1007_v32  ;;  %v802_v18 = vrot.slane %v801_v49, 1 }
  0xdf   :  { %v841_v1 = vmax.f32 %v839_v34, %v840_v50  ;;  %v616_v5 = vsel %vm584_vm6, %v568_v41, %v600_v59  ;;  %v848_v4 = vmax.f32 %v846_v9, %v847_v53  ;;  %v571_v8 = vadd.f32 %v1330_v3, %v551_v55 }
  0xe0   :  { %v772_v6 = vrot.slane %v771_v62, 2  ;;  %v778_v7 = vmax.f32 %v776_v58, %v777_v63  ;;  %v808_v11 = vmax.f32 %v806_v44, %v807_v57  ;;  %v648_v12 = vrot.slane %v616_v5, 4 }
  0xe1   :  { %v811_v14 = vsel %vm670_vm3, %v616_v5, -inf  ;;  %v1397_v10 = vsel %vm991_vm8, %v976_v60, %v975_v56  ;;  %v1009_v15 = vsel %vm999_vm15, %v972_v61, %v1008_v0  ;;  %v803_v17 = vmax.f32 %v801_v49, %v802_v18 }
  0xe2   :  { %v773_v16 = vmax.f32 %v771_v62, %v772_v6  ;;  %v779_v19 = vrot.slane %v778_v7, 2  ;;  %v842_v21 = vrot.slane %v841_v1, 2  ;;  %v812_v23 = vrot.slane %v811_v14, 4 }
  0xe3   :  { %v818_v24 = vsel %vm670_vm3, %v648_v12, -inf  ;;  %v849_v27 = vrot.slane %v848_v4, 2  ;;  %vm587_vm7 = vcmp.ge.f32.partialorder %v571_v8, 0.0  ;;  %v809_v28 = vrot.slane %v808_v11, 1 }
  0xe4   :  { %v774_v13 = vrot.slane %v773_v16, 1  ;;  %v780_v22 = vmax.f32 %v778_v7, %v779_v19  ;;  %v813_v29 = vmax.f32 %v811_v14, %v812_v23  ;;  %v819_v30 = vrot.slane %v818_v24, 4 }
  0xe5   :  { %v603_v31 = vmul.f32 0.2, %v571_v8  ;;  %v549_v35 = vmul.f32 %v1325_v2, %v521_v25  ;;  %v552_v36 = vmul.f32 %v1325_v2, %v529_v26  ;;  %v843_v37 = vmax.f32 %v841_v1, %v842_v21 }
  0xe6   :  { %v775_v32 = vmax.f32 %v773_v16, %v774_v13  ;;  %v781_v33 = vrot.slane %v780_v22, 1  ;;  %v814_v38 = vrot.slane %v813_v29, 2  ;;  %v820_v39 = vmax.f32 %v818_v24, %v819_v30 }
  0xe7   :  { %v619_v34 = vsel %vm587_vm7, %v571_v8, %v603_v31  ;;  %v569_v46 = vadd.f32 %v1330_v3, %v549_v35  ;;  %v572_v49 = vadd.f32 %v1330_v3, %v552_v36  ;;  %v913_v50 = vpack.c.bf16 %v803_v17, %v803_v17 }
  0xe8   :  { %v782_v40 = vmax.f32 %v780_v22, %v781_v33  ;;  %v909_v41 = vpack.c.bf16 %v775_v32, %v775_v32  ;;  %v651_v42 = vrot.slane %v619_v34, 4  ;;  %v853_v43 = vsel %vm670_vm3, %v619_v34, -inf }
  0xe9   :  { %v815_v44 = vmax.f32 %v813_v29, %v814_v38  ;;  %v821_v9 = vrot.slane %v820_v39, 2  ;;  %v854_v45 = vrot.slane %v853_v43, 4  ;;  %vm585_vm9 = vcmp.ge.f32.partialorder %v569_v46, 0.0 }
  0xea   :  { %v910_v20 = vpack.c.bf16 %v782_v40, %v782_v40  ;;  %v973_v47 = vunpack.c.l.b16 %v909_v41  ;;  %v860_v48 = vsel %vm670_vm3, %v651_v42, -inf  ;;  %v601_v56 = vmul.f32 0.2, %v569_v46 }
  0xeb   :  { %v822_v51 = vmax.f32 %v820_v39, %v821_v9  ;;  %v855_v52 = vmax.f32 %v853_v43, %v854_v45  ;;  %v861_v53 = vrot.slane %v860_v48, 4  ;;  %v810_v57 = vmax.f32 %v808_v11, %v809_v28 }
  0xec   :  { %v974_v54 = vunpack.c.l.b16 %v910_v20  ;;  %v1010_v55 = vsel %vm1001_vm0, %v973_v47, %v1009_v15  ;;  %v850_v58 = vmax.f32 %v848_v4, %v849_v27  ;;  %v816_v59 = vrot.slane %v815_v44, 1  ;;  %v531_v27 = vpop.f32.mrf.mxu3 }
  0xed   :  { %v862_v60 = vmax.f32 %v860_v48, %v861_v53  ;;  %v617_v62 = vsel %vm585_vm9, %v569_v46, %v601_v56  ;;  %vm588_vm12 = vcmp.ge.f32.partialorder %v572_v49, 0.0  ;;  %v604_v63 = vmul.f32 0.2, %v572_v49 }
  0xee   :  { %v1011_v61 = vsel %vm1003_vm4, %v974_v54, %v1010_v55  ;;  %v977_v0 = vunpack.c.l.b16 %v913_v50  ;;  %v844_v18 = vrot.slane %v843_v37, 1  ;;  %v856_v5 = vrot.slane %v855_v52, 2 }
  0xef   :  { %v1027_v1 = vpack.c.b16 %v1011_v61, %v1011_v61  ;;  %v823_v6 = vrot.slane %v822_v51, 1  ;;  %v649_v7 = vrot.slane %v617_v62, 4  ;;  %v825_v8 = vsel %vm670_vm3, %v617_v62, -inf }
  0xf0   :  { %v620_v12 = vsel %vm588_vm12, %v572_v49, %v604_v63  ;;  %v851_v14 = vrot.slane %v850_v58, 1  ;;  %v817_v4 = vmax.f32 %v815_v44, %v816_v59  ;;  %v863_v11 = vrot.slane %v862_v60, 2 }
  0xf1   :  { %1035 = vst [vmem:[%s1449_s5 + $0x4] sm:$0xf] %v1027_v1  ;;  %v826_v15 = vrot.slane %v825_v8, 4  ;;  %v914_v16 = vpack.c.bf16 %v810_v57, %v810_v57  ;;  %v832_v19 = vsel %vm670_vm3, %v649_v7, -inf  ;;  %v652_v17 = vrot.slane %v620_v12, 4 }
  0xf2   :  { %v867_v21 = vsel %vm670_vm3, %v620_v12, -inf  ;;  %v1013_v23 = vsel %vm993_vm10, %v977_v0, %v1397_v10  ;;  %v1417_v24 = vmax.f32 %v843_v37, %v844_v18  ;;  %v857_v25 = vmax.f32 %v855_v52, %v856_v5 }
  0xf3   :  { %v827_v26 = vmax.f32 %v825_v8, %v826_v15  ;;  %v824_v13 = vmax.f32 %v822_v51, %v823_v6  ;;  %v833_v22 = vrot.slane %v832_v19, 4  ;;  %v868_v28 = vrot.slane %v867_v21, 4 }
  0xf4   :  { %v874_v29 = vsel %vm670_vm3, %v652_v17, -inf  ;;  %v915_v30 = vpack.c.bf16 %v817_v4, %v817_v4  ;;  %v864_v31 = vmax.f32 %v862_v60, %v863_v11  ;;  %v852_v35 = vmax.f32 %v850_v58, %v851_v14 }
  0xf5   :  { %v828_v32 = vrot.slane %v827_v26, 2  ;;  %v875_v33 = vrot.slane %v874_v29, 4  ;;  %v834_v36 = vmax.f32 %v832_v19, %v833_v22  ;;  %v869_v38 = vmax.f32 %v867_v21, %v868_v28 }
  0xf6   :  { %v553_v39 = vmul.f32 %v1325_v2, %v531_v27  ;;  %v978_v10 = vunpack.c.l.b16 %v914_v16  ;;  %v858_v37 = vrot.slane %v857_v25, 1  ;;  %v916_v41 = vpack.c.bf16 %v824_v13, %v824_v13 }
  0xf7   :  { %v829_v34 = vmax.f32 %v827_v26, %v828_v32  ;;  %v876_v40 = vmax.f32 %v874_v29, %v875_v33  ;;  %v835_v42 = vrot.slane %v834_v36, 2  ;;  %v870_v43 = vrot.slane %v869_v38, 2 }
  0xf8   :  { %v573_v44 = vadd.f32 %v1330_v3, %v553_v39  ;;  %v979_v9 = vunpack.c.l.b16 %v915_v30  ;;  %v865_v45 = vrot.slane %v864_v31, 1  ;;  %v920_v47 = vpack.c.bf16 %v852_v35, %v852_v35 }
  0xf9   :  { %v830_v46 = vrot.slane %v829_v34, 1  ;;  %v877_v20 = vrot.slane %v876_v40, 2  ;;  %v836_v48 = vmax.f32 %v834_v36, %v835_v42  ;;  %v871_v49 = vmax.f32 %v869_v38, %v870_v43 }
  0xfa   :  { %vm589_vm13 = vcmp.ge.f32.partialorder %v573_v44, 0.0  ;;  %v859_v50 = vmax.f32 %v857_v25, %v858_v37  ;;  %v605_v52 = vmul.f32 0.2, %v573_v44  ;;  %v1014_v53 = vsel %vm995_vm11, %v978_v10, %v1013_v23 }
  0xfb   :  { %v831_v51 = vmax.f32 %v829_v34, %v830_v46  ;;  %v878_v2 = vmax.f32 %v876_v40, %v877_v20  ;;  %v980_v54 = vunpack.c.l.b16 %v916_v41  ;;  %v837_v55 = vrot.slane %v836_v48, 1 }
  0xfc   :  { %v872_v56 = vrot.slane %v871_v49, 1  ;;  %v1015_v57 = vsel %vm997_vm14, %v979_v9, %v1014_v53  ;;  %v866_v3 = vmax.f32 %v864_v31, %v865_v45  ;;  %v621_v59 = vsel %vm589_vm13, %v573_v44, %v605_v52 }
  0xfd   :  { %v917_v58 = vpack.c.bf16 %v831_v51, %v831_v51  ;;  %v838_v60 = vmax.f32 %v836_v48, %v837_v55  ;;  %v879_v61 = vrot.slane %v878_v2, 1  ;;  %v653_v62 = vrot.slane %v621_v59, 4 }
  0xfe   :  { %v881_v63 = vsel %vm670_vm3, %v621_v59, -inf  ;;  %v921_v0 = vpack.c.bf16 %v859_v50, %v859_v50  ;;  %v873_v1 = vmax.f32 %v871_v49, %v872_v56  ;;  %v919_v6 = vpack.c.bf16 %v1417_v24, %v1417_v24 }
  0xff   :  { %v981_v18 = vunpack.c.l.b16 %v917_v58  ;;  %v882_v5 = vrot.slane %v881_v63, 4  ;;  %v1016_v7 = vsel %vm999_vm15, %v980_v54, %v1015_v57  ;;  %v918_v8 = vpack.c.bf16 %v838_v60, %v838_v60 }
 0x100   :  { %v888_v12 = vsel %vm670_vm3, %v653_v62, -inf  ;;  %v984_v15 = vunpack.c.l.b16 %v920_v47  ;;  %v922_v16 = vpack.c.bf16 %v866_v3, %v866_v3  ;;  %v880_v17 = vmax.f32 %v878_v2, %v879_v61 }
 0x101   :  { %v1017_v14 = vsel %vm1001_vm0, %v981_v18, %v1016_v7  ;;  %v883_v4 = vmax.f32 %v881_v63, %v882_v5  ;;  %v889_v11 = vrot.slane %v888_v12, 4  ;;  %v982_v19 = vunpack.c.l.b16 %v918_v8 }
 0x102   :  { %v985_v21 = vunpack.c.l.b16 %v921_v0  ;;  %v923_v23 = vpack.c.bf16 %v873_v1, %v873_v1  ;;  %v983_v27 = vunpack.c.l.b16 %v919_v6  ;;  %v986_v30 = vunpack.c.l.b16 %v922_v16 }
 0x103   :  { %v884_v25 = vrot.slane %v883_v4, 2  ;;  %v890_v26 = vmax.f32 %v888_v12, %v889_v11  ;;  %v1018_v24 = vsel %vm1003_vm4, %v982_v19, %v1017_v14  ;;  %v924_v31 = vpack.c.bf16 %v880_v17, %v880_v17 }
 0x104   :  { %v1028_v13 = vpack.c.b16 %v1018_v24, %v1018_v24  ;;  %v1019_v29 = vsel %vm991_vm8, %v984_v15, %v983_v27  ;;  %v987_v33 = vunpack.c.l.b16 %v923_v23 }
 0x105   :  { %v885_v22 = vmax.f32 %v883_v4, %v884_v25  ;;  %v891_v28 = vrot.slane %v890_v26, 2  ;;  %v1020_v32 = vsel %vm993_vm10, %v985_v21, %v1019_v29  ;;  %v988_v37 = vunpack.c.l.b16 %v924_v31 }
 0x106   :  { %1036 = vst [vmem:[%s1449_s5 + $0x8] sm:$0xf] %v1028_v13  ;;  %v1021_v10 = vsel %vm995_vm11, %v986_v30, %v1020_v32 }
 0x107   :  { %v886_v35 = vrot.slane %v885_v22, 1  ;;  %v892_v36 = vmax.f32 %v890_v26, %v891_v28  ;;  %v1022_v34 = vsel %vm997_vm14, %v987_v33, %v1021_v10 }
 0x108   :  { %v1023_v44 = vsel %vm999_vm15, %v988_v37, %v1022_v34 }
 0x109   :  { %v887_v38 = vmax.f32 %v885_v22, %v886_v35  ;;  %v893_v39 = vrot.slane %v892_v36, 1 }
 0x10b   :  { %v894_v40 = vmax.f32 %v892_v36, %v893_v39  ;;  %v925_v41 = vpack.c.bf16 %v887_v38, %v887_v38 }
 0x10d   :  { %v926_v42 = vpack.c.bf16 %v894_v40, %v894_v40  ;;  %v989_v43 = vunpack.c.l.b16 %v925_v41 }
 0x10f   :  { %v990_v9 = vunpack.c.l.b16 %v926_v42  ;;  %v1024_v45 = vsel %vm1001_vm0, %v989_v43, %v1023_v44 }
 0x111   :  { %v1025_v46 = vsel %vm1003_vm4, %v990_v9, %v1024_v45 }
 0x112   :  { %v1029_v20 = vpack.c.b16 %v1025_v46, %v1025_v46 }
 0x114   :  { %1037 = vst [vmem:[%s1449_s5 + $0xc] sm:$0xf] %v1029_v20 }

// kernel: forward.23
= control target key start
LH: loop header
LB: loop body
LE: loop exit
PB: predicated region body
PF: predicated region fallthrough
CT: control target
= control target key end

     0   :  { %9 = vsyncpa [#allocation3], 0  ;;  %s3385_s18 = smov [#allocation2]   ;;  %s3386_s20 = smov 256   ;;  %s3497_s0 = inlined_call_operand.vmem [shape: f32[2,1024], index: 0, kind: input, shape index: {}]   ;;  %s3498_s1 = inlined_call_operand.hbm [shape: bf16[1024,512], index: 1, kind: input, shape index: {}]   ;;  %s3499_s2 = inlined_call_operand.vmem [shape: f32[1,512], index: 2, kind: input, shape index: {}]   ;;  %s3500_s3 = inlined_call_operand.vmem [shape: f32[1,512], index: 3, kind: input, shape index: {}]   ;;  %s3501_s4 = inlined_call_operand.vmem [shape: f32[2,512], index: 4, kind: output, shape index: {}]  }
   0x1   :  { %s16_s17 = sshll.u32 %s3498_s1, 4  ;;  %s18_s19 = sshll.u32 %s3385_s18, 4  ;;  %s17_s17 = int_to_ptr.hbm [resolvable:$true] %s16_s17  ;;  %s19_s19 = int_to_ptr.vmem [resolvable:$true] %s18_s19 }
   0x2   :  { %s3387_s21 = smov 16  }
   0x3   :  { %24 = dma.hbm_to_vmem [thread:$0]  %s17_s17, 32768, %s19_s19, [#allocation3], %s3386_s20, %s3386_s20, %s3387_s21  }
   0x4   :  { %3383 = dma.done.wait [#allocation3], 32768  }
   0x5   :  { %3384 = vsyncadd [#allocation3], 4294934528  ;;  %v2190_v0 = vld [vmem:[#allocation2 + $0xe0] sm:$0xf]  ;;  %v3130_v1 = vld [vmem:[#allocation2 + $0xec] sm:$0xf0] }
   0x6   :  { %v2318_v2 = vld [vmem:[#allocation2 + $0x1e0] sm:$0xf]  ;;  %v2191_v3 = vor.u32 %v3130_v1, %v2190_v0  ;;  %v3162_v4 = vld [vmem:[#allocation2 + $0x1ec] sm:$0xf0]  ;;  %vm2063_vm2 = vcmask 1041408   ;;  %vm2065_vm5 = vcmask 1045508  }
   0x7   :  { %v2446_v5 = vld [vmem:[#allocation2 + $0x2e0] sm:$0xf]  ;;  %v3194_v6 = vld [vmem:[#allocation2 + $0x2ec] sm:$0xf0]  ;;  %v2319_v7 = vor.u32 %v3162_v4, %v2318_v2  ;;  %vm2067_vm6 = vcmask 1043456  }
   0x8   :  { %v2447_v8 = vor.u32 %v3194_v6, %v2446_v5  ;;  %v2574_v9 = vld [vmem:[#allocation2 + $0x3e0] sm:$0xf]  ;;  %v3226_v10 = vld [vmem:[#allocation2 + $0x3ec] sm:$0xf0]  ;;  %1600 = vmatpush.bf16.msra.mxu0 %v2191_v3 }
   0x9   :  { %v2174_v11 = vld [vmem:[#allocation2 + $0xc0] sm:$0xf]  ;;  %v2575_v12 = vor.u32 %v3226_v10, %v2574_v9  ;;  %v3126_v13 = vld [vmem:[#allocation2 + $0xcc] sm:$0xf0]  ;;  %1613 = vmatpush.bf16.msra.mxu1 %v2319_v7 }
   0xa   :  { %v2302_v14 = vld [vmem:[#allocation2 + $0x1c0] sm:$0xf]  ;;  %v3158_v15 = vld [vmem:[#allocation2 + $0x1cc] sm:$0xf0]  ;;  %1626 = vmatpush.bf16.msra.mxu2 %v2447_v8  ;;  %v2175_v16 = vor.u32 %v3126_v13, %v2174_v11 }
   0xb   :  { %v2303_v17 = vor.u32 %v3158_v15, %v2302_v14  ;;  %v2430_v18 = vld [vmem:[#allocation2 + $0x2c0] sm:$0xf]  ;;  %v3190_v19 = vld [vmem:[#allocation2 + $0x2cc] sm:$0xf0]  ;;  %1639 = vmatpush.bf16.msra.mxu3 %v2575_v12 }
   0xc   :  { %v2558_v20 = vld [vmem:[#allocation2 + $0x3c0] sm:$0xf]  ;;  %v2431_v21 = vor.u32 %v3190_v19, %v2430_v18  ;;  %v3222_v22 = vld [vmem:[#allocation2 + $0x3cc] sm:$0xf0]  ;;  %1601 = vmatpush.bf16.msra.mxu0 %v2175_v16 }
   0xd   :  { %v2158_v23 = vld [vmem:[#allocation2 + $0xa0] sm:$0xf]  ;;  %v3122_v24 = vld [vmem:[#allocation2 + $0xac] sm:$0xf0]  ;;  %v2559_v25 = vor.u32 %v3222_v22, %v2558_v20  ;;  %1614 = vmatpush.bf16.msra.mxu1 %v2303_v17 }
   0xe   :  { %v2286_v26 = vld [vmem:[#allocation2 + $0x1a0] sm:$0xf]  ;;  %v3154_v27 = vld [vmem:[#allocation2 + $0x1ac] sm:$0xf0]  ;;  %v2159_v29 = vor.u32 %v3122_v24, %v2158_v23  ;;  %1627 = vmatpush.bf16.msra.mxu2 %v2431_v21 }
   0xf   :  { %v2414_v28 = vld [vmem:[#allocation2 + $0x2a0] sm:$0xf]  ;;  %v3186_v30 = vld [vmem:[#allocation2 + $0x2ac] sm:$0xf0]  ;;  %v2287_v33 = vor.u32 %v3154_v27, %v2286_v26  ;;  %1640 = vmatpush.bf16.msra.mxu3 %v2559_v25 }
  0x10   :  { %v2542_v31 = vld [vmem:[#allocation2 + $0x3a0] sm:$0xf]  ;;  %v3218_v32 = vld [vmem:[#allocation2 + $0x3ac] sm:$0xf0]  ;;  %v2415_v34 = vor.u32 %v3186_v30, %v2414_v28  ;;  %1602 = vmatpush.bf16.msra.mxu0 %v2159_v29 }
  0x11   :  { %v2142_v35 = vld [vmem:[#allocation2 + $0x80] sm:$0xf]  ;;  %v3118_v36 = vld [vmem:[#allocation2 + $0x8c] sm:$0xf0]  ;;  %v2543_v38 = vor.u32 %v3218_v32, %v2542_v31  ;;  %1615 = vmatpush.bf16.msra.mxu1 %v2287_v33 }
  0x12   :  { %v2270_v37 = vld [vmem:[#allocation2 + $0x180] sm:$0xf]  ;;  %v3150_v39 = vld [vmem:[#allocation2 + $0x18c] sm:$0xf0]  ;;  %v2143_v44 = vor.u32 %v3118_v36, %v2142_v35  ;;  %1628 = vmatpush.bf16.msra.mxu2 %v2415_v34 }
  0x13   :  { %v2398_v40 = vld [vmem:[#allocation2 + $0x280] sm:$0xf]  ;;  %v3182_v41 = vld [vmem:[#allocation2 + $0x28c] sm:$0xf0]  ;;  %v2271_v45 = vor.u32 %v3150_v39, %v2270_v37  ;;  %1641 = vmatpush.bf16.msra.mxu3 %v2543_v38 }
  0x14   :  { %v2526_v42 = vld [vmem:[#allocation2 + $0x380] sm:$0xf]  ;;  %v3214_v43 = vld [vmem:[#allocation2 + $0x38c] sm:$0xf0]  ;;  %v2399_v46 = vor.u32 %v3182_v41, %v2398_v40  ;;  %1603 = vmatpush.bf16.msra.mxu0 %v2143_v44 }
  0x15   :  { %v2126_v47 = vld [vmem:[#allocation2 + $0x60] sm:$0xf]  ;;  %v3114_v48 = vld [vmem:[#allocation2 + $0x6c] sm:$0xf0]  ;;  %v2527_v50 = vor.u32 %v3214_v43, %v2526_v42  ;;  %1616 = vmatpush.bf16.msra.mxu1 %v2271_v45 }
  0x16   :  { %v2254_v49 = vld [vmem:[#allocation2 + $0x160] sm:$0xf]  ;;  %v3146_v51 = vld [vmem:[#allocation2 + $0x16c] sm:$0xf0]  ;;  %v2127_v56 = vor.u32 %v3114_v48, %v2126_v47  ;;  %1629 = vmatpush.bf16.msra.mxu2 %v2399_v46 }
  0x17   :  { %v2382_v52 = vld [vmem:[#allocation2 + $0x260] sm:$0xf]  ;;  %v3178_v53 = vld [vmem:[#allocation2 + $0x26c] sm:$0xf0]  ;;  %v2255_v57 = vor.u32 %v3146_v51, %v2254_v49  ;;  %1642 = vmatpush.bf16.msra.mxu3 %v2527_v50 }
  0x18   :  { %v2510_v54 = vld [vmem:[#allocation2 + $0x360] sm:$0xf]  ;;  %v3210_v55 = vld [vmem:[#allocation2 + $0x36c] sm:$0xf0]  ;;  %v2383_v58 = vor.u32 %v3178_v53, %v2382_v52  ;;  %1604 = vmatpush.bf16.msra.mxu0 %v2127_v56 }
  0x19   :  { %v2110_v59 = vld [vmem:[#allocation2 + $0x40] sm:$0xf]  ;;  %v3110_v60 = vld [vmem:[#allocation2 + $0x4c] sm:$0xf0]  ;;  %v2511_v62 = vor.u32 %v3210_v55, %v2510_v54  ;;  %1617 = vmatpush.bf16.msra.mxu1 %v2255_v57 }
  0x1a   :  { %v2238_v61 = vld [vmem:[#allocation2 + $0x140] sm:$0xf]  ;;  %v3142_v63 = vld [vmem:[#allocation2 + $0x14c] sm:$0xf0]  ;;  %v2111_v4 = vor.u32 %v3110_v60, %v2110_v59  ;;  %1630 = vmatpush.bf16.msra.mxu2 %v2383_v58  ;;  %v33_v59 = vld [vmem:[%s3497_s0] sm:$0xff] }
  0x1b   :  { %v2366_v0 = vld [vmem:[#allocation2 + $0x240] sm:$0xf]  ;;  %v3174_v1 = vld [vmem:[#allocation2 + $0x24c] sm:$0xf0]  ;;  %v2239_v5 = vor.u32 %v3142_v63, %v2238_v61  ;;  %1643 = vmatpush.bf16.msra.mxu3 %v2511_v62  ;;  %37 = vst [vmem:[#allocation1] ss:$4 sm:$0xff] %v33_v59 }
  0x1c   :  { %v2494_v2 = vld [vmem:[#allocation2 + $0x340] sm:$0xf]  ;;  %v3206_v3 = vld [vmem:[#allocation2 + $0x34c] sm:$0xf0]  ;;  %v2367_v6 = vor.u32 %v3174_v1, %v2366_v0  ;;  %1605 = vmatpush.bf16.msra.mxu0 %v2111_v4 }
  0x1d   :  { %v2094_v7 = vld [vmem:[#allocation2 + $0x20] sm:$0xf]  ;;  %v3106_v8 = vld [vmem:[#allocation2 + $0x2c] sm:$0xf0]  ;;  %v2495_v10 = vor.u32 %v3206_v3, %v2494_v2  ;;  %1618 = vmatpush.bf16.msra.mxu1 %v2239_v5 }
  0x1e   :  { %v2222_v9 = vld [vmem:[#allocation2 + $0x120] sm:$0xf]  ;;  %v3138_v11 = vld [vmem:[#allocation2 + $0x12c] sm:$0xf0]  ;;  %v2095_v16 = vor.u32 %v3106_v8, %v2094_v7  ;;  %1631 = vmatpush.bf16.msra.mxu2 %v2367_v6 }
  0x1f   :  { %v2350_v12 = vld [vmem:[#allocation2 + $0x220] sm:$0xf]  ;;  %v3170_v13 = vld [vmem:[#allocation2 + $0x22c] sm:$0xf0]  ;;  %v2223_v19 = vor.u32 %v3138_v11, %v2222_v9  ;;  %1644 = vmatpush.bf16.msra.mxu3 %v2495_v10 }
  0x20   :  { %v2478_v14 = vld [vmem:[#allocation2 + $0x320] sm:$0xf]  ;;  %v3202_v15 = vld [vmem:[#allocation2 + $0x32c] sm:$0xf0]  ;;  %v2351_v20 = vor.u32 %v3170_v13, %v2350_v12  ;;  %1606 = vmatpush.bf16.msra.mxu0 %v2095_v16 }
  0x21   :  { %v2078_v17 = vld [vmem:[#allocation2] sm:$0xf]  ;;  %v3102_v18 = vld [vmem:[#allocation2 + $0xc] sm:$0xf0]  ;;  %v2479_v24 = vor.u32 %v3202_v15, %v2478_v14  ;;  %1619 = vmatpush.bf16.msra.mxu1 %v2223_v19 }
  0x22   :  { %v2206_v21 = vld [vmem:[#allocation2 + $0x100] sm:$0xf]  ;;  %v3134_v22 = vld [vmem:[#allocation2 + $0x10c] sm:$0xf0]  ;;  %v2079_v31 = vor.u32 %v3102_v18, %v2078_v17  ;;  %1632 = vmatpush.bf16.msra.mxu2 %v2351_v20 }
  0x23   :  { %v2334_v23 = vld [vmem:[#allocation2 + $0x200] sm:$0xf]  ;;  %v3166_v25 = vld [vmem:[#allocation2 + $0x20c] sm:$0xf0]  ;;  %v2207_v35 = vor.u32 %v3134_v22, %v2206_v21  ;;  %1645 = vmatpush.bf16.msra.mxu3 %v2479_v24 }
  0x24   :  { %v2462_v26 = vld [vmem:[#allocation2 + $0x300] sm:$0xf]  ;;  %v3198_v27 = vld [vmem:[#allocation2 + $0x30c] sm:$0xf0]  ;;  %v2335_v36 = vor.u32 %v3166_v25, %v2334_v23  ;;  %1607 = vmatpush.bf16.msra.mxu0 %v2079_v31 }
  0x25   :  { %v2702_v28 = vld [vmem:[#allocation2 + $0x4e0] sm:$0xf]  ;;  %v3258_v29 = vld [vmem:[#allocation2 + $0x4ec] sm:$0xf0]  ;;  %v2463_v39 = vor.u32 %v3198_v27, %v2462_v26  ;;  %1620 = vmatpush.bf16.msra.mxu1 %v2207_v35 }
  0x26   :  { %v2830_v30 = vld [vmem:[#allocation2 + $0x5e0] sm:$0xf]  ;;  %v3290_v32 = vld [vmem:[#allocation2 + $0x5ec] sm:$0xf0]  ;;  %v2703_v40 = vor.u32 %v3258_v29, %v2702_v28  ;;  %1633 = vmatpush.bf16.msra.mxu2 %v2335_v36 }
  0x27   :  { %v2958_v33 = vld [vmem:[#allocation2 + $0x6e0] sm:$0xf]  ;;  %v3322_v34 = vld [vmem:[#allocation2 + $0x6ec] sm:$0xf0]  ;;  %v2831_v41 = vor.u32 %v3290_v32, %v2830_v30  ;;  %1646 = vmatpush.bf16.msra.mxu3 %v2463_v39 }
  0x28   :  { %v3086_v37 = vld [vmem:[#allocation2 + $0x7e0] sm:$0xf]  ;;  %v3354_v38 = vld [vmem:[#allocation2 + $0x7ec] sm:$0xf0]  ;;  %v2959_v42 = vor.u32 %v3322_v34, %v2958_v33  ;;  %1652 = vmatpush.bf16.msrb.mxu0 %v2703_v40 }
  0x29   :  { %v2686_v43 = vld [vmem:[#allocation2 + $0x4c0] sm:$0xf]  ;;  %v3254_v44 = vld [vmem:[#allocation2 + $0x4cc] sm:$0xf0]  ;;  %v3087_v46 = vor.u32 %v3354_v38, %v3086_v37  ;;  %1665 = vmatpush.bf16.msrb.mxu1 %v2831_v41 }
  0x2a   :  { %v2814_v45 = vld [vmem:[#allocation2 + $0x5c0] sm:$0xf]  ;;  %v3286_v47 = vld [vmem:[#allocation2 + $0x5cc] sm:$0xf0]  ;;  %v2687_v52 = vor.u32 %v3254_v44, %v2686_v43  ;;  %1678 = vmatpush.bf16.msrb.mxu2 %v2959_v42 }
  0x2b   :  { %v2942_v48 = vld [vmem:[#allocation2 + $0x6c0] sm:$0xf]  ;;  %v3318_v49 = vld [vmem:[#allocation2 + $0x6cc] sm:$0xf0]  ;;  %v2815_v55 = vor.u32 %v3286_v47, %v2814_v45  ;;  %1691 = vmatpush.bf16.msrb.mxu3 %v3087_v46 }
  0x2c   :  { %v3070_v50 = vld [vmem:[#allocation2 + $0x7c0] sm:$0xf]  ;;  %v3350_v51 = vld [vmem:[#allocation2 + $0x7cc] sm:$0xf0]  ;;  %v2943_v56 = vor.u32 %v3318_v49, %v2942_v48  ;;  %1653 = vmatpush.bf16.msrb.mxu0 %v2687_v52 }
  0x2d   :  { %v2670_v53 = vld [vmem:[#allocation2 + $0x4a0] sm:$0xf]  ;;  %v3250_v54 = vld [vmem:[#allocation2 + $0x4ac] sm:$0xf0]  ;;  %v3071_v60 = vor.u32 %v3350_v51, %v3070_v50  ;;  %1666 = vmatpush.bf16.msrb.mxu1 %v2815_v55 }
  0x2e   :  { %v2798_v57 = vld [vmem:[#allocation2 + $0x5a0] sm:$0xf]  ;;  %v3282_v58 = vld [vmem:[#allocation2 + $0x5ac] sm:$0xf0]  ;;  %v2671_v1 = vor.u32 %v3250_v54, %v2670_v53  ;;  %1679 = vmatpush.bf16.msrb.mxu2 %v2943_v56 }
  0x2f   :  { %v2926_v61 = vld [vmem:[#allocation2 + $0x6a0] sm:$0xf]  ;;  %v3314_v62 = vld [vmem:[#allocation2 + $0x6ac] sm:$0xf0]  ;;  %v2799_v3 = vor.u32 %v3282_v58, %v2798_v57  ;;  %1692 = vmatpush.bf16.msrb.mxu3 %v3071_v60 }
  0x30   :  { %v3054_v63 = vld [vmem:[#allocation2 + $0x7a0] sm:$0xf]  ;;  %v3346_v0 = vld [vmem:[#allocation2 + $0x7ac] sm:$0xf0]  ;;  %v2927_v4 = vor.u32 %v3314_v62, %v2926_v61  ;;  %1654 = vmatpush.bf16.msrb.mxu0 %v2671_v1 }
  0x31   :  { %v2654_v2 = vld [vmem:[#allocation2 + $0x480] sm:$0xf]  ;;  %v3246_v5 = vld [vmem:[#allocation2 + $0x48c] sm:$0xf0]  ;;  %v3055_v8 = vor.u32 %v3346_v0, %v3054_v63  ;;  %1667 = vmatpush.bf16.msrb.mxu1 %v2799_v3 }
  0x32   :  { %v2782_v6 = vld [vmem:[#allocation2 + $0x580] sm:$0xf]  ;;  %v3278_v7 = vld [vmem:[#allocation2 + $0x58c] sm:$0xf0]  ;;  %v2655_v15 = vor.u32 %v3246_v5, %v2654_v2  ;;  %1680 = vmatpush.bf16.msrb.mxu2 %v2927_v4 }
  0x33   :  { %v2910_v9 = vld [vmem:[#allocation2 + $0x680] sm:$0xf]  ;;  %v3310_v10 = vld [vmem:[#allocation2 + $0x68c] sm:$0xf0]  ;;  %v2783_v20 = vor.u32 %v3278_v7, %v2782_v6  ;;  %1693 = vmatpush.bf16.msrb.mxu3 %v3055_v8  ;;  %v3128_v6 = vld [vmem:[#allocation2 + $0xe4] sm:$0xf] }
  0x34   :  { %v3038_v11 = vld [vmem:[#allocation2 + $0x780] sm:$0xf]  ;;  %v3342_v12 = vld [vmem:[#allocation2 + $0x78c] sm:$0xf0]  ;;  %v2911_v21 = vor.u32 %v3310_v10, %v2910_v9  ;;  %1655 = vmatpush.bf16.msrb.mxu0 %v2655_v15  ;;  %v2192_v7 = vld [vmem:[#allocation2 + $0xf0] sm:$0xf0] }
  0x35   :  { %v2638_v13 = vld [vmem:[#allocation2 + $0x460] sm:$0xf]  ;;  %v3242_v14 = vld [vmem:[#allocation2 + $0x46c] sm:$0xf0]  ;;  %v3039_v24 = vor.u32 %v3342_v12, %v3038_v11  ;;  %1668 = vmatpush.bf16.msrb.mxu1 %v2783_v20  ;;  %v3160_v8 = vld [vmem:[#allocation2 + $0x1e4] sm:$0xf] }
  0x36   :  { %v2766_v16 = vld [vmem:[#allocation2 + $0x560] sm:$0xf]  ;;  %v3274_v17 = vld [vmem:[#allocation2 + $0x56c] sm:$0xf0]  ;;  %v2639_v33 = vor.u32 %v3242_v14, %v2638_v13  ;;  %1681 = vmatpush.bf16.msrb.mxu2 %v2911_v21  ;;  %v2320_v9 = vld [vmem:[#allocation2 + $0x1f0] sm:$0xf0]  ;;  %v2195_v21 = vor.u32 %v3128_v6, %v2192_v7 }
  0x37   :  { %v2894_v18 = vld [vmem:[#allocation2 + $0x660] sm:$0xf]  ;;  %v3306_v19 = vld [vmem:[#allocation2 + $0x66c] sm:$0xf0]  ;;  %v2767_v34 = vor.u32 %v3274_v17, %v2766_v16  ;;  %1694 = vmatpush.bf16.msrb.mxu3 %v3039_v24  ;;  %v3192_v10 = vld [vmem:[#allocation2 + $0x2e4] sm:$0xf]  ;;  %v2323_v24 = vor.u32 %v3160_v8, %v2320_v9 }
  0x38   :  { %v42_v22 = vld.sshfl [vmem:[#allocation1 + $0x10] sm:$0xff pattern:$0x73625140]  ;;  %v40_v23 = vld.sshfl [vmem:[#allocation1] sm:$0xff pattern:$0x73625140]  ;;  %v2895_v35 = vor.u32 %v3306_v19, %v2894_v18  ;;  %1656 = vmatpush.bf16.msrb.mxu0 %v2639_v33 }
  0x39   :  { %v3419_v25 = vpack.c.bf16 %v42_v22, %v42_v22  ;;  %v3421_v26 = vpack.c.bf16 %v40_v23, %v40_v23  ;;  %v43_v27 = vld.sshfl [vmem:[#allocation1 + $0x18] sm:$0xff pattern:$0x73625140]  ;;  %v41_v28 = vld.sshfl [vmem:[#allocation1 + $0x8] sm:$0xff pattern:$0x73625140]  ;;  %1669 = vmatpush.bf16.msrb.mxu1 %v2767_v34 }
  0x3a   :  { %v3022_v29 = vld [vmem:[#allocation2 + $0x760] sm:$0xf]  ;;  %v3338_v30 = vld [vmem:[#allocation2 + $0x76c] sm:$0xf0]  ;;  %v3423_v31 = vpack.c.bf16 %v43_v27, %v43_v27  ;;  %v3425_v32 = vpack.c.bf16 %v41_v28, %v41_v28  ;;  %1682 = vmatpush.bf16.msrb.mxu2 %v2895_v35  ;;  %v2448_v12 = vld [vmem:[#allocation2 + $0x2f0] sm:$0xf0] }
  0x3b   :  { %1634 = vmatmul.bf16.vlgmr.msra.gmra.mxu2 %v3419_v25  ;;  %v2622_v36 = vld [vmem:[#allocation2 + $0x440] sm:$0xf]  ;;  %v3238_v37 = vld [vmem:[#allocation2 + $0x44c] sm:$0xf0]  ;;  %v3023_v39 = vor.u32 %v3338_v30, %v3022_v29  ;;  %1608 = vmatmul.bf16.vlgmr.msra.gmra.mxu0 %v3421_v26  ;;  %v3224_v13 = vld [vmem:[#allocation2 + $0x3e4] sm:$0xf]  ;;  %v2451_v27 = vor.u32 %v3192_v10, %v2448_v12 }
  0x3c   :  { %v2750_v38 = vld [vmem:[#allocation2 + $0x540] sm:$0xf]  ;;  %v3270_v40 = vld [vmem:[#allocation2 + $0x54c] sm:$0xf0]  ;;  %1647 = vmatmul.bf16.vlgmr.msra.gmra.mxu3 %v3423_v31  ;;  %1621 = vmatmul.bf16.vlgmr.msra.gmra.mxu1 %v3425_v32  ;;  %v2623_v46 = vor.u32 %v3238_v37, %v2622_v36  ;;  %v2576_v14 = vld [vmem:[#allocation2 + $0x3f0] sm:$0xf0] }
  0x3d   :  { %v2878_v41 = vld [vmem:[#allocation2 + $0x640] sm:$0xf]  ;;  %v3302_v42 = vld [vmem:[#allocation2 + $0x64c] sm:$0xf0]  ;;  %v2751_v47 = vor.u32 %v3270_v40, %v2750_v38  ;;  %1695 = vmatpush.bf16.msrb.mxu3 %v3023_v39  ;;  %v3124_v18 = vld [vmem:[#allocation2 + $0xc4] sm:$0xf]  ;;  %v2579_v30 = vor.u32 %v3224_v13, %v2576_v14 }
  0x3e   :  { %v3006_v43 = vld [vmem:[#allocation2 + $0x740] sm:$0xf]  ;;  %v3334_v44 = vld [vmem:[#allocation2 + $0x74c] sm:$0xf0]  ;;  %v2879_v48 = vor.u32 %v3302_v42, %v2878_v41  ;;  %1657 = vmatpush.bf16.msrb.mxu0 %v2623_v46  ;;  %v2176_v19 = vld [vmem:[#allocation2 + $0xd0] sm:$0xf0] }
  0x3f   :  { %v34_v45 = vld [vmem:[%s3497_s0 + $0x8] sm:$0xff]  ;;  %v3234_v50 = vld [vmem:[#allocation2 + $0x42c] sm:$0xf0]  ;;  %v3007_v52 = vor.u32 %v3334_v44, %v3006_v43  ;;  %1670 = vmatpush.bf16.msrb.mxu1 %v2751_v47  ;;  %v2304_v34 = vld [vmem:[#allocation2 + $0x1d0] sm:$0xf0]  ;;  %v2179_v41 = vor.u32 %v3124_v18, %v2176_v19 }
  0x40   :  { %39 = vst [vmem:[#allocation1 + $0x20] ss:$4 sm:$0xff] %v34_v45  ;;  %v2606_v49 = vld [vmem:[#allocation2 + $0x420] sm:$0xf]  ;;  %v3266_v53 = vld [vmem:[#allocation2 + $0x52c] sm:$0xf0]  ;;  %1683 = vmatpush.bf16.msrb.mxu2 %v2879_v48 }
  0x41   :  { %v2734_v51 = vld [vmem:[#allocation2 + $0x520] sm:$0xf]  ;;  %v3298_v55 = vld [vmem:[#allocation2 + $0x62c] sm:$0xf0]  ;;  %v2607_v59 = vor.u32 %v3234_v50, %v2606_v49  ;;  %1696 = vmatpush.bf16.msrb.mxu3 %v3007_v52  ;;  %v3156_v28 = vld [vmem:[#allocation2 + $0x1c4] sm:$0xf] }
  0x42   :  { %v2862_v54 = vld [vmem:[#allocation2 + $0x620] sm:$0xf]  ;;  %v3330_v57 = vld [vmem:[#allocation2 + $0x72c] sm:$0xf0]  ;;  %v2735_v63 = vor.u32 %v3266_v53, %v2734_v51  ;;  %v3188_v35 = vld [vmem:[#allocation2 + $0x2c4] sm:$0xf]  ;;  %v2307_v43 = vor.u32 %v3156_v28, %v2304_v34 }
  0x43   :  { %v2990_v56 = vld [vmem:[#allocation2 + $0x720] sm:$0xf]  ;;  %v3230_v60 = vld [vmem:[#allocation2 + $0x40c] sm:$0xf0]  ;;  %v2863_v0 = vor.u32 %v3298_v55, %v2862_v54  ;;  %1658 = vmatpush.bf16.msrb.mxu0 %v2607_v59  ;;  %v2432_v36 = vld [vmem:[#allocation2 + $0x2d0] sm:$0xf0] }
  0x44   :  { %v2590_v58 = vld [vmem:[#allocation2 + $0x400] sm:$0xf]  ;;  %v3262_v62 = vld [vmem:[#allocation2 + $0x50c] sm:$0xf0]  ;;  %v2991_v4 = vor.u32 %v3330_v57, %v2990_v56  ;;  %1671 = vmatpush.bf16.msrb.mxu1 %v2735_v63  ;;  %v3220_v37 = vld [vmem:[#allocation2 + $0x3c4] sm:$0xf]  ;;  %v2435_v44 = vor.u32 %v3188_v35, %v2432_v36 }
  0x45   :  { %v2718_v61 = vld [vmem:[#allocation2 + $0x500] sm:$0xf]  ;;  %v3294_v2 = vld [vmem:[#allocation2 + $0x60c] sm:$0xf0]  ;;  %v2591_v11 = vor.u32 %v3230_v60, %v2590_v58  ;;  %1684 = vmatpush.bf16.msrb.mxu2 %v2863_v0  ;;  %v2560_v38 = vld [vmem:[#allocation2 + $0x3d0] sm:$0xf0] }
  0x46   :  { %v2846_v1 = vld [vmem:[#allocation2 + $0x600] sm:$0xf]  ;;  %v3326_v5 = vld [vmem:[#allocation2 + $0x70c] sm:$0xf0]  ;;  %v2719_v15 = vor.u32 %v3262_v62, %v2718_v61  ;;  %1697 = vmatpush.bf16.msrb.mxu3 %v2991_v4  ;;  %v3120_v45 = vld [vmem:[#allocation2 + $0xa4] sm:$0xf]  ;;  %v2563_v48 = vor.u32 %v3220_v37, %v2560_v38 }
  0x47   :  { %v2974_v3 = vld [vmem:[#allocation2 + $0x700] sm:$0xf]  ;;  %v2847_v16 = vor.u32 %v3294_v2, %v2846_v1  ;;  %v46_v17 = vld.sshfl [vmem:[#allocation1 + $0x30] sm:$0xff pattern:$0x73625140]  ;;  %1659 = vmatpush.bf16.msrb.mxu0 %v2591_v11 }
  0x48   :  { %v2975_v20 = vor.u32 %v3326_v5, %v2974_v3  ;;  %v44_v22 = vld.sshfl [vmem:[#allocation1 + $0x20] sm:$0xff pattern:$0x73625140]  ;;  %v47_v23 = vld.sshfl [vmem:[#allocation1 + $0x38] sm:$0xff pattern:$0x73625140]  ;;  %v3434_v33 = vpack.c.bf16 %v46_v17, %v46_v17  ;;  %1672 = vmatpush.bf16.msrb.mxu1 %v2719_v15 }
  0x49   :  { %v45_v29 = vld.sshfl [vmem:[#allocation1 + $0x28] sm:$0xff pattern:$0x73625140]  ;;  %1685 = vmatpush.bf16.msrb.mxu2 %v2847_v16  ;;  %v3436_v39 = vpack.c.bf16 %v44_v22, %v44_v22  ;;  %v3438_v40 = vpack.c.bf16 %v47_v23, %v47_v23  ;;  %v2160_v46 = vld [vmem:[#allocation2 + $0xb0] sm:$0xf0] }
  0x4a   :  { %1698 = vmatpush.bf16.msrb.mxu3 %v2975_v20  ;;  %v3440_v42 = vpack.c.bf16 %v45_v29, %v45_v29  ;;  %v3152_v47 = vld [vmem:[#allocation2 + $0x1a4] sm:$0xf]  ;;  %v2288_v49 = vld [vmem:[#allocation2 + $0x1b0] sm:$0xf0]  ;;  %v2163_v54 = vor.u32 %v3120_v45, %v2160_v46 }
  0x4b   :  { %1704 = vmatpush.bf16.msra.mxu0 %v2195_v21  ;;  %v3184_v50 = vld [vmem:[#allocation2 + $0x2a4] sm:$0xf]  ;;  %v2416_v51 = vld [vmem:[#allocation2 + $0x2b0] sm:$0xf0]  ;;  %v2291_v55 = vor.u32 %v3152_v47, %v2288_v49 }
  0x4c   :  { %1717 = vmatpush.bf16.msra.mxu1 %v2323_v24  ;;  %1686 = vmatmul.bf16.vlgmr.msrb.gmra.mxu2 %v3434_v33  ;;  %v3216_v52 = vld [vmem:[#allocation2 + $0x3a4] sm:$0xf]  ;;  %v2544_v53 = vld [vmem:[#allocation2 + $0x3b0] sm:$0xf0]  ;;  %v2419_v56 = vor.u32 %v3184_v50, %v2416_v51 }
  0x4d   :  { %1730 = vmatpush.bf16.msra.mxu2 %v2451_v27  ;;  %1660 = vmatmul.bf16.vlgmr.msrb.gmra.mxu0 %v3436_v39  ;;  %v3116_v57 = vld [vmem:[#allocation2 + $0x84] sm:$0xf]  ;;  %v2144_v58 = vld [vmem:[#allocation2 + $0x90] sm:$0xf0]  ;;  %v2547_v60 = vor.u32 %v3216_v52, %v2544_v53 }
  0x4e   :  { %1743 = vmatpush.bf16.msra.mxu3 %v2579_v30  ;;  %1673 = vmatmul.bf16.vlgmr.msrb.gmra.mxu1 %v3440_v42  ;;  %v3148_v59 = vld [vmem:[#allocation2 + $0x184] sm:$0xf]  ;;  %v2272_v61 = vld [vmem:[#allocation2 + $0x190] sm:$0xf0]  ;;  %v2147_v2 = vor.u32 %v3116_v57, %v2144_v58 }
  0x4f   :  { %1699 = vmatmul.bf16.vlgmr.msrb.gmra.mxu3 %v3438_v40  ;;  %1705 = vmatpush.bf16.msra.mxu0 %v2179_v41  ;;  %v3180_v62 = vld [vmem:[#allocation2 + $0x284] sm:$0xf]  ;;  %v2400_v63 = vld [vmem:[#allocation2 + $0x290] sm:$0xf0]  ;;  %v2275_v3 = vor.u32 %v3148_v59, %v2272_v61 }
  0x50   :  { %1718 = vmatpush.bf16.msra.mxu1 %v2307_v43  ;;  %v3212_v0 = vld [vmem:[#allocation2 + $0x384] sm:$0xf]  ;;  %v2528_v1 = vld [vmem:[#allocation2 + $0x390] sm:$0xf0]  ;;  %v2403_v4 = vor.u32 %v3180_v62, %v2400_v63 }
  0x51   :  { %1731 = vmatpush.bf16.msra.mxu2 %v2435_v44  ;;  %v3112_v5 = vld [vmem:[#allocation2 + $0x64] sm:$0xf]  ;;  %v2128_v6 = vld [vmem:[#allocation2 + $0x70] sm:$0xf0]  ;;  %v2531_v8 = vor.u32 %v3212_v0, %v2528_v1 }
  0x52   :  { %1744 = vmatpush.bf16.msra.mxu3 %v2563_v48  ;;  %v3144_v7 = vld [vmem:[#allocation2 + $0x164] sm:$0xf]  ;;  %v2256_v9 = vld [vmem:[#allocation2 + $0x170] sm:$0xf0]  ;;  %v2131_v14 = vor.u32 %v3112_v5, %v2128_v6 }
  0x53   :  { %1706 = vmatpush.bf16.msra.mxu0 %v2163_v54  ;;  %v3176_v10 = vld [vmem:[#allocation2 + $0x264] sm:$0xf]  ;;  %v2384_v11 = vld [vmem:[#allocation2 + $0x270] sm:$0xf0]  ;;  %v2259_v15 = vor.u32 %v3144_v7, %v2256_v9 }
  0x54   :  { %1719 = vmatpush.bf16.msra.mxu1 %v2291_v55  ;;  %v3208_v12 = vld [vmem:[#allocation2 + $0x364] sm:$0xf]  ;;  %v2512_v13 = vld [vmem:[#allocation2 + $0x370] sm:$0xf0]  ;;  %v2387_v16 = vor.u32 %v3176_v10, %v2384_v11 }
  0x55   :  { %1732 = vmatpush.bf16.msra.mxu2 %v2419_v56  ;;  %v3108_v17 = vld [vmem:[#allocation2 + $0x44] sm:$0xf]  ;;  %v2112_v18 = vld [vmem:[#allocation2 + $0x50] sm:$0xf0]  ;;  %v2515_v20 = vor.u32 %v3208_v12, %v2512_v13 }
  0x56   :  { %1745 = vmatpush.bf16.msra.mxu3 %v2547_v60  ;;  %v3140_v19 = vld [vmem:[#allocation2 + $0x144] sm:$0xf]  ;;  %v2240_v21 = vld [vmem:[#allocation2 + $0x150] sm:$0xf0]  ;;  %v2115_v28 = vor.u32 %v3108_v17, %v2112_v18 }
  0x57   :  { %1707 = vmatpush.bf16.msra.mxu0 %v2147_v2  ;;  %v3172_v22 = vld [vmem:[#allocation2 + $0x244] sm:$0xf]  ;;  %v2368_v23 = vld [vmem:[#allocation2 + $0x250] sm:$0xf0]  ;;  %v2243_v29 = vor.u32 %v3140_v19, %v2240_v21 }
  0x58   :  { %1720 = vmatpush.bf16.msra.mxu1 %v2275_v3  ;;  %v3204_v24 = vld [vmem:[#allocation2 + $0x344] sm:$0xf]  ;;  %v2496_v27 = vld [vmem:[#allocation2 + $0x350] sm:$0xf0]  ;;  %v2371_v30 = vor.u32 %v3172_v22, %v2368_v23 }
  0x59   :  { %1733 = vmatpush.bf16.msra.mxu2 %v2403_v4  ;;  %v3104_v34 = vld [vmem:[#allocation2 + $0x24] sm:$0xf]  ;;  %v2096_v35 = vld [vmem:[#allocation2 + $0x30] sm:$0xf0]  ;;  %v2499_v37 = vor.u32 %v3204_v24, %v2496_v27 }
  0x5a   :  { %1746 = vmatpush.bf16.msra.mxu3 %v2531_v8  ;;  %v3136_v36 = vld [vmem:[#allocation2 + $0x124] sm:$0xf]  ;;  %v2224_v38 = vld [vmem:[#allocation2 + $0x130] sm:$0xf0]  ;;  %v2099_v46 = vor.u32 %v3104_v34, %v2096_v35 }
  0x5b   :  { %1708 = vmatpush.bf16.msra.mxu0 %v2131_v14  ;;  %v3168_v41 = vld [vmem:[#allocation2 + $0x224] sm:$0xf]  ;;  %v2352_v43 = vld [vmem:[#allocation2 + $0x230] sm:$0xf0]  ;;  %v2227_v49 = vor.u32 %v3136_v36, %v2224_v38 }
  0x5c   :  { %1721 = vmatpush.bf16.msra.mxu1 %v2259_v15  ;;  %v3200_v44 = vld [vmem:[#allocation2 + $0x324] sm:$0xf]  ;;  %v2480_v45 = vld [vmem:[#allocation2 + $0x330] sm:$0xf0]  ;;  %v2355_v50 = vor.u32 %v3168_v41, %v2352_v43 }
  0x5d   :  { %1734 = vmatpush.bf16.msra.mxu2 %v2387_v16  ;;  %v3100_v47 = vld [vmem:[#allocation2 + $0x4] sm:$0xf]  ;;  %v2080_v48 = vld [vmem:[#allocation2 + $0x10] sm:$0xf0]  ;;  %v2483_v54 = vor.u32 %v3200_v44, %v2480_v45 }
  0x5e   :  { %1747 = vmatpush.bf16.msra.mxu3 %v2515_v20  ;;  %v3132_v51 = vld [vmem:[#allocation2 + $0x104] sm:$0xf]  ;;  %v2208_v52 = vld [vmem:[#allocation2 + $0x110] sm:$0xf0]  ;;  %v2083_v61 = vor.u32 %v3100_v47, %v2080_v48 }
  0x5f   :  { %1709 = vmatpush.bf16.msra.mxu0 %v2115_v28  ;;  %v3164_v53 = vld [vmem:[#allocation2 + $0x204] sm:$0xf]  ;;  %v2336_v55 = vld [vmem:[#allocation2 + $0x210] sm:$0xf0]  ;;  %v2211_v1 = vor.u32 %v3132_v51, %v2208_v52 }
  0x60   :  { %1722 = vmatpush.bf16.msra.mxu1 %v2243_v29  ;;  %v3196_v56 = vld [vmem:[#allocation2 + $0x304] sm:$0xf]  ;;  %v2464_v57 = vld [vmem:[#allocation2 + $0x310] sm:$0xf0]  ;;  %v2339_v2 = vor.u32 %v3164_v53, %v2336_v55 }
  0x61   :  { %1735 = vmatpush.bf16.msra.mxu2 %v2371_v30  ;;  %v3256_v58 = vld [vmem:[#allocation2 + $0x4e4] sm:$0xf]  ;;  %v2704_v59 = vld [vmem:[#allocation2 + $0x4f0] sm:$0xf0]  ;;  %v2467_v5 = vor.u32 %v3196_v56, %v2464_v57 }
  0x62   :  { %1748 = vmatpush.bf16.msra.mxu3 %v2499_v37  ;;  %v3288_v60 = vld [vmem:[#allocation2 + $0x5e4] sm:$0xf]  ;;  %v2832_v62 = vld [vmem:[#allocation2 + $0x5f0] sm:$0xf0]  ;;  %v2707_v6 = vor.u32 %v3256_v58, %v2704_v59 }
  0x63   :  { %1710 = vmatpush.bf16.msra.mxu0 %v2099_v46  ;;  %v3320_v63 = vld [vmem:[#allocation2 + $0x6e4] sm:$0xf]  ;;  %v2960_v0 = vld [vmem:[#allocation2 + $0x6f0] sm:$0xf0]  ;;  %v2835_v7 = vor.u32 %v3288_v60, %v2832_v62 }
  0x64   :  { %1723 = vmatpush.bf16.msra.mxu1 %v2227_v49  ;;  %v3352_v3 = vld [vmem:[#allocation2 + $0x7e4] sm:$0xf]  ;;  %v3088_v4 = vld [vmem:[#allocation2 + $0x7f0] sm:$0xf0]  ;;  %v2963_v8 = vor.u32 %v3320_v63, %v2960_v0 }
  0x65   :  { %1736 = vmatpush.bf16.msra.mxu2 %v2355_v50  ;;  %v3252_v9 = vld [vmem:[#allocation2 + $0x4c4] sm:$0xf]  ;;  %v2688_v10 = vld [vmem:[#allocation2 + $0x4d0] sm:$0xf0]  ;;  %v3091_v12 = vor.u32 %v3352_v3, %v3088_v4 }
  0x66   :  { %1749 = vmatpush.bf16.msra.mxu3 %v2483_v54  ;;  %v3284_v11 = vld [vmem:[#allocation2 + $0x5c4] sm:$0xf]  ;;  %v2816_v13 = vld [vmem:[#allocation2 + $0x5d0] sm:$0xf0]  ;;  %v2691_v18 = vor.u32 %v3252_v9, %v2688_v10 }
  0x67   :  { %1711 = vmatpush.bf16.msra.mxu0 %v2083_v61  ;;  %v3316_v14 = vld [vmem:[#allocation2 + $0x6c4] sm:$0xf]  ;;  %v2944_v15 = vld [vmem:[#allocation2 + $0x6d0] sm:$0xf0]  ;;  %v2819_v19 = vor.u32 %v3284_v11, %v2816_v13 }
  0x68   :  { %1724 = vmatpush.bf16.msra.mxu1 %v2211_v1  ;;  %v3348_v16 = vld [vmem:[#allocation2 + $0x7c4] sm:$0xf]  ;;  %v3072_v17 = vld [vmem:[#allocation2 + $0x7d0] sm:$0xf0]  ;;  %v2947_v20 = vor.u32 %v3316_v14, %v2944_v15 }
  0x69   :  { %1737 = vmatpush.bf16.msra.mxu2 %v2339_v2  ;;  %v3248_v21 = vld [vmem:[#allocation2 + $0x4a4] sm:$0xf]  ;;  %v2672_v22 = vld [vmem:[#allocation2 + $0x4b0] sm:$0xf0]  ;;  %v3075_v24 = vor.u32 %v3348_v16, %v3072_v17 }
  0x6a   :  { %1750 = vmatpush.bf16.msra.mxu3 %v2467_v5  ;;  %v3280_v23 = vld [vmem:[#allocation2 + $0x5a4] sm:$0xf]  ;;  %v2800_v27 = vld [vmem:[#allocation2 + $0x5b0] sm:$0xf0]  ;;  %1712 = vmatmul.bf16.vlgmr.msra.gmra.mxu0 %v3421_v26  ;;  %v2675_v35 = vor.u32 %v3248_v21, %v2672_v22 }
  0x6b   :  { %1756 = vmatpush.bf16.msrb.mxu0 %v2707_v6  ;;  %v3312_v28 = vld [vmem:[#allocation2 + $0x6a4] sm:$0xf]  ;;  %v2928_v29 = vld [vmem:[#allocation2 + $0x6b0] sm:$0xf0]  ;;  %1725 = vmatmul.bf16.vlgmr.msra.gmra.mxu1 %v3425_v32  ;;  %v2803_v36 = vor.u32 %v3280_v23, %v2800_v27 }
  0x6c   :  { %1769 = vmatpush.bf16.msrb.mxu1 %v2835_v7  ;;  %1738 = vmatmul.bf16.vlgmr.msra.gmra.mxu2 %v3419_v25  ;;  %v3344_v30 = vld [vmem:[#allocation2 + $0x7a4] sm:$0xf]  ;;  %v3056_v34 = vld [vmem:[#allocation2 + $0x7b0] sm:$0xf0]  ;;  %v2931_v37 = vor.u32 %v3312_v28, %v2928_v29 }
  0x6d   :  { %1782 = vmatpush.bf16.msrb.mxu2 %v2963_v8  ;;  %1751 = vmatmul.bf16.vlgmr.msra.gmra.mxu3 %v3423_v31  ;;  %v3244_v38 = vld [vmem:[#allocation2 + $0x484] sm:$0xf]  ;;  %v2656_v41 = vld [vmem:[#allocation2 + $0x490] sm:$0xf0]  ;;  %v3059_v44 = vor.u32 %v3344_v30, %v3056_v34 }
  0x6e   :  { %1795 = vmatpush.bf16.msrb.mxu3 %v3091_v12  ;;  %v3276_v43 = vld [vmem:[#allocation2 + $0x584] sm:$0xf]  ;;  %v2784_v45 = vld [vmem:[#allocation2 + $0x590] sm:$0xf0]  ;;  %v2659_v50 = vor.u32 %v3244_v38, %v2656_v41  ;;  %v2198_v41 = vld [vmem:[#allocation2 + $0xe8] sm:$0xf] }
  0x6f   :  { %1757 = vmatpush.bf16.msrb.mxu0 %v2691_v18  ;;  %v3308_v46 = vld [vmem:[#allocation2 + $0x684] sm:$0xf]  ;;  %v2912_v47 = vld [vmem:[#allocation2 + $0x690] sm:$0xf0]  ;;  %v2787_v51 = vor.u32 %v3276_v43, %v2784_v45  ;;  %v3131_v43 = vld [vmem:[#allocation2 + $0xf4] sm:$0xf0] }
  0x70   :  { %1770 = vmatpush.bf16.msrb.mxu1 %v2819_v19  ;;  %v3340_v48 = vld [vmem:[#allocation2 + $0x784] sm:$0xf]  ;;  %v3040_v49 = vld [vmem:[#allocation2 + $0x790] sm:$0xf0]  ;;  %v2915_v52 = vor.u32 %v3308_v46, %v2912_v47  ;;  %v3163_v46 = vld [vmem:[#allocation2 + $0x1f4] sm:$0xf0] }
  0x71   :  { %1783 = vmatpush.bf16.msrb.mxu2 %v2947_v20  ;;  %v3240_v53 = vld [vmem:[#allocation2 + $0x464] sm:$0xf]  ;;  %v2640_v54 = vld [vmem:[#allocation2 + $0x470] sm:$0xf0]  ;;  %v3043_v56 = vor.u32 %v3340_v48, %v3040_v49  ;;  %v2454_v47 = vld [vmem:[#allocation2 + $0x2e8] sm:$0xf] }
  0x72   :  { %1796 = vmatpush.bf16.msrb.mxu3 %v3075_v24  ;;  %v3272_v55 = vld [vmem:[#allocation2 + $0x564] sm:$0xf]  ;;  %v2768_v57 = vld [vmem:[#allocation2 + $0x570] sm:$0xf0]  ;;  %v2643_v62 = vor.u32 %v3240_v53, %v2640_v54  ;;  %v3195_v48 = vld [vmem:[#allocation2 + $0x2f4] sm:$0xf0]  ;;  %v2199_v54 = vor.u32 %v3131_v43, %v2198_v41 }
  0x73   :  { %1758 = vmatpush.bf16.msrb.mxu0 %v2675_v35  ;;  %v3304_v58 = vld [vmem:[#allocation2 + $0x664] sm:$0xf]  ;;  %v2896_v59 = vld [vmem:[#allocation2 + $0x670] sm:$0xf0]  ;;  %v2771_v63 = vor.u32 %v3272_v55, %v2768_v57  ;;  %v2182_v57 = vld [vmem:[#allocation2 + $0xc8] sm:$0xf] }
  0x74   :  { %1771 = vmatpush.bf16.msrb.mxu1 %v2803_v36  ;;  %v3336_v60 = vld [vmem:[#allocation2 + $0x764] sm:$0xf]  ;;  %v3024_v61 = vld [vmem:[#allocation2 + $0x770] sm:$0xf0]  ;;  %v2899_v0 = vor.u32 %v3304_v58, %v2896_v59  ;;  %v3127_v58 = vld [vmem:[#allocation2 + $0xd4] sm:$0xf0] }
  0x75   :  { %1784 = vmatpush.bf16.msrb.mxu2 %v2931_v37  ;;  %v3236_v1 = vld [vmem:[#allocation2 + $0x444] sm:$0xf]  ;;  %v2624_v2 = vld [vmem:[#allocation2 + $0x450] sm:$0xf0]  ;;  %v3027_v4 = vor.u32 %v3336_v60, %v3024_v61  ;;  %v2310_v59 = vld [vmem:[#allocation2 + $0x1c8] sm:$0xf] }
  0x76   :  { %1797 = vmatpush.bf16.msrb.mxu3 %v3059_v44  ;;  %v3268_v3 = vld [vmem:[#allocation2 + $0x544] sm:$0xf]  ;;  %v2752_v5 = vld [vmem:[#allocation2 + $0x550] sm:$0xf0]  ;;  %v2627_v10 = vor.u32 %v3236_v1, %v2624_v2  ;;  %v2326_v44 = vld [vmem:[#allocation2 + $0x1e8] sm:$0xf]  ;;  %v2183_v2 = vor.u32 %v3127_v58, %v2182_v57 }
  0x77   :  { %1759 = vmatpush.bf16.msrb.mxu0 %v2659_v50  ;;  %v3300_v6 = vld [vmem:[#allocation2 + $0x644] sm:$0xf]  ;;  %v2880_v7 = vld [vmem:[#allocation2 + $0x650] sm:$0xf0]  ;;  %v2755_v11 = vor.u32 %v3268_v3, %v2752_v5  ;;  %v2327_v55 = vor.u32 %v3163_v46, %v2326_v44  ;;  %v3159_v61 = vld [vmem:[#allocation2 + $0x1d4] sm:$0xf0] }
  0x78   :  { %1772 = vmatpush.bf16.msrb.mxu1 %v2787_v51  ;;  %v3332_v8 = vld [vmem:[#allocation2 + $0x744] sm:$0xf]  ;;  %v3008_v9 = vld [vmem:[#allocation2 + $0x750] sm:$0xf0]  ;;  %v2883_v12 = vor.u32 %v3300_v6, %v2880_v7  ;;  %v2582_v51 = vld [vmem:[#allocation2 + $0x3e8] sm:$0xf]  ;;  %v2311_v3 = vor.u32 %v3159_v61, %v2310_v59 }
  0x79   :  { %1785 = vmatpush.bf16.msrb.mxu2 %v2915_v52  ;;  %v3232_v13 = vld [vmem:[#allocation2 + $0x424] sm:$0xf]  ;;  %v2608_v14 = vld [vmem:[#allocation2 + $0x430] sm:$0xf0]  ;;  %v3011_v16 = vor.u32 %v3332_v8, %v3008_v9  ;;  %v3227_v52 = vld [vmem:[#allocation2 + $0x3f4] sm:$0xf0] }
  0x7a   :  { %1798 = vmatpush.bf16.msrb.mxu3 %v3043_v56  ;;  %v3264_v15 = vld [vmem:[#allocation2 + $0x524] sm:$0xf]  ;;  %v2736_v17 = vld [vmem:[#allocation2 + $0x530] sm:$0xf0]  ;;  %v2611_v22 = vor.u32 %v3232_v13, %v2608_v14  ;;  %v2455_v56 = vor.u32 %v3195_v48, %v2454_v47  ;;  %v2583_v60 = vor.u32 %v3227_v52, %v2582_v51  ;;  %v3223_v1 = vld [vmem:[#allocation2 + $0x3d4] sm:$0xf0] }
  0x7b   :  { %1760 = vmatpush.bf16.msrb.mxu0 %v2643_v62  ;;  %v3296_v18 = vld [vmem:[#allocation2 + $0x624] sm:$0xf]  ;;  %v2864_v19 = vld [vmem:[#allocation2 + $0x630] sm:$0xf0]  ;;  %v2739_v27 = vor.u32 %v3264_v15, %v2736_v17  ;;  %v2438_v62 = vld [vmem:[#allocation2 + $0x2c8] sm:$0xf] }
  0x7c   :  { %1773 = vmatpush.bf16.msrb.mxu1 %v2771_v63  ;;  %v3328_v20 = vld [vmem:[#allocation2 + $0x724] sm:$0xf]  ;;  %v2992_v21 = vld [vmem:[#allocation2 + $0x730] sm:$0xf0]  ;;  %v2867_v28 = vor.u32 %v3296_v18, %v2864_v19  ;;  %v3191_v63 = vld [vmem:[#allocation2 + $0x2d4] sm:$0xf0] }
  0x7d   :  { %1786 = vmatpush.bf16.msrb.mxu2 %v2899_v0  ;;  %v3228_v23 = vld [vmem:[#allocation2 + $0x404] sm:$0xf]  ;;  %v2592_v24 = vld [vmem:[#allocation2 + $0x410] sm:$0xf0]  ;;  %v2995_v35 = vor.u32 %v3328_v20, %v2992_v21  ;;  %v2566_v0 = vld [vmem:[#allocation2 + $0x3c8] sm:$0xf] }
  0x7e   :  { %1799 = vmatpush.bf16.msrb.mxu3 %v3027_v4  ;;  %v3260_v29 = vld [vmem:[#allocation2 + $0x504] sm:$0xf]  ;;  %v2720_v30 = vld [vmem:[#allocation2 + $0x510] sm:$0xf0]  ;;  %v2595_v45 = vor.u32 %v3228_v23, %v2592_v24  ;;  %v2439_v4 = vor.u32 %v3191_v63, %v2438_v62  ;;  %v2166_v5 = vld [vmem:[#allocation2 + $0xa8] sm:$0xf]  ;;  %v2567_v8 = vor.u32 %v3223_v1, %v2566_v0 }
  0x7f   :  { %1761 = vmatpush.bf16.msrb.mxu0 %v2627_v10  ;;  %v3292_v34 = vld [vmem:[#allocation2 + $0x604] sm:$0xf]  ;;  %v2848_v36 = vld [vmem:[#allocation2 + $0x610] sm:$0xf0]  ;;  %v2723_v49 = vor.u32 %v3260_v29, %v2720_v30  ;;  %v3123_v6 = vld [vmem:[#allocation2 + $0xb4] sm:$0xf0] }
  0x80   :  { %1774 = vmatpush.bf16.msrb.mxu1 %v2755_v11  ;;  %v3324_v37 = vld [vmem:[#allocation2 + $0x704] sm:$0xf]  ;;  %v2976_v38 = vld [vmem:[#allocation2 + $0x710] sm:$0xf0]  ;;  %v2851_v50 = vor.u32 %v3292_v34, %v2848_v36  ;;  %v2294_v7 = vld [vmem:[#allocation2 + $0x1a8] sm:$0xf]  ;;  %v2167_v14 = vor.u32 %v3123_v6, %v2166_v5 }
  0x81   :  { %1787 = vmatpush.bf16.msrb.mxu2 %v2883_v12  ;;  %v2979_v53 = vor.u32 %v3324_v37, %v2976_v38  ;;  %v3155_v9 = vld [vmem:[#allocation2 + $0x1b4] sm:$0xf0]  ;;  %v2422_v10 = vld [vmem:[#allocation2 + $0x2a8] sm:$0xf] }
  0x82   :  { %1800 = vmatpush.bf16.msrb.mxu3 %v3011_v16  ;;  %v3187_v11 = vld [vmem:[#allocation2 + $0x2b4] sm:$0xf0]  ;;  %v2550_v12 = vld [vmem:[#allocation2 + $0x3a8] sm:$0xf]  ;;  %v2295_v15 = vor.u32 %v3155_v9, %v2294_v7 }
  0x83   :  { %1762 = vmatpush.bf16.msrb.mxu0 %v2611_v22  ;;  %v3219_v13 = vld [vmem:[#allocation2 + $0x3b4] sm:$0xf0]  ;;  %v2423_v16 = vor.u32 %v3187_v11, %v2422_v10  ;;  %v2150_v17 = vld [vmem:[#allocation2 + $0x88] sm:$0xf] }
  0x84   :  { %1775 = vmatpush.bf16.msrb.mxu1 %v2739_v27  ;;  %v3119_v18 = vld [vmem:[#allocation2 + $0x94] sm:$0xf0]  ;;  %v2278_v19 = vld [vmem:[#allocation2 + $0x188] sm:$0xf]  ;;  %v2551_v20 = vor.u32 %v3219_v13, %v2550_v12 }
  0x85   :  { %1788 = vmatpush.bf16.msrb.mxu2 %v2867_v28  ;;  %v3151_v21 = vld [vmem:[#allocation2 + $0x194] sm:$0xf0]  ;;  %v2406_v22 = vld [vmem:[#allocation2 + $0x288] sm:$0xf]  ;;  %v2151_v28 = vor.u32 %v3119_v18, %v2150_v17 }
  0x86   :  { %1801 = vmatpush.bf16.msrb.mxu3 %v2995_v35  ;;  %v3183_v23 = vld [vmem:[#allocation2 + $0x294] sm:$0xf0]  ;;  %v2534_v24 = vld [vmem:[#allocation2 + $0x388] sm:$0xf]  ;;  %v2279_v29 = vor.u32 %v3151_v21, %v2278_v19 }
  0x87   :  { %1763 = vmatpush.bf16.msrb.mxu0 %v2595_v45  ;;  %v3215_v27 = vld [vmem:[#allocation2 + $0x394] sm:$0xf0]  ;;  %v2407_v30 = vor.u32 %v3183_v23, %v2406_v22  ;;  %v2134_v34 = vld [vmem:[#allocation2 + $0x68] sm:$0xf] }
  0x88   :  { %1776 = vmatpush.bf16.msrb.mxu1 %v2723_v49  ;;  %v3115_v35 = vld [vmem:[#allocation2 + $0x74] sm:$0xf0]  ;;  %v2262_v36 = vld [vmem:[#allocation2 + $0x168] sm:$0xf]  ;;  %v2535_v37 = vor.u32 %v3215_v27, %v2534_v24 }
  0x89   :  { %1789 = vmatpush.bf16.msrb.mxu2 %v2851_v50  ;;  %v3147_v38 = vld [vmem:[#allocation2 + $0x174] sm:$0xf0]  ;;  %v2390_v41 = vld [vmem:[#allocation2 + $0x268] sm:$0xf]  ;;  %v2135_v46 = vor.u32 %v3115_v35, %v2134_v34 }
  0x8a   :  { %1802 = vmatpush.bf16.msrb.mxu3 %v2979_v53  ;;  %1764 = vmatmul.bf16.vlgmr.msrb.gmra.mxu0 %v3436_v39  ;;  %v3179_v43 = vld [vmem:[#allocation2 + $0x274] sm:$0xf0]  ;;  %v2518_v44 = vld [vmem:[#allocation2 + $0x368] sm:$0xf]  ;;  %v2263_v47 = vor.u32 %v3147_v38, %v2262_v36 }
  0x8b   :  { %1808 = vmatpush.bf16.msra.mxu0 %v2199_v54  ;;  %1777 = vmatmul.bf16.vlgmr.msrb.gmra.mxu1 %v3440_v42  ;;  %v3211_v45 = vld [vmem:[#allocation2 + $0x374] sm:$0xf0]  ;;  %v2391_v48 = vor.u32 %v3179_v43, %v2390_v41  ;;  %v2118_v49 = vld [vmem:[#allocation2 + $0x48] sm:$0xf] }
  0x8c   :  { %1821 = vmatpush.bf16.msra.mxu1 %v2327_v55  ;;  %1790 = vmatmul.bf16.vlgmr.msrb.gmra.mxu2 %v3434_v33  ;;  %v3111_v50 = vld [vmem:[#allocation2 + $0x54] sm:$0xf0]  ;;  %v2246_v51 = vld [vmem:[#allocation2 + $0x148] sm:$0xf]  ;;  %v2519_v52 = vor.u32 %v3211_v45, %v2518_v44 }
  0x8d   :  { %1834 = vmatpush.bf16.msra.mxu2 %v2455_v56  ;;  %1803 = vmatmul.bf16.vlgmr.msrb.gmra.mxu3 %v3438_v40  ;;  %v3143_v53 = vld [vmem:[#allocation2 + $0x154] sm:$0xf0]  ;;  %v2374_v54 = vld [vmem:[#allocation2 + $0x248] sm:$0xf]  ;;  %v2119_v58 = vor.u32 %v3111_v50, %v2118_v49 }
  0x8e   :  { %1847 = vmatpush.bf16.msra.mxu3 %v2583_v60  ;;  %v3175_v55 = vld [vmem:[#allocation2 + $0x254] sm:$0xf0]  ;;  %v2502_v56 = vld [vmem:[#allocation2 + $0x348] sm:$0xf]  ;;  %v2247_v59 = vor.u32 %v3143_v53, %v2246_v51 }
  0x8f   :  { %1809 = vmatpush.bf16.msra.mxu0 %v2183_v2  ;;  %v3207_v57 = vld [vmem:[#allocation2 + $0x354] sm:$0xf0]  ;;  %v2375_v60 = vor.u32 %v3175_v55, %v2374_v54  ;;  %v2102_v61 = vld [vmem:[#allocation2 + $0x28] sm:$0xf] }
  0x90   :  { %1822 = vmatpush.bf16.msra.mxu1 %v2311_v3  ;;  %v3107_v62 = vld [vmem:[#allocation2 + $0x34] sm:$0xf0]  ;;  %v2230_v63 = vld [vmem:[#allocation2 + $0x128] sm:$0xf]  ;;  %v2503_v0 = vor.u32 %v3207_v57, %v2502_v56 }
  0x91   :  { %1835 = vmatpush.bf16.msra.mxu2 %v2439_v4  ;;  %v3139_v1 = vld [vmem:[#allocation2 + $0x134] sm:$0xf0]  ;;  %v2358_v2 = vld [vmem:[#allocation2 + $0x228] sm:$0xf]  ;;  %v2103_v6 = vor.u32 %v3107_v62, %v2102_v61 }
  0x92   :  { %1848 = vmatpush.bf16.msra.mxu3 %v2567_v8  ;;  %v3171_v3 = vld [vmem:[#allocation2 + $0x234] sm:$0xf0]  ;;  %v2486_v4 = vld [vmem:[#allocation2 + $0x328] sm:$0xf]  ;;  %v2231_v9 = vor.u32 %v3139_v1, %v2230_v63 }
  0x93   :  { %1810 = vmatpush.bf16.msra.mxu0 %v2167_v14  ;;  %v3203_v5 = vld [vmem:[#allocation2 + $0x334] sm:$0xf0]  ;;  %v2086_v7 = vld [vmem:[#allocation2 + $0x8] sm:$0xf]  ;;  %v2359_v10 = vor.u32 %v3171_v3, %v2358_v2 }
  0x94   :  { %1823 = vmatpush.bf16.msra.mxu1 %v2295_v15  ;;  %v3103_v8 = vld [vmem:[#allocation2 + $0x14] sm:$0xf0]  ;;  %v2214_v11 = vld [vmem:[#allocation2 + $0x108] sm:$0xf]  ;;  %v2487_v14 = vor.u32 %v3203_v5, %v2486_v4 }
  0x95   :  { %1836 = vmatpush.bf16.msra.mxu2 %v2423_v16  ;;  %v3135_v12 = vld [vmem:[#allocation2 + $0x114] sm:$0xf0]  ;;  %v2342_v13 = vld [vmem:[#allocation2 + $0x208] sm:$0xf]  ;;  %v2087_v21 = vor.u32 %v3103_v8, %v2086_v7 }
  0x96   :  { %1849 = vmatpush.bf16.msra.mxu3 %v2551_v20  ;;  %v3167_v15 = vld [vmem:[#allocation2 + $0x214] sm:$0xf0]  ;;  %v2470_v16 = vld [vmem:[#allocation2 + $0x308] sm:$0xf]  ;;  %v2215_v27 = vor.u32 %v3135_v12, %v2214_v11 }
  0x97   :  { %1811 = vmatpush.bf16.msra.mxu0 %v2151_v28  ;;  %v3199_v17 = vld [vmem:[#allocation2 + $0x314] sm:$0xf0]  ;;  %v2710_v18 = vld [vmem:[#allocation2 + $0x4e8] sm:$0xf]  ;;  %v2343_v28 = vor.u32 %v3167_v15, %v2342_v13 }
  0x98   :  { %1824 = vmatpush.bf16.msra.mxu1 %v2279_v29  ;;  %v3259_v19 = vld [vmem:[#allocation2 + $0x4f4] sm:$0xf0]  ;;  %v2838_v20 = vld [vmem:[#allocation2 + $0x5e8] sm:$0xf]  ;;  %v2471_v34 = vor.u32 %v3199_v17, %v2470_v16 }
  0x99   :  { %1837 = vmatpush.bf16.msra.mxu2 %v2407_v30  ;;  %v3291_v22 = vld [vmem:[#allocation2 + $0x5f4] sm:$0xf0]  ;;  %v2966_v23 = vld [vmem:[#allocation2 + $0x6e8] sm:$0xf]  ;;  %v2711_v35 = vor.u32 %v3259_v19, %v2710_v18 }
  0x9a   :  { %1850 = vmatpush.bf16.msra.mxu3 %v2535_v37  ;;  %v3323_v24 = vld [vmem:[#allocation2 + $0x6f4] sm:$0xf0]  ;;  %v3094_v29 = vld [vmem:[#allocation2 + $0x7e8] sm:$0xf]  ;;  %v2839_v36 = vor.u32 %v3291_v22, %v2838_v20 }
  0x9b   :  { %1812 = vmatpush.bf16.msra.mxu0 %v2135_v46  ;;  %v3355_v30 = vld [vmem:[#allocation2 + $0x7f4] sm:$0xf0]  ;;  %v2967_v37 = vor.u32 %v3323_v24, %v2966_v23  ;;  %v2694_v38 = vld [vmem:[#allocation2 + $0x4c8] sm:$0xf] }
  0x9c   :  { %1825 = vmatpush.bf16.msra.mxu1 %v2263_v47  ;;  %v3255_v41 = vld [vmem:[#allocation2 + $0x4d4] sm:$0xf0]  ;;  %v2822_v43 = vld [vmem:[#allocation2 + $0x5c8] sm:$0xf]  ;;  %v3095_v44 = vor.u32 %v3355_v30, %v3094_v29 }
  0x9d   :  { %1838 = vmatpush.bf16.msra.mxu2 %v2391_v48  ;;  %v3287_v45 = vld [vmem:[#allocation2 + $0x5d4] sm:$0xf0]  ;;  %v2950_v46 = vld [vmem:[#allocation2 + $0x6c8] sm:$0xf]  ;;  %v2695_v50 = vor.u32 %v3255_v41, %v2694_v38 }
  0x9e   :  { %1851 = vmatpush.bf16.msra.mxu3 %v2519_v52  ;;  %v3319_v47 = vld [vmem:[#allocation2 + $0x6d4] sm:$0xf0]  ;;  %v3078_v48 = vld [vmem:[#allocation2 + $0x7c8] sm:$0xf]  ;;  %v2823_v51 = vor.u32 %v3287_v45, %v2822_v43 }
  0x9f   :  { %1813 = vmatpush.bf16.msra.mxu0 %v2119_v58  ;;  %v3351_v49 = vld [vmem:[#allocation2 + $0x7d4] sm:$0xf0]  ;;  %v2951_v52 = vor.u32 %v3319_v47, %v2950_v46  ;;  %v2678_v53 = vld [vmem:[#allocation2 + $0x4a8] sm:$0xf] }
  0xa0   :  { %1826 = vmatpush.bf16.msra.mxu1 %v2247_v59  ;;  %v3251_v54 = vld [vmem:[#allocation2 + $0x4b4] sm:$0xf0]  ;;  %v2806_v55 = vld [vmem:[#allocation2 + $0x5a8] sm:$0xf]  ;;  %v3079_v56 = vor.u32 %v3351_v49, %v3078_v48 }
  0xa1   :  { %1839 = vmatpush.bf16.msra.mxu2 %v2375_v60  ;;  %v3283_v57 = vld [vmem:[#allocation2 + $0x5b4] sm:$0xf0]  ;;  %v2934_v58 = vld [vmem:[#allocation2 + $0x6a8] sm:$0xf]  ;;  %v2679_v62 = vor.u32 %v3251_v54, %v2678_v53 }
  0xa2   :  { %1852 = vmatpush.bf16.msra.mxu3 %v2503_v0  ;;  %v3315_v59 = vld [vmem:[#allocation2 + $0x6b4] sm:$0xf0]  ;;  %v3062_v60 = vld [vmem:[#allocation2 + $0x7a8] sm:$0xf]  ;;  %v2807_v63 = vor.u32 %v3283_v57, %v2806_v55 }
  0xa3   :  { %1814 = vmatpush.bf16.msra.mxu0 %v2103_v6  ;;  %v3347_v61 = vld [vmem:[#allocation2 + $0x7b4] sm:$0xf0]  ;;  %v2935_v0 = vor.u32 %v3315_v59, %v2934_v58  ;;  %v2662_v1 = vld [vmem:[#allocation2 + $0x488] sm:$0xf] }
  0xa4   :  { %1827 = vmatpush.bf16.msra.mxu1 %v2231_v9  ;;  %v3247_v2 = vld [vmem:[#allocation2 + $0x494] sm:$0xf0]  ;;  %v2790_v3 = vld [vmem:[#allocation2 + $0x588] sm:$0xf]  ;;  %v3063_v4 = vor.u32 %v3347_v61, %v3062_v60 }
  0xa5   :  { %1840 = vmatpush.bf16.msra.mxu2 %v2359_v10  ;;  %v3279_v5 = vld [vmem:[#allocation2 + $0x594] sm:$0xf0]  ;;  %v2918_v6 = vld [vmem:[#allocation2 + $0x688] sm:$0xf]  ;;  %v2663_v10 = vor.u32 %v3247_v2, %v2662_v1 }
  0xa6   :  { %1853 = vmatpush.bf16.msra.mxu3 %v2487_v14  ;;  %v3311_v7 = vld [vmem:[#allocation2 + $0x694] sm:$0xf0]  ;;  %v3046_v8 = vld [vmem:[#allocation2 + $0x788] sm:$0xf]  ;;  %v2791_v11 = vor.u32 %v3279_v5, %v2790_v3  ;;  %v3129_v5 = vld [vmem:[#allocation2 + $0xec] sm:$0xf] }
  0xa7   :  { %1815 = vmatpush.bf16.msra.mxu0 %v2087_v21  ;;  %v3343_v9 = vld [vmem:[#allocation2 + $0x794] sm:$0xf0]  ;;  %v2919_v12 = vor.u32 %v3311_v7, %v2918_v6  ;;  %v2646_v13 = vld [vmem:[#allocation2 + $0x468] sm:$0xf]  ;;  %v2200_v6 = vld [vmem:[#allocation2 + $0xf8] sm:$0xf0] }
  0xa8   :  { %1828 = vmatpush.bf16.msra.mxu1 %v2215_v27  ;;  %v3243_v14 = vld [vmem:[#allocation2 + $0x474] sm:$0xf0]  ;;  %v2774_v15 = vld [vmem:[#allocation2 + $0x568] sm:$0xf]  ;;  %v3047_v16 = vor.u32 %v3343_v9, %v3046_v8  ;;  %v3161_v7 = vld [vmem:[#allocation2 + $0x1ec] sm:$0xf] }
  0xa9   :  { %1841 = vmatpush.bf16.msra.mxu2 %v2343_v28  ;;  %v3275_v17 = vld [vmem:[#allocation2 + $0x574] sm:$0xf0]  ;;  %v2902_v18 = vld [vmem:[#allocation2 + $0x668] sm:$0xf]  ;;  %v2647_v22 = vor.u32 %v3243_v14, %v2646_v13 }
  0xaa   :  { %1854 = vmatpush.bf16.msra.mxu3 %v2471_v34  ;;  %1816 = vmatmul.bf16.vlgmr.msra.gmra.mxu0 %v3421_v26  ;;  %v3307_v19 = vld [vmem:[#allocation2 + $0x674] sm:$0xf0]  ;;  %v3030_v20 = vld [vmem:[#allocation2 + $0x768] sm:$0xf]  ;;  %v2775_v23 = vor.u32 %v3275_v17, %v2774_v15  ;;  %v2584_v17 = vld [vmem:[#allocation2 + $0x3f8] sm:$0xf0] }
  0xab   :  { %1860 = vmatpush.bf16.msrb.mxu0 %v2711_v35  ;;  %1829 = vmatmul.bf16.vlgmr.msra.gmra.mxu1 %v3425_v32  ;;  %v3339_v21 = vld [vmem:[#allocation2 + $0x774] sm:$0xf0]  ;;  %v2903_v24 = vor.u32 %v3307_v19, %v2902_v18  ;;  %v2630_v27 = vld [vmem:[#allocation2 + $0x448] sm:$0xf]  ;;  %v2203_v19 = vor.u32 %v3129_v5, %v2200_v6 }
  0xac   :  { %1873 = vmatpush.bf16.msrb.mxu1 %v2839_v36  ;;  %1842 = vmatmul.bf16.vlgmr.msra.gmra.mxu2 %v3419_v25  ;;  %v3239_v28 = vld [vmem:[#allocation2 + $0x454] sm:$0xf0]  ;;  %v2758_v29 = vld [vmem:[#allocation2 + $0x548] sm:$0xf]  ;;  %v3031_v30 = vor.u32 %v3339_v21, %v3030_v20 }
  0xad   :  { %1886 = vmatpush.bf16.msrb.mxu2 %v2967_v37  ;;  %1855 = vmatmul.bf16.vlgmr.msra.gmra.mxu3 %v3423_v31  ;;  %v3271_v34 = vld [vmem:[#allocation2 + $0x554] sm:$0xf0]  ;;  %v2886_v35 = vld [vmem:[#allocation2 + $0x648] sm:$0xf]  ;;  %v2631_v41 = vor.u32 %v3239_v28, %v2630_v27  ;;  %v3157_v27 = vld [vmem:[#allocation2 + $0x1cc] sm:$0xf] }
  0xae   :  { %1899 = vmatpush.bf16.msrb.mxu3 %v3095_v44  ;;  %v3303_v36 = vld [vmem:[#allocation2 + $0x654] sm:$0xf0]  ;;  %v3014_v37 = vld [vmem:[#allocation2 + $0x748] sm:$0xf]  ;;  %v2759_v43 = vor.u32 %v3271_v34, %v2758_v29  ;;  %v2312_v34 = vld [vmem:[#allocation2 + $0x1d8] sm:$0xf0] }
  0xaf   :  { %1861 = vmatpush.bf16.msrb.mxu0 %v2695_v50  ;;  %v3335_v38 = vld [vmem:[#allocation2 + $0x754] sm:$0xf0]  ;;  %v2887_v44 = vor.u32 %v3303_v36, %v2886_v35  ;;  %v2614_v45 = vld [vmem:[#allocation2 + $0x428] sm:$0xf]  ;;  %v3189_v35 = vld [vmem:[#allocation2 + $0x2cc] sm:$0xf] }
  0xb0   :  { %1874 = vmatpush.bf16.msrb.mxu1 %v2823_v51  ;;  %v3235_v46 = vld [vmem:[#allocation2 + $0x434] sm:$0xf0]  ;;  %v2742_v47 = vld [vmem:[#allocation2 + $0x528] sm:$0xf]  ;;  %v3015_v48 = vor.u32 %v3335_v38, %v3014_v37  ;;  %v2440_v36 = vld [vmem:[#allocation2 + $0x2d8] sm:$0xf0] }
  0xb1   :  { %1887 = vmatpush.bf16.msrb.mxu2 %v2951_v52  ;;  %v3267_v49 = vld [vmem:[#allocation2 + $0x534] sm:$0xf0]  ;;  %v2870_v50 = vld [vmem:[#allocation2 + $0x628] sm:$0xf]  ;;  %v2615_v55 = vor.u32 %v3235_v46, %v2614_v45  ;;  %v3221_v38 = vld [vmem:[#allocation2 + $0x3cc] sm:$0xf]  ;;  %v2443_v45 = vor.u32 %v3189_v35, %v2440_v36 }
  0xb2   :  { %1900 = vmatpush.bf16.msrb.mxu3 %v3079_v56  ;;  %v3299_v51 = vld [vmem:[#allocation2 + $0x634] sm:$0xf0]  ;;  %v2998_v52 = vld [vmem:[#allocation2 + $0x728] sm:$0xf]  ;;  %v2743_v59 = vor.u32 %v3267_v49, %v2742_v47  ;;  %v3121_v46 = vld [vmem:[#allocation2 + $0xac] sm:$0xf] }
  0xb3   :  { %1862 = vmatpush.bf16.msrb.mxu0 %v2679_v62  ;;  %v3331_v53 = vld [vmem:[#allocation2 + $0x734] sm:$0xf0]  ;;  %v2598_v56 = vld [vmem:[#allocation2 + $0x408] sm:$0xf]  ;;  %v2871_v60 = vor.u32 %v3299_v51, %v2870_v50  ;;  %v2168_v47 = vld [vmem:[#allocation2 + $0xb8] sm:$0xf0] }
  0xb4   :  { %1875 = vmatpush.bf16.msrb.mxu1 %v2807_v63  ;;  %v3231_v57 = vld [vmem:[#allocation2 + $0x414] sm:$0xf0]  ;;  %v2726_v61 = vld [vmem:[#allocation2 + $0x508] sm:$0xf]  ;;  %v2999_v1 = vor.u32 %v3331_v53, %v2998_v52  ;;  %v2296_v51 = vld [vmem:[#allocation2 + $0x1b8] sm:$0xf0] }
  0xb5   :  { %1888 = vmatpush.bf16.msrb.mxu2 %v2935_v0  ;;  %v3263_v62 = vld [vmem:[#allocation2 + $0x514] sm:$0xf0]  ;;  %v2854_v63 = vld [vmem:[#allocation2 + $0x608] sm:$0xf]  ;;  %v2599_v9 = vor.u32 %v3231_v57, %v2598_v56  ;;  %v3185_v52 = vld [vmem:[#allocation2 + $0x2ac] sm:$0xf]  ;;  %v2171_v56 = vor.u32 %v3121_v46, %v2168_v47 }
  0xb6   :  { %1901 = vmatpush.bf16.msrb.mxu3 %v3063_v4  ;;  %v3295_v2 = vld [vmem:[#allocation2 + $0x614] sm:$0xf0]  ;;  %v2982_v3 = vld [vmem:[#allocation2 + $0x708] sm:$0xf]  ;;  %v2727_v14 = vor.u32 %v3263_v62, %v2726_v61  ;;  %v2424_v53 = vld [vmem:[#allocation2 + $0x2b8] sm:$0xf0] }
  0xb7   :  { %1863 = vmatpush.bf16.msrb.mxu0 %v2663_v10  ;;  %v3327_v4 = vld [vmem:[#allocation2 + $0x714] sm:$0xf0]  ;;  %v2328_v10 = vld [vmem:[#allocation2 + $0x1f8] sm:$0xf0]  ;;  %v2855_v15 = vor.u32 %v3295_v2, %v2854_v63  ;;  %v3149_v62 = vld [vmem:[#allocation2 + $0x18c] sm:$0xf] }
  0xb8   :  { %1876 = vmatpush.bf16.msrb.mxu1 %v2791_v11  ;;  %v1609_v54 = vpop.f32.mrf.mxu0  ;;  %v3193_v11 = vld [vmem:[#allocation2 + $0x2ec] sm:$0xf]  ;;  %v2983_v18 = vor.u32 %v3327_v4, %v2982_v3  ;;  %v2331_v21 = vor.u32 %v3161_v7, %v2328_v10  ;;  %v2152_v61 = vld [vmem:[#allocation2 + $0x98] sm:$0xf0] }
  0xb9   :  { %1889 = vmatpush.bf16.msrb.mxu2 %v2919_v12  ;;  %v1622_v58 = vpop.f32.mrf.mxu1  ;;  %v2456_v12 = vld [vmem:[#allocation2 + $0x2f8] sm:$0xf0]  ;;  %v3213_v3 = vld [vmem:[#allocation2 + $0x38c] sm:$0xf] }
  0xba   :  { %1902 = vmatpush.bf16.msrb.mxu3 %v3047_v16  ;;  %v1623_v0 = vadd.f32 %v1622_v58, %v1609_v54  ;;  %v3225_v16 = vld [vmem:[#allocation2 + $0x3ec] sm:$0xf]  ;;  %v2408_v2 = vld [vmem:[#allocation2 + $0x298] sm:$0xf0] }
  0xbb   :  { %1864 = vmatpush.bf16.msrb.mxu0 %v2647_v22  ;;  %v2459_v22 = vor.u32 %v3193_v11, %v2456_v12  ;;  %v3217_v54 = vld [vmem:[#allocation2 + $0x3ac] sm:$0xf]  ;;  %v2536_v4 = vld [vmem:[#allocation2 + $0x398] sm:$0xf0] }
  0xbc   :  { %1877 = vmatpush.bf16.msrb.mxu1 %v2775_v23  ;;  %v3125_v23 = vld [vmem:[#allocation2 + $0xcc] sm:$0xf]  ;;  %v2136_v11 = vld [vmem:[#allocation2 + $0x78] sm:$0xf0] }
  0xbd   :  { %1890 = vmatpush.bf16.msrb.mxu2 %v2903_v24  ;;  %v2184_v24 = vld [vmem:[#allocation2 + $0xd8] sm:$0xf0]  ;;  %v3113_v10 = vld [vmem:[#allocation2 + $0x6c] sm:$0xf] }
  0xbe   :  { %1903 = vmatpush.bf16.msrb.mxu3 %v3031_v30  ;;  %v1635_v8 = vpop.f32.mrf.mxu2  ;;  %v2587_v30 = vor.u32 %v3225_v16, %v2584_v17  ;;  %v3145_v12 = vld [vmem:[#allocation2 + $0x16c] sm:$0xf]  ;;  %v2392_v17 = vld [vmem:[#allocation2 + $0x278] sm:$0xf0] }
  0xbf   :  { %1865 = vmatpush.bf16.msrb.mxu0 %v2631_v41  ;;  %v1636_v13 = vadd.f32 %v1635_v8, %v1623_v0  ;;  %v1648_v20 = vpop.f32.mrf.mxu3  ;;  %v2568_v41 = vld [vmem:[#allocation2 + $0x3d8] sm:$0xf0]  ;;  %v3177_v16 = vld [vmem:[#allocation2 + $0x26c] sm:$0xf] }
  0xc0   :  { %1878 = vmatpush.bf16.msrb.mxu1 %v2759_v43  ;;  %v1611_v29 = vpop.f32.mrf.mxu0  ;;  %v2187_v43 = vor.u32 %v3125_v23, %v2184_v24  ;;  %v2571_v50 = vor.u32 %v3221_v38, %v2568_v41  ;;  %v2280_v0 = vld [vmem:[#allocation2 + $0x198] sm:$0xf0]  ;;  %v2395_v23 = vor.u32 %v3177_v16, %v2392_v17  ;;  %v3173_v36 = vld [vmem:[#allocation2 + $0x24c] sm:$0xf] }
  0xc1   :  { %1891 = vmatpush.bf16.msrb.mxu2 %v2887_v44  ;;  %v1649_v28 = vadd.f32 %v1648_v20, %v1636_v13  ;;  %v1624_v37 = vpop.f32.mrf.mxu1  ;;  %v2315_v44 = vor.u32 %v3157_v27, %v2312_v34  ;;  %v2283_v7 = vor.u32 %v3149_v62, %v2280_v0  ;;  %v3109_v27 = vld [vmem:[#allocation2 + $0x4c] sm:$0xf]  ;;  %v2248_v35 = vld [vmem:[#allocation2 + $0x158] sm:$0xf0] }
  0xc2   :  { %1904 = vmatpush.bf16.msrb.mxu3 %v3015_v48  ;;  %v3153_v48 = vld [vmem:[#allocation2 + $0x1ac] sm:$0xf]  ;;  %v2376_v37 = vld [vmem:[#allocation2 + $0x258] sm:$0xf0] }
  0xc3   :  { %1866 = vmatpush.bf16.msrb.mxu0 %v2615_v55  ;;  %v2552_v55 = vld [vmem:[#allocation2 + $0x3b8] sm:$0xf0]  ;;  %v2299_v58 = vor.u32 %v3153_v48, %v2296_v51  ;;  %v3141_v29 = vld [vmem:[#allocation2 + $0x14c] sm:$0xf]  ;;  %v2379_v48 = vor.u32 %v3173_v36, %v2376_v37 }
  0xc4   :  { %1879 = vmatpush.bf16.msrb.mxu1 %v2743_v59  ;;  %v2427_v59 = vor.u32 %v3185_v52, %v2424_v53  ;;  %v2555_v63 = vor.u32 %v3217_v54, %v2552_v55  ;;  %v3205_v41 = vld [vmem:[#allocation2 + $0x34c] sm:$0xf]  ;;  %v2251_v47 = vor.u32 %v3141_v29, %v2248_v35  ;;  %v2232_v54 = vld [vmem:[#allocation2 + $0x138] sm:$0xf0] }
  0xc5   :  { %1892 = vmatpush.bf16.msrb.mxu2 %v2871_v60  ;;  %v3117_v60 = vld [vmem:[#allocation2 + $0x8c] sm:$0xf]  ;;  %v2952_v35 = vld [vmem:[#allocation2 + $0x6d8] sm:$0xf0] }
  0xc6   :  { %1905 = vmatpush.bf16.msrb.mxu3 %v2999_v1  ;;  %v1637_v49 = vpop.f32.mrf.mxu2  ;;  %v3181_v1 = vld [vmem:[#allocation2 + $0x28c] sm:$0xf]  ;;  %v2155_v5 = vor.u32 %v3117_v60, %v2152_v61  ;;  %v2088_v61 = vld [vmem:[#allocation2 + $0x18] sm:$0xf0] }
  0xc7   :  { %1867 = vmatpush.bf16.msrb.mxu0 %v2599_v9  ;;  %v1650_v57 = vpop.f32.mrf.mxu3  ;;  %v2411_v8 = vor.u32 %v3181_v1, %v2408_v2  ;;  %v3105_v49 = vld [vmem:[#allocation2 + $0x2c] sm:$0xf]  ;;  %v2216_v1 = vld [vmem:[#allocation2 + $0x118] sm:$0xf0] }
  0xc8   :  { %1880 = vmatpush.bf16.msrb.mxu1 %v2727_v14  ;;  %v2539_v14 = vor.u32 %v3213_v3, %v2536_v4  ;;  %v3137_v51 = vld [vmem:[#allocation2 + $0x12c] sm:$0xf]  ;;  %v3080_v37 = vld [vmem:[#allocation2 + $0x7d8] sm:$0xf0] }
  0xc9   :  { %1893 = vmatpush.bf16.msrb.mxu2 %v2855_v15  ;;  %v2264_v15 = vld [vmem:[#allocation2 + $0x178] sm:$0xf0]  ;;  %v3169_v55 = vld [vmem:[#allocation2 + $0x22c] sm:$0xf]  ;;  %v2235_v62 = vor.u32 %v3137_v51, %v2232_v54 }
  0xca   :  { %1906 = vmatpush.bf16.msrb.mxu3 %v2983_v18  ;;  %1868 = vmatmul.bf16.vlgmr.msrb.gmra.mxu0 %v3436_v39  ;;  %v1661_v6 = vpop.f32.mrf.mxu0  ;;  %v3209_v18 = vld [vmem:[#allocation2 + $0x36c] sm:$0xf]  ;;  %v2936_v51 = vld [vmem:[#allocation2 + $0x6b8] sm:$0xf0] }
  0xcb   :  { %1912 = vmatpush.bf16.msra.mxu0 %v2203_v19  ;;  %1881 = vmatmul.bf16.vlgmr.msrb.gmra.mxu1 %v3440_v42  ;;  %v1662_v9 = vadd.f32 %v1661_v6, %v1649_v28  ;;  %v1674_v13 = vpop.f32.mrf.mxu1  ;;  %v2520_v19 = vld [vmem:[#allocation2 + $0x378] sm:$0xf0]  ;;  %v3201_v57 = vld [vmem:[#allocation2 + $0x32c] sm:$0xf] }
  0xcc   :  { %1925 = vmatpush.bf16.msra.mxu1 %v2331_v21  ;;  %1894 = vmatmul.bf16.vlgmr.msrb.gmra.mxu2 %v3434_v33  ;;  %v2139_v21 = vor.u32 %v3113_v10, %v2136_v11  ;;  %v2120_v28 = vld [vmem:[#allocation2 + $0x58] sm:$0xf0]  ;;  %v3101_v60 = vld [vmem:[#allocation2 + $0xc] sm:$0xf] }
  0xcd   :  { %1938 = vmatpush.bf16.msra.mxu2 %v2459_v22  ;;  %1907 = vmatmul.bf16.vlgmr.msrb.gmra.mxu3 %v3438_v40  ;;  %v1675_v20 = vadd.f32 %v1674_v13, %v1662_v9  ;;  %v2267_v22 = vor.u32 %v3145_v12, %v2264_v15  ;;  %v3133_v0 = vld [vmem:[#allocation2 + $0x10c] sm:$0xf]  ;;  %v2712_v10 = vld [vmem:[#allocation2 + $0x4f8] sm:$0xf0]  ;;  %v2091_v12 = vor.u32 %v3101_v60, %v2088_v61 }
  0xce   :  { %1951 = vmatpush.bf16.msra.mxu3 %v2587_v30  ;;  %v2523_v30 = vor.u32 %v3209_v18, %v2520_v19  ;;  %v3165_v2 = vld [vmem:[#allocation2 + $0x20c] sm:$0xf]  ;;  %v2840_v13 = vld [vmem:[#allocation2 + $0x5f8] sm:$0xf0]  ;;  %v2219_v16 = vor.u32 %v3133_v0, %v2216_v1 }
  0xcf   :  { %1913 = vmatpush.bf16.msra.mxu0 %v2187_v43  ;;  %v1687_v24 = vpop.f32.mrf.mxu2  ;;  %v2504_v43 = vld [vmem:[#allocation2 + $0x358] sm:$0xf0]  ;;  %v3197_v6 = vld [vmem:[#allocation2 + $0x30c] sm:$0xf] }
  0xd0   :  { %1926 = vmatpush.bf16.msra.mxu1 %v2315_v44  ;;  %v1688_v34 = vadd.f32 %v1687_v24, %v1675_v20  ;;  %v2123_v44 = vor.u32 %v3109_v27, %v2120_v28  ;;  %v2507_v53 = vor.u32 %v3205_v41, %v2504_v43  ;;  %v3257_v9 = vld [vmem:[#allocation2 + $0x4ec] sm:$0xf]  ;;  %v2968_v15 = vld [vmem:[#allocation2 + $0x6f8] sm:$0xf0] }
  0xd1   :  { %1939 = vmatpush.bf16.msra.mxu2 %v2443_v45  ;;  %v3289_v11 = vld [vmem:[#allocation2 + $0x5ec] sm:$0xf]  ;;  %v3096_v19 = vld [vmem:[#allocation2 + $0x7f8] sm:$0xf0] }
  0xd2   :  { %1952 = vmatpush.bf16.msra.mxu3 %v2571_v50  ;;  %v1700_v38 = vpop.f32.mrf.mxu3  ;;  %v1663_v46 = vpop.f32.mrf.mxu0  ;;  %v2104_v50 = vld [vmem:[#allocation2 + $0x38] sm:$0xf0]  ;;  %v3353_v18 = vld [vmem:[#allocation2 + $0x7ec] sm:$0xf] }
  0xd3   :  { %1914 = vmatpush.bf16.msra.mxu0 %v2171_v56  ;;  %v3462_v45 = vadd.f32 %v1700_v38, %v1688_v34  ;;  %v1676_v52 = vpop.f32.mrf.mxu1  ;;  %v2360_v56 = vld [vmem:[#allocation2 + $0x238] sm:$0xf0]  ;;  %v3253_v24 = vld [vmem:[#allocation2 + $0x4cc] sm:$0xf]  ;;  %v3099_v29 = vor.u32 %v3353_v18, %v3096_v19 }
  0xd4   :  { %1927 = vmatpush.bf16.msra.mxu1 %v2299_v58  ;;  %v2488_v58 = vld [vmem:[#allocation2 + $0x338] sm:$0xf0]  ;;  %v3285_v28 = vld [vmem:[#allocation2 + $0x5cc] sm:$0xf] }
  0xd5   :  { %1940 = vmatpush.bf16.msra.mxu2 %v2427_v59  ;;  %v2107_v59 = vor.u32 %v3105_v49, %v2104_v50  ;;  %v2491_v4 = vor.u32 %v3201_v57, %v2488_v58  ;;  %v2696_v27 = vld [vmem:[#allocation2 + $0x4d8] sm:$0xf0]  ;;  %v3317_v34 = vld [vmem:[#allocation2 + $0x6cc] sm:$0xf] }
  0xd6   :  { %1953 = vmatpush.bf16.msra.mxu3 %v2555_v63  ;;  %v2363_v63 = vor.u32 %v3169_v55, %v2360_v56  ;;  %v3349_v36 = vld [vmem:[#allocation2 + $0x7cc] sm:$0xf]  ;;  %v2699_v38 = vor.u32 %v3253_v24, %v2696_v27  ;;  %v2955_v43 = vor.u32 %v3317_v34, %v2952_v35  ;;  %v2680_v46 = vld [vmem:[#allocation2 + $0x4b8] sm:$0xf0] }
  0xd7   :  { %1915 = vmatpush.bf16.msra.mxu0 %v2155_v5  ;;  %v1689_v3 = vpop.f32.mrf.mxu2  ;;  %v2344_v5 = vld [vmem:[#allocation2 + $0x218] sm:$0xf0]  ;;  %v3313_v50 = vld [vmem:[#allocation2 + $0x6ac] sm:$0xf] }
  0xd8   :  { %1928 = vmatpush.bf16.msra.mxu1 %v2283_v7  ;;  %v2472_v7 = vld [vmem:[#allocation2 + $0x318] sm:$0xf0]  ;;  %v2347_v17 = vor.u32 %v3165_v2, %v2344_v5  ;;  %v3345_v52 = vld [vmem:[#allocation2 + $0x7ac] sm:$0xf]  ;;  %v2939_v56 = vor.u32 %v3313_v50, %v2936_v51 }
  0xd9   :  { %1941 = vmatpush.bf16.msra.mxu2 %v2411_v8  ;;  %v2475_v20 = vor.u32 %v3197_v6, %v2472_v7  ;;  %v2808_v49 = vld [vmem:[#allocation2 + $0x5b8] sm:$0xf0]  ;;  %v3245_v57 = vld [vmem:[#allocation2 + $0x48c] sm:$0xf] }
  0xda   :  { %1954 = vmatpush.bf16.msra.mxu3 %v2539_v14  ;;  %v1702_v8 = vpop.f32.mrf.mxu3  ;;  %v3321_v14 = vld [vmem:[#allocation2 + $0x6ec] sm:$0xf]  ;;  %v2664_v58 = vld [vmem:[#allocation2 + $0x498] sm:$0xf0] }
  0xdb   :  { %1916 = vmatpush.bf16.msra.mxu0 %v2139_v21  ;;  %v2715_v21 = vor.u32 %v3257_v9, %v2712_v10  ;;  %v2792_v60 = vld [vmem:[#allocation2 + $0x598] sm:$0xf0]  ;;  %v3309_v61 = vld [vmem:[#allocation2 + $0x68c] sm:$0xf] }
  0xdc   :  { %1929 = vmatpush.bf16.msra.mxu1 %v2267_v22  ;;  %v2843_v22 = vor.u32 %v3289_v11, %v2840_v13  ;;  %v3241_v2 = vld [vmem:[#allocation2 + $0x46c] sm:$0xf]  ;;  %v2648_v3 = vld [vmem:[#allocation2 + $0x478] sm:$0xf0] }
  0xdd   :  { %1942 = vmatpush.bf16.msra.mxu2 %v2395_v23  ;;  %v2971_v23 = vor.u32 %v3321_v14, %v2968_v15  ;;  %v2776_v7 = vld [vmem:[#allocation2 + $0x578] sm:$0xf0]  ;;  %v3305_v8 = vld [vmem:[#allocation2 + $0x66c] sm:$0xf]  ;;  %v2651_v13 = vor.u32 %v3241_v2, %v2648_v3  ;;  %v3475_v2 = vld [vmem:[%s3499_s2] sm:$0xf] }
  0xde   :  { %1955 = vmatpush.bf16.msra.mxu3 %v2523_v30  ;;  %v2824_v30 = vld [vmem:[#allocation2 + $0x5d8] sm:$0xf0]  ;;  %v3337_v11 = vld [vmem:[#allocation2 + $0x76c] sm:$0xf] }
  0xdf   :  { %1917 = vmatpush.bf16.msra.mxu0 %v2123_v44  ;;  %v2827_v41 = vor.u32 %v3285_v28, %v2824_v30  ;;  %v3249_v44 = vld [vmem:[#allocation2 + $0x4ac] sm:$0xf]  ;;  %v2904_v9 = vld [vmem:[#allocation2 + $0x678] sm:$0xf0] }
  0xe0   :  { %1930 = vmatpush.bf16.msra.mxu1 %v2251_v47  ;;  %v3281_v47 = vld [vmem:[#allocation2 + $0x5ac] sm:$0xf]  ;;  %v2683_v54 = vor.u32 %v3249_v44, %v2680_v46  ;;  %v2907_v15 = vor.u32 %v3305_v8, %v2904_v9  ;;  %v3000_v51 = vld [vmem:[#allocation2 + $0x738] sm:$0xf0] }
  0xe1   :  { %1943 = vmatpush.bf16.msra.mxu2 %v2379_v48  ;;  %v3083_v48 = vor.u32 %v3349_v36, %v3080_v37  ;;  %v2811_v55 = vor.u32 %v3281_v47, %v2808_v49  ;;  %v3269_v18 = vld [vmem:[#allocation2 + $0x54c] sm:$0xf]  ;;  %v2744_v47 = vld [vmem:[#allocation2 + $0x538] sm:$0xf0] }
  0xe2   :  { %1956 = vmatpush.bf16.msra.mxu3 %v2507_v53  ;;  %v3064_v53 = vld [vmem:[#allocation2 + $0x7b8] sm:$0xf0]  ;;  %v3333_v28 = vld [vmem:[#allocation2 + $0x74c] sm:$0xf] }
  0xe3   :  { %1918 = vmatpush.bf16.msra.mxu0 %v2107_v59  ;;  %v3067_v59 = vor.u32 %v3345_v52, %v3064_v53  ;;  %v2872_v49 = vld [vmem:[#allocation2 + $0x638] sm:$0xf0]  ;;  %v3329_v50 = vld [vmem:[#allocation2 + $0x72c] sm:$0xf] }
  0xe4   :  { %1931 = vmatpush.bf16.msra.mxu1 %v2235_v62  ;;  %v2920_v62 = vld [vmem:[#allocation2 + $0x698] sm:$0xf0] }
  0xe5   :  { %1944 = vmatpush.bf16.msra.mxu2 %v2363_v63  ;;  %v3341_v63 = vld [vmem:[#allocation2 + $0x78c] sm:$0xf]  ;;  %v2923_v1 = vor.u32 %v3309_v61, %v2920_v62  ;;  %v2856_v61 = vld [vmem:[#allocation2 + $0x618] sm:$0xf0] }
  0xe6   :  { %1957 = vmatpush.bf16.msra.mxu3 %v2491_v4  ;;  %v3273_v4 = vld [vmem:[#allocation2 + $0x56c] sm:$0xf] }
  0xe7   :  { %1919 = vmatpush.bf16.msra.mxu0 %v2091_v12  ;;  %v1713_v0 = vpop.f32.mrf.mxu0  ;;  %v3032_v12 = vld [vmem:[#allocation2 + $0x778] sm:$0xf0]  ;;  %v2779_v14 = vor.u32 %v3273_v4, %v2776_v7 }
  0xe8   :  { %1932 = vmatpush.bf16.msra.mxu1 %v2219_v16  ;;  %v1726_v5 = vpop.f32.mrf.mxu1  ;;  %v3237_v16 = vld [vmem:[#allocation2 + $0x44c] sm:$0xf] }
  0xe9   :  { %1945 = vmatpush.bf16.msra.mxu2 %v2347_v17  ;;  %v1727_v10 = vadd.f32 %v1726_v5, %v1713_v0  ;;  %v2632_v17 = vld [vmem:[#allocation2 + $0x458] sm:$0xf0] }
  0xea   :  { %1958 = vmatpush.bf16.msra.mxu3 %v2475_v20  ;;  %1920 = vmatmul.bf16.vlgmr.msra.gmra.mxu0 %v3421_v26  ;;  %v3048_v26 = vld [vmem:[#allocation2 + $0x798] sm:$0xf0]  ;;  %v3035_v20 = vor.u32 %v3337_v11, %v3032_v12  ;;  %v2635_v30 = vor.u32 %v3237_v16, %v2632_v17 }
  0xeb   :  { %1964 = vmatpush.bf16.msrb.mxu0 %v2715_v21  ;;  %1933 = vmatmul.bf16.vlgmr.msra.gmra.mxu1 %v3425_v32  ;;  %v3051_v6 = vor.u32 %v3341_v63, %v3048_v26  ;;  %v2760_v21 = vld [vmem:[#allocation2 + $0x558] sm:$0xf0]  ;;  %v3325_v63 = vld [vmem:[#allocation2 + $0x70c] sm:$0xf] }
  0xec   :  { %1977 = vmatpush.bf16.msrb.mxu1 %v2843_v22  ;;  %1946 = vmatmul.bf16.vlgmr.msra.gmra.mxu2 %v3419_v25  ;;  %v3277_v25 = vld [vmem:[#allocation2 + $0x58c] sm:$0xf]  ;;  %v2763_v36 = vor.u32 %v3269_v18, %v2760_v21  ;;  %v2984_v26 = vld [vmem:[#allocation2 + $0x718] sm:$0xf0] }
  0xed   :  { %1990 = vmatpush.bf16.msrb.mxu2 %v2971_v23  ;;  %1959 = vmatmul.bf16.vlgmr.msra.gmra.mxu3 %v3423_v31  ;;  %v2667_v31 = vor.u32 %v3245_v57, %v2664_v58  ;;  %v2795_v32 = vor.u32 %v3277_v25, %v2792_v60  ;;  %v3301_v22 = vld [vmem:[#allocation2 + $0x64c] sm:$0xf]  ;;  %v2888_v23 = vld [vmem:[#allocation2 + $0x658] sm:$0xf0]  ;;  %v3003_v25 = vor.u32 %v3329_v50, %v3000_v51 }
  0xee   :  { %2003 = vmatpush.bf16.msrb.mxu3 %v3099_v29  ;;  %v3016_v29 = vld [vmem:[#allocation2 + $0x758] sm:$0xf0]  ;;  %v2891_v37 = vor.u32 %v3301_v22, %v2888_v23  ;;  %v3261_v57 = vld [vmem:[#allocation2 + $0x50c] sm:$0xf] }
  0xef   :  { %1965 = vmatpush.bf16.msrb.mxu0 %v2699_v38  ;;  %v1739_v19 = vpop.f32.mrf.mxu2  ;;  %v1715_v35 = vpop.f32.mrf.mxu0  ;;  %v3233_v38 = vld [vmem:[#allocation2 + $0x42c] sm:$0xf]  ;;  %v3019_v46 = vor.u32 %v3333_v28, %v3016_v29 }
  0xf0   :  { %1978 = vmatpush.bf16.msrb.mxu1 %v2827_v41  ;;  %v1740_v24 = vadd.f32 %v1739_v19, %v1727_v10  ;;  %v1752_v27 = vpop.f32.mrf.mxu3  ;;  %v2616_v41 = vld [vmem:[#allocation2 + $0x438] sm:$0xf0]  ;;  %v1728_v44 = vpop.f32.mrf.mxu1  ;;  %v3293_v60 = vld [vmem:[#allocation2 + $0x60c] sm:$0xf]  ;;  %v2019_v10 = vperm.slane %v3475_v2, 1 }
  0xf1   :  { %1991 = vmatpush.bf16.msrb.mxu2 %v2955_v43  ;;  %v3265_v43 = vld [vmem:[#allocation2 + $0x52c] sm:$0xf]  ;;  %v2619_v52 = vor.u32 %v3233_v38, %v2616_v41 }
  0xf2   :  { %2004 = vmatpush.bf16.msrb.mxu3 %v3083_v48  ;;  %v1753_v34 = vadd.f32 %v1752_v27, %v1740_v24  ;;  %v3297_v48 = vld [vmem:[#allocation2 + $0x62c] sm:$0xf]  ;;  %v2747_v53 = vor.u32 %v3265_v43, %v2744_v47 }
  0xf3   :  { %1966 = vmatpush.bf16.msrb.mxu0 %v2683_v54  ;;  %v2875_v54 = vor.u32 %v3297_v48, %v2872_v49 }
  0xf4   :  { %1979 = vmatpush.bf16.msrb.mxu1 %v2811_v55  ;;  %v3229_v55 = vld [vmem:[#allocation2 + $0x40c] sm:$0xf] }
  0xf5   :  { %1992 = vmatpush.bf16.msrb.mxu2 %v2939_v56  ;;  %v2600_v56 = vld [vmem:[#allocation2 + $0x418] sm:$0xf0] }
  0xf6   :  { %2005 = vmatpush.bf16.msrb.mxu3 %v3067_v59  ;;  %v2728_v59 = vld [vmem:[#allocation2 + $0x518] sm:$0xf0] }
  0xf7   :  { %1967 = vmatpush.bf16.msrb.mxu0 %v2667_v31  ;;  %v1741_v58 = vpop.f32.mrf.mxu2  ;;  %v2603_v31 = vor.u32 %v3229_v55, %v2600_v56  ;;  %v2731_v0 = vor.u32 %v3261_v57, %v2728_v59 }
  0xf8   :  { %1980 = vmatpush.bf16.msrb.mxu1 %v2795_v32  ;;  %v1754_v62 = vpop.f32.mrf.mxu3  ;;  %v2859_v32 = vor.u32 %v3293_v60, %v2856_v61 }
  0xf9   :  { %1993 = vmatpush.bf16.msrb.mxu2 %v2923_v1  ;;  %v2987_v1 = vor.u32 %v3325_v63, %v2984_v26 }
  0xfa   :  { %2006 = vmatpush.bf16.msrb.mxu3 %v3051_v6  ;;  %v2018_v6 = vperm.slane %v3475_v2, 0 }
  0xfb   :  { %1968 = vmatpush.bf16.msrb.mxu0 %v2651_v13 }
  0xfc   :  { %1981 = vmatpush.bf16.msrb.mxu1 %v2779_v14 }
  0xfd   :  { %1994 = vmatpush.bf16.msrb.mxu2 %v2907_v15 }
  0xfe   :  { %2007 = vmatpush.bf16.msrb.mxu3 %v3035_v20 }
  0xff   :  { %1969 = vmatpush.bf16.msrb.mxu0 %v2635_v30 }
 0x100   :  { %1982 = vmatpush.bf16.msrb.mxu1 %v2763_v36 }
 0x101   :  { %1995 = vmatpush.bf16.msrb.mxu2 %v2891_v37 }
 0x102   :  { %2008 = vmatpush.bf16.msrb.mxu3 %v3019_v46 }
 0x103   :  { %1970 = vmatpush.bf16.msrb.mxu0 %v2619_v52 }
 0x104   :  { %1983 = vmatpush.bf16.msrb.mxu1 %v2747_v53 }
 0x105   :  { %1996 = vmatpush.bf16.msrb.mxu2 %v2875_v54 }
 0x106   :  { %2009 = vmatpush.bf16.msrb.mxu3 %v3003_v25 }
 0x107   :  { %1971 = vmatpush.bf16.msrb.mxu0 %v2603_v31  ;;  %v1765_v3 = vpop.f32.mrf.mxu0 }
 0x108   :  { %1984 = vmatpush.bf16.msrb.mxu1 %v2731_v0  ;;  %v1766_v4 = vadd.f32 %v1765_v3, %v1753_v34  ;;  %v1778_v5 = vpop.f32.mrf.mxu1  ;;  %v2020_v0 = vperm.slane %v3475_v2, 2 }
 0x109   :  { %1997 = vmatpush.bf16.msrb.mxu2 %v2859_v32 }
 0x10a   :  { %2010 = vmatpush.bf16.msrb.mxu3 %v2987_v1  ;;  %1972 = vmatmul.bf16.vlgmr.msrb.gmra.mxu0 %v3436_v39  ;;  %v3481_v39 = vld [vmem:[%s3500_s3] sm:$0xf] }
 0x10b   :  { %1985 = vmatmul.bf16.vlgmr.msrb.gmra.mxu1 %v3440_v42  ;;  %v1779_v42 = vadd.f32 %v1778_v5, %v1766_v4  ;;  %v2033_v12 = vperm.slane %v3481_v39, 1 }
 0x10c   :  { %1998 = vmatmul.bf16.vlgmr.msrb.gmra.mxu2 %v3434_v33  ;;  %v2026_v33 = vmul.f32 %v2018_v6, %v3462_v45  ;;  %v2034_v6 = vperm.slane %v3481_v39, 2 }
 0x10d   :  { %2011 = vmatmul.bf16.vlgmr.msrb.gmra.mxu3 %v3438_v40  ;;  %v2032_v40 = vperm.slane %v3481_v39, 0 }
 0x10f   :  { %v1791_v7 = vpop.f32.mrf.mxu2  ;;  %v1767_v13 = vpop.f32.mrf.mxu0  ;;  %v2040_v15 = vadd.f32 %v2032_v40, %v2026_v33 }
 0x110   :  { %v1792_v8 = vadd.f32 %v1791_v7, %v1779_v42  ;;  %v1804_v9 = vpop.f32.mrf.mxu3  ;;  %v1780_v14 = vpop.f32.mrf.mxu1  ;;  %v2035_v13 = vperm.slane %v3481_v39, 3 }
 0x111   :  { %v2048_v19 = vmul.f32 0.2, %v2040_v15  ;;  %vm2044_vm1 = vcmp.ge.f32.partialorder %v2040_v15, 0.0 }
 0x112   :  { %v1805_v11 = vadd.f32 %v1804_v9, %v1792_v8  ;;  %v2021_v9 = vperm.slane %v3475_v2, 3 }
 0x113   :  { %v2052_v23 = vsel %vm2044_vm1, %v2040_v15, %v2048_v19 }
 0x114   :  { %v2027_v16 = vmul.f32 %v2019_v10, %v1805_v11 }
 0x116   :  { %v2041_v17 = vadd.f32 %v2033_v12, %v2027_v16 }
 0x117   :  { %v1793_v18 = vpop.f32.mrf.mxu2 }
 0x118   :  { %vm2045_vm0 = vcmp.ge.f32.partialorder %v2041_v17, 0.0  ;;  %v2049_v20 = vmul.f32 0.2, %v2041_v17  ;;  %v1806_v21 = vpop.f32.mrf.mxu3 }
 0x11a   :  { %v2053_v45 = vsel %vm2045_vm0, %v2041_v17, %v2049_v20 }
 0x11b   :  { %v2060_v22 = vrot.slane %v2053_v45, 6 }
 0x11d   :  { %v3487_v24 = vsel %vm2063_vm2, %v2052_v23, %v2060_v22 }
 0x127   :  { %v1817_v27 = vpop.f32.mrf.mxu0 }
 0x128   :  { %v1830_v28 = vpop.f32.mrf.mxu1 }
 0x129   :  { %v1831_v29 = vadd.f32 %v1830_v28, %v1817_v27 }
 0x12f   :  { %v1843_v30 = vpop.f32.mrf.mxu2  ;;  %v1819_v37 = vpop.f32.mrf.mxu0 }
 0x130   :  { %v1844_v34 = vadd.f32 %v1843_v30, %v1831_v29  ;;  %v1856_v35 = vpop.f32.mrf.mxu3  ;;  %v1832_v38 = vpop.f32.mrf.mxu1 }
 0x132   :  { %v1857_v36 = vadd.f32 %v1856_v35, %v1844_v34 }
 0x137   :  { %v1845_v41 = vpop.f32.mrf.mxu2 }
 0x138   :  { %v1858_v43 = vpop.f32.mrf.mxu3 }
 0x147   :  { %v1869_v44 = vpop.f32.mrf.mxu0 }
 0x148   :  { %v1882_v46 = vpop.f32.mrf.mxu1  ;;  %v1870_v60 = vadd.f32 %v1869_v44, %v1857_v36 }
 0x14a   :  { %v1883_v61 = vadd.f32 %v1882_v46, %v1870_v60 }
 0x14f   :  { %v1895_v47 = vpop.f32.mrf.mxu2  ;;  %v1871_v49 = vpop.f32.mrf.mxu0 }
 0x150   :  { %v1908_v48 = vpop.f32.mrf.mxu3  ;;  %v1884_v50 = vpop.f32.mrf.mxu1  ;;  %v1896_v63 = vadd.f32 %v1895_v47, %v1883_v61 }
 0x152   :  { %v1909_v31 = vadd.f32 %v1908_v48, %v1896_v63 }
 0x154   :  { %v2028_v5 = vmul.f32 %v2020_v0, %v1909_v31 }
 0x156   :  { %v2042_v33 = vadd.f32 %v2034_v6, %v2028_v5 }
 0x157   :  { %v1897_v51 = vpop.f32.mrf.mxu2 }
 0x158   :  { %v1910_v52 = vpop.f32.mrf.mxu3  ;;  %v2050_v14 = vmul.f32 0.2, %v2042_v33  ;;  %vm2046_vm3 = vcmp.ge.f32.partialorder %v2042_v33, 0.0 }
 0x15a   :  { %v2054_v18 = vsel %vm2046_vm3, %v2042_v33, %v2050_v14 }
 0x15b   :  { %v2061_v45 = vrot.slane %v2054_v18, 4 }
 0x167   :  { %v1921_v53 = vpop.f32.mrf.mxu0 }
 0x168   :  { %v1934_v54 = vpop.f32.mrf.mxu1 }
 0x169   :  { %v1935_v62 = vadd.f32 %v1934_v54, %v1921_v53 }
 0x16f   :  { %v1947_v55 = vpop.f32.mrf.mxu2  ;;  %v1923_v57 = vpop.f32.mrf.mxu0 }
 0x170   :  { %v1960_v56 = vpop.f32.mrf.mxu3  ;;  %v1936_v58 = vpop.f32.mrf.mxu1  ;;  %v1948_v26 = vadd.f32 %v1947_v55, %v1935_v62 }
 0x172   :  { %v1961_v32 = vadd.f32 %v1960_v56, %v1948_v26 }
 0x177   :  { %v1949_v25 = vpop.f32.mrf.mxu2 }
 0x178   :  { %v1962_v59 = vpop.f32.mrf.mxu3 }
 0x187   :  { %v1973_v1 = vpop.f32.mrf.mxu0 }
 0x188   :  { %v1986_v3 = vpop.f32.mrf.mxu1  ;;  %v1974_v4 = vadd.f32 %v1973_v1, %v1961_v32 }
 0x18a   :  { %v1987_v42 = vadd.f32 %v1986_v3, %v1974_v4 }
 0x18f   :  { %v1999_v7 = vpop.f32.mrf.mxu2  ;;  %v1975_v10 = vpop.f32.mrf.mxu0 }
 0x190   :  { %v2000_v40 = vadd.f32 %v1999_v7, %v1987_v42  ;;  %v2012_v8 = vpop.f32.mrf.mxu3  ;;  %v1988_v11 = vpop.f32.mrf.mxu1 }
 0x192   :  { %v2013_v12 = vadd.f32 %v2012_v8, %v2000_v40 }
 0x194   :  { %v2029_v15 = vmul.f32 %v2021_v9, %v2013_v12 }
 0x196   :  { %v2043_v16 = vadd.f32 %v2035_v13, %v2029_v15 }
 0x197   :  { %v2001_v17 = vpop.f32.mrf.mxu2 }
 0x198   :  { %vm2047_vm4 = vcmp.ge.f32.partialorder %v2043_v16, 0.0  ;;  %v2051_v19 = vmul.f32 0.2, %v2043_v16  ;;  %v2014_v20 = vpop.f32.mrf.mxu3 }
 0x19a   :  { %v2055_v21 = vsel %vm2047_vm4, %v2043_v16, %v2051_v19 }
 0x19b   :  { %v2062_v22 = vrot.slane %v2055_v21, 2 }
 0x19d   :  { %v2066_v2 = vsel %vm2065_vm5, %v2061_v45, %v2062_v22 }
 0x19e   :  { %v2068_v23 = vsel %vm2067_vm6, %v3487_v24, %v2066_v2 }
 0x19f   :  { %2070 = vst [vmem:[%s3501_s4] sm:$0xff] %v2068_v23 }
 0x1a0   :  { %2075 = vsyncpa [#allocation3], 1 }

// kernel: forward.24
= control target key start
LH: loop header
LB: loop body
LE: loop exit
PB: predicated region body
PF: predicated region fallthrough
CT: control target
= control target key end

     0   :  { %vm545_vm2 = vcmask 1041408   ;;  %s1310_s1 = inlined_call_operand.vmem [shape: bf16[512,256], index: 1, kind: input, shape index: {}]   ;;  %s1311_s0 = inlined_call_operand.vmem [shape: f32[2,512], index: 0, kind: input, shape index: {}]   ;;  %s1312_s2 = inlined_call_operand.vmem [shape: f32[1,256], index: 2, kind: input, shape index: {}]   ;;  %s1313_s3 = inlined_call_operand.vmem [shape: f32[1,256], index: 3, kind: input, shape index: {}]   ;;  %s1314_s4 = inlined_call_operand.vmem [shape: f32[2,256], index: 4, kind: output, shape index: {}]  }
   0x1   :  { %v611_v0 = vld [vmem:[%s1310_s1 + $0x70] sm:$0xf]  ;;  %v824_v1 = vld [vmem:[%s1310_s1 + $0x74] sm:$0xf0]  ;;  %v603_v11 = vld [vmem:[%s1310_s1 + $0x60] sm:$0xf] }
   0x2   :  { %v675_v2 = vld [vmem:[%s1310_s1 + $0xf0] sm:$0xf]  ;;  %v612_v3 = vor.u32 %v824_v1, %v611_v0  ;;  %v840_v4 = vld [vmem:[%s1310_s1 + $0xf4] sm:$0xf0]  ;;  %v822_v13 = vld [vmem:[%s1310_s1 + $0x64] sm:$0xf0] }
   0x3   :  { %v739_v5 = vld [vmem:[%s1310_s1 + $0x170] sm:$0xf]  ;;  %v856_v6 = vld [vmem:[%s1310_s1 + $0x174] sm:$0xf0]  ;;  %v676_v7 = vor.u32 %v840_v4, %v675_v2  ;;  %v667_v14 = vld [vmem:[%s1310_s1 + $0xe0] sm:$0xf]  ;;  %v604_v16 = vor.u32 %v822_v13, %v603_v11 }
   0x4   :  { %v740_v8 = vor.u32 %v856_v6, %v739_v5  ;;  %v803_v9 = vld [vmem:[%s1310_s1 + $0x1f0] sm:$0xf]  ;;  %v872_v10 = vld [vmem:[%s1310_s1 + $0x1f4] sm:$0xf0]  ;;  %416 = vmatpush.bf16.msra.mxu0 %v612_v3  ;;  %v838_v15 = vld [vmem:[%s1310_s1 + $0xe4] sm:$0xf0] }
   0x5   :  { %v804_v12 = vor.u32 %v872_v10, %v803_v9  ;;  %429 = vmatpush.bf16.msra.mxu1 %v676_v7  ;;  %v668_v17 = vor.u32 %v838_v15, %v667_v14  ;;  %v731_v18 = vld [vmem:[%s1310_s1 + $0x160] sm:$0xf]  ;;  %v854_v19 = vld [vmem:[%s1310_s1 + $0x164] sm:$0xf0]  ;;  %v595_v23 = vld [vmem:[%s1310_s1 + $0x50] sm:$0xf] }
   0x6   :  { %442 = vmatpush.bf16.msra.mxu2 %v740_v8  ;;  %v795_v20 = vld [vmem:[%s1310_s1 + $0x1e0] sm:$0xf]  ;;  %v732_v21 = vor.u32 %v854_v19, %v731_v18  ;;  %v870_v22 = vld [vmem:[%s1310_s1 + $0x1e4] sm:$0xf0]  ;;  %v820_v24 = vld [vmem:[%s1310_s1 + $0x54] sm:$0xf0] }
   0x7   :  { %455 = vmatpush.bf16.msra.mxu3 %v804_v12  ;;  %v796_v25 = vor.u32 %v870_v22, %v795_v20  ;;  %v659_v26 = vld [vmem:[%s1310_s1 + $0xd0] sm:$0xf]  ;;  %v836_v27 = vld [vmem:[%s1310_s1 + $0xd4] sm:$0xf0]  ;;  %v596_v29 = vor.u32 %v820_v24, %v595_v23  ;;  %v587_v35 = vld [vmem:[%s1310_s1 + $0x40] sm:$0xf] }
   0x8   :  { %v723_v28 = vld [vmem:[%s1310_s1 + $0x150] sm:$0xf]  ;;  %417 = vmatpush.bf16.msra.mxu0 %v604_v16  ;;  %v852_v30 = vld [vmem:[%s1310_s1 + $0x154] sm:$0xf0]  ;;  %v660_v33 = vor.u32 %v836_v27, %v659_v26  ;;  %v818_v36 = vld [vmem:[%s1310_s1 + $0x44] sm:$0xf0] }
   0x9   :  { %v787_v31 = vld [vmem:[%s1310_s1 + $0x1d0] sm:$0xf]  ;;  %v868_v32 = vld [vmem:[%s1310_s1 + $0x1d4] sm:$0xf0]  ;;  %430 = vmatpush.bf16.msra.mxu1 %v668_v17  ;;  %v724_v34 = vor.u32 %v852_v30, %v723_v28  ;;  %v651_v37 = vld [vmem:[%s1310_s1 + $0xc0] sm:$0xf]  ;;  %v588_v44 = vor.u32 %v818_v36, %v587_v35 }
   0xa   :  { %443 = vmatpush.bf16.msra.mxu2 %v732_v21  ;;  %v788_v38 = vor.u32 %v868_v32, %v787_v31  ;;  %v834_v39 = vld [vmem:[%s1310_s1 + $0xc4] sm:$0xf0]  ;;  %v715_v40 = vld [vmem:[%s1310_s1 + $0x140] sm:$0xf]  ;;  %v579_v47 = vld [vmem:[%s1310_s1 + $0x30] sm:$0xf] }
   0xb   :  { %456 = vmatpush.bf16.msra.mxu3 %v796_v25  ;;  %v850_v41 = vld [vmem:[%s1310_s1 + $0x144] sm:$0xf0]  ;;  %v779_v42 = vld [vmem:[%s1310_s1 + $0x1c0] sm:$0xf]  ;;  %v652_v45 = vor.u32 %v834_v39, %v651_v37  ;;  %v816_v48 = vld [vmem:[%s1310_s1 + $0x34] sm:$0xf0] }
   0xc   :  { %v866_v43 = vld [vmem:[%s1310_s1 + $0x1c4] sm:$0xf0]  ;;  %418 = vmatpush.bf16.msra.mxu0 %v596_v29  ;;  %v716_v46 = vor.u32 %v850_v41, %v715_v40  ;;  %v643_v49 = vld [vmem:[%s1310_s1 + $0xb0] sm:$0xf]  ;;  %v832_v51 = vld [vmem:[%s1310_s1 + $0xb4] sm:$0xf0]  ;;  %v580_v56 = vor.u32 %v816_v48, %v579_v47 }
   0xd   :  { %431 = vmatpush.bf16.msra.mxu1 %v660_v33  ;;  %v780_v50 = vor.u32 %v866_v43, %v779_v42  ;;  %v707_v52 = vld [vmem:[%s1310_s1 + $0x130] sm:$0xf]  ;;  %v848_v53 = vld [vmem:[%s1310_s1 + $0x134] sm:$0xf0]  ;;  %v644_v57 = vor.u32 %v832_v51, %v643_v49  ;;  %v571_v59 = vld [vmem:[%s1310_s1 + $0x20] sm:$0xf] }
   0xe   :  { %444 = vmatpush.bf16.msra.mxu2 %v724_v34  ;;  %v771_v54 = vld [vmem:[%s1310_s1 + $0x1b0] sm:$0xf]  ;;  %v864_v55 = vld [vmem:[%s1310_s1 + $0x1b4] sm:$0xf0]  ;;  %v708_v58 = vor.u32 %v848_v53, %v707_v52  ;;  %v814_v60 = vld [vmem:[%s1310_s1 + $0x24] sm:$0xf0] }
   0xf   :  { %457 = vmatpush.bf16.msra.mxu3 %v788_v38  ;;  %v635_v61 = vld [vmem:[%s1310_s1 + $0xa0] sm:$0xf]  ;;  %v772_v62 = vor.u32 %v864_v55, %v771_v54  ;;  %v830_v63 = vld [vmem:[%s1310_s1 + $0xa4] sm:$0xf0]  ;;  %v572_v4 = vor.u32 %v814_v60, %v571_v59  ;;  %v563_v7 = vld [vmem:[%s1310_s1 + $0x10] sm:$0xf] }
  0x10   :  { %419 = vmatpush.bf16.msra.mxu0 %v588_v44  ;;  %v699_v0 = vld [vmem:[%s1310_s1 + $0x120] sm:$0xf]  ;;  %v846_v1 = vld [vmem:[%s1310_s1 + $0x124] sm:$0xf0]  ;;  %v636_v5 = vor.u32 %v830_v63, %v635_v61  ;;  %v812_v8 = vld [vmem:[%s1310_s1 + $0x14] sm:$0xf0] }
  0x11   :  { %432 = vmatpush.bf16.msra.mxu1 %v652_v45  ;;  %v763_v2 = vld [vmem:[%s1310_s1 + $0x1a0] sm:$0xf]  ;;  %v862_v3 = vld [vmem:[%s1310_s1 + $0x1a4] sm:$0xf0]  ;;  %v700_v6 = vor.u32 %v846_v1, %v699_v0  ;;  %v627_v9 = vld [vmem:[%s1310_s1 + $0x90] sm:$0xf]  ;;  %v564_v17 = vor.u32 %v812_v8, %v563_v7 }
  0x12   :  { %445 = vmatpush.bf16.msra.mxu2 %v716_v46  ;;  %v764_v10 = vor.u32 %v862_v3, %v763_v2  ;;  %v828_v11 = vld [vmem:[%s1310_s1 + $0x94] sm:$0xf0]  ;;  %v691_v12 = vld [vmem:[%s1310_s1 + $0x110] sm:$0xf]  ;;  %v555_v16 = vld [vmem:[%s1310_s1] sm:$0xf] }
  0x13   :  { %458 = vmatpush.bf16.msra.mxu3 %v780_v50  ;;  %v844_v13 = vld [vmem:[%s1310_s1 + $0x114] sm:$0xf0]  ;;  %v755_v14 = vld [vmem:[%s1310_s1 + $0x190] sm:$0xf]  ;;  %v810_v18 = vld [vmem:[%s1310_s1 + $0x4] sm:$0xf0]  ;;  %v628_v21 = vor.u32 %v828_v11, %v627_v9 }
  0x14   :  { %420 = vmatpush.bf16.msra.mxu0 %v580_v56  ;;  %v860_v15 = vld [vmem:[%s1310_s1 + $0x194] sm:$0xf0]  ;;  %v619_v19 = vld [vmem:[%s1310_s1 + $0x80] sm:$0xf]  ;;  %v826_v20 = vld [vmem:[%s1310_s1 + $0x84] sm:$0xf0]  ;;  %v692_v22 = vor.u32 %v844_v13, %v691_v12  ;;  %v556_v33 = vor.u32 %v810_v18, %v555_v16 }
  0x15   :  { %433 = vmatpush.bf16.msra.mxu1 %v644_v57  ;;  %v683_v23 = vld [vmem:[%s1310_s1 + $0x100] sm:$0xf]  ;;  %v842_v24 = vld [vmem:[%s1310_s1 + $0x104] sm:$0xf0]  ;;  %v756_v26 = vor.u32 %v860_v15, %v755_v14  ;;  %v823_v28 = vld [vmem:[%s1310_s1 + $0x74] sm:$0xf]  ;;  %v620_v36 = vor.u32 %v826_v20, %v619_v19 }
  0x16   :  { %446 = vmatpush.bf16.msra.mxu2 %v708_v58  ;;  %v747_v25 = vld [vmem:[%s1310_s1 + $0x180] sm:$0xf]  ;;  %v858_v27 = vld [vmem:[%s1310_s1 + $0x184] sm:$0xf0]  ;;  %v613_v29 = vld [vmem:[%s1310_s1 + $0x78] sm:$0xf0]  ;;  %v684_v37 = vor.u32 %v842_v24, %v683_v23 }
  0x17   :  { %459 = vmatpush.bf16.msra.mxu3 %v772_v62  ;;  %v839_v30 = vld [vmem:[%s1310_s1 + $0xf4] sm:$0xf]  ;;  %v677_v31 = vld [vmem:[%s1310_s1 + $0xf8] sm:$0xf0]  ;;  %v17_v32 = vld [vmem:[%s1311_s0] sm:$0xff]  ;;  %v748_v40 = vor.u32 %v858_v27, %v747_v25  ;;  %v616_v41 = vor.u32 %v823_v28, %v613_v29 }
  0x18   :  { %421 = vmatpush.bf16.msra.mxu0 %v572_v4  ;;  %v855_v34 = vld [vmem:[%s1310_s1 + $0x174] sm:$0xf]  ;;  %v741_v35 = vld [vmem:[%s1310_s1 + $0x178] sm:$0xf0]  ;;  %19 = vst [vmem:[#allocation1] ss:$4 sm:$0xff] %v17_v32  ;;  %v680_v43 = vor.u32 %v839_v30, %v677_v31 }
  0x19   :  { %434 = vmatpush.bf16.msra.mxu1 %v636_v5  ;;  %v871_v38 = vld [vmem:[%s1310_s1 + $0x1f4] sm:$0xf]  ;;  %v805_v39 = vld [vmem:[%s1310_s1 + $0x1f8] sm:$0xf0]  ;;  %v821_v42 = vld [vmem:[%s1310_s1 + $0x64] sm:$0xf]  ;;  %v744_v44 = vor.u32 %v855_v34, %v741_v35 }
  0x1a   :  { %447 = vmatpush.bf16.msra.mxu2 %v700_v6  ;;  %v605_v45 = vld [vmem:[%s1310_s1 + $0x68] sm:$0xf0]  ;;  %v837_v46 = vld [vmem:[%s1310_s1 + $0xe4] sm:$0xf]  ;;  %v808_v48 = vor.u32 %v871_v38, %v805_v39  ;;  %v819_v53 = vld [vmem:[%s1310_s1 + $0x54] sm:$0xf] }
  0x1b   :  { %460 = vmatpush.bf16.msra.mxu3 %v764_v10  ;;  %v669_v47 = vld [vmem:[%s1310_s1 + $0xe8] sm:$0xf0]  ;;  %v853_v49 = vld [vmem:[%s1310_s1 + $0x164] sm:$0xf]  ;;  %v597_v54 = vld [vmem:[%s1310_s1 + $0x58] sm:$0xf0]  ;;  %v608_v55 = vor.u32 %v821_v42, %v605_v45 }
  0x1c   :  { %422 = vmatpush.bf16.msra.mxu0 %v564_v17  ;;  %v733_v50 = vld [vmem:[%s1310_s1 + $0x168] sm:$0xf0]  ;;  %v869_v51 = vld [vmem:[%s1310_s1 + $0x1e4] sm:$0xf]  ;;  %v835_v56 = vld [vmem:[%s1310_s1 + $0xd4] sm:$0xf]  ;;  %v672_v60 = vor.u32 %v837_v46, %v669_v47  ;;  %v600_v9 = vor.u32 %v819_v53, %v597_v54 }
  0x1d   :  { %435 = vmatpush.bf16.msra.mxu1 %v628_v21  ;;  %v797_v52 = vld [vmem:[%s1310_s1 + $0x1e8] sm:$0xf0]  ;;  %v661_v57 = vld [vmem:[%s1310_s1 + $0xd8] sm:$0xf0]  ;;  %v851_v58 = vld [vmem:[%s1310_s1 + $0x154] sm:$0xf]  ;;  %v736_v61 = vor.u32 %v853_v49, %v733_v50 }
  0x1e   :  { %448 = vmatpush.bf16.msra.mxu2 %v692_v22  ;;  %v725_v59 = vld [vmem:[%s1310_s1 + $0x158] sm:$0xf0]  ;;  %v800_v0 = vor.u32 %v869_v51, %v797_v52  ;;  %v867_v4 = vld [vmem:[%s1310_s1 + $0x1d4] sm:$0xf]  ;;  %v664_v10 = vor.u32 %v835_v56, %v661_v57  ;;  %v817_v12 = vld [vmem:[%s1310_s1 + $0x44] sm:$0xf] }
  0x1f   :  { %461 = vmatpush.bf16.msra.mxu3 %v756_v26  ;;  %v22_v62 = vld.sshfl [vmem:[#allocation1 + $0x10] sm:$0xff pattern:$0x73625140]  ;;  %v23_v63 = vld.sshfl [vmem:[#allocation1 + $0x18] sm:$0xff pattern:$0x73625140]  ;;  %v728_v11 = vor.u32 %v851_v58, %v725_v59 }
  0x20   :  { %423 = vmatpush.bf16.msra.mxu0 %v556_v33  ;;  %v1159_v1 = vpack.c.bf16 %v22_v62, %v22_v62  ;;  %v20_v2 = vld.sshfl [vmem:[#allocation1] sm:$0xff pattern:$0x73625140]  ;;  %v21_v3 = vld.sshfl [vmem:[#allocation1 + $0x8] sm:$0xff pattern:$0x73625140]  ;;  %v1167_v6 = vpack.c.bf16 %v23_v63, %v23_v63 }
  0x21   :  { %436 = vmatpush.bf16.msra.mxu1 %v620_v36  ;;  %v789_v5 = vld [vmem:[%s1310_s1 + $0x1d8] sm:$0xf0]  ;;  %v1169_v7 = vpack.c.bf16 %v20_v2, %v20_v2  ;;  %v1171_v8 = vpack.c.bf16 %v21_v3, %v21_v3  ;;  %v589_v13 = vld [vmem:[%s1310_s1 + $0x48] sm:$0xf0]  ;;  %v833_v14 = vld [vmem:[%s1310_s1 + $0xc4] sm:$0xf] }
  0x22   :  { %449 = vmatpush.bf16.msra.mxu2 %v684_v37  ;;  %v792_v15 = vor.u32 %v867_v4, %v789_v5  ;;  %v653_v16 = vld [vmem:[%s1310_s1 + $0xc8] sm:$0xf0]  ;;  %v849_v17 = vld [vmem:[%s1310_s1 + $0x144] sm:$0xf]  ;;  %v592_v21 = vor.u32 %v817_v12, %v589_v13  ;;  %v815_v24 = vld [vmem:[%s1310_s1 + $0x34] sm:$0xf] }
  0x23   :  { %462 = vmatpush.bf16.msra.mxu3 %v748_v40  ;;  %424 = vmatmul.bf16.vlgmr.msra.gmra.mxu0 %v1169_v7  ;;  %v717_v18 = vld [vmem:[%s1310_s1 + $0x148] sm:$0xf0]  ;;  %v865_v19 = vld [vmem:[%s1310_s1 + $0x1c4] sm:$0xf]  ;;  %v656_v22 = vor.u32 %v833_v14, %v653_v16  ;;  %v581_v25 = vld [vmem:[%s1310_s1 + $0x38] sm:$0xf0] }
  0x24   :  { %468 = vmatpush.bf16.msrb.mxu0 %v616_v41  ;;  %437 = vmatmul.bf16.vlgmr.msra.gmra.mxu1 %v1171_v8  ;;  %v781_v20 = vld [vmem:[%s1310_s1 + $0x1c8] sm:$0xf0]  ;;  %v720_v23 = vor.u32 %v849_v17, %v717_v18  ;;  %v831_v26 = vld [vmem:[%s1310_s1 + $0xb4] sm:$0xf]  ;;  %v645_v28 = vld [vmem:[%s1310_s1 + $0xb8] sm:$0xf0]  ;;  %v584_v33 = vor.u32 %v815_v24, %v581_v25 }
  0x25   :  { %481 = vmatpush.bf16.msrb.mxu1 %v680_v43  ;;  %450 = vmatmul.bf16.vlgmr.msra.gmra.mxu2 %v1159_v1  ;;  %v784_v27 = vor.u32 %v865_v19, %v781_v20  ;;  %v847_v29 = vld [vmem:[%s1310_s1 + $0x134] sm:$0xf]  ;;  %v709_v30 = vld [vmem:[%s1310_s1 + $0x138] sm:$0xf0]  ;;  %v648_v34 = vor.u32 %v831_v26, %v645_v28  ;;  %v813_v36 = vld [vmem:[%s1310_s1 + $0x24] sm:$0xf] }
  0x26   :  { %494 = vmatpush.bf16.msrb.mxu2 %v744_v44  ;;  %463 = vmatmul.bf16.vlgmr.msra.gmra.mxu3 %v1167_v6  ;;  %v863_v31 = vld [vmem:[%s1310_s1 + $0x1b4] sm:$0xf]  ;;  %v773_v32 = vld [vmem:[%s1310_s1 + $0x1b8] sm:$0xf0]  ;;  %v712_v35 = vor.u32 %v847_v29, %v709_v30  ;;  %v573_v37 = vld [vmem:[%s1310_s1 + $0x28] sm:$0xf0] }
  0x27   :  { %507 = vmatpush.bf16.msrb.mxu3 %v808_v48  ;;  %v829_v38 = vld [vmem:[%s1310_s1 + $0xa4] sm:$0xf]  ;;  %v776_v39 = vor.u32 %v863_v31, %v773_v32  ;;  %v637_v40 = vld [vmem:[%s1310_s1 + $0xa8] sm:$0xf0]  ;;  %v576_v45 = vor.u32 %v813_v36, %v573_v37  ;;  %v811_v48 = vld [vmem:[%s1310_s1 + $0x14] sm:$0xf] }
  0x28   :  { %469 = vmatpush.bf16.msrb.mxu0 %v608_v55  ;;  %v845_v41 = vld [vmem:[%s1310_s1 + $0x124] sm:$0xf]  ;;  %v701_v42 = vld [vmem:[%s1310_s1 + $0x128] sm:$0xf0]  ;;  %v640_v46 = vor.u32 %v829_v38, %v637_v40  ;;  %v565_v49 = vld [vmem:[%s1310_s1 + $0x18] sm:$0xf0] }
  0x29   :  { %482 = vmatpush.bf16.msrb.mxu1 %v672_v60  ;;  %v861_v43 = vld [vmem:[%s1310_s1 + $0x1a4] sm:$0xf]  ;;  %v765_v44 = vld [vmem:[%s1310_s1 + $0x1a8] sm:$0xf0]  ;;  %v704_v47 = vor.u32 %v845_v41, %v701_v42  ;;  %v827_v50 = vld [vmem:[%s1310_s1 + $0x94] sm:$0xf]  ;;  %v568_v57 = vor.u32 %v811_v48, %v565_v49 }
  0x2a   :  { %495 = vmatpush.bf16.msrb.mxu2 %v736_v61  ;;  %v768_v51 = vor.u32 %v861_v43, %v765_v44  ;;  %v629_v52 = vld [vmem:[%s1310_s1 + $0x98] sm:$0xf0]  ;;  %v843_v53 = vld [vmem:[%s1310_s1 + $0x114] sm:$0xf]  ;;  %v809_v60 = vld [vmem:[%s1310_s1 + $0x4] sm:$0xf] }
  0x2b   :  { %508 = vmatpush.bf16.msrb.mxu3 %v800_v0  ;;  %v693_v54 = vld [vmem:[%s1310_s1 + $0x118] sm:$0xf0]  ;;  %v859_v55 = vld [vmem:[%s1310_s1 + $0x194] sm:$0xf]  ;;  %v632_v58 = vor.u32 %v827_v50, %v629_v52  ;;  %v557_v61 = vld [vmem:[%s1310_s1 + $0x8] sm:$0xf0] }
  0x2c   :  { %470 = vmatpush.bf16.msrb.mxu0 %v600_v9  ;;  %v757_v56 = vld [vmem:[%s1310_s1 + $0x198] sm:$0xf0]  ;;  %v696_v59 = vor.u32 %v843_v53, %v693_v54  ;;  %v825_v62 = vld [vmem:[%s1310_s1 + $0x84] sm:$0xf]  ;;  %v621_v0 = vld [vmem:[%s1310_s1 + $0x88] sm:$0xf0]  ;;  %v560_v9 = vor.u32 %v809_v60, %v557_v61 }
  0x2d   :  { %483 = vmatpush.bf16.msrb.mxu1 %v664_v10  ;;  %v760_v63 = vor.u32 %v859_v55, %v757_v56  ;;  %v841_v2 = vld [vmem:[%s1310_s1 + $0x104] sm:$0xf]  ;;  %v685_v3 = vld [vmem:[%s1310_s1 + $0x108] sm:$0xf0]  ;;  %v624_v10 = vor.u32 %v825_v62, %v621_v0 }
  0x2e   :  { %496 = vmatpush.bf16.msrb.mxu2 %v728_v11  ;;  %v857_v4 = vld [vmem:[%s1310_s1 + $0x184] sm:$0xf]  ;;  %v749_v5 = vld [vmem:[%s1310_s1 + $0x188] sm:$0xf0]  ;;  %v688_v11 = vor.u32 %v841_v2, %v685_v3 }
  0x2f   :  { %509 = vmatpush.bf16.msrb.mxu3 %v792_v15  ;;  %v752_v12 = vor.u32 %v857_v4, %v749_v5 }
  0x30   :  { %471 = vmatpush.bf16.msrb.mxu0 %v592_v21 }
  0x31   :  { %484 = vmatpush.bf16.msrb.mxu1 %v656_v22 }
  0x32   :  { %497 = vmatpush.bf16.msrb.mxu2 %v720_v23 }
  0x33   :  { %510 = vmatpush.bf16.msrb.mxu3 %v784_v27 }
  0x34   :  { %472 = vmatpush.bf16.msrb.mxu0 %v584_v33 }
  0x35   :  { %485 = vmatpush.bf16.msrb.mxu1 %v648_v34 }
  0x36   :  { %498 = vmatpush.bf16.msrb.mxu2 %v712_v35 }
  0x37   :  { %511 = vmatpush.bf16.msrb.mxu3 %v776_v39 }
  0x38   :  { %473 = vmatpush.bf16.msrb.mxu0 %v576_v45 }
  0x39   :  { %486 = vmatpush.bf16.msrb.mxu1 %v640_v46 }
  0x3a   :  { %499 = vmatpush.bf16.msrb.mxu2 %v704_v47 }
  0x3b   :  { %512 = vmatpush.bf16.msrb.mxu3 %v768_v51 }
  0x3c   :  { %474 = vmatpush.bf16.msrb.mxu0 %v568_v57 }
  0x3d   :  { %487 = vmatpush.bf16.msrb.mxu1 %v632_v58 }
  0x3e   :  { %500 = vmatpush.bf16.msrb.mxu2 %v696_v59 }
  0x3f   :  { %513 = vmatpush.bf16.msrb.mxu3 %v760_v63 }
  0x40   :  { %475 = vmatpush.bf16.msrb.mxu0 %v560_v9 }
  0x41   :  { %488 = vmatpush.bf16.msrb.mxu1 %v624_v10 }
  0x42   :  { %501 = vmatpush.bf16.msrb.mxu2 %v688_v11 }
  0x43   :  { %514 = vmatpush.bf16.msrb.mxu3 %v752_v12  ;;  %476 = vmatmul.bf16.vlgmr.msrb.gmra.mxu0 %v1169_v7  ;;  %v520_v7 = vld [vmem:[%s1312_s2] sm:$0x3] }
  0x44   :  { %489 = vmatmul.bf16.vlgmr.msrb.gmra.mxu1 %v1171_v8  ;;  %v523_v31 = vperm.slane %v520_v7, 1 }
  0x45   :  { %502 = vmatmul.bf16.vlgmr.msrb.gmra.mxu2 %v1159_v1  ;;  %v522_v1 = vperm.slane %v520_v7, 0 }
  0x46   :  { %515 = vmatmul.bf16.vlgmr.msrb.gmra.mxu3 %v1167_v6  ;;  %v528_v6 = vld [vmem:[%s1313_s3] sm:$0x3] }
  0x47   :  { %v530_v28 = vperm.slane %v528_v6, 0  ;;  %v531_v35 = vperm.slane %v528_v6, 1 }
  0xa0   :  { %v425_v13 = vpop.f32.mrf.mxu0 }
  0xa1   :  { %v438_v14 = vpop.f32.mrf.mxu1 }
  0xa2   :  { %v439_v21 = vadd.f32 %v438_v14, %v425_v13 }
  0xa8   :  { %v451_v15 = vpop.f32.mrf.mxu2  ;;  %v427_v17 = vpop.f32.mrf.mxu0 }
  0xa9   :  { %v464_v16 = vpop.f32.mrf.mxu3  ;;  %v440_v18 = vpop.f32.mrf.mxu1  ;;  %v452_v22 = vadd.f32 %v451_v15, %v439_v21 }
  0xab   :  { %v465_v24 = vadd.f32 %v464_v16, %v452_v22 }
  0xad   :  { %v526_v27 = vmul.f32 %v522_v1, %v465_v24 }
  0xaf   :  { %v534_v36 = vadd.f32 %v530_v28, %v526_v27 }
  0xb0   :  { %v453_v19 = vpop.f32.mrf.mxu2 }
  0xb1   :  { %v466_v20 = vpop.f32.mrf.mxu3  ;;  %v538_v40 = vmul.f32 0.2, %v534_v36  ;;  %vm536_vm1 = vcmp.ge.f32.partialorder %v534_v36, 0.0 }
  0xb3   :  { %v540_v45 = vsel %vm536_vm1, %v534_v36, %v538_v40 }
  0xc0   :  { %v477_v23 = vpop.f32.mrf.mxu0 }
  0xc1   :  { %v490_v8 = vpop.f32.mrf.mxu1 }
  0xc2   :  { %v491_v25 = vadd.f32 %v490_v8, %v477_v23 }
  0xc8   :  { %v503_v26 = vpop.f32.mrf.mxu2  ;;  %v479_v32 = vpop.f32.mrf.mxu0 }
  0xc9   :  { %v504_v29 = vadd.f32 %v503_v26, %v491_v25  ;;  %v516_v30 = vpop.f32.mrf.mxu3  ;;  %v492_v33 = vpop.f32.mrf.mxu1 }
  0xcb   :  { %v517_v34 = vadd.f32 %v516_v30, %v504_v29 }
  0xcd   :  { %v527_v37 = vmul.f32 %v523_v31, %v517_v34 }
  0xcf   :  { %v535_v38 = vadd.f32 %v531_v35, %v527_v37 }
  0xd0   :  { %v505_v39 = vpop.f32.mrf.mxu2 }
  0xd1   :  { %vm537_vm0 = vcmp.ge.f32.partialorder %v535_v38, 0.0  ;;  %v539_v41 = vmul.f32 0.2, %v535_v38  ;;  %v518_v42 = vpop.f32.mrf.mxu3 }
  0xd3   :  { %v541_v43 = vsel %vm537_vm0, %v535_v38, %v539_v41 }
  0xd4   :  { %v544_v44 = vrot.slane %v541_v43, 6 }
  0xd6   :  { %v546_v46 = vsel %vm545_vm2, %v540_v45, %v544_v44 }
  0xd7   :  { %548 = vst [vmem:[%s1314_s4] sm:$0xf] %v546_v46 }

// kernel: forward.25
= control target key start
LH: loop header
LB: loop body
LE: loop exit
PB: predicated region body
PF: predicated region fallthrough
CT: control target
= control target key end

     0   :  { %vm190_vm0 = vcmask 66560   ;;  %s363_s1 = inlined_call_operand.vmem [shape: bf16[256,9], index: 1, kind: input, shape index: {}]   ;;  %s364_s0 = inlined_call_operand.vmem [shape: f32[2,256], index: 0, kind: input, shape index: {}]   ;;  %s365_s2 = inlined_call_operand.vmem [shape: f32[1,9], index: 2, kind: input, shape index: {}]   ;;  %s366_s3 = inlined_call_operand.vmem [shape: f32[1,9], index: 3, kind: input, shape index: {}]   ;;  %s367_s4 = inlined_call_operand.vmem [shape: f32[2,9], index: 4, kind: output, shape index: {}]  }
   0x1   :  { %v267_v0 = vld [vmem:[%s363_s1 + $0x38] sm:$0xff]  ;;  %v266_v2 = vld [vmem:[%s363_s1 + $0x30] sm:$0xff]  ;;  %v17_v4 = vld [vmem:[%s364_s0] sm:$0xf] }
   0x2   :  { %v275_v1 = vld [vmem:[%s363_s1 + $0x78] sm:$0xff]  ;;  %154 = vmatpush.bf16.msra.mxu0 %v267_v0  ;;  %v274_v3 = vld [vmem:[%s363_s1 + $0x70] sm:$0xff]  ;;  %v265_v5 = vld [vmem:[%s363_s1 + $0x28] sm:$0xff]  ;;  %19 = vst [vmem:[#allocation1] ss:$4 sm:$0xff] %v17_v4 }
   0x3   :  { %167 = vmatpush.bf16.msra.mxu1 %v275_v1  ;;  %v273_v6 = vld [vmem:[%s363_s1 + $0x68] sm:$0xff]  ;;  %v264_v7 = vld [vmem:[%s363_s1 + $0x20] sm:$0xff]  ;;  %v263_v9 = vld [vmem:[%s363_s1 + $0x18] sm:$0xff] }
   0x4   :  { %v272_v8 = vld [vmem:[%s363_s1 + $0x60] sm:$0xff]  ;;  %v271_v10 = vld [vmem:[%s363_s1 + $0x58] sm:$0xff]  ;;  %v262_v11 = vld [vmem:[%s363_s1 + $0x10] sm:$0xff] }
   0x5   :  { %v270_v12 = vld [vmem:[%s363_s1 + $0x50] sm:$0xff]  ;;  %v261_v13 = vld [vmem:[%s363_s1 + $0x8] sm:$0xff]  ;;  %v260_v15 = vld [vmem:[%s363_s1] sm:$0xff] }
   0x6   :  { %155 = vmatpush.bf16.msra.mxu0 %v266_v2  ;;  %v269_v14 = vld [vmem:[%s363_s1 + $0x48] sm:$0xff]  ;;  %v268_v16 = vld [vmem:[%s363_s1 + $0x40] sm:$0xff] }
   0x7   :  { %168 = vmatpush.bf16.msra.mxu1 %v274_v3  ;;  %v276_v21 = vld [vmem:[%s365_s2] ss:$0 sm:$0xff] }
   0x8   :  { %v277_v25 = vld [vmem:[%s366_s3] ss:$0 sm:$0xff] }
   0x9   :  { %v20_v17 = vld.sshfl [vmem:[#allocation1] sm:$0xff pattern:$0x73625140]  ;;  %v21_v18 = vld.sshfl [vmem:[#allocation1 + $0x8] sm:$0xff pattern:$0x73625140] }
   0xa   :  { %156 = vmatpush.bf16.msra.mxu0 %v265_v5  ;;  %v24_v19 = vpack.c.bf16 %v20_v17, %v20_v17  ;;  %v25_v20 = vpack.c.bf16 %v21_v18, %v21_v18 }
   0xb   :  { %169 = vmatpush.bf16.msra.mxu1 %v273_v6 }
   0xe   :  { %157 = vmatpush.bf16.msra.mxu0 %v264_v7 }
   0xf   :  { %170 = vmatpush.bf16.msra.mxu1 %v272_v8 }
  0x12   :  { %158 = vmatpush.bf16.msra.mxu0 %v263_v9 }
  0x13   :  { %171 = vmatpush.bf16.msra.mxu1 %v271_v10 }
  0x16   :  { %159 = vmatpush.bf16.msra.mxu0 %v262_v11 }
  0x17   :  { %172 = vmatpush.bf16.msra.mxu1 %v270_v12 }
  0x1a   :  { %160 = vmatpush.bf16.msra.mxu0 %v261_v13 }
  0x1b   :  { %173 = vmatpush.bf16.msra.mxu1 %v269_v14 }
  0x1e   :  { %161 = vmatpush.bf16.msra.mxu0 %v260_v15 }
  0x1f   :  { %174 = vmatpush.bf16.msra.mxu1 %v268_v16 }
  0x21   :  { %162 = vmatmul.bf16.vlgmr.msra.gmra.mxu0 %v24_v19 }
  0x22   :  { %175 = vmatmul.bf16.vlgmr.msra.gmra.mxu1 %v25_v20 }
  0x9e   :  { %v163_v22 = vpop.f32.mrf.mxu0 }
  0x9f   :  { %v176_v23 = vpop.f32.mrf.mxu1 }
  0xa0   :  { %v177_v24 = vadd.f32 %v176_v23, %v163_v22 }
  0xa2   :  { %v184_v26 = vmul.f32 %v276_v21, %v177_v24 }
  0xa4   :  { %v189_v27 = vadd.f32 %v277_v25, %v184_v26 }
  0xa6   :  { %191 = vst.msk [vmem:[%s367_s4] sm:$0x3] %vm190_vm0, %v189_v27  ;;  %v165_v28 = vpop.f32.mrf.mxu0 }
  0xa7   :  { %v178_v29 = vpop.f32.mrf.mxu1 }

// kernel: forward.29
= control target key start
LH: loop header
LB: loop body
LE: loop exit
PB: predicated region body
PF: predicated region fallthrough
CT: control target
= control target key end

     0   :  { %s495_s12 = smov 0   ;;  %s497_s13 = smov 0   ;;  %s534_s0 = inlined_call_operand.vmem [shape: bf16[2,16,64], index: 0, kind: input, shape index: {}, may-alias: {0,1}]   ;;  %s535_s1 = inlined_call_operand.vmem [shape: bf16[2,16,64], index: 1, kind: input, shape index: {}, may-alias: {0,1}]   ;;  %s536_s2 = inlined_call_operand.vmem [shape: f32[2,1,16], index: 2, kind: input, shape index: {}]   ;;  %s537_s3 = inlined_call_operand.vmem [shape: f32[2,16,16], index: 3, kind: output, shape index: {}]  }
   0x1   :  { %s499_s14 = smov 0  }
   0x2 LB: > { %s25_s15 = sadd.s32 1, %s469_s13  ;;  %p403_p0 = scmp.ge.s32.totalorder %s473_s14, 1  ;;  %s473_s14 = sphi %s499_s14, %s13_s14   ;;  %s469_s13 = sphi %s497_s13, %s539_s13   ;;  %s465_s12 = sphi %s495_s12, %s538_s12  }
   0x3   : > { %p27_p1 = scmp.ge.s32.totalorder %s25_s15, 2  ;;  %p176_p2 = scmp.lt.s32.totalorder %s473_s14, 3 }
   0x5   : > { %s541_s15 = smov (%p27_p1, %s25_s15), 0  ;;  %p177_p3 = pnand %p403_p0, %p176_p2 }
   0x6   : > { %p217_p4 = scmp.lt.s32.totalorder (!%p177_p3), %s465_s12, 1 }
   0x7   : > { %180 = sbr.rel (%p177_p3) target bundleno = 163 (0xa3), region = 32 }
   0xc   : > { %s543_s12 = smov (!%p217_p4, %s465_s12), 1  ;;  %vm259_vm0 = vcmask 523264   ;;  %vm288_vm1 = vcmask 130048  }
   0xd   : > { %s421_s16 = sshll.u32 %s543_s12, 3  ;;  %s233_s19 = scalar_lea.vmem %s536_s2, %s543_s12 }
   0xe   : > { %s230_s22 = scalar_lea.vmem %s535_s1, %s421_s16  ;;  %s224_s25 = scalar_lea.vmem %s534_s0, %s421_s16  ;;  %v450_v3 = vld [vmem:[%s233_s19] ss:$0 sm:$0xff] }
   0xf   : > { %v425_v0 = vld [vmem:[%s230_s22] sm:$0xff]  ;;  %s423_s26 = sshll.u32 %s543_s12, 4 }
  0x10   : > { %v264_v1 = vsel %vm259_vm0, %v425_v0, 0  ;;  %v424_v2 = vld [vmem:[%s224_s25] sm:$0xff]  ;;  %s242_s29 = scalar_lea.vmem %s537_s3, %s423_s26 }
  0x11   : > { %273 = vmatpush.bf16.xpose.msra.mxu0 %v264_v1 }
  0x18   : > { %418 = vmatmul.msk.bf16.vlgmr.msra.gmra.mxu0 %vm259_vm0, %v424_v2 }
  0x95   : > { %v275_v4 = vpop.f32.mrf.mxu0 }
  0x96   : > { %v280_v5 = vmul.f32 2.0, %v275_v4 }
  0x98   : > { %v286_v6 = vsub.f32 %v280_v5, %v450_v3 }
  0x9a   : > { %289 = vst.msk [vmem:[%s242_s29] sm:$0xff] %vm288_vm1, %v286_v6 }
  0x9d   : > { %v277_v7 = vpop.f32.mrf.mxu0 }
  0x9e   : > { %v281_v8 = vmul.f32 2.0, %v277_v7 }
  0xa0   : > { %v287_v9 = vsub.f32 %v281_v8, %v450_v3 }
  0xa2   : > { %290 = vst.msk [vmem:[%s242_s29 + $0x8] sm:$0xff] %vm288_vm1, %v287_v9 }
  0xa3 PF: > { %s13_s14 = sadd.s32 1, %s473_s14   ;;  %s538_s12 = smov %s469_s13 }
  0xa4   : > { %p10_p5 = scmp.ge.s32.totalorder %s13_s14, 4   ;;  %s539_s13 = smov %s541_s15 }
  0xa6   :  { %12 = sbr.rel (!%p10_p5) target bundleno = 2 (0x2), region = 68 }

// kernel: forward.28
= control target key start
LH: loop header
LB: loop body
LE: loop exit
PB: predicated region body
PF: predicated region fallthrough
CT: control target
= control target key end

     0   :  { %vm460_vm4 = vcmask 523264   ;;  %s1448_s2 = inlined_call_operand.vmem [shape: bf16[64,64], index: 2, kind: input, shape index: {}]   ;;  %s1449_s0 = inlined_call_operand.vmem [shape: bf16[32,4,64], index: 0, kind: input, shape index: {}]   ;;  %s1450_s1 = inlined_call_operand.vmem [shape: bf16[32,64], index: 1, kind: input, shape index: {}]   ;;  %s1451_s3 = inlined_call_operand.vmem [shape: f32[1,64], index: 3, kind: input, shape index: {}]   ;;  %s1452_s4 = inlined_call_operand.vmem [shape: f32[1,64], index: 4, kind: input, shape index: {}]   ;;  %s1453_s5 = inlined_call_operand.vmem [shape: bf16[32,64], index: 5, kind: output, shape index: {}]  }
   0x1   :  { %v1069_v0 = vld [vmem:[%s1448_s2 + $0x18] sm:$0xff]  ;;  %v1068_v1 = vld [vmem:[%s1448_s2 + $0x10] sm:$0xff]  ;;  %v1071_v2 = vld [vmem:[%s1450_s1] sm:$0xff]  }
   0x2   :  { %v61_v3 = vld [vmem:[%s1449_s0] sm:$0x3]  ;;  %489 = vmatpush.bf16.msra.mxu0 %v1069_v0  ;;  %1079 = vmatpush.bf16.msra.mxu1 %v1069_v0  ;;  %v1135_v4 = vunpack.c.l.bf16 %v1071_v2  ;;  %v62_v5 = vld [vmem:[%s1449_s0 + $0x2] sm:$0x3]  ;;  %v63_v6 = vld [vmem:[%s1449_s0 + $0x4] sm:$0x3]  ;;  %v1146_v9 = vunpack.c.h.bf16 %v1071_v2 }
   0x3   :  { %v64_v7 = vld [vmem:[%s1449_s0 + $0x6] sm:$0x3]  ;;  %v93_v8 = vunpack.c.l.bf16 %v61_v3  ;;  %1080 = vmatpush.bf16.msra.mxu2 %v1069_v0  ;;  %v94_v10 = vunpack.c.l.bf16 %v62_v5  ;;  %v95_v11 = vunpack.c.l.bf16 %v63_v6  ;;  %v1151_v13 = vld [vmem:[%s1450_s1 + $0x8] sm:$0xff]   ;;  %1081 = vmatpush.bf16.msra.mxu3 %v1069_v0  ;;  %v1165_v21 = vld [vmem:[%s1449_s0 + $0x10] sm:$0x3] }
   0x4   :  { %v96_v12 = vunpack.c.l.bf16 %v64_v7  ;;  %v33_v14 = vrot.slane %v1135_v4, 1  ;;  %v34_v15 = vrot.slane %v1135_v4, 2  ;;  %v35_v16 = vrot.slane %v1135_v4, 3  ;;  %v1170_v22 = vld [vmem:[%s1449_s0 + $0x12] sm:$0x3]  ;;  %v1067_v23 = vld [vmem:[%s1448_s2 + $0x8] sm:$0xff] }
   0x5   :  { %v125_v17 = vperm.slane %v1135_v4, 0  ;;  %v1158_v18 = vunpack.c.l.bf16 %v1151_v13  ;;  %v40_v19 = vrot.slane %v1146_v9, 1  ;;  %v41_v20 = vrot.slane %v1146_v9, 2  ;;  %v71_v28 = vld [vmem:[%s1449_s0 + $0x14] sm:$0x3]  ;;  %v1066_v44 = vld [vmem:[%s1448_s2] sm:$0xff] }
   0x6   :  { %490 = vmatpush.bf16.msra.mxu0 %v1068_v1  ;;  %1082 = vmatpush.bf16.msra.mxu1 %v1068_v1  ;;  %v126_v24 = vperm.slane %v33_v14, 0  ;;  %v127_v25 = vperm.slane %v34_v15, 0  ;;  %v128_v26 = vperm.slane %v35_v16, 0  ;;  %v42_v29 = vrot.slane %v1146_v9, 3  ;;  %v72_v36 = vld [vmem:[%s1449_s0 + $0x16] sm:$0x3] }
   0x7   :  { %v189_v27 = vadd.f32 %v125_v17, %v93_v8  ;;  %1083 = vmatpush.bf16.msra.mxu2 %v1068_v1  ;;  %v47_v30 = vrot.slane %v1158_v18, 1  ;;  %v48_v31 = vrot.slane %v1158_v18, 2  ;;  %v49_v32 = vrot.slane %v1158_v18, 3  ;;  %1084 = vmatpush.bf16.msra.mxu3 %v1068_v1  ;;  %v77_v37 = vld [vmem:[%s1449_s0 + $0x20] sm:$0x3] }
   0x8   :  { %v190_v33 = vadd.f32 %v126_v24, %v94_v10  ;;  %v191_v34 = vadd.f32 %v127_v25, %v95_v11  ;;  %v192_v35 = vadd.f32 %v128_v26, %v96_v12  ;;  %v78_v39 = vld [vmem:[%s1449_s0 + $0x22] sm:$0x3]  ;;  %v79_v40 = vld [vmem:[%s1449_s0 + $0x24] sm:$0x3]  ;;  %v101_v41 = vunpack.c.l.bf16 %v1165_v21  ;;  %v80_v51 = vld [vmem:[%s1449_s0 + $0x26] sm:$0x3] }
   0x9   :  { %vm221_vm0 = vcmp.ge.f32.partialorder %v189_v27, 0.0  ;;  %v253_v38 = vmul.f32 0.2, %v189_v27  ;;  %v102_v42 = vunpack.c.l.bf16 %v1170_v22  ;;  %v103_v43 = vunpack.c.l.bf16 %v71_v28  ;;  %v85_v11 = vld [vmem:[%s1449_s0 + $0x30] sm:$0x3] }
   0xa   :  { %491 = vmatpush.bf16.msra.mxu0 %v1067_v23  ;;  %1085 = vmatpush.bf16.msra.mxu1 %v1067_v23  ;;  %vm222_vm1 = vcmp.ge.f32.partialorder %v190_v33, 0.0  ;;  %vm223_vm2 = vcmp.ge.f32.partialorder %v191_v34, 0.0  ;;  %vm224_vm3 = vcmp.ge.f32.partialorder %v192_v35, 0.0  ;;  %v254_v45 = vmul.f32 0.2, %v190_v33 }
   0xb   :  { %v255_v46 = vmul.f32 0.2, %v191_v34  ;;  %v256_v47 = vmul.f32 0.2, %v192_v35  ;;  %v285_v48 = vsel %vm221_vm0, %v189_v27, %v253_v38  ;;  %v104_v49 = vunpack.c.l.bf16 %v72_v36  ;;  %1086 = vmatpush.bf16.msra.mxu2 %v1067_v23  ;;  %1087 = vmatpush.bf16.msra.mxu3 %v1067_v23  ;;  %v86_v15 = vld [vmem:[%s1449_s0 + $0x32] sm:$0x3] }
   0xc   :  { %v286_v50 = vsel %vm222_vm1, %v190_v33, %v254_v45  ;;  %349 = vst [vmem:[#allocation1] ss:$2 sm:$0xff] %v285_v48  ;;  %v109_v52 = vunpack.c.l.bf16 %v77_v37  ;;  %v110_v53 = vunpack.c.l.bf16 %v78_v39  ;;  %v111_v54 = vunpack.c.l.bf16 %v79_v40  ;;  %v87_v23 = vld [vmem:[%s1449_s0 + $0x34] sm:$0x3]  ;;  %v65_v37 = vld [vmem:[%s1449_s0 + $0x8] sm:$0x3] }
   0xd   :  { %v287_v55 = vsel %vm223_vm2, %v191_v34, %v255_v46  ;;  %v288_v56 = vsel %vm224_vm3, %v192_v35, %v256_v47  ;;  %351 = vst [vmem:[#allocation1 + $0x1] ss:$2 sm:$0xff] %v286_v50  ;;  %v133_v57 = vperm.slane %v1146_v9, 0  ;;  %v134_v58 = vperm.slane %v40_v19, 0  ;;  %v67_v50 = vld [vmem:[%s1449_s0 + $0xc] sm:$0x3] }
   0xe   :  { %492 = vmatpush.bf16.msra.mxu0 %v1066_v44  ;;  %353 = vst [vmem:[#allocation1 + $0x10] ss:$2 sm:$0xff] %v287_v55  ;;  %1088 = vmatpush.bf16.msra.mxu1 %v1066_v44  ;;  %v135_v59 = vperm.slane %v41_v20, 0  ;;  %v136_v60 = vperm.slane %v42_v29, 0  ;;  %v141_v61 = vperm.slane %v1158_v18, 0  ;;  %v142_v62 = vperm.slane %v47_v30, 0 }
   0xf   :  { %355 = vst [vmem:[#allocation1 + $0x11] ss:$2 sm:$0xff] %v288_v56  ;;  %v112_v63 = vunpack.c.l.bf16 %v80_v51  ;;  %v143_v0 = vperm.slane %v48_v31, 0  ;;  %v197_v1 = vadd.f32 %v133_v57, %v101_v41  ;;  %v198_v2 = vadd.f32 %v134_v58, %v102_v42  ;;  %1089 = vmatpush.bf16.msra.mxu2 %v1066_v44  ;;  %1090 = vmatpush.bf16.msra.mxu3 %v1066_v44  ;;  %v68_v55 = vld [vmem:[%s1449_s0 + $0xe] sm:$0x3] }
  0x10   :  { %v144_v3 = vperm.slane %v49_v32, 0  ;;  %v199_v5 = vadd.f32 %v135_v59, %v103_v43  ;;  %v200_v6 = vadd.f32 %v136_v60, %v104_v49  ;;  %v205_v7 = vadd.f32 %v141_v61, %v109_v52  ;;  %v66_v49 = vld [vmem:[%s1449_s0 + $0xa] sm:$0x3] }
  0x11   :  { %v206_v8 = vadd.f32 %v142_v62, %v110_v53  ;;  %v1205_v10 = vadd.f32 %v143_v0, %v111_v54  ;;  %vm229_vm5 = vcmp.ge.f32.partialorder %v197_v1, 0.0  ;;  %vm230_vm6 = vcmp.ge.f32.partialorder %v198_v2, 0.0 }
  0x12   :  { %vm231_vm7 = vcmp.ge.f32.partialorder %v199_v5, 0.0  ;;  %vm232_vm8 = vcmp.ge.f32.partialorder %v200_v6, 0.0  ;;  %v261_v12 = vmul.f32 0.2, %v197_v1  ;;  %v262_v14 = vmul.f32 0.2, %v198_v2 }
  0x13   :  { %v1213_v17 = vadd.f32 %v144_v3, %v112_v63  ;;  %vm237_vm9 = vcmp.ge.f32.partialorder %v205_v7, 0.0  ;;  %v263_v19 = vmul.f32 0.2, %v199_v5  ;;  %v1216_v20 = vunpack.c.h.bf16 %v1151_v13  ;;  %v88_v13 = vld [vmem:[%s1449_s0 + $0x36] sm:$0x3] }
  0x14   :  { %v364_v16 = vld.sshfl [vmem:[#allocation1] sm:$0xff pattern:$0x75316420]  ;;  %vm238_vm10 = vcmp.ge.f32.partialorder %v206_v8, 0.0  ;;  %vm239_vm11 = vcmp.ge.f32.partialorder %v1205_v10, 0.0  ;;  %v293_v22 = vsel %vm229_vm5, %v197_v1, %v261_v12  ;;  %v294_v25 = vsel %vm230_vm6, %v198_v2, %v262_v14 }
  0x15   :  { %v264_v21 = vmul.f32 0.2, %v200_v6  ;;  %v295_v26 = vsel %vm231_vm7, %v199_v5, %v263_v19  ;;  %v54_v27 = vrot.slane %v1216_v20, 1  ;;  %v117_v28 = vunpack.c.l.bf16 %v85_v11  ;;  %368 = vst [vmem:[#allocation1] ss:$2 sm:$0xff] %v293_v22 }
  0x16   :  { %v365_v24 = vld.sshfl [vmem:[#allocation1 + $0x10] sm:$0xff pattern:$0x75316420]  ;;  %v269_v30 = vmul.f32 0.2, %v205_v7  ;;  %v55_v34 = vrot.slane %v1216_v20, 2  ;;  %v118_v36 = vunpack.c.l.bf16 %v86_v15  ;;  %v119_v39 = vunpack.c.l.bf16 %v87_v23 }
  0x17   :  { %v420_v29 = vpack.c.bf16 %v365_v24, %v364_v16  ;;  %v270_v31 = vmul.f32 0.2, %v206_v8  ;;  %v296_v32 = vsel %vm232_vm8, %v200_v6, %v264_v21  ;;  %v271_v33 = vmul.f32 0.2, %v1205_v10  ;;  %369 = vst [vmem:[#allocation1 + $0x1] ss:$2 sm:$0xff] %v294_v25 }
  0x18   :  { %v56_v35 = vrot.slane %v1216_v20, 3  ;;  %v272_v38 = vmul.f32 0.2, %v1213_v17  ;;  %370 = vst [vmem:[#allocation1 + $0x10] ss:$2 sm:$0xff] %v295_v26  ;;  %v120_v40 = vunpack.c.l.bf16 %v88_v13  ;;  %v149_v41 = vperm.slane %v1216_v20, 0 }
  0x19   :  { %1058 = vmatmul.msk.bf16.vlgmr.msra.gmra.mxu0 %vm460_vm4, %v420_v29  ;;  %vm240_vm12 = vcmp.ge.f32.partialorder %v1213_v17, 0.0  ;;  %371 = vst [vmem:[#allocation1 + $0x11] ss:$2 sm:$0xff] %v296_v32  ;;  %v150_v42 = vperm.slane %v54_v27, 0  ;;  %v151_v43 = vperm.slane %v55_v34, 0  ;;  %v301_v45 = vsel %vm237_vm9, %v205_v7, %v269_v30 }
  0x1a   :  { %v152_v44 = vperm.slane %v56_v35, 0  ;;  %v302_v46 = vsel %vm238_vm10, %v206_v8, %v270_v31  ;;  %v213_v47 = vadd.f32 %v149_v41, %v117_v28  ;;  %v36_v48 = vrot.slane %v1135_v4, 4  ;;  %v74_v23 = vld [vmem:[%s1449_s0 + $0x1a] sm:$0x3]  ;;  %v75_v24 = vld [vmem:[%s1449_s0 + $0x1c] sm:$0x3] }
  0x1b   :  { %v214_v51 = vadd.f32 %v150_v42, %v118_v36  ;;  %v215_v52 = vadd.f32 %v151_v43, %v119_v39  ;;  %v37_v53 = vrot.slane %v1135_v4, 5  ;;  %v38_v54 = vrot.slane %v1135_v4, 6  ;;  %v76_v13 = vld [vmem:[%s1449_s0 + $0x1e] sm:$0x3]  ;;  %v81_v28 = vld [vmem:[%s1449_s0 + $0x28] sm:$0x3] }
  0x1c   :  { %v216_v56 = vadd.f32 %v152_v44, %v120_v40  ;;  %vm245_vm13 = vcmp.ge.f32.partialorder %v213_v47, 0.0  ;;  %v39_v57 = vrot.slane %v1135_v4, 7  ;;  %v97_v58 = vunpack.c.l.bf16 %v65_v37  ;;  %v82_v43 = vld [vmem:[%s1449_s0 + $0x2a] sm:$0x3] }
  0x1d   :  { %vm246_vm14 = vcmp.ge.f32.partialorder %v214_v51, 0.0  ;;  %v277_v59 = vmul.f32 0.2, %v213_v47  ;;  %v98_v60 = vunpack.c.l.bf16 %v66_v49  ;;  %v99_v61 = vunpack.c.l.bf16 %v67_v50 }
  0x1e   :  { %v303_v62 = vsel %vm239_vm11, %v1205_v10, %v271_v33  ;;  %v376_v63 = vld.sshfl [vmem:[#allocation1] sm:$0xff pattern:$0x75316420]  ;;  %v278_v0 = vmul.f32 0.2, %v214_v51  ;;  %v100_v1 = vunpack.c.l.bf16 %v68_v55  ;;  %v129_v2 = vperm.slane %v36_v48, 0 }
  0x1f   :  { %v304_v3 = vsel %vm240_vm12, %v1213_v17, %v272_v38  ;;  %380 = vst [vmem:[#allocation1] ss:$2 sm:$0xff] %v301_v45  ;;  %v279_v5 = vmul.f32 0.2, %v215_v52  ;;  %v130_v4 = vperm.slane %v37_v53, 0  ;;  %v131_v6 = vperm.slane %v38_v54, 0 }
  0x20   :  { %v377_v7 = vld.sshfl [vmem:[#allocation1 + $0x10] sm:$0xff pattern:$0x75316420]  ;;  %381 = vst [vmem:[#allocation1 + $0x1] ss:$2 sm:$0xff] %v302_v46  ;;  %v132_v8 = vperm.slane %v39_v57, 0  ;;  %v193_v11 = vadd.f32 %v129_v2, %v97_v58  ;;  %v309_v25 = vsel %vm245_vm13, %v213_v47, %v277_v59  ;;  %v310_v26 = vsel %vm246_vm14, %v214_v51, %v278_v0 }
  0x21   :  { %382 = vst [vmem:[#allocation1 + $0x10] ss:$2 sm:$0xff] %v303_v62  ;;  %v422_v12 = vpack.c.bf16 %v377_v7, %v376_v63  ;;  %v280_v14 = vmul.f32 0.2, %v216_v56  ;;  %v194_v10 = vadd.f32 %v130_v4, %v98_v60  ;;  %v195_v15 = vadd.f32 %v131_v6, %v99_v61  ;;  %v73_v17 = vld [vmem:[%s1449_s0 + $0x18] sm:$0x3] }
  0x22   :  { %383 = vst [vmem:[#allocation1 + $0x11] ss:$2 sm:$0xff] %v304_v3  ;;  %vm247_vm15 = vcmp.ge.f32.partialorder %v215_v52, 0.0  ;;  %v196_v16 = vadd.f32 %v132_v8, %v100_v1  ;;  %vm225_vm0 = vcmp.ge.f32.partialorder %v193_v11, 0.0  ;;  %v257_v19 = vmul.f32 0.2, %v193_v11 }
  0x23   :  { %1060 = vmatmul.msk.bf16.vlgmr.msra.gmra.mxu1 %vm460_vm4, %v422_v12  ;;  %vm226_vm1 = vcmp.ge.f32.partialorder %v194_v10, 0.0  ;;  %vm227_vm2 = vcmp.ge.f32.partialorder %v195_v15, 0.0  ;;  %v258_v21 = vmul.f32 0.2, %v194_v10  ;;  %v259_v22 = vmul.f32 0.2, %v195_v15 }
  0x24   :  { %vm248_vm3 = vcmp.ge.f32.partialorder %v216_v56, 0.0  ;;  %v289_v27 = vsel %vm225_vm0, %v193_v11, %v257_v19  ;;  %v260_v29 = vmul.f32 0.2, %v196_v16  ;;  %v43_v32 = vrot.slane %v1146_v9, 4  ;;  %v83_v55 = vld [vmem:[%s1449_s0 + $0x2c] sm:$0x3] }
  0x25   :  { %v290_v30 = vsel %vm226_vm1, %v194_v10, %v258_v21  ;;  %v291_v31 = vsel %vm227_vm2, %v195_v15, %v259_v22  ;;  %357 = vst [vmem:[#allocation1 + $0x20] ss:$2 sm:$0xff] %v289_v27  ;;  %vm228_vm5 = vcmp.ge.f32.partialorder %v196_v16, 0.0  ;;  %v44_v33 = vrot.slane %v1146_v9, 5  ;;  %v84_v57 = vld [vmem:[%s1449_s0 + $0x2e] sm:$0x3] }
  0x26   :  { %359 = vst [vmem:[#allocation1 + $0x21] ss:$2 sm:$0xff] %v290_v30  ;;  %v45_v34 = vrot.slane %v1146_v9, 6  ;;  %v46_v35 = vrot.slane %v1146_v9, 7  ;;  %v311_v36 = vsel %vm247_vm15, %v215_v52, %v279_v5  ;;  %v312_v37 = vsel %vm248_vm3, %v216_v56, %v280_v14  ;;  %v90_v19 = vld [vmem:[%s1449_s0 + $0x3a] sm:$0x3] }
  0x27   :  { %v388_v38 = vld.sshfl [vmem:[#allocation1] sm:$0xff pattern:$0x75316420]  ;;  %361 = vst [vmem:[#allocation1 + $0x30] ss:$2 sm:$0xff] %v291_v31  ;;  %v50_v39 = vrot.slane %v1158_v18, 4  ;;  %v105_v40 = vunpack.c.l.bf16 %v73_v17  ;;  %v106_v44 = vunpack.c.l.bf16 %v74_v23  ;;  %v107_v9 = vunpack.c.l.bf16 %v75_v24 }
  0x28   :  { %392 = vst [vmem:[#allocation1] ss:$2 sm:$0xff] %v309_v25  ;;  %v51_v41 = vrot.slane %v1158_v18, 5  ;;  %v52_v42 = vrot.slane %v1158_v18, 6  ;;  %v292_v46 = vsel %vm228_vm5, %v196_v16, %v260_v29  ;;  %v108_v47 = vunpack.c.l.bf16 %v76_v13  ;;  %v89_v16 = vld [vmem:[%s1449_s0 + $0x38] sm:$0x3] }
  0x29   :  { %v389_v45 = vld.sshfl [vmem:[#allocation1 + $0x10] sm:$0xff pattern:$0x75316420]  ;;  %393 = vst [vmem:[#allocation1 + $0x1] ss:$2 sm:$0xff] %v310_v26  ;;  %v113_v48 = vunpack.c.l.bf16 %v81_v28  ;;  %v137_v49 = vperm.slane %v43_v32, 0  ;;  %v114_v61 = vunpack.c.l.bf16 %v82_v43  ;;  %v115_v63 = vunpack.c.l.bf16 %v83_v55 }
  0x2a   :  { %394 = vst [vmem:[#allocation1 + $0x10] ss:$2 sm:$0xff] %v311_v36  ;;  %v424_v50 = vpack.c.bf16 %v389_v45, %v388_v38  ;;  %v138_v51 = vperm.slane %v44_v33, 0  ;;  %v139_v52 = vperm.slane %v45_v34, 0  ;;  %v140_v53 = vperm.slane %v46_v35, 0 }
  0x2b   :  { %395 = vst [vmem:[#allocation1 + $0x11] ss:$2 sm:$0xff] %v312_v37  ;;  %v53_v54 = vrot.slane %v1158_v18, 7  ;;  %v145_v56 = vperm.slane %v50_v39, 0  ;;  %v201_v58 = vadd.f32 %v137_v49, %v105_v40  ;;  %v146_v0 = vperm.slane %v51_v41, 0 }
  0x2c   :  { %1062 = vmatmul.msk.bf16.vlgmr.msra.gmra.mxu2 %vm460_vm4, %v424_v50  ;;  %363 = vst [vmem:[#allocation1 + $0x31] ss:$2 sm:$0xff] %v292_v46  ;;  %v202_v59 = vadd.f32 %v138_v51, %v106_v44  ;;  %v203_v60 = vadd.f32 %v139_v52, %v107_v9  ;;  %v204_v62 = vadd.f32 %v140_v53, %v108_v47  ;;  %v147_v18 = vperm.slane %v52_v42, 0  ;;  %v91_v25 = vld [vmem:[%s1449_s0 + $0x3c] sm:$0x3] }
  0x2d   :  { %v209_v1 = vadd.f32 %v145_v56, %v113_v48  ;;  %v366_v2 = vld.sshfl [vmem:[#allocation1 + $0x20] sm:$0xff pattern:$0x75316420]  ;;  %v116_v3 = vunpack.c.l.bf16 %v84_v57  ;;  %v148_v5 = vperm.slane %v53_v54, 0  ;;  %vm233_vm6 = vcmp.ge.f32.partialorder %v201_v58, 0.0 }
  0x2e   :  { %vm234_vm7 = vcmp.ge.f32.partialorder %v202_v59, 0.0  ;;  %vm235_vm8 = vcmp.ge.f32.partialorder %v203_v60, 0.0  ;;  %vm236_vm9 = vcmp.ge.f32.partialorder %v204_v62, 0.0  ;;  %v265_v4 = vmul.f32 0.2, %v201_v58 }
  0x2f   :  { %v266_v6 = vmul.f32 0.2, %v202_v59  ;;  %v267_v7 = vmul.f32 0.2, %v203_v60  ;;  %v268_v8 = vmul.f32 0.2, %v204_v62  ;;  %v210_v12 = vadd.f32 %v146_v0, %v114_v61 }
  0x30   :  { %v57_v11 = vrot.slane %v1216_v20, 4  ;;  %v211_v14 = vadd.f32 %v147_v18, %v115_v63  ;;  %v273_v10 = vmul.f32 0.2, %v209_v1  ;;  %v297_v15 = vsel %vm233_vm6, %v201_v58, %v265_v4  ;;  %v400_v13 = vld.sshfl [vmem:[#allocation1] sm:$0xff pattern:$0x75316420] }
  0x31   :  { %v298_v21 = vsel %vm234_vm7, %v202_v59, %v266_v6  ;;  %v299_v22 = vsel %vm235_vm8, %v203_v60, %v267_v7  ;;  %v300_v23 = vsel %vm236_vm9, %v204_v62, %v268_v8  ;;  %372 = vst [vmem:[#allocation1 + $0x20] ss:$2 sm:$0xff] %v297_v15  ;;  %v58_v24 = vrot.slane %v1216_v20, 5  ;;  %v92_v28 = vld [vmem:[%s1449_s0 + $0x3e] sm:$0x3] }
  0x32   :  { %v212_v27 = vadd.f32 %v148_v5, %v116_v3  ;;  %vm241_vm10 = vcmp.ge.f32.partialorder %v209_v1, 0.0  ;;  %373 = vst [vmem:[#allocation1 + $0x21] ss:$2 sm:$0xff] %v298_v21  ;;  %v401_v29 = vld.sshfl [vmem:[#allocation1 + $0x10] sm:$0xff pattern:$0x75316420]  ;;  %v121_v31 = vunpack.c.l.bf16 %v89_v16  ;;  %v122_v37 = vunpack.c.l.bf16 %v90_v19 }
  0x33   :  { %v367_v17 = vld.sshfl [vmem:[#allocation1 + $0x30] sm:$0xff pattern:$0x75316420]  ;;  %v59_v30 = vrot.slane %v1216_v20, 6  ;;  %v274_v32 = vmul.f32 0.2, %v210_v12  ;;  %v426_v33 = vpack.c.bf16 %v401_v29, %v400_v13  ;;  %v123_v40 = vunpack.c.l.bf16 %v91_v25 }
  0x34   :  { %v421_v26 = vpack.c.bf16 %v367_v17, %v366_v2  ;;  %374 = vst [vmem:[#allocation1 + $0x30] ss:$2 sm:$0xff] %v299_v22  ;;  %v60_v34 = vrot.slane %v1216_v20, 7  ;;  %v153_v35 = vperm.slane %v57_v11, 0  ;;  %vm242_vm11 = vcmp.ge.f32.partialorder %v210_v12, 0.0 }
  0x35   :  { %375 = vst [vmem:[#allocation1 + $0x31] ss:$2 sm:$0xff] %v300_v23  ;;  %v275_v36 = vmul.f32 0.2, %v211_v14  ;;  %v154_v38 = vperm.slane %v58_v24, 0  ;;  %vm243_vm12 = vcmp.ge.f32.partialorder %v211_v14, 0.0  ;;  %1064 = vmatmul.msk.bf16.vlgmr.msra.gmra.mxu3 %vm460_vm4, %v426_v33  ;;  %v305_v42 = vsel %vm241_vm10, %v209_v1, %v273_v10 }
  0x36   :  { %1059 = vmatmul.msk.bf16.gmra.mxu0 %vm460_vm4, %v421_v26  ;;  %v276_v39 = vmul.f32 0.2, %v212_v27  ;;  %v155_v41 = vperm.slane %v59_v30, 0  ;;  %vm244_vm13 = vcmp.ge.f32.partialorder %v212_v27, 0.0  ;;  %v124_v43 = vunpack.c.l.bf16 %v92_v28  ;;  %v1325_v2 = vld [vmem:[%s1451_s3] ss:$0 sm:$0xff] }
  0x37   :  { %v156_v44 = vperm.slane %v60_v34, 0  ;;  %v306_v9 = vsel %vm242_vm11, %v210_v12, %v274_v32  ;;  %v217_v45 = vadd.f32 %v153_v35, %v121_v31  ;;  %v307_v46 = vsel %vm243_vm12, %v211_v14, %v275_v36  ;;  %v1330_v3 = vld [vmem:[%s1452_s4] ss:$0 sm:$0xff] }
  0x38   :  { %v218_v47 = vadd.f32 %v154_v38, %v122_v37  ;;  %v308_v48 = vsel %vm244_vm13, %v212_v27, %v276_v39  ;;  %v219_v49 = vadd.f32 %v155_v41, %v123_v40  ;;  %vm670_vm3 = vcmask 519168  }
  0x39   :  { %v378_v20 = vld.sshfl [vmem:[#allocation1 + $0x20] sm:$0xff pattern:$0x75316420]  ;;  %v220_v51 = vadd.f32 %v156_v44, %v124_v43  ;;  %v281_v53 = vmul.f32 0.2, %v217_v45  ;;  %vm249_vm14 = vcmp.ge.f32.partialorder %v217_v45, 0.0 }
  0x3a   :  { %384 = vst [vmem:[#allocation1 + $0x20] ss:$2 sm:$0xff] %v305_v42  ;;  %v282_v54 = vmul.f32 0.2, %v218_v47  ;;  %vm250_vm15 = vcmp.ge.f32.partialorder %v218_v47, 0.0  ;;  %vm251_vm0 = vcmp.ge.f32.partialorder %v219_v49, 0.0 }
  0x3b   :  { %385 = vst [vmem:[#allocation1 + $0x21] ss:$2 sm:$0xff] %v306_v9  ;;  %v283_v55 = vmul.f32 0.2, %v219_v49  ;;  %v284_v56 = vmul.f32 0.2, %v220_v51  ;;  %v313_v57 = vsel %vm249_vm14, %v217_v45, %v281_v53 }
  0x3c   :  { %v379_v50 = vld.sshfl [vmem:[#allocation1 + $0x30] sm:$0xff pattern:$0x75316420]  ;;  %vm252_vm1 = vcmp.ge.f32.partialorder %v220_v51, 0.0  ;;  %v314_v58 = vsel %vm250_vm15, %v218_v47, %v282_v54  ;;  %vm991_vm8 = vcmask 1041409   ;;  %vm993_vm10 = vcmask 1042434  }
  0x3d   :  { %386 = vst [vmem:[#allocation1 + $0x30] ss:$2 sm:$0xff] %v307_v46  ;;  %v423_v52 = vpack.c.bf16 %v379_v50, %v378_v20  ;;  %v315_v59 = vsel %vm251_vm0, %v219_v49, %v283_v55  ;;  %v316_v61 = vsel %vm252_vm1, %v220_v51, %v284_v56  ;;  %vm995_vm11 = vcmask 1043459  }
  0x3e   :  { %387 = vst [vmem:[#allocation1 + $0x31] ss:$2 sm:$0xff] %v308_v48  ;;  %vm997_vm14 = vcmask 1044484   ;;  %vm999_vm15 = vcmask 1045509   ;;  %vm1001_vm0 = vcmask 1046534  }
  0x3f   :  { %1061 = vmatmul.msk.bf16.gmra.mxu1 %vm460_vm4, %v423_v52 }
  0x42   :  { %v390_v60 = vld.sshfl [vmem:[#allocation1 + $0x20] sm:$0xff pattern:$0x75316420] }
  0x43   :  { %396 = vst [vmem:[#allocation1 + $0x20] ss:$2 sm:$0xff] %v313_v57 }
  0x44   :  { %397 = vst [vmem:[#allocation1 + $0x21] ss:$2 sm:$0xff] %v314_v58 }
  0x45   :  { %v391_v62 = vld.sshfl [vmem:[#allocation1 + $0x30] sm:$0xff pattern:$0x75316420] }
  0x46   :  { %398 = vst [vmem:[#allocation1 + $0x30] ss:$2 sm:$0xff] %v315_v59  ;;  %v425_v63 = vpack.c.bf16 %v391_v62, %v390_v60 }
  0x47   :  { %399 = vst [vmem:[#allocation1 + $0x31] ss:$2 sm:$0xff] %v316_v61 }
  0x48   :  { %1063 = vmatmul.msk.bf16.gmra.mxu2 %vm460_vm4, %v425_v63 }
  0x4b   :  { %v402_v0 = vld.sshfl [vmem:[#allocation1 + $0x20] sm:$0xff pattern:$0x75316420] }
  0x4e   :  { %v403_v18 = vld.sshfl [vmem:[#allocation1 + $0x30] sm:$0xff pattern:$0x75316420] }
  0x4f   :  { %v427_v1 = vpack.c.bf16 %v403_v18, %v402_v0 }
  0x51   :  { %1065 = vmatmul.msk.bf16.gmra.mxu3 %vm460_vm4, %v427_v1 }
  0x96   :  { %v494_v5 = vpop.f32.mrf.mxu0 }
  0x97   :  { %v538_v4 = vmul.f32 %v1325_v2, %v494_v5 }
  0x99   :  { %v558_v6 = vadd.f32 %v1330_v3, %v538_v4 }
  0x9b   :  { %vm574_vm2 = vcmp.ge.f32.partialorder %v558_v6, 0.0  ;;  %v590_v7 = vmul.f32 0.2, %v558_v6 }
  0x9d   :  { %v606_v8 = vsel %vm574_vm2, %v558_v6, %v590_v7 }
  0x9e   :  { %v638_v11 = vrot.slane %v606_v8, 4  ;;  %v671_v12 = vsel %vm670_vm3, %v606_v8, -inf  ;;  %v496_v14 = vpop.f32.mrf.mxu0 }
  0x9f   :  { %v672_v10 = vrot.slane %v671_v12, 4  ;;  %v539_v15 = vmul.f32 %v1325_v2, %v496_v14 }
  0xa0   :  { %v678_v16 = vsel %vm670_vm3, %v638_v11, -inf  ;;  %v504_v21 = vpop.f32.mrf.mxu1 }
  0xa1   :  { %v673_v19 = vmax.f32 %v671_v12, %v672_v10  ;;  %v679_v17 = vrot.slane %v678_v16, 4  ;;  %v559_v22 = vadd.f32 %v1330_v3, %v539_v15  ;;  %v542_v23 = vmul.f32 %v1325_v2, %v504_v21 }
  0xa3   :  { %vm575_vm4 = vcmp.ge.f32.partialorder %v559_v22, 0.0  ;;  %v591_v24 = vmul.f32 0.2, %v559_v22  ;;  %v680_v25 = vmax.f32 %v678_v16, %v679_v17  ;;  %v562_v26 = vadd.f32 %v1330_v3, %v542_v23 }
  0xa4   :  { %v674_v27 = vrot.slane %v673_v19, 2 }
  0xa5   :  { %v607_v13 = vsel %vm575_vm4, %v559_v22, %v591_v24  ;;  %vm578_vm5 = vcmp.ge.f32.partialorder %v562_v26, 0.0  ;;  %v594_v28 = vmul.f32 0.2, %v562_v26  ;;  %v681_v32 = vrot.slane %v680_v25, 2 }
  0xa6   :  { %v639_v29 = vrot.slane %v607_v13, 4  ;;  %v685_v30 = vsel %vm670_vm3, %v607_v13, -inf  ;;  %v675_v35 = vmax.f32 %v673_v19, %v674_v27  ;;  %vm1003_vm4 = vcmask 1047559  }
  0xa7   :  { %v686_v31 = vrot.slane %v685_v30, 4  ;;  %v610_v33 = vsel %vm578_vm5, %v562_v26, %v594_v28  ;;  %v682_v44 = vmax.f32 %v680_v25, %v681_v32 }
  0xa8   :  { %v692_v34 = vsel %vm670_vm3, %v639_v29, -inf  ;;  %v642_v36 = vrot.slane %v610_v33, 4  ;;  %v727_v37 = vsel %vm670_vm3, %v610_v33, -inf  ;;  %v506_v38 = vpop.f32.mrf.mxu1  ;;  %v676_v47 = vrot.slane %v675_v35, 1 }
  0xa9   :  { %v728_v39 = vrot.slane %v727_v37, 4  ;;  %v687_v40 = vmax.f32 %v685_v30, %v686_v31  ;;  %v693_v41 = vrot.slane %v692_v34, 4  ;;  %v543_v42 = vmul.f32 %v1325_v2, %v506_v38 }
  0xaa   :  { %v734_v43 = vsel %vm670_vm3, %v642_v36, -inf  ;;  %v683_v51 = vrot.slane %v682_v44, 1  ;;  %v677_v57 = vmax.f32 %v675_v35, %v676_v47 }
  0xab   :  { %v735_v9 = vrot.slane %v734_v43, 4  ;;  %v688_v45 = vrot.slane %v687_v40, 2  ;;  %v694_v46 = vmax.f32 %v692_v34, %v693_v41  ;;  %v563_v20 = vadd.f32 %v1330_v3, %v543_v42 }
  0xac   :  { %v729_v48 = vmax.f32 %v727_v37, %v728_v39  ;;  %v684_v63 = vmax.f32 %v682_v44, %v683_v51  ;;  %v895_v7 = vpack.c.bf16 %v677_v57, %v677_v57 }
  0xad   :  { %v736_v49 = vmax.f32 %v734_v43, %v735_v9  ;;  %vm579_vm6 = vcmp.ge.f32.partialorder %v563_v20, 0.0  ;;  %v595_v50 = vmul.f32 0.2, %v563_v20  ;;  %v689_v52 = vmax.f32 %v687_v40, %v688_v45 }
  0xae   :  { %v695_v53 = vrot.slane %v694_v46, 2  ;;  %v730_v58 = vrot.slane %v729_v48, 2  ;;  %v896_v16 = vpack.c.bf16 %v684_v63, %v684_v63  ;;  %v959_v27 = vunpack.c.l.b16 %v895_v7 }
  0xaf   :  { %v514_v54 = vpop.f32.mrf.mxu2  ;;  %v611_v55 = vsel %vm579_vm6, %v563_v20, %v595_v50  ;;  %v737_v59 = vrot.slane %v736_v49, 2  ;;  %v690_v0 = vrot.slane %v689_v52, 1 }
  0xb0   :  { %v546_v56 = vmul.f32 %v1325_v2, %v514_v54  ;;  %v643_v60 = vrot.slane %v611_v55, 4  ;;  %v741_v61 = vsel %vm670_vm3, %v611_v55, -inf  ;;  %v696_v18 = vmax.f32 %v694_v46, %v695_v53 }
  0xb1   :  { %v742_v5 = vrot.slane %v741_v61, 4  ;;  %v731_v8 = vmax.f32 %v729_v48, %v730_v58  ;;  %v738_v11 = vmax.f32 %v736_v49, %v737_v59  ;;  %v691_v19 = vmax.f32 %v689_v52, %v690_v0 }
  0xb2   :  { %v566_v62 = vadd.f32 %v1330_v3, %v546_v56  ;;  %v748_v4 = vsel %vm670_vm3, %v643_v60, -inf  ;;  %v697_v17 = vrot.slane %v696_v18, 1  ;;  %v960_v35 = vunpack.c.l.b16 %v896_v16 }
  0xb3   :  { %v499_v1 = vpop.f32.mrf.mxu0  ;;  %v743_v12 = vmax.f32 %v741_v61, %v742_v5  ;;  %v749_v14 = vrot.slane %v748_v4, 4  ;;  %v732_v24 = vrot.slane %v731_v8, 1  ;;  %v739_v25 = vrot.slane %v738_v11, 1 }
  0xb4   :  { %v540_v6 = vmul.f32 %v1325_v2, %v499_v1  ;;  %vm582_vm7 = vcmp.ge.f32.partialorder %v566_v62, 0.0  ;;  %v598_v15 = vmul.f32 0.2, %v566_v62  ;;  %v698_v30 = vmax.f32 %v696_v18, %v697_v17 }
  0xb5   :  { %v744_v21 = vrot.slane %v743_v12, 2  ;;  %v750_v22 = vmax.f32 %v748_v4, %v749_v14  ;;  %v897_v36 = vpack.c.bf16 %v691_v19, %v691_v19  ;;  %v733_v39 = vmax.f32 %v731_v8, %v732_v24 }
  0xb6   :  { %v560_v10 = vadd.f32 %v1330_v3, %v540_v6  ;;  %v614_v26 = vsel %vm582_vm7, %v566_v62, %v598_v15  ;;  %v740_v40 = vmax.f32 %v738_v11, %v739_v25  ;;  %v898_v20 = vpack.c.bf16 %v698_v30, %v698_v30 }
  0xb7   :  { %v751_v13 = vrot.slane %v750_v22, 2  ;;  %v646_v29 = vrot.slane %v614_v26, 4  ;;  %v745_v31 = vmax.f32 %v743_v12, %v744_v21  ;;  %v783_v38 = vsel %vm670_vm3, %v614_v26, -inf  ;;  %v516_v21 = vpop.f32.mrf.mxu2 }
  0xb8   :  { %vm576_vm9 = vcmp.ge.f32.partialorder %v560_v10, 0.0  ;;  %v592_v23 = vmul.f32 0.2, %v560_v10  ;;  %v784_v48 = vrot.slane %v783_v38, 4  ;;  %v961_v50 = vunpack.c.l.b16 %v897_v36 }
  0xb9   :  { %v752_v44 = vmax.f32 %v750_v22, %v751_v13  ;;  %v790_v46 = vsel %vm670_vm3, %v646_v29, -inf  ;;  %v746_v47 = vrot.slane %v745_v31, 1  ;;  %v992_v54 = vsel %vm991_vm8, %v960_v35, %v959_v27 }
  0xba   :  { %v608_v28 = vsel %vm576_vm9, %v560_v10, %v592_v23  ;;  %v903_v55 = vpack.c.bf16 %v733_v39, %v733_v39  ;;  %v791_v56 = vrot.slane %v790_v46, 4  ;;  %v904_v58 = vpack.c.bf16 %v740_v40, %v740_v40 }
  0xbb   :  { %v640_v32 = vrot.slane %v608_v28, 4  ;;  %v699_v33 = vsel %vm670_vm3, %v608_v28, -inf  ;;  %v501_v34 = vpop.f32.mrf.mxu0  ;;  %v753_v59 = vrot.slane %v752_v44, 1  ;;  %v747_v62 = vmax.f32 %v745_v31, %v746_v47 }
  0xbc   :  { %v700_v37 = vrot.slane %v699_v33, 4  ;;  %v509_v42 = vpop.f32.mrf.mxu1  ;;  %v541_v43 = vmul.f32 %v1325_v2, %v501_v34  ;;  %v785_v63 = vmax.f32 %v783_v38, %v784_v48  ;;  %v962_v18 = vunpack.c.l.b16 %v898_v20 }
  0xbd   :  { %v706_v41 = vsel %vm670_vm3, %v640_v32, -inf  ;;  %v544_v49 = vmul.f32 %v1325_v2, %v509_v42  ;;  %v994_v1 = vsel %vm993_vm10, %v961_v50, %v992_v54  ;;  %v792_v6 = vmax.f32 %v790_v46, %v791_v56 }
  0xbe   :  { %v701_v9 = vmax.f32 %v699_v33, %v700_v37  ;;  %v707_v45 = vrot.slane %v706_v41, 4  ;;  %v561_v53 = vadd.f32 %v1330_v3, %v541_v43  ;;  %v967_v11 = vunpack.c.l.b16 %v903_v55 }
  0xbf   :  { %v564_v57 = vadd.f32 %v1330_v3, %v544_v49  ;;  %v968_v12 = vunpack.c.l.b16 %v904_v58  ;;  %v754_v14 = vmax.f32 %v752_v44, %v753_v59  ;;  %v905_v15 = vpack.c.bf16 %v747_v62, %v747_v62 }
  0xc0   :  { %v702_v51 = vrot.slane %v701_v9, 2  ;;  %v708_v52 = vmax.f32 %v706_v41, %v707_v45  ;;  %vm577_vm13 = vcmp.ge.f32.partialorder %v561_v53, 0.0  ;;  %v593_v8 = vmul.f32 0.2, %v561_v53 }
  0xc1   :  { %vm580_vm12 = vcmp.ge.f32.partialorder %v564_v57, 0.0  ;;  %v596_v0 = vmul.f32 0.2, %v564_v57  ;;  %v786_v16 = vrot.slane %v785_v63, 2  ;;  %v996_v22 = vsel %vm995_vm11, %v962_v18, %v994_v1 }
  0xc2   :  { %v703_v60 = vmax.f32 %v701_v9, %v702_v51  ;;  %v709_v61 = vrot.slane %v708_v52, 2  ;;  %v609_v17 = vsel %vm577_vm13, %v561_v53, %v593_v8  ;;  %v793_v27 = vrot.slane %v792_v6, 2  ;;  %v524_v9 = vpop.f32.mrf.mxu3 }
  0xc3   :  { %v612_v7 = vsel %vm580_vm12, %v564_v57, %v596_v0  ;;  %v641_v28 = vrot.slane %v609_v17, 4  ;;  %v906_v29 = vpack.c.bf16 %v754_v14, %v754_v14  ;;  %v713_v31 = vsel %vm670_vm3, %v609_v17, -inf }
  0xc4   :  { %v710_v5 = vmax.f32 %v708_v52, %v709_v61  ;;  %v704_v4 = vrot.slane %v703_v60, 1  ;;  %v644_v10 = vrot.slane %v612_v7, 4  ;;  %v755_v19 = vsel %vm670_vm3, %v612_v7, -inf  ;;  %v511_v55 = vpop.f32.mrf.mxu1 }
  0xc5   :  { %v756_v24 = vrot.slane %v755_v19, 4  ;;  %v547_v32 = vmul.f32 %v1325_v2, %v516_v21  ;;  %v969_v33 = vunpack.c.l.b16 %v905_v15  ;;  %v787_v34 = vmax.f32 %v785_v63, %v786_v16 }
  0xc6   :  { %v711_v23 = vrot.slane %v710_v5, 1  ;;  %v762_v25 = vsel %vm670_vm3, %v644_v10, -inf  ;;  %v705_v26 = vmax.f32 %v703_v60, %v704_v4  ;;  %v714_v36 = vrot.slane %v713_v31, 4 }
  0xc7   :  { %v763_v13 = vrot.slane %v762_v25, 4  ;;  %v757_v30 = vmax.f32 %v755_v19, %v756_v24  ;;  %v1005_v37 = vsel %vm991_vm8, %v968_v12, %v967_v11  ;;  %v720_v40 = vsel %vm670_vm3, %v641_v28, -inf }
  0xc8   :  { %v712_v38 = vmax.f32 %v710_v5, %v711_v23  ;;  %v899_v41 = vpack.c.bf16 %v705_v26, %v705_v26  ;;  %v794_v42 = vmax.f32 %v792_v6, %v793_v27  ;;  %v715_v43 = vmax.f32 %v713_v31, %v714_v36 }
  0xc9   :  { %v764_v35 = vmax.f32 %v762_v25, %v763_v13  ;;  %v758_v39 = vrot.slane %v757_v30, 2  ;;  %v721_v44 = vrot.slane %v720_v40, 4  ;;  %v970_v45 = vunpack.c.l.b16 %v906_v29 }
  0xca   :  { %v567_v47 = vadd.f32 %v1330_v3, %v547_v32  ;;  %v1006_v48 = vsel %vm993_vm10, %v969_v33, %v1005_v37  ;;  %v788_v49 = vrot.slane %v787_v34, 1  ;;  %v716_v50 = vrot.slane %v715_v43, 2 }
  0xcb   :  { %v759_v46 = vmax.f32 %v757_v30, %v758_v39  ;;  %v765_v20 = vrot.slane %v764_v35, 2  ;;  %v722_v51 = vmax.f32 %v720_v40, %v721_v44  ;;  %v900_v52 = vpack.c.bf16 %v712_v38, %v712_v38  ;;  %v519_v10 = vpop.f32.mrf.mxu2 }
  0xcc   :  { %vm583_vm1 = vcmp.ge.f32.partialorder %v567_v47, 0.0  ;;  %v599_v53 = vmul.f32 0.2, %v567_v47  ;;  %v550_v54 = vmul.f32 %v1325_v2, %v524_v9  ;;  %v963_v56 = vunpack.c.l.b16 %v899_v41 }
  0xcd   :  { %v795_v57 = vrot.slane %v794_v42, 1  ;;  %v717_v58 = vmax.f32 %v715_v43, %v716_v50  ;;  %v723_v59 = vrot.slane %v722_v51, 2  ;;  %v760_v60 = vrot.slane %v759_v46, 1 }
  0xce   :  { %v766_v61 = vmax.f32 %v764_v35, %v765_v20  ;;  %v615_v62 = vsel %vm583_vm1, %v567_v47, %v599_v53  ;;  %v570_v63 = vadd.f32 %v1330_v3, %v550_v54  ;;  %v545_v5 = vmul.f32 %v1325_v2, %v511_v55 }
  0xcf   :  { %v718_v0 = vrot.slane %v717_v58, 1  ;;  %v724_v18 = vmax.f32 %v722_v51, %v723_v59  ;;  %v647_v1 = vrot.slane %v615_v62, 4  ;;  %v964_v4 = vunpack.c.l.b16 %v900_v52 }
  0xd0   :  { %v797_v6 = vsel %vm670_vm3, %v615_v62, -inf  ;;  %vm586_vm2 = vcmp.ge.f32.partialorder %v570_v63, 0.0  ;;  %v602_v7 = vmul.f32 0.2, %v570_v63  ;;  %v998_v8 = vsel %vm997_vm14, %v963_v56, %v996_v22 }
  0xd1   :  { %v719_v11 = vmax.f32 %v717_v58, %v718_v0  ;;  %v725_v12 = vrot.slane %v724_v18, 1  ;;  %v798_v14 = vrot.slane %v797_v6, 4  ;;  %v761_v15 = vmax.f32 %v759_v46, %v760_v60 }
  0xd2   :  { %v767_v16 = vrot.slane %v766_v61, 1  ;;  %v804_v19 = vsel %vm670_vm3, %v647_v1, -inf  ;;  %v618_v17 = vsel %vm586_vm2, %v570_v63, %v602_v7  ;;  %v565_v25 = vadd.f32 %v1330_v3, %v545_v5 }
  0xd3   :  { %v726_v21 = vmax.f32 %v724_v18, %v725_v12  ;;  %v901_v23 = vpack.c.bf16 %v719_v11, %v719_v11  ;;  %v799_v24 = vmax.f32 %v797_v6, %v798_v14  ;;  %v1000_v26 = vsel %vm999_vm15, %v964_v4, %v998_v8 }
  0xd4   :  { %v789_v27 = vmax.f32 %v787_v34, %v788_v49  ;;  %v796_v13 = vmax.f32 %v794_v42, %v795_v57  ;;  %v548_v22 = vmul.f32 %v1325_v2, %v519_v10  ;;  %v805_v30 = vrot.slane %v804_v19, 4 }
  0xd5   :  { %v902_v28 = vpack.c.bf16 %v726_v21, %v726_v21  ;;  %v965_v29 = vunpack.c.l.b16 %v901_v23  ;;  %v650_v31 = vrot.slane %v618_v17, 4  ;;  %v1007_v32 = vsel %vm995_vm11, %v970_v45, %v1006_v48  ;;  %v526_v45 = vpop.f32.mrf.mxu3 }
  0xd6   :  { %v768_v33 = vmax.f32 %v766_v61, %v767_v16  ;;  %v907_v35 = vpack.c.bf16 %v761_v15, %v761_v15  ;;  %v800_v38 = vrot.slane %v799_v24, 2  ;;  %vm581_vm5 = vcmp.ge.f32.partialorder %v565_v25, 0.0 }
  0xd7   :  { %v966_v36 = vunpack.c.l.b16 %v902_v28  ;;  %v1002_v37 = vsel %vm1001_vm0, %v965_v29, %v1000_v26  ;;  %v911_v39 = vpack.c.bf16 %v789_v27, %v789_v27  ;;  %v839_v34 = vsel %vm670_vm3, %v618_v17, -inf }
  0xd8   :  { %v597_v40 = vmul.f32 0.2, %v565_v25  ;;  %v568_v41 = vadd.f32 %v1330_v3, %v548_v22  ;;  %v912_v42 = vpack.c.bf16 %v796_v13, %v796_v13  ;;  %v806_v44 = vmax.f32 %v804_v19, %v805_v30 }
  0xd9   :  { %v1004_v43 = vsel %vm1003_vm4, %v966_v36, %v1002_v37  ;;  %v846_v9 = vsel %vm670_vm3, %v650_v31, -inf  ;;  %v908_v46 = vpack.c.bf16 %v768_v33, %v768_v33  ;;  %v971_v20 = vunpack.c.l.b16 %v907_v35 }
  0xda   :  { %v1026_v47 = vpack.c.b16 %v1004_v43, %v1004_v43  ;;  %v613_v48 = vsel %vm581_vm5, %v565_v25, %v597_v40  ;;  %v801_v49 = vmax.f32 %v799_v24, %v800_v38  ;;  %v840_v50 = vrot.slane %v839_v34, 4  ;;  %v521_v25 = vpop.f32.mrf.mxu2 }
  0xdb   :  { %v645_v51 = vrot.slane %v613_v48, 4  ;;  %v769_v52 = vsel %vm670_vm3, %v613_v48, -inf  ;;  %v847_v53 = vrot.slane %v846_v9, 4  ;;  %vm584_vm6 = vcmp.ge.f32.partialorder %v568_v41, 0.0 }
  0xdc   :  { %1034 = vst.msk [vmem:[%s1453_s5] sm:$0xf] %vm670_vm3, %v1026_v47  ;;  %v770_v54 = vrot.slane %v769_v52, 4  ;;  %v551_v55 = vmul.f32 %v1325_v2, %v526_v45  ;;  %v975_v56 = vunpack.c.l.b16 %v911_v39  ;;  %v807_v57 = vrot.slane %v806_v44, 2 }
  0xdd   :  { %v776_v58 = vsel %vm670_vm3, %v645_v51, -inf  ;;  %v600_v59 = vmul.f32 0.2, %v568_v41  ;;  %v976_v60 = vunpack.c.l.b16 %v912_v42  ;;  %v972_v61 = vunpack.c.l.b16 %v908_v46  ;;  %v529_v26 = vpop.f32.mrf.mxu3 }
  0xde   :  { %v771_v62 = vmax.f32 %v769_v52, %v770_v54  ;;  %v777_v63 = vrot.slane %v776_v58, 4  ;;  %v1008_v0 = vsel %vm997_vm14, %v971_v20, %v1007_v32  ;;  %v802_v18 = vrot.slane %v801_v49, 1 }
  0xdf   :  { %v841_v1 = vmax.f32 %v839_v34, %v840_v50  ;;  %v616_v5 = vsel %vm584_vm6, %v568_v41, %v600_v59  ;;  %v848_v4 = vmax.f32 %v846_v9, %v847_v53  ;;  %v571_v8 = vadd.f32 %v1330_v3, %v551_v55 }
  0xe0   :  { %v772_v6 = vrot.slane %v771_v62, 2  ;;  %v778_v7 = vmax.f32 %v776_v58, %v777_v63  ;;  %v808_v11 = vmax.f32 %v806_v44, %v807_v57  ;;  %v648_v12 = vrot.slane %v616_v5, 4 }
  0xe1   :  { %v811_v14 = vsel %vm670_vm3, %v616_v5, -inf  ;;  %v1398_v10 = vsel %vm991_vm8, %v976_v60, %v975_v56  ;;  %v1009_v15 = vsel %vm999_vm15, %v972_v61, %v1008_v0  ;;  %v803_v17 = vmax.f32 %v801_v49, %v802_v18 }
  0xe2   :  { %v773_v16 = vmax.f32 %v771_v62, %v772_v6  ;;  %v779_v19 = vrot.slane %v778_v7, 2  ;;  %v842_v21 = vrot.slane %v841_v1, 2  ;;  %v812_v23 = vrot.slane %v811_v14, 4 }
  0xe3   :  { %v818_v24 = vsel %vm670_vm3, %v648_v12, -inf  ;;  %v849_v27 = vrot.slane %v848_v4, 2  ;;  %vm587_vm7 = vcmp.ge.f32.partialorder %v571_v8, 0.0  ;;  %v809_v28 = vrot.slane %v808_v11, 1 }
  0xe4   :  { %v774_v13 = vrot.slane %v773_v16, 1  ;;  %v780_v22 = vmax.f32 %v778_v7, %v779_v19  ;;  %v813_v29 = vmax.f32 %v811_v14, %v812_v23  ;;  %v819_v30 = vrot.slane %v818_v24, 4 }
  0xe5   :  { %v603_v31 = vmul.f32 0.2, %v571_v8  ;;  %v549_v35 = vmul.f32 %v1325_v2, %v521_v25  ;;  %v552_v36 = vmul.f32 %v1325_v2, %v529_v26  ;;  %v843_v37 = vmax.f32 %v841_v1, %v842_v21 }
  0xe6   :  { %v775_v32 = vmax.f32 %v773_v16, %v774_v13  ;;  %v781_v33 = vrot.slane %v780_v22, 1  ;;  %v814_v38 = vrot.slane %v813_v29, 2  ;;  %v820_v39 = vmax.f32 %v818_v24, %v819_v30 }
  0xe7   :  { %v619_v34 = vsel %vm587_vm7, %v571_v8, %v603_v31  ;;  %v569_v46 = vadd.f32 %v1330_v3, %v549_v35  ;;  %v572_v49 = vadd.f32 %v1330_v3, %v552_v36  ;;  %v913_v50 = vpack.c.bf16 %v803_v17, %v803_v17 }
  0xe8   :  { %v782_v40 = vmax.f32 %v780_v22, %v781_v33  ;;  %v909_v41 = vpack.c.bf16 %v775_v32, %v775_v32  ;;  %v651_v42 = vrot.slane %v619_v34, 4  ;;  %v853_v43 = vsel %vm670_vm3, %v619_v34, -inf }
  0xe9   :  { %v815_v44 = vmax.f32 %v813_v29, %v814_v38  ;;  %v821_v9 = vrot.slane %v820_v39, 2  ;;  %v854_v45 = vrot.slane %v853_v43, 4  ;;  %vm585_vm9 = vcmp.ge.f32.partialorder %v569_v46, 0.0 }
  0xea   :  { %v910_v20 = vpack.c.bf16 %v782_v40, %v782_v40  ;;  %v973_v47 = vunpack.c.l.b16 %v909_v41  ;;  %v860_v48 = vsel %vm670_vm3, %v651_v42, -inf  ;;  %v601_v56 = vmul.f32 0.2, %v569_v46 }
  0xeb   :  { %v822_v51 = vmax.f32 %v820_v39, %v821_v9  ;;  %v855_v52 = vmax.f32 %v853_v43, %v854_v45  ;;  %v861_v53 = vrot.slane %v860_v48, 4  ;;  %v810_v57 = vmax.f32 %v808_v11, %v809_v28 }
  0xec   :  { %v974_v54 = vunpack.c.l.b16 %v910_v20  ;;  %v1010_v55 = vsel %vm1001_vm0, %v973_v47, %v1009_v15  ;;  %v850_v58 = vmax.f32 %v848_v4, %v849_v27  ;;  %v816_v59 = vrot.slane %v815_v44, 1  ;;  %v531_v27 = vpop.f32.mrf.mxu3 }
  0xed   :  { %v862_v60 = vmax.f32 %v860_v48, %v861_v53  ;;  %v617_v62 = vsel %vm585_vm9, %v569_v46, %v601_v56  ;;  %vm588_vm12 = vcmp.ge.f32.partialorder %v572_v49, 0.0  ;;  %v604_v63 = vmul.f32 0.2, %v572_v49 }
  0xee   :  { %v1011_v61 = vsel %vm1003_vm4, %v974_v54, %v1010_v55  ;;  %v977_v0 = vunpack.c.l.b16 %v913_v50  ;;  %v844_v18 = vrot.slane %v843_v37, 1  ;;  %v856_v5 = vrot.slane %v855_v52, 2 }
  0xef   :  { %v1027_v1 = vpack.c.b16 %v1011_v61, %v1011_v61  ;;  %v823_v6 = vrot.slane %v822_v51, 1  ;;  %v649_v7 = vrot.slane %v617_v62, 4  ;;  %v825_v8 = vsel %vm670_vm3, %v617_v62, -inf }
  0xf0   :  { %v620_v12 = vsel %vm588_vm12, %v572_v49, %v604_v63  ;;  %v851_v14 = vrot.slane %v850_v58, 1  ;;  %v817_v4 = vmax.f32 %v815_v44, %v816_v59  ;;  %v863_v11 = vrot.slane %v862_v60, 2 }
  0xf1   :  { %1035 = vst.msk [vmem:[%s1453_s5 + $0x4] sm:$0xf] %vm670_vm3, %v1027_v1  ;;  %v826_v15 = vrot.slane %v825_v8, 4  ;;  %v914_v16 = vpack.c.bf16 %v810_v57, %v810_v57  ;;  %v832_v19 = vsel %vm670_vm3, %v649_v7, -inf  ;;  %v652_v17 = vrot.slane %v620_v12, 4 }
  0xf2   :  { %v867_v21 = vsel %vm670_vm3, %v620_v12, -inf  ;;  %v1013_v23 = vsel %vm993_vm10, %v977_v0, %v1398_v10  ;;  %v1419_v24 = vmax.f32 %v843_v37, %v844_v18  ;;  %v857_v25 = vmax.f32 %v855_v52, %v856_v5 }
  0xf3   :  { %v827_v26 = vmax.f32 %v825_v8, %v826_v15  ;;  %v824_v13 = vmax.f32 %v822_v51, %v823_v6  ;;  %v833_v22 = vrot.slane %v832_v19, 4  ;;  %v868_v28 = vrot.slane %v867_v21, 4 }
  0xf4   :  { %v874_v29 = vsel %vm670_vm3, %v652_v17, -inf  ;;  %v915_v30 = vpack.c.bf16 %v817_v4, %v817_v4  ;;  %v864_v31 = vmax.f32 %v862_v60, %v863_v11  ;;  %v852_v35 = vmax.f32 %v850_v58, %v851_v14 }
  0xf5   :  { %v828_v32 = vrot.slane %v827_v26, 2  ;;  %v875_v33 = vrot.slane %v874_v29, 4  ;;  %v834_v36 = vmax.f32 %v832_v19, %v833_v22  ;;  %v869_v38 = vmax.f32 %v867_v21, %v868_v28 }
  0xf6   :  { %v553_v39 = vmul.f32 %v1325_v2, %v531_v27  ;;  %v978_v10 = vunpack.c.l.b16 %v914_v16  ;;  %v858_v37 = vrot.slane %v857_v25, 1  ;;  %v916_v41 = vpack.c.bf16 %v824_v13, %v824_v13 }
  0xf7   :  { %v829_v34 = vmax.f32 %v827_v26, %v828_v32  ;;  %v876_v40 = vmax.f32 %v874_v29, %v875_v33  ;;  %v835_v42 = vrot.slane %v834_v36, 2  ;;  %v870_v43 = vrot.slane %v869_v38, 2 }
  0xf8   :  { %v573_v44 = vadd.f32 %v1330_v3, %v553_v39  ;;  %v979_v9 = vunpack.c.l.b16 %v915_v30  ;;  %v865_v45 = vrot.slane %v864_v31, 1  ;;  %v920_v47 = vpack.c.bf16 %v852_v35, %v852_v35 }
  0xf9   :  { %v830_v46 = vrot.slane %v829_v34, 1  ;;  %v877_v20 = vrot.slane %v876_v40, 2  ;;  %v836_v48 = vmax.f32 %v834_v36, %v835_v42  ;;  %v871_v49 = vmax.f32 %v869_v38, %v870_v43 }
  0xfa   :  { %vm589_vm13 = vcmp.ge.f32.partialorder %v573_v44, 0.0  ;;  %v859_v50 = vmax.f32 %v857_v25, %v858_v37  ;;  %v605_v52 = vmul.f32 0.2, %v573_v44  ;;  %v1014_v53 = vsel %vm995_vm11, %v978_v10, %v1013_v23 }
  0xfb   :  { %v831_v51 = vmax.f32 %v829_v34, %v830_v46  ;;  %v878_v2 = vmax.f32 %v876_v40, %v877_v20  ;;  %v980_v54 = vunpack.c.l.b16 %v916_v41  ;;  %v837_v55 = vrot.slane %v836_v48, 1 }
  0xfc   :  { %v872_v56 = vrot.slane %v871_v49, 1  ;;  %v1015_v57 = vsel %vm997_vm14, %v979_v9, %v1014_v53  ;;  %v866_v3 = vmax.f32 %v864_v31, %v865_v45  ;;  %v621_v59 = vsel %vm589_vm13, %v573_v44, %v605_v52 }
  0xfd   :  { %v917_v58 = vpack.c.bf16 %v831_v51, %v831_v51  ;;  %v838_v60 = vmax.f32 %v836_v48, %v837_v55  ;;  %v879_v61 = vrot.slane %v878_v2, 1  ;;  %v653_v62 = vrot.slane %v621_v59, 4 }
  0xfe   :  { %v881_v63 = vsel %vm670_vm3, %v621_v59, -inf  ;;  %v921_v0 = vpack.c.bf16 %v859_v50, %v859_v50  ;;  %v873_v1 = vmax.f32 %v871_v49, %v872_v56  ;;  %v919_v6 = vpack.c.bf16 %v1419_v24, %v1419_v24 }
  0xff   :  { %v981_v18 = vunpack.c.l.b16 %v917_v58  ;;  %v882_v5 = vrot.slane %v881_v63, 4  ;;  %v1016_v7 = vsel %vm999_vm15, %v980_v54, %v1015_v57  ;;  %v918_v8 = vpack.c.bf16 %v838_v60, %v838_v60 }
 0x100   :  { %v888_v12 = vsel %vm670_vm3, %v653_v62, -inf  ;;  %v984_v15 = vunpack.c.l.b16 %v920_v47  ;;  %v922_v16 = vpack.c.bf16 %v866_v3, %v866_v3  ;;  %v880_v17 = vmax.f32 %v878_v2, %v879_v61 }
 0x101   :  { %v1017_v14 = vsel %vm1001_vm0, %v981_v18, %v1016_v7  ;;  %v883_v4 = vmax.f32 %v881_v63, %v882_v5  ;;  %v889_v11 = vrot.slane %v888_v12, 4  ;;  %v982_v19 = vunpack.c.l.b16 %v918_v8 }
 0x102   :  { %v985_v21 = vunpack.c.l.b16 %v921_v0  ;;  %v923_v23 = vpack.c.bf16 %v873_v1, %v873_v1  ;;  %v983_v27 = vunpack.c.l.b16 %v919_v6  ;;  %v986_v30 = vunpack.c.l.b16 %v922_v16 }
 0x103   :  { %v884_v25 = vrot.slane %v883_v4, 2  ;;  %v890_v26 = vmax.f32 %v888_v12, %v889_v11  ;;  %v1018_v24 = vsel %vm1003_vm4, %v982_v19, %v1017_v14  ;;  %v924_v31 = vpack.c.bf16 %v880_v17, %v880_v17 }
 0x104   :  { %v1028_v13 = vpack.c.b16 %v1018_v24, %v1018_v24  ;;  %v1019_v29 = vsel %vm991_vm8, %v984_v15, %v983_v27  ;;  %v987_v33 = vunpack.c.l.b16 %v923_v23 }
 0x105   :  { %v885_v22 = vmax.f32 %v883_v4, %v884_v25  ;;  %v891_v28 = vrot.slane %v890_v26, 2  ;;  %v1020_v32 = vsel %vm993_vm10, %v985_v21, %v1019_v29  ;;  %v988_v37 = vunpack.c.l.b16 %v924_v31 }
 0x106   :  { %1036 = vst.msk [vmem:[%s1453_s5 + $0x8] sm:$0xf] %vm670_vm3, %v1028_v13  ;;  %v1021_v10 = vsel %vm995_vm11, %v986_v30, %v1020_v32 }
 0x107   :  { %v886_v35 = vrot.slane %v885_v22, 1  ;;  %v892_v36 = vmax.f32 %v890_v26, %v891_v28  ;;  %v1022_v34 = vsel %vm997_vm14, %v987_v33, %v1021_v10 }
 0x108   :  { %v1023_v44 = vsel %vm999_vm15, %v988_v37, %v1022_v34 }
 0x109   :  { %v887_v38 = vmax.f32 %v885_v22, %v886_v35  ;;  %v893_v39 = vrot.slane %v892_v36, 1 }
 0x10b   :  { %v894_v40 = vmax.f32 %v892_v36, %v893_v39  ;;  %v925_v41 = vpack.c.bf16 %v887_v38, %v887_v38 }
 0x10d   :  { %v926_v42 = vpack.c.bf16 %v894_v40, %v894_v40  ;;  %v989_v43 = vunpack.c.l.b16 %v925_v41 }
 0x10f   :  { %v990_v9 = vunpack.c.l.b16 %v926_v42  ;;  %v1024_v45 = vsel %vm1001_vm0, %v989_v43, %v1023_v44 }
 0x111   :  { %v1025_v46 = vsel %vm1003_vm4, %v990_v9, %v1024_v45 }
 0x112   :  { %v1029_v20 = vpack.c.b16 %v1025_v46, %v1025_v46 }
 0x114   :  { %1037 = vst.msk [vmem:[%s1453_s5 + $0xc] sm:$0xf] %vm670_vm3, %v1029_v20 }

// kernel: forward.30
= control target key start
LH: loop header
LB: loop body
LE: loop exit
PB: predicated region body
PF: predicated region fallthrough
CT: control target
= control target key end

     0   :  { %vm66_vm0 = vcmask 523264   ;;  %vm96_vm1 = vcmask 519168   ;;  %s330_s1 = inlined_call_operand.vmem [shape: bf16[64,64], index: 1, kind: input, shape index: {}]   ;;  %s331_s2 = inlined_call_operand.vmem [shape: bf16[64,64], index: 2, kind: input, shape index: {}]   ;;  %s332_s0 = inlined_call_operand.vmem [shape: bf16[32,64], index: 0, kind: input, shape index: {}]   ;;  %s333_s3 = inlined_call_operand.vmem [shape: f32[1,64], index: 3, kind: input, shape index: {}]   ;;  %s334_s4 = inlined_call_operand.vmem [shape: bf16[32,64], index: 4, kind: output, shape index: {0}]   ;;  %s335_s5 = inlined_call_operand.vmem [shape: bf16[32,64], index: 5, kind: output, shape index: {1}]  }
   0x1   :  { %v221_v0 = vld [vmem:[%s330_s1 + $0x18] sm:$0xff]  ;;  %v220_v2 = vld [vmem:[%s330_s1 + $0x10] sm:$0xff]  ;;  %v219_v4 = vld [vmem:[%s330_s1 + $0x8] sm:$0xff] }
   0x2   :  { %v225_v1 = vld [vmem:[%s331_s2 + $0x18] sm:$0xff]  ;;  %77 = vmatpush.bf16.msra.mxu0 %v221_v0  ;;  %226 = vmatpush.bf16.msra.mxu2 %v221_v0  ;;  %v224_v3 = vld [vmem:[%s331_s2 + $0x10] sm:$0xff]  ;;  %v223_v5 = vld [vmem:[%s331_s2 + $0x8] sm:$0xff] }
   0x3   :  { %141 = vmatpush.bf16.msra.mxu1 %v225_v1  ;;  %230 = vmatpush.bf16.msra.mxu3 %v225_v1  ;;  %v218_v6 = vld [vmem:[%s330_s1] sm:$0xff]  ;;  %v217_v9 = vld [vmem:[%s332_s0 + $0x8] sm:$0xff] }
   0x4   :  { %v222_v7 = vld [vmem:[%s331_s2] sm:$0xff] }
   0x5   :  { %v216_v8 = vld [vmem:[%s332_s0] sm:$0xff] }
   0x6   :  { %78 = vmatpush.bf16.msra.mxu0 %v220_v2  ;;  %227 = vmatpush.bf16.msra.mxu2 %v220_v2  ;;  %v234_v10 = vld [vmem:[%s333_s3] ss:$0 sm:$0xff] }
   0x7   :  { %142 = vmatpush.bf16.msra.mxu1 %v224_v3  ;;  %231 = vmatpush.bf16.msra.mxu3 %v224_v3 }
   0xa   :  { %79 = vmatpush.bf16.msra.mxu0 %v219_v4  ;;  %228 = vmatpush.bf16.msra.mxu2 %v219_v4 }
   0xb   :  { %143 = vmatpush.bf16.msra.mxu1 %v223_v5  ;;  %232 = vmatpush.bf16.msra.mxu3 %v223_v5 }
   0xe   :  { %80 = vmatpush.bf16.msra.mxu0 %v218_v6  ;;  %229 = vmatpush.bf16.msra.mxu2 %v218_v6 }
   0xf   :  { %144 = vmatpush.bf16.msra.mxu1 %v222_v7  ;;  %233 = vmatpush.bf16.msra.mxu3 %v222_v7 }
  0x11   :  { %196 = vmatmul.msk.bf16.vlgmr.msra.gmra.mxu0 %vm66_vm0, %v216_v8  ;;  %197 = vmatmul.msk.bf16.vlgmr.msra.gmra.mxu2 %vm66_vm0, %v217_v9 }
  0x12   :  { %214 = vmatmul.msk.bf16.vlgmr.msra.gmra.mxu1 %vm66_vm0, %v216_v8  ;;  %215 = vmatmul.msk.bf16.vlgmr.msra.gmra.mxu3 %vm66_vm0, %v217_v9 }
  0x8e   :  { %v82_v11 = vpop.f32.mrf.mxu0 }
  0x8f   :  { %v92_v12 = vpack.c.bf16 %v82_v11, %v82_v11  ;;  %v146_v13 = vpop.f32.mrf.mxu1 }
  0x90   :  { %v147_v14 = vadd.f32 %v234_v10, %v146_v13 }
  0x91   :  { %97 = vst.msk [vmem:[%s334_s4] sm:$0xf] %vm96_vm1, %v92_v12 }
  0x92   :  { %v156_v15 = vpack.c.bf16 %v147_v14, %v147_v14 }
  0x94   :  { %160 = vst.msk [vmem:[%s335_s5] sm:$0xf] %vm96_vm1, %v156_v15  ;;  %v87_v16 = vpop.f32.mrf.mxu2 }
  0x95   :  { %v94_v17 = vpack.c.bf16 %v87_v16, %v87_v16  ;;  %v151_v18 = vpop.f32.mrf.mxu3 }
  0x96   :  { %v152_v19 = vadd.f32 %v234_v10, %v151_v18  ;;  %v84_v20 = vpop.f32.mrf.mxu0 }
  0x97   :  { %99 = vst.msk [vmem:[%s334_s4 + $0x8] sm:$0xf] %vm96_vm1, %v94_v17  ;;  %v93_v21 = vpack.c.bf16 %v84_v20, %v84_v20  ;;  %v148_v22 = vpop.f32.mrf.mxu1 }
  0x98   :  { %v158_v23 = vpack.c.bf16 %v152_v19, %v152_v19  ;;  %v149_v24 = vadd.f32 %v234_v10, %v148_v22 }
  0x99   :  { %98 = vst.msk [vmem:[%s334_s4 + $0x4] sm:$0xf] %vm96_vm1, %v93_v21 }
  0x9a   :  { %162 = vst.msk [vmem:[%s335_s5 + $0x8] sm:$0xf] %vm96_vm1, %v158_v23  ;;  %v157_v25 = vpack.c.bf16 %v149_v24, %v149_v24 }
  0x9c   :  { %161 = vst.msk [vmem:[%s335_s5 + $0x4] sm:$0xf] %vm96_vm1, %v157_v25  ;;  %v89_v26 = vpop.f32.mrf.mxu2 }
  0x9d   :  { %v95_v27 = vpack.c.bf16 %v89_v26, %v89_v26  ;;  %v153_v28 = vpop.f32.mrf.mxu3 }
  0x9e   :  { %v154_v29 = vadd.f32 %v234_v10, %v153_v28 }
  0x9f   :  { %100 = vst.msk [vmem:[%s334_s4 + $0xc] sm:$0xf] %vm96_vm1, %v95_v27 }
  0xa0   :  { %v159_v30 = vpack.c.bf16 %v154_v29, %v154_v29 }
  0xa2   :  { %163 = vst.msk [vmem:[%s335_s5 + $0xc] sm:$0xf] %vm96_vm1, %v159_v30 }

// kernel: forward.34
= control target key start
LH: loop header
LB: loop body
LE: loop exit
PB: predicated region body
PF: predicated region fallthrough
CT: control target
= control target key end

     0   :  { %s1537_s1 = inlined_call_operand.vmem [shape: bf16[32,64], index: 1, kind: input, shape index: {}]   ;;  %s1538_s0 = inlined_call_operand.vmem [shape: bf16[32,4,64], index: 0, kind: input, shape index: {}]   ;;  %s1539_s2 = inlined_call_operand.vmem [shape: bf16[32,64], index: 2, kind: output, shape index: {}]  }
   0x1   :  { %v680_v0 = vld [vmem:[%s1537_s1] sm:$0xff]   ;;  %v687_v2 = vld [vmem:[%s1537_s1 + $0x8] sm:$0xff]   ;;  %v784_v38 = vld [vmem:[%s1538_s0 + $0x10] sm:$0x3] }
   0x2   :  { %v706_v1 = vunpack.c.l.bf16 %v680_v0  ;;  %v711_v3 = vunpack.c.h.bf16 %v680_v0  ;;  %v713_v4 = vunpack.c.l.bf16 %v687_v2  ;;  %v715_v5 = vunpack.c.h.bf16 %v687_v2  ;;  %v736_v22 = vld [vmem:[%s1538_s0] sm:$0x3]  ;;  %v741_v23 = vld [vmem:[%s1538_s0 + $0x2] sm:$0x3]  ;;  %v746_v24 = vld [vmem:[%s1538_s0 + $0x4] sm:$0x3] }
   0x3   :  { %v755_v29 = vld [vmem:[%s1538_s0 + $0x6] sm:$0x3]  ;;  %v760_v30 = vld [vmem:[%s1538_s0 + $0x8] sm:$0x3]  ;;  %v765_v31 = vld [vmem:[%s1538_s0 + $0xa] sm:$0x3] }
   0x4   :  { %v23_v6 = vrot.slane %v706_v1, 1  ;;  %v24_v7 = vrot.slane %v706_v1, 2  ;;  %v25_v8 = vrot.slane %v706_v1, 3  ;;  %v26_v9 = vrot.slane %v706_v1, 4  ;;  %v770_v32 = vld [vmem:[%s1538_s0 + $0xc] sm:$0x3] }
   0x5   :  { %v27_v10 = vrot.slane %v706_v1, 5  ;;  %v28_v11 = vrot.slane %v706_v1, 6  ;;  %v29_v12 = vrot.slane %v706_v1, 7  ;;  %v30_v13 = vrot.slane %v711_v3, 1  ;;  %v779_v37 = vld [vmem:[%s1538_s0 + $0xe] sm:$0x3] }
   0x6   :  { %v31_v14 = vrot.slane %v711_v3, 2  ;;  %v32_v15 = vrot.slane %v711_v3, 3  ;;  %v33_v16 = vrot.slane %v711_v3, 4  ;;  %v34_v17 = vrot.slane %v711_v3, 5  ;;  %v789_v39 = vld [vmem:[%s1538_s0 + $0x12] sm:$0x3] }
   0x7   :  { %v35_v18 = vrot.slane %v711_v3, 6  ;;  %v36_v19 = vrot.slane %v711_v3, 7  ;;  %v37_v20 = vrot.slane %v713_v4, 1  ;;  %v38_v21 = vrot.slane %v713_v4, 2  ;;  %v794_v40 = vld [vmem:[%s1538_s0 + $0x14] sm:$0x3] }
   0x8   :  { %v39_v25 = vrot.slane %v713_v4, 3  ;;  %v40_v26 = vrot.slane %v713_v4, 4  ;;  %v803_v45 = vld [vmem:[%s1538_s0 + $0x16] sm:$0x3]  ;;  %v808_v46 = vld [vmem:[%s1538_s0 + $0x18] sm:$0x3] }
   0x9   :  { %v813_v47 = vld [vmem:[%s1538_s0 + $0x1a] sm:$0x3]  ;;  %v818_v48 = vld [vmem:[%s1538_s0 + $0x1c] sm:$0x3]  ;;  %v823_v49 = vld [vmem:[%s1538_s0 + $0x1e] sm:$0x3] }
   0xa   :  { %v828_v50 = vld [vmem:[%s1538_s0 + $0x20] sm:$0x3]  ;;  %v833_v51 = vld [vmem:[%s1538_s0 + $0x22] sm:$0x3]  ;;  %v838_v52 = vld [vmem:[%s1538_s0 + $0x24] sm:$0x3] }
   0xb   :  { %v846_v56 = vld [vmem:[%s1538_s0 + $0x26] sm:$0x3]  ;;  %v851_v57 = vld [vmem:[%s1538_s0 + $0x28] sm:$0x3]  ;;  %v856_v58 = vld [vmem:[%s1538_s0 + $0x2a] sm:$0x3] }
   0xc   :  { %1551 = vst [vmem:[#allocation2_spill] sm:$0xff] %v856_v58  ;;  %v865_v63 = vld [vmem:[%s1538_s0 + $0x2c] sm:$0x3]  ;;  %v870_v0 = vld [vmem:[%s1538_s0 + $0x2e] sm:$0x3]  ;;  %v115_v33 = vperm.slane %v706_v1, 0 }
   0xd   :  { %1552 = vst [vmem:[#allocation3_spill] sm:$0xff] %v865_v63  ;;  %v875_v2 = vld [vmem:[%s1538_s0 + $0x30] sm:$0x3]  ;;  %v884_v55 = vld [vmem:[%s1538_s0 + $0x32] sm:$0x3]  ;;  %v116_v62 = vperm.slane %v23_v6, 0 }
   0xe   :  { %1553 = vst [vmem:[#allocation4_spill] sm:$0xff] %v870_v0  ;;  %v889_v54 = vld [vmem:[%s1538_s0 + $0x34] sm:$0x3]  ;;  %v894_v60 = vld [vmem:[%s1538_s0 + $0x36] sm:$0x3]  ;;  %v117_v53 = vperm.slane %v24_v7, 0 }
   0xf   :  { %1554 = vst [vmem:[#allocation5_spill] sm:$0xff] %v875_v2  ;;  %v903_v44 = vld [vmem:[%s1538_s0 + $0x38] sm:$0x3]  ;;  %v908_v43 = vld [vmem:[%s1538_s0 + $0x3a] sm:$0x3]  ;;  %v118_v42 = vperm.slane %v25_v8, 0 }
  0x10   :  { %1555 = vst [vmem:[#allocation6_spill] sm:$0xff] %v884_v55  ;;  %v913_v61 = vld [vmem:[%s1538_s0 + $0x3c] sm:$0x3]  ;;  %v922_v41 = vld [vmem:[%s1538_s0 + $0x3e] sm:$0x3]  ;;  %v119_v27 = vperm.slane %v26_v9, 0 }
  0x11   :  { %1556 = vst [vmem:[#allocation7_spill] sm:$0xff] %v889_v54  ;;  %v120_v36 = vperm.slane %v27_v10, 0  ;;  %v121_v34 = vperm.slane %v28_v11, 0  ;;  %v122_v35 = vperm.slane %v29_v12, 0  ;;  %v123_v6 = vperm.slane %v711_v3, 0 }
  0x12   :  { %1557 = vst [vmem:[#allocation8_spill] sm:$0xff] %v894_v60  ;;  %v124_v7 = vperm.slane %v30_v13, 0  ;;  %v125_v8 = vperm.slane %v31_v14, 0  ;;  %v126_v9 = vperm.slane %v32_v15, 0  ;;  %v127_v10 = vperm.slane %v33_v16, 0 }
  0x13   :  { %1558 = vst [vmem:[#allocation9_spill] sm:$0xff] %v903_v44  ;;  %v128_v11 = vperm.slane %v34_v17, 0  ;;  %v129_v1 = vperm.slane %v35_v18, 0  ;;  %v130_v12 = vperm.slane %v36_v19, 0  ;;  %v131_v13 = vperm.slane %v713_v4, 0 }
  0x14   :  { %1559 = vst [vmem:[#allocation10_spill] sm:$0xff] %v908_v43  ;;  %v132_v14 = vperm.slane %v37_v20, 0  ;;  %v133_v15 = vperm.slane %v38_v21, 0  ;;  %v134_v16 = vperm.slane %v39_v25, 0  ;;  %v135_v17 = vperm.slane %v40_v26, 0 }
  0x15   :  { %1560 = vst [vmem:[#allocation11_spill] sm:$0xff] %v913_v61  ;;  %v1562_v28 = vrot.slane %v713_v4, 5  ;;  %v1563_v3 = vrot.slane %v713_v4, 6  ;;  %v1564_v59 = vrot.slane %v713_v4, 7  ;;  %v139_v20 = vperm.slane %v715_v5, 0 }
  0x16   :  { %1561 = vst [vmem:[#allocation12_spill] sm:$0xff] %v922_v41  ;;  %v1565_v61 = vrot.slane %v715_v5, 1  ;;  %v1566_v43 = vrot.slane %v715_v5, 2  ;;  %v1567_v44 = vrot.slane %v715_v5, 3  ;;  %v1568_v60 = vrot.slane %v715_v5, 4 }
  0x17   :  { %v136_v18 = vperm.slane %v1562_v28, 0  ;;  %v137_v19 = vperm.slane %v1563_v3, 0  ;;  %v138_v41 = vperm.slane %v1564_v59, 0  ;;  %v1569_v54 = vrot.slane %v715_v5, 5 }
  0x18   :  { %v140_v21 = vperm.slane %v1565_v61, 0  ;;  %v141_v25 = vperm.slane %v1566_v43, 0  ;;  %v142_v26 = vperm.slane %v1567_v44, 0  ;;  %v143_v28 = vperm.slane %v1568_v60, 0 }
  0x19   :  { %v144_v3 = vperm.slane %v1569_v54, 0  ;;  %v1570_v4 = vrot.slane %v715_v5, 6  ;;  %v1571_v55 = vrot.slane %v715_v5, 7  ;;  %v1572_v61 = vunpack.c.l.bf16 %v736_v22 }
  0x1a   :  { %v1573_v43 = vunpack.c.l.bf16 %v741_v23  ;;  %v1574_v44 = vunpack.c.l.bf16 %v746_v24  ;;  %v1575_v54 = vunpack.c.l.bf16 %v755_v29  ;;  %v1577_v22 = vunpack.c.l.bf16 %v765_v31 }
  0x1b   :  { %v145_v59 = vperm.slane %v1570_v4, 0  ;;  %v146_v2 = vperm.slane %v1571_v55, 0  ;;  %v999_v0 = vadd.f32 %v115_v33, %v1572_v61  ;;  %v1576_v4 = vunpack.c.l.bf16 %v760_v30  ;;  %v1595_v61 = vld [vmem:[#allocation3_spill] sm:$0xff] }
  0x1c   :  { %v1003_v63 = vadd.f32 %v116_v62, %v1573_v43  ;;  %v1007_v60 = vadd.f32 %v117_v53, %v1574_v44  ;;  %v1011_v58 = vadd.f32 %v118_v42, %v1575_v54  ;;  %v1019_v33 = vadd.f32 %v120_v36, %v1577_v22  ;;  %v1597_v43 = vld [vmem:[#allocation4_spill] sm:$0xff]  ;;  %v1599_v44 = vld [vmem:[#allocation5_spill] sm:$0xff]  ;;  %v1601_v54 = vld [vmem:[#allocation6_spill] sm:$0xff] }
  0x1d   :  { %v1015_v5 = vadd.f32 %v119_v27, %v1576_v4  ;;  %v1578_v23 = vunpack.c.l.bf16 %v770_v32  ;;  %v1579_v24 = vunpack.c.l.bf16 %v779_v37  ;;  %v1580_v29 = vunpack.c.l.bf16 %v784_v38  ;;  %v1603_v4 = vld [vmem:[#allocation7_spill] sm:$0xff] }
  0x1e   :  { %v1581_v30 = vunpack.c.l.bf16 %v789_v39  ;;  %v1582_v31 = vunpack.c.l.bf16 %v794_v40  ;;  %v1583_v32 = vunpack.c.l.bf16 %v803_v45  ;;  %v1584_v37 = vunpack.c.l.bf16 %v808_v46 }
  0x1f   :  { %v1023_v55 = vadd.f32 %v121_v34, %v1578_v23  ;;  %v1027_v53 = vadd.f32 %v122_v35, %v1579_v24  ;;  %v1031_v42 = vadd.f32 %v123_v6, %v1580_v29  ;;  %v1585_v38 = vunpack.c.l.bf16 %v813_v47  ;;  %v1605_v23 = vld [vmem:[#allocation8_spill] sm:$0xff]  ;;  %v1607_v29 = vld [vmem:[#allocation9_spill] sm:$0xff] }
  0x20   :  { %v1035_v27 = vadd.f32 %v124_v7, %v1581_v30  ;;  %v1039_v36 = vadd.f32 %v125_v8, %v1582_v31  ;;  %v1043_v34 = vadd.f32 %v126_v9, %v1583_v32  ;;  %v1047_v35 = vadd.f32 %v127_v10, %v1584_v37  ;;  %v1609_v31 = vld [vmem:[#allocation10_spill] sm:$0xff] }
  0x21   :  { %v1051_v62 = vadd.f32 %v128_v11, %v1585_v38  ;;  %v1586_v39 = vunpack.c.l.bf16 %v818_v48  ;;  %v1587_v40 = vunpack.c.l.bf16 %v823_v49  ;;  %v1588_v45 = vunpack.c.l.bf16 %v828_v50  ;;  %v1613_v38 = vld [vmem:[#allocation12_spill] sm:$0xff] }
  0x22   :  { %v1589_v46 = vunpack.c.l.bf16 %v833_v51  ;;  %v1590_v47 = vunpack.c.l.bf16 %v838_v52  ;;  %v1591_v48 = vunpack.c.l.bf16 %v846_v56  ;;  %v1592_v49 = vunpack.c.l.bf16 %v851_v57 }
  0x23   :  { %v1055_v6 = vadd.f32 %v129_v1, %v1586_v39  ;;  %v1059_v7 = vadd.f32 %v130_v12, %v1587_v40  ;;  %v1063_v8 = vadd.f32 %v131_v13, %v1588_v45  ;;  %v1593_v12 = vld [vmem:[#allocation2_spill] sm:$0xff]  ;;  %v1596_v51 = vunpack.c.l.bf16 %v1595_v61 }
  0x24   :  { %v1067_v9 = vadd.f32 %v132_v14, %v1589_v46  ;;  %v1071_v10 = vadd.f32 %v133_v15, %v1590_v47  ;;  %v1075_v11 = vadd.f32 %v134_v16, %v1591_v48  ;;  %v1079_v1 = vadd.f32 %v135_v17, %v1592_v49 }
  0x25   :  { %v1594_v50 = vunpack.c.l.bf16 %v1593_v12  ;;  %v1087_v14 = vadd.f32 %v137_v19, %v1596_v51  ;;  %v1598_v52 = vunpack.c.l.bf16 %v1597_v43  ;;  %v1600_v56 = vunpack.c.l.bf16 %v1599_v44 }
  0x26   :  { %v1602_v57 = vunpack.c.l.bf16 %v1601_v54  ;;  %v1604_v22 = vunpack.c.l.bf16 %v1603_v4  ;;  %v1606_v24 = vunpack.c.l.bf16 %v1605_v23  ;;  %v1608_v30 = vunpack.c.l.bf16 %v1607_v29 }
  0x27   :  { %v1083_v13 = vadd.f32 %v136_v18, %v1594_v50  ;;  %v1091_v15 = vadd.f32 %v138_v41, %v1598_v52  ;;  %v1095_v16 = vadd.f32 %v139_v20, %v1600_v56  ;;  %v1610_v32 = vunpack.c.l.bf16 %v1609_v31 }
  0x28   :  { %v1099_v17 = vadd.f32 %v140_v21, %v1602_v57  ;;  %v1103_v18 = vadd.f32 %v141_v25, %v1604_v22  ;;  %v1107_v19 = vadd.f32 %v142_v26, %v1606_v24  ;;  %v1111_v41 = vadd.f32 %v143_v28, %v1608_v30  ;;  %v1611_v21 = vld [vmem:[#allocation11_spill] sm:$0xff] }
  0x29   :  { %v1115_v20 = vadd.f32 %v144_v3, %v1610_v32  ;;  %vm211_vm0 = vcmp.ge.f32.partialorder %v999_v0, 0.0  ;;  %vm212_vm1 = vcmp.ge.f32.partialorder %v1003_v63, 0.0  ;;  %vm213_vm2 = vcmp.ge.f32.partialorder %v1007_v60, 0.0 }
  0x2a   :  { %vm214_vm3 = vcmp.ge.f32.partialorder %v1011_v58, 0.0  ;;  %vm215_vm4 = vcmp.ge.f32.partialorder %v1015_v5, 0.0  ;;  %vm216_vm5 = vcmp.ge.f32.partialorder %v1019_v33, 0.0  ;;  %vm217_vm6 = vcmp.ge.f32.partialorder %v1023_v55, 0.0 }
  0x2b   :  { %vm218_vm7 = vcmp.ge.f32.partialorder %v1027_v53, 0.0  ;;  %vm219_vm8 = vcmp.ge.f32.partialorder %v1031_v42, 0.0  ;;  %v1612_v25 = vunpack.c.l.bf16 %v1611_v21  ;;  %v243_v28 = vmul.f32 0.2, %v999_v0 }
  0x2c   :  { %v244_v3 = vmul.f32 0.2, %v1003_v63  ;;  %v245_v37 = vmul.f32 0.2, %v1007_v60  ;;  %v1614_v39 = vunpack.c.l.bf16 %v1613_v38  ;;  %v247_v45 = vmul.f32 0.2, %v1015_v5 }
  0x2d   :  { %v1128_v26 = vadd.f32 %v145_v59, %v1612_v25  ;;  %v246_v59 = vmul.f32 0.2, %v1011_v58  ;;  %v248_v46 = vmul.f32 0.2, %v1019_v33  ;;  %vm229_vm10 = vcmp.ge.f32.partialorder %v1071_v10, 0.0 }
  0x2e   :  { %v1139_v40 = vadd.f32 %v146_v2, %v1614_v39  ;;  %vm230_vm9 = vcmp.ge.f32.partialorder %v1075_v11, 0.0  ;;  %v249_v2 = vmul.f32 0.2, %v1023_v55  ;;  %v250_v47 = vmul.f32 0.2, %v1027_v53 }
  0x2f   :  { %v251_v48 = vmul.f32 0.2, %v1031_v42  ;;  %vm235_vm12 = vcmp.ge.f32.partialorder %v1095_v16, 0.0  ;;  %v252_v49 = vmul.f32 0.2, %v1035_v27  ;;  %v275_v61 = vsel %vm211_vm0, %v999_v0, %v243_v28 }
  0x30   :  { %v253_v12 = vmul.f32 0.2, %v1039_v36  ;;  %v254_v50 = vmul.f32 0.2, %v1043_v34  ;;  %vm238_vm15 = vcmp.ge.f32.partialorder %v1107_v19, 0.0  ;;  %vm239_vm14 = vcmp.ge.f32.partialorder %v1111_v41, 0.0 }
  0x31   :  { %v255_v51 = vmul.f32 0.2, %v1047_v35  ;;  %v256_v43 = vmul.f32 0.2, %v1051_v62  ;;  %v257_v52 = vmul.f32 0.2, %v1055_v6  ;;  %v276_v44 = vsel %vm212_vm1, %v1003_v63, %v244_v3 }
  0x32   :  { %vm240_vm0 = vcmp.ge.f32.partialorder %v1115_v20, 0.0  ;;  %vm241_vm13 = vcmp.ge.f32.partialorder %v1128_v26, 0.0  ;;  %vm242_vm11 = vcmp.ge.f32.partialorder %v1139_v40, 0.0  ;;  %v258_v0 = vmul.f32 0.2, %v1059_v7 }
  0x33   :  { %v259_v56 = vmul.f32 0.2, %v1063_v8  ;;  %v260_v54 = vmul.f32 0.2, %v1067_v9  ;;  %v277_v57 = vsel %vm213_vm2, %v1007_v60, %v245_v37  ;;  %v261_v4 = vmul.f32 0.2, %v1071_v10 }
  0x34   :  { %v262_v63 = vmul.f32 0.2, %v1075_v11  ;;  %v263_v22 = vmul.f32 0.2, %v1079_v1  ;;  %v278_v23 = vsel %vm214_vm3, %v1011_v58, %v246_v59  ;;  %v264_v24 = vmul.f32 0.2, %v1083_v13 }
  0x35   :  { %v265_v29 = vmul.f32 0.2, %v1087_v14  ;;  %v266_v30 = vmul.f32 0.2, %v1091_v15  ;;  %v279_v60 = vsel %vm215_vm4, %v1015_v5, %v247_v45  ;;  %v267_v31 = vmul.f32 0.2, %v1095_v16 }
  0x36   :  { %v268_v32 = vmul.f32 0.2, %v1099_v17  ;;  %v269_v21 = vmul.f32 0.2, %v1103_v18  ;;  %v280_v58 = vsel %vm216_vm5, %v1019_v33, %v248_v46  ;;  %v270_v25 = vmul.f32 0.2, %v1107_v19 }
  0x37   :  { %v271_v28 = vmul.f32 0.2, %v1111_v41  ;;  %v272_v3 = vmul.f32 0.2, %v1115_v20  ;;  %v281_v5 = vsel %vm217_vm6, %v1023_v55, %v249_v2  ;;  %v273_v37 = vmul.f32 0.2, %v1128_v26 }
  0x38   :  { %v274_v38 = vmul.f32 0.2, %v1139_v40  ;;  %v282_v39 = vsel %vm218_vm7, %v1027_v53, %v250_v47  ;;  %v1216_v33 = vsel %vm219_vm8, %v1031_v42, %v251_v48  ;;  %vm1615_vm1 = vcmp.ge.f32.partialorder %v1035_v27, 0.0 }
  0x39   :  { %v1221_v59 = vsel %vm1615_vm1, %v1035_v27, %v252_v49  ;;  %vm1616_vm2 = vcmp.ge.f32.partialorder %v1039_v36, 0.0  ;;  %vm1617_vm3 = vcmp.ge.f32.partialorder %v1043_v34, 0.0  ;;  %vm1618_vm4 = vcmp.ge.f32.partialorder %v1047_v35, 0.0 }
  0x3a   :  { %v1226_v55 = vsel %vm1616_vm2, %v1039_v36, %v253_v12  ;;  %v1231_v45 = vsel %vm1617_vm3, %v1043_v34, %v254_v50  ;;  %v1236_v53 = vsel %vm1618_vm4, %v1047_v35, %v255_v51  ;;  %vm1619_vm5 = vcmp.ge.f32.partialorder %v1051_v62, 0.0 }
  0x3b   :  { %v1241_v42 = vsel %vm1619_vm5, %v1051_v62, %v256_v43  ;;  %vm1620_vm6 = vcmp.ge.f32.partialorder %v1055_v6, 0.0  ;;  %vm1621_vm7 = vcmp.ge.f32.partialorder %v1059_v7, 0.0  ;;  %vm1622_vm8 = vcmp.ge.f32.partialorder %v1063_v8, 0.0 }
  0x3c   :  { %v1246_v27 = vsel %vm1620_vm6, %v1055_v6, %v257_v52  ;;  %v1251_v36 = vsel %vm1621_vm7, %v1059_v7, %v258_v0  ;;  %v1256_v34 = vsel %vm1622_vm8, %v1063_v8, %v259_v56  ;;  %vm1623_vm1 = vcmp.ge.f32.partialorder %v1067_v9, 0.0 }
  0x3d   :  { %v1261_v35 = vsel %vm1623_vm1, %v1067_v9, %v260_v54  ;;  %v1266_v62 = vsel %vm229_vm10, %v1071_v10, %v261_v4  ;;  %v1271_v6 = vsel %vm230_vm9, %v1075_v11, %v262_v63  ;;  %vm1624_vm2 = vcmp.ge.f32.partialorder %v1079_v1, 0.0 }
  0x3e   :  { %v1276_v7 = vsel %vm1624_vm2, %v1079_v1, %v263_v22  ;;  %vm1625_vm3 = vcmp.ge.f32.partialorder %v1083_v13, 0.0  ;;  %vm1626_vm4 = vcmp.ge.f32.partialorder %v1087_v14, 0.0  ;;  %vm1627_vm10 = vcmp.ge.f32.partialorder %v1091_v15, 0.0 }
  0x3f   :  { %v1281_v8 = vsel %vm1625_vm3, %v1083_v13, %v264_v24  ;;  %v1286_v9 = vsel %vm1626_vm4, %v1087_v14, %v265_v29  ;;  %v1291_v10 = vsel %vm1627_vm10, %v1091_v15, %v266_v30  ;;  %v1296_v11 = vsel %vm235_vm12, %v1095_v16, %v267_v31 }
  0x40   :  { %vm1628_vm9 = vcmp.ge.f32.partialorder %v1099_v17, 0.0  ;;  %vm1629_vm5 = vcmp.ge.f32.partialorder %v1103_v18, 0.0  ;;  %v1311_v14 = vsel %vm238_vm15, %v1107_v19, %v270_v25  ;;  %v1316_v15 = vsel %vm239_vm14, %v1111_v41, %v271_v28 }
  0x41   :  { %v1301_v1 = vsel %vm1628_vm9, %v1099_v17, %v268_v32  ;;  %v1306_v13 = vsel %vm1629_vm5, %v1103_v18, %v269_v21  ;;  %v1321_v16 = vsel %vm240_vm0, %v1115_v20, %v272_v3  ;;  %v1326_v17 = vsel %vm241_vm13, %v1128_v26, %v273_v37 }
  0x42   :  { %v1331_v18 = vsel %vm242_vm11, %v1139_v40, %v274_v38  ;;  %vm307_vm12 = vcmask 519168   ;;  %vm628_vm11 = vcmask 1041409   ;;  %vm630_vm13 = vcmask 1042434  }
  0x43   :  { %v308_v19 = vsel %vm307_vm12, %v275_v61, -inf  ;;  %v315_v41 = vsel %vm307_vm12, %v276_v44, -inf  ;;  %v322_v46 = vsel %vm307_vm12, %v277_v57, -inf  ;;  %v329_v20 = vsel %vm307_vm12, %v278_v23, -inf }
  0x44   :  { %v309_v2 = vrot.slane %v308_v19, 4  ;;  %v316_v47 = vrot.slane %v315_v41, 4  ;;  %v323_v48 = vrot.slane %v322_v46, 4  ;;  %v330_v49 = vrot.slane %v329_v20, 4 }
  0x45   :  { %v336_v26 = vsel %vm307_vm12, %v279_v60, -inf  ;;  %v343_v12 = vsel %vm307_vm12, %v280_v58, -inf  ;;  %v350_v40 = vsel %vm307_vm12, %v281_v5, -inf  ;;  %v357_v50 = vsel %vm307_vm12, %v282_v39, -inf }
  0x46   :  { %v310_v51 = vmax.f32 %v308_v19, %v309_v2  ;;  %v317_v61 = vmax.f32 %v315_v41, %v316_v47  ;;  %v324_v43 = vmax.f32 %v322_v46, %v323_v48  ;;  %v331_v52 = vmax.f32 %v329_v20, %v330_v49 }
  0x47   :  { %v337_v44 = vrot.slane %v336_v26, 4  ;;  %v344_v0 = vrot.slane %v343_v12, 4  ;;  %v351_v56 = vrot.slane %v350_v40, 4  ;;  %v358_v54 = vrot.slane %v357_v50, 4 }
  0x48   :  { %v311_v57 = vrot.slane %v310_v51, 2  ;;  %v318_v4 = vrot.slane %v317_v61, 2  ;;  %v325_v63 = vrot.slane %v324_v43, 2  ;;  %v332_v22 = vrot.slane %v331_v52, 2 }
  0x49   :  { %v338_v23 = vmax.f32 %v336_v26, %v337_v44  ;;  %v345_v24 = vmax.f32 %v343_v12, %v344_v0  ;;  %v352_v29 = vmax.f32 %v350_v40, %v351_v56  ;;  %v359_v30 = vmax.f32 %v357_v50, %v358_v54 }
  0x4a   :  { %v312_v60 = vmax.f32 %v310_v51, %v311_v57  ;;  %v319_v31 = vmax.f32 %v317_v61, %v318_v4  ;;  %v326_v32 = vmax.f32 %v324_v43, %v325_v63  ;;  %v333_v21 = vmax.f32 %v331_v52, %v332_v22 }
  0x4b   :  { %v339_v58 = vrot.slane %v338_v23, 2  ;;  %v346_v25 = vrot.slane %v345_v24, 2  ;;  %v353_v28 = vrot.slane %v352_v29, 2  ;;  %v360_v3 = vrot.slane %v359_v30, 2 }
  0x4c   :  { %v313_v5 = vrot.slane %v312_v60, 1  ;;  %v320_v37 = vrot.slane %v319_v31, 1  ;;  %v327_v38 = vrot.slane %v326_v32, 1  ;;  %v334_v39 = vrot.slane %v333_v21, 1 }
  0x4d   :  { %v340_v19 = vmax.f32 %v338_v23, %v339_v58  ;;  %v347_v41 = vmax.f32 %v345_v24, %v346_v25  ;;  %v354_v46 = vmax.f32 %v352_v29, %v353_v28  ;;  %v361_v20 = vmax.f32 %v359_v30, %v360_v3 }
  0x4e   :  { %v1341_v2 = vmax.f32 %v312_v60, %v313_v5  ;;  %v1343_v47 = vmax.f32 %v319_v31, %v320_v37  ;;  %v1345_v48 = vmax.f32 %v326_v32, %v327_v38  ;;  %v1347_v49 = vmax.f32 %v333_v21, %v334_v39 }
  0x4f   :  { %v341_v26 = vrot.slane %v340_v19, 1  ;;  %v348_v12 = vrot.slane %v347_v41, 1  ;;  %v355_v40 = vrot.slane %v354_v46, 1  ;;  %v362_v50 = vrot.slane %v361_v20, 1 }
  0x50   :  { %v364_v51 = vsel %vm307_vm12, %v1216_v33, -inf  ;;  %v371_v61 = vsel %vm307_vm12, %v1221_v59, -inf  ;;  %v378_v43 = vsel %vm307_vm12, %v1226_v55, -inf  ;;  %v385_v52 = vsel %vm307_vm12, %v1231_v45, -inf }
  0x51   :  { %v1357_v44 = vmax.f32 %v340_v19, %v341_v26  ;;  %v1359_v0 = vmax.f32 %v347_v41, %v348_v12  ;;  %v1361_v56 = vmax.f32 %v354_v46, %v355_v40  ;;  %v1363_v54 = vmax.f32 %v361_v20, %v362_v50 }
  0x52   :  { %v365_v57 = vrot.slane %v364_v51, 4  ;;  %v372_v4 = vrot.slane %v371_v61, 4  ;;  %v379_v33 = vrot.slane %v378_v43, 4  ;;  %v386_v63 = vrot.slane %v385_v52, 4 }
  0x53   :  { %v392_v59 = vsel %vm307_vm12, %v1236_v53, -inf  ;;  %v399_v55 = vsel %vm307_vm12, %v1241_v42, -inf  ;;  %v406_v45 = vsel %vm307_vm12, %v1246_v27, -inf  ;;  %v413_v22 = vsel %vm307_vm12, %v1251_v36, -inf }
  0x54   :  { %v366_v23 = vmax.f32 %v364_v51, %v365_v57  ;;  %v373_v24 = vmax.f32 %v371_v61, %v372_v4  ;;  %v380_v29 = vmax.f32 %v378_v43, %v379_v33  ;;  %v387_v30 = vmax.f32 %v385_v52, %v386_v63 }
  0x55   :  { %v393_v60 = vrot.slane %v392_v59, 4  ;;  %v400_v31 = vrot.slane %v399_v55, 4  ;;  %v407_v32 = vrot.slane %v406_v45, 4  ;;  %v414_v21 = vrot.slane %v413_v22, 4 }
  0x56   :  { %v367_v58 = vrot.slane %v366_v23, 2  ;;  %v374_v25 = vrot.slane %v373_v24, 2  ;;  %v381_v53 = vrot.slane %v380_v29, 2  ;;  %v388_v28 = vrot.slane %v387_v30, 2 }
  0x57   :  { %v394_v3 = vmax.f32 %v392_v59, %v393_v60  ;;  %v401_v42 = vmax.f32 %v399_v55, %v400_v31  ;;  %v408_v5 = vmax.f32 %v406_v45, %v407_v32  ;;  %v415_v37 = vmax.f32 %v413_v22, %v414_v21 }
  0x58   :  { %v368_v27 = vmax.f32 %v366_v23, %v367_v58  ;;  %v375_v38 = vmax.f32 %v373_v24, %v374_v25  ;;  %v382_v39 = vmax.f32 %v380_v29, %v381_v53  ;;  %v389_v36 = vmax.f32 %v387_v30, %v388_v28 }
  0x59   :  { %v395_v19 = vrot.slane %v394_v3, 2  ;;  %v402_v41 = vrot.slane %v401_v42, 2  ;;  %v409_v46 = vrot.slane %v408_v5, 2  ;;  %v416_v20 = vrot.slane %v415_v37, 2 }
  0x5a   :  { %v369_v26 = vrot.slane %v368_v27, 1  ;;  %v376_v12 = vrot.slane %v375_v38, 1  ;;  %v383_v40 = vrot.slane %v382_v39, 1  ;;  %v390_v50 = vrot.slane %v389_v36, 1 }
  0x5b   :  { %v396_v51 = vmax.f32 %v394_v3, %v395_v19  ;;  %v403_v61 = vmax.f32 %v401_v42, %v402_v41  ;;  %v410_v43 = vmax.f32 %v408_v5, %v409_v46  ;;  %v417_v52 = vmax.f32 %v415_v37, %v416_v20 }
  0x5c   :  { %v1373_v57 = vmax.f32 %v368_v27, %v369_v26  ;;  %v1375_v4 = vmax.f32 %v375_v38, %v376_v12  ;;  %v1377_v33 = vmax.f32 %v382_v39, %v383_v40  ;;  %v1379_v63 = vmax.f32 %v389_v36, %v390_v50 }
  0x5d   :  { %v397_v59 = vrot.slane %v396_v51, 1  ;;  %v404_v55 = vrot.slane %v403_v61, 1  ;;  %v411_v45 = vrot.slane %v410_v43, 1  ;;  %v418_v22 = vrot.slane %v417_v52, 1 }
  0x5e   :  { %v420_v23 = vsel %vm307_vm12, %v1256_v34, -inf  ;;  %v427_v24 = vsel %vm307_vm12, %v1261_v35, -inf  ;;  %v434_v29 = vsel %vm307_vm12, %v1266_v62, -inf  ;;  %v441_v30 = vsel %vm307_vm12, %v1271_v6, -inf }
  0x5f   :  { %v1389_v60 = vmax.f32 %v396_v51, %v397_v59  ;;  %v1391_v31 = vmax.f32 %v403_v61, %v404_v55  ;;  %v1393_v32 = vmax.f32 %v410_v43, %v411_v45  ;;  %v1395_v21 = vmax.f32 %v417_v52, %v418_v22 }
  0x60   :  { %v421_v58 = vrot.slane %v420_v23, 4  ;;  %v428_v25 = vrot.slane %v427_v24, 4  ;;  %v435_v34 = vrot.slane %v434_v29, 4  ;;  %v442_v53 = vrot.slane %v441_v30, 4 }
  0x61   :  { %v448_v35 = vsel %vm307_vm12, %v1276_v7, -inf  ;;  %v455_v62 = vsel %vm307_vm12, %v1281_v8, -inf  ;;  %v462_v6 = vsel %vm307_vm12, %v1286_v9, -inf  ;;  %v469_v28 = vsel %vm307_vm12, %v1291_v10, -inf }
  0x62   :  { %v422_v3 = vmax.f32 %v420_v23, %v421_v58  ;;  %v429_v42 = vmax.f32 %v427_v24, %v428_v25  ;;  %v436_v5 = vmax.f32 %v434_v29, %v435_v34  ;;  %v443_v37 = vmax.f32 %v441_v30, %v442_v53 }
  0x63   :  { %v449_v27 = vrot.slane %v448_v35, 4  ;;  %v456_v38 = vrot.slane %v455_v62, 4  ;;  %v463_v39 = vrot.slane %v462_v6, 4  ;;  %v470_v36 = vrot.slane %v469_v28, 4 }
  0x64   :  { %v423_v19 = vrot.slane %v422_v3, 2  ;;  %v430_v41 = vrot.slane %v429_v42, 2  ;;  %v437_v7 = vrot.slane %v436_v5, 2  ;;  %v444_v46 = vrot.slane %v443_v37, 2 }
  0x65   :  { %v450_v20 = vmax.f32 %v448_v35, %v449_v27  ;;  %v457_v8 = vmax.f32 %v455_v62, %v456_v38  ;;  %v464_v26 = vmax.f32 %v462_v6, %v463_v39  ;;  %v471_v12 = vmax.f32 %v469_v28, %v470_v36 }
  0x66   :  { %v424_v9 = vmax.f32 %v422_v3, %v423_v19  ;;  %v431_v40 = vmax.f32 %v429_v42, %v430_v41  ;;  %v438_v50 = vmax.f32 %v436_v5, %v437_v7  ;;  %v445_v10 = vmax.f32 %v443_v37, %v444_v46 }
  0x67   :  { %v451_v51 = vrot.slane %v450_v20, 2  ;;  %v458_v61 = vrot.slane %v457_v8, 2  ;;  %v465_v43 = vrot.slane %v464_v26, 2  ;;  %v472_v52 = vrot.slane %v471_v12, 2 }
  0x68   :  { %v425_v59 = vrot.slane %v424_v9, 1  ;;  %v432_v55 = vrot.slane %v431_v40, 1  ;;  %v439_v45 = vrot.slane %v438_v50, 1  ;;  %v446_v22 = vrot.slane %v445_v10, 1 }
  0x69   :  { %v452_v23 = vmax.f32 %v450_v20, %v451_v51  ;;  %v459_v24 = vmax.f32 %v457_v8, %v458_v61  ;;  %v466_v29 = vmax.f32 %v464_v26, %v465_v43  ;;  %v473_v30 = vmax.f32 %v471_v12, %v472_v52 }
  0x6a   :  { %v1405_v58 = vmax.f32 %v424_v9, %v425_v59  ;;  %v1407_v25 = vmax.f32 %v431_v40, %v432_v55  ;;  %v1409_v34 = vmax.f32 %v438_v50, %v439_v45  ;;  %v1411_v53 = vmax.f32 %v445_v10, %v446_v22 }
  0x6b   :  { %v453_v35 = vrot.slane %v452_v23, 1  ;;  %v460_v62 = vrot.slane %v459_v24, 1  ;;  %v467_v6 = vrot.slane %v466_v29, 1  ;;  %v474_v28 = vrot.slane %v473_v30, 1 }
  0x6c   :  { %v476_v3 = vsel %vm307_vm12, %v1296_v11, -inf  ;;  %v483_v42 = vsel %vm307_vm12, %v1301_v1, -inf  ;;  %v490_v5 = vsel %vm307_vm12, %v1306_v13, -inf  ;;  %v497_v37 = vsel %vm307_vm12, %v1311_v14, -inf }
  0x6d   :  { %v1421_v27 = vmax.f32 %v452_v23, %v453_v35  ;;  %v1423_v38 = vmax.f32 %v459_v24, %v460_v62  ;;  %v1425_v39 = vmax.f32 %v466_v29, %v467_v6  ;;  %v1427_v36 = vmax.f32 %v473_v30, %v474_v28 }
  0x6e   :  { %v477_v19 = vrot.slane %v476_v3, 4  ;;  %v484_v41 = vrot.slane %v483_v42, 4  ;;  %v491_v11 = vrot.slane %v490_v5, 4  ;;  %v498_v7 = vrot.slane %v497_v37, 4 }
  0x6f   :  { %v504_v1 = vsel %vm307_vm12, %v1316_v15, -inf  ;;  %v511_v13 = vsel %vm307_vm12, %v1321_v16, -inf  ;;  %v518_v14 = vsel %vm307_vm12, %v1326_v17, -inf  ;;  %v525_v46 = vsel %vm307_vm12, %v1331_v18, -inf }
  0x70   :  { %v478_v20 = vmax.f32 %v476_v3, %v477_v19  ;;  %v485_v8 = vmax.f32 %v483_v42, %v484_v41  ;;  %v492_v26 = vmax.f32 %v490_v5, %v491_v11  ;;  %v499_v12 = vmax.f32 %v497_v37, %v498_v7 }
  0x71   :  { %v505_v9 = vrot.slane %v504_v1, 4  ;;  %v512_v40 = vrot.slane %v511_v13, 4  ;;  %v519_v50 = vrot.slane %v518_v14, 4  ;;  %v526_v10 = vrot.slane %v525_v46, 4 }
  0x72   :  { %v479_v51 = vrot.slane %v478_v20, 2  ;;  %v486_v61 = vrot.slane %v485_v8, 2  ;;  %v493_v15 = vrot.slane %v492_v26, 2  ;;  %v500_v43 = vrot.slane %v499_v12, 2 }
  0x73   :  { %v506_v52 = vmax.f32 %v504_v1, %v505_v9  ;;  %v513_v16 = vmax.f32 %v511_v13, %v512_v40  ;;  %v520_v59 = vmax.f32 %v518_v14, %v519_v50  ;;  %v527_v55 = vmax.f32 %v525_v46, %v526_v10 }
  0x74   :  { %v480_v17 = vmax.f32 %v478_v20, %v479_v51  ;;  %v487_v45 = vmax.f32 %v485_v8, %v486_v61  ;;  %v494_v22 = vmax.f32 %v492_v26, %v493_v15  ;;  %v501_v18 = vmax.f32 %v499_v12, %v500_v43 }
  0x75   :  { %v507_v23 = vrot.slane %v506_v52, 2  ;;  %v514_v24 = vrot.slane %v513_v16, 2  ;;  %v521_v29 = vrot.slane %v520_v59, 2  ;;  %v528_v30 = vrot.slane %v527_v55, 2 }
  0x76   :  { %v481_v35 = vrot.slane %v480_v17, 1  ;;  %v488_v62 = vrot.slane %v487_v45, 1  ;;  %v495_v6 = vrot.slane %v494_v22, 1  ;;  %v502_v28 = vrot.slane %v501_v18, 1 }
  0x77   :  { %v508_v3 = vmax.f32 %v506_v52, %v507_v23  ;;  %v515_v42 = vmax.f32 %v513_v16, %v514_v24  ;;  %v522_v5 = vmax.f32 %v520_v59, %v521_v29  ;;  %v529_v37 = vmax.f32 %v527_v55, %v528_v30 }
  0x78   :  { %v1437_v19 = vmax.f32 %v480_v17, %v481_v35  ;;  %v1439_v41 = vmax.f32 %v487_v45, %v488_v62  ;;  %v1441_v11 = vmax.f32 %v494_v22, %v495_v6  ;;  %v1443_v7 = vmax.f32 %v501_v18, %v502_v28 }
  0x79   :  { %v509_v1 = vrot.slane %v508_v3, 1  ;;  %v516_v13 = vrot.slane %v515_v42, 1  ;;  %v523_v14 = vrot.slane %v522_v5, 1  ;;  %v530_v46 = vrot.slane %v529_v37, 1 }
  0x7a   :  { %v532_v20 = vpack.c.bf16 %v1341_v2, %v1341_v2  ;;  %v533_v8 = vpack.c.bf16 %v1343_v47, %v1343_v47  ;;  %v534_v26 = vpack.c.bf16 %v1345_v48, %v1345_v48  ;;  %v535_v12 = vpack.c.bf16 %v1347_v49, %v1347_v49 }
  0x7b   :  { %v510_v9 = vmax.f32 %v508_v3, %v509_v1  ;;  %v517_v40 = vmax.f32 %v515_v42, %v516_v13  ;;  %v524_v50 = vmax.f32 %v522_v5, %v523_v14  ;;  %v531_v10 = vmax.f32 %v529_v37, %v530_v46 }
  0x7c   :  { %v536_v51 = vpack.c.bf16 %v1357_v44, %v1357_v44  ;;  %v537_v61 = vpack.c.bf16 %v1359_v0, %v1359_v0  ;;  %v538_v2 = vpack.c.bf16 %v1361_v56, %v1361_v56  ;;  %v539_v47 = vpack.c.bf16 %v1363_v54, %v1363_v54 }
  0x7d   :  { %v540_v48 = vpack.c.bf16 %v1373_v57, %v1373_v57  ;;  %v541_v49 = vpack.c.bf16 %v1375_v4, %v1375_v4  ;;  %v542_v15 = vpack.c.bf16 %v1377_v33, %v1377_v33  ;;  %v543_v44 = vpack.c.bf16 %v1379_v63, %v1379_v63 }
  0x7e   :  { %v544_v0 = vpack.c.bf16 %v1389_v60, %v1389_v60  ;;  %v545_v56 = vpack.c.bf16 %v1391_v31, %v1391_v31  ;;  %v546_v54 = vpack.c.bf16 %v1393_v32, %v1393_v32  ;;  %v547_v57 = vpack.c.bf16 %v1395_v21, %v1395_v21 }
  0x7f   :  { %v548_v4 = vpack.c.bf16 %v1405_v58, %v1405_v58  ;;  %v549_v33 = vpack.c.bf16 %v1407_v25, %v1407_v25  ;;  %v550_v63 = vpack.c.bf16 %v1409_v34, %v1409_v34  ;;  %v551_v60 = vpack.c.bf16 %v1411_v53, %v1411_v53 }
  0x80   :  { %v552_v31 = vpack.c.bf16 %v1421_v27, %v1421_v27  ;;  %v553_v32 = vpack.c.bf16 %v1423_v38, %v1423_v38  ;;  %v554_v21 = vpack.c.bf16 %v1425_v39, %v1425_v39  ;;  %v555_v58 = vpack.c.bf16 %v1427_v36, %v1427_v36 }
  0x81   :  { %v556_v25 = vpack.c.bf16 %v1437_v19, %v1437_v19  ;;  %v557_v34 = vpack.c.bf16 %v1439_v41, %v1439_v41  ;;  %v558_v53 = vpack.c.bf16 %v1441_v11, %v1441_v11  ;;  %v559_v27 = vpack.c.bf16 %v1443_v7, %v1443_v7 }
  0x82   :  { %v560_v43 = vpack.c.bf16 %v510_v9, %v510_v9  ;;  %v561_v38 = vpack.c.bf16 %v517_v40, %v517_v40  ;;  %v562_v52 = vpack.c.bf16 %v524_v50, %v524_v50  ;;  %v563_v16 = vpack.c.bf16 %v531_v10, %v531_v10 }
  0x83   :  { %v596_v39 = vunpack.c.l.b16 %v532_v20  ;;  %v597_v59 = vunpack.c.l.b16 %v533_v8  ;;  %v598_v55 = vunpack.c.l.b16 %v534_v26  ;;  %v599_v36 = vunpack.c.l.b16 %v535_v12 }
  0x84   :  { %v600_v17 = vunpack.c.l.b16 %v536_v51  ;;  %v601_v45 = vunpack.c.l.b16 %v537_v61  ;;  %v602_v22 = vunpack.c.l.b16 %v538_v2  ;;  %v603_v18 = vunpack.c.l.b16 %v539_v47 }
  0x85   :  { %v604_v23 = vunpack.c.l.b16 %v540_v48  ;;  %v605_v24 = vunpack.c.l.b16 %v541_v49  ;;  %v606_v29 = vunpack.c.l.b16 %v542_v15  ;;  %v607_v30 = vunpack.c.l.b16 %v543_v44 }
  0x86   :  { %v608_v35 = vunpack.c.l.b16 %v544_v0  ;;  %v609_v62 = vunpack.c.l.b16 %v545_v56  ;;  %v610_v6 = vunpack.c.l.b16 %v546_v54  ;;  %v611_v28 = vunpack.c.l.b16 %v547_v57 }
  0x87   :  { %v612_v3 = vunpack.c.l.b16 %v548_v4  ;;  %v613_v42 = vunpack.c.l.b16 %v549_v33  ;;  %v614_v5 = vunpack.c.l.b16 %v550_v63  ;;  %v615_v37 = vunpack.c.l.b16 %v551_v60 }
  0x88   :  { %v616_v19 = vunpack.c.l.b16 %v552_v31  ;;  %v617_v41 = vunpack.c.l.b16 %v553_v32  ;;  %v618_v11 = vunpack.c.l.b16 %v554_v21  ;;  %v619_v7 = vunpack.c.l.b16 %v555_v58 }
  0x89   :  { %v620_v1 = vunpack.c.l.b16 %v556_v25  ;;  %v621_v13 = vunpack.c.l.b16 %v557_v34  ;;  %v622_v14 = vunpack.c.l.b16 %v558_v53  ;;  %v623_v46 = vunpack.c.l.b16 %v559_v27 }
  0x8a   :  { %v624_v20 = vunpack.c.l.b16 %v560_v43  ;;  %v625_v8 = vunpack.c.l.b16 %v561_v38  ;;  %v626_v26 = vunpack.c.l.b16 %v562_v52  ;;  %v627_v12 = vunpack.c.l.b16 %v563_v16 }
  0x8b   :  { %vm632_vm14 = vcmask 1043459   ;;  %vm634_vm15 = vcmask 1044484   ;;  %v629_v9 = vsel %vm628_vm11, %v597_v59, %v596_v39  ;;  %vm636_vm0 = vcmask 1045509  }
  0x8c   :  { %vm638_vm6 = vcmask 1046534   ;;  %vm640_vm7 = vcmask 1047559   ;;  %v631_v40 = vsel %vm630_vm13, %v598_v55, %v629_v9  ;;  %v642_v50 = vsel %vm628_vm11, %v605_v24, %v604_v23 }
  0x8d   :  { %v649_v10 = vsel %vm628_vm11, %v613_v42, %v612_v3  ;;  %v656_v51 = vsel %vm628_vm11, %v621_v13, %v620_v1  ;;  %v633_v61 = vsel %vm632_vm14, %v599_v36, %v631_v40  ;;  %v643_v2 = vsel %vm630_vm13, %v606_v29, %v642_v50 }
  0x8e   :  { %v650_v47 = vsel %vm630_vm13, %v614_v5, %v649_v10  ;;  %v657_v48 = vsel %vm630_vm13, %v622_v14, %v656_v51  ;;  %v635_v49 = vsel %vm634_vm15, %v600_v17, %v633_v61  ;;  %v644_v15 = vsel %vm632_vm14, %v607_v30, %v643_v2 }
  0x8f   :  { %v651_v44 = vsel %vm632_vm14, %v615_v37, %v650_v47  ;;  %v658_v0 = vsel %vm632_vm14, %v623_v46, %v657_v48  ;;  %v637_v56 = vsel %vm636_vm0, %v601_v45, %v635_v49  ;;  %v645_v54 = vsel %vm634_vm15, %v608_v35, %v644_v15 }
  0x90   :  { %v652_v57 = vsel %vm634_vm15, %v616_v19, %v651_v44  ;;  %v659_v4 = vsel %vm634_vm15, %v624_v20, %v658_v0  ;;  %v639_v33 = vsel %vm638_vm6, %v602_v22, %v637_v56  ;;  %v646_v63 = vsel %vm636_vm0, %v609_v62, %v645_v54 }
  0x91   :  { %v653_v60 = vsel %vm636_vm0, %v617_v41, %v652_v57  ;;  %v660_v31 = vsel %vm636_vm0, %v625_v8, %v659_v4  ;;  %v641_v32 = vsel %vm640_vm7, %v603_v18, %v639_v33  ;;  %v647_v21 = vsel %vm638_vm6, %v610_v6, %v646_v63 }
  0x92   :  { %v654_v58 = vsel %vm638_vm6, %v618_v11, %v653_v60  ;;  %v661_v25 = vsel %vm638_vm6, %v626_v26, %v660_v31  ;;  %v648_v34 = vsel %vm640_vm7, %v611_v28, %v647_v21  ;;  %v663_v43 = vpack.c.b16 %v641_v32, %v641_v32 }
  0x93   :  { %v655_v53 = vsel %vm640_vm7, %v619_v7, %v654_v58  ;;  %v662_v27 = vsel %vm640_vm7, %v627_v12, %v661_v25  ;;  %v664_v38 = vpack.c.b16 %v648_v34, %v648_v34 }
  0x94   :  { %v665_v52 = vpack.c.b16 %v655_v53, %v655_v53  ;;  %v666_v16 = vpack.c.b16 %v662_v27, %v662_v27  ;;  %671 = vst.msk [vmem:[%s1539_s2] sm:$0xf] %vm307_vm12, %v663_v43 }
  0x95   :  { %672 = vst.msk [vmem:[%s1539_s2 + $0x4] sm:$0xf] %vm307_vm12, %v664_v38 }
  0x96   :  { %673 = vst.msk [vmem:[%s1539_s2 + $0x8] sm:$0xf] %vm307_vm12, %v665_v52 }
  0x97   :  { %674 = vst.msk [vmem:[%s1539_s2 + $0xc] sm:$0xf] %vm307_vm12, %v666_v16 }

// kernel: forward.36
= control target key start
LH: loop header
LB: loop body
LE: loop exit
PB: predicated region body
PF: predicated region fallthrough
CT: control target
= control target key end

     0   :  { %vm28_vm0 = vcmask 130048   ;;  %vm58_vm2 = vcmask 517120   ;;  %s112_s1 = inlined_call_operand.vmem [shape: bf16[16,64], index: 1, kind: input, shape index: {}]   ;;  %s113_s0 = inlined_call_operand.vmem [shape: f32[2,16], index: 0, kind: input, shape index: {}]   ;;  %s114_s2 = inlined_call_operand.vmem [shape: f32[1,64], index: 2, kind: input, shape index: {}]   ;;  %s115_s3 = inlined_call_operand.vmem [shape: f32[1,64], index: 3, kind: input, shape index: {}]   ;;  %s116_s4 = inlined_call_operand.vmem [shape: f32[2,64], index: 4, kind: output, shape index: {}]  }
   0x1   :  { %v69_v0 = vld [vmem:[%s112_s1] sm:$0xff] }
   0x2   :  { %v18_v1 = vld [vmem:[%s113_s0] sm:$0x3]  ;;  %39 = vmatpush.bf16.msra.mxu0 %v69_v0 }
   0x3   :  { %v19_v2 = vpack.c.bf16 %v18_v1, %v18_v1  ;;  %v70_v3 = vld [vmem:[%s114_s2] ss:$0 sm:$0xff] }
   0x4   :  { %v71_v4 = vld [vmem:[%s115_s3] ss:$0 sm:$0xff] }
   0x5   :  { %68 = vmatmul.msk.bf16.vlgmr.msra.gmra.mxu0 %vm28_vm0, %v19_v2 }
  0x82   :  { %v41_v5 = vpop.f32.mrf.mxu0 }
  0x83   :  { %v49_v6 = vmul.f32 %v70_v3, %v41_v5 }
  0x85   :  { %v54_v7 = vadd.f32 %v71_v4, %v49_v6 }
  0x87   :  { %vm55_vm1 = vcmp.ge.f32.partialorder %v54_v7, 0.0  ;;  %v56_v8 = vmul.f32 0.2, %v54_v7 }
  0x89   :  { %v57_v9 = vsel %vm55_vm1, %v54_v7, %v56_v8 }
  0x8a   :  { %59 = vst.msk [vmem:[%s116_s4] sm:$0x3] %vm58_vm2, %v57_v9  ;;  %v43_v10 = vpop.f32.mrf.mxu0 }

// kernel: forward.35
= control target key start
LH: loop header
LB: loop body
LE: loop exit
PB: predicated region body
PF: predicated region fallthrough
CT: control target
= control target key end

     0   :  { %s1910_s15 = smov 0   ;;  %s1912_s16 = smov 0   ;;  %s2594_s0 = inlined_call_operand.vmem [shape: bf16[2,16,192], index: 0, kind: input, shape index: {}]   ;;  %s2595_s1 = inlined_call_operand.vmem [shape: bf16[192,1024], index: 1, kind: input, shape index: {}]   ;;  %s2596_s2 = inlined_call_operand.vmem [shape: f32[1,1024], index: 2, kind: input, shape index: {}]   ;;  %s2597_s3 = inlined_call_operand.vmem [shape: f32[1,1024], index: 3, kind: input, shape index: {}]   ;;  %s2598_s4 = inlined_call_operand.vmem [shape: f32[2,1,1024], index: 4, kind: output, shape index: {}]  }
   0x1   :  { %s1914_s17 = smov 0  }
   0x2 LB: > { %s26_s18 = sadd.s32 1, %s1879_s16  ;;  %p1332_p0 = scmp.ge.s32.totalorder %s1883_s17, 1  ;;  %s1883_s17 = sphi %s1914_s17, %s14_s17   ;;  %s1879_s16 = sphi %s1912_s16, %s2600_s16   ;;  %s1875_s15 = sphi %s1910_s15, %s2599_s15  }
   0x3   : > { %p28_p1 = scmp.ge.s32.totalorder %s26_s18, 2  ;;  %p182_p2 = scmp.lt.s32.totalorder %s1883_s17, 3 }
   0x5   : > { %s2602_s18 = smov (%p28_p1, %s26_s18), 0  ;;  %p183_p3 = pnand %p1332_p0, %p182_p2 }
   0x6   : > { %p213_p4 = scmp.lt.s32.totalorder (!%p183_p3), %s1875_s15, 1 }
   0x7   : > { %186 = sbr.rel (%p183_p3) target bundleno = 282 (0x11a), region = 36 }
   0xc   : > { %v1570_v0 = vld [vmem:[%s2595_s1 + $0x1c0] sm:$0xf]  ;;  %v1797_v5 = vld [vmem:[%s2595_s1 + $0x1c4] sm:$0xf]  ;;  %v1578_v44 = vld [vmem:[%s2595_s1 + $0x1c8] sm:$0xf] }
   0xd   : > { %v1801_v1 = vld [vmem:[%s2595_s1 + $0x1dc] sm:$0xf0]  ;;  %v1572_v6 = vld [vmem:[%s2595_s1 + $0x1e0] sm:$0xf0]  ;;  %v1802_v46 = vld [vmem:[%s2595_s1 + $0x1e4] sm:$0xf0] }
   0xe   : > { %v1698_v2 = vld [vmem:[%s2595_s1 + $0x2c0] sm:$0xf]  ;;  %v1571_v3 = vor.u32 %v1801_v1, %v1570_v0  ;;  %v1575_v8 = vor.u32 %v1797_v5, %v1572_v6  ;;  %v1829_v9 = vld [vmem:[%s2595_s1 + $0x2c4] sm:$0xf]  ;;  %v1706_v47 = vld [vmem:[%s2595_s1 + $0x2c8] sm:$0xf]  ;;  %v1579_v54 = vor.u32 %v1802_v46, %v1578_v44 }
   0xf   : > { %v1833_v4 = vld [vmem:[%s2595_s1 + $0x2dc] sm:$0xf0]  ;;  %v1700_v10 = vld [vmem:[%s2595_s1 + $0x2e0] sm:$0xf0]  ;;  %v1834_v48 = vld [vmem:[%s2595_s1 + $0x2e4] sm:$0xf0] }
  0x10   : > { %v1699_v7 = vor.u32 %v1833_v4, %v1698_v2  ;;  %v1538_v11 = vld [vmem:[%s2595_s1 + $0x180] sm:$0xf]  ;;  %824 = vmatpush.bf16.msra.mxu0 %v1571_v3  ;;  %v1703_v12 = vor.u32 %v1829_v9, %v1700_v10  ;;  %852 = vmatpush.bf16.msra.mxu2 %v1575_v8  ;;  %v1789_v18 = vld [vmem:[%s2595_s1 + $0x184] sm:$0xf]  ;;  %v1707_v57 = vor.u32 %v1834_v48, %v1706_v47  ;;  %v1546_v58 = vld [vmem:[%s2595_s1 + $0x188] sm:$0xf] }
  0x11   : > { %v1793_v13 = vld [vmem:[%s2595_s1 + $0x19c] sm:$0xf0]  ;;  %v1540_v19 = vld [vmem:[%s2595_s1 + $0x1a0] sm:$0xf0]  ;;  %v1794_v59 = vld [vmem:[%s2595_s1 + $0x1a4] sm:$0xf0] }
  0x12   : > { %v1666_v14 = vld [vmem:[%s2595_s1 + $0x280] sm:$0xf]  ;;  %842 = vmatpush.bf16.msra.mxu1 %v1699_v7  ;;  %v1539_v16 = vor.u32 %v1793_v13, %v1538_v11  ;;  %v1821_v20 = vld [vmem:[%s2595_s1 + $0x284] sm:$0xf]  ;;  %870 = vmatpush.bf16.msra.mxu3 %v1703_v12  ;;  %v1543_v21 = vor.u32 %v1789_v18, %v1540_v19  ;;  %s2604_s15 = smov (!%p213_p4, %s1875_s15), 1  ;;  %v1547_v2 = vor.u32 %v1794_v59, %v1546_v58  ;;  %vm820_vm0 = vcmask 523264  }
  0x13   : > { %v1825_v15 = vld [vmem:[%s2595_s1 + $0x29c] sm:$0xf0]  ;;  %v1668_v22 = vld [vmem:[%s2595_s1 + $0x2a0] sm:$0xf0]  ;;  %v1674_v61 = vld [vmem:[%s2595_s1 + $0x288] sm:$0xf] }
  0x14   : > { %v1667_v17 = vor.u32 %v1825_v15, %v1666_v14  ;;  %v1506_v23 = vld [vmem:[%s2595_s1 + $0x140] sm:$0xf]  ;;  %v1671_v25 = vor.u32 %v1821_v20, %v1668_v22  ;;  %v1781_v28 = vld [vmem:[%s2595_s1 + $0x144] sm:$0xf]  ;;  %825 = vmatpush.bf16.msra.mxu0 %v1539_v16  ;;  %853 = vmatpush.bf16.msra.mxu2 %v1543_v21  ;;  %v1826_v63 = vld [vmem:[%s2595_s1 + $0x2a4] sm:$0xf0] }
  0x15   : > { %v1785_v24 = vld [vmem:[%s2595_s1 + $0x15c] sm:$0xf0]  ;;  %v1508_v30 = vld [vmem:[%s2595_s1 + $0x160] sm:$0xf0]  ;;  %s1738_s23 = sshll.u32 %s2604_s15, 4  ;;  %v1675_v9 = vor.u32 %v1826_v63, %v1674_v61  ;;  %s1335_s13 = sshll.u32 %s2604_s15, 3 }
  0x16   : > { %v1634_v26 = vld [vmem:[%s2595_s1 + $0x240] sm:$0xf]  ;;  %v1507_v29 = vor.u32 %v1785_v24, %v1506_v23  ;;  %v1813_v31 = vld [vmem:[%s2595_s1 + $0x244] sm:$0xf]  ;;  %843 = vmatpush.bf16.msra.mxu1 %v1667_v17  ;;  %v1511_v34 = vor.u32 %v1781_v28, %v1508_v30  ;;  %871 = vmatpush.bf16.msra.mxu3 %v1671_v25  ;;  %s2082_s30 = scalar_lea.vmem %s2594_s0, %s1738_s23  ;;  %v1514_v5 = vld [vmem:[%s2595_s1 + $0x148] sm:$0xf]  ;;  %s226_s20 = scalar_lea.vmem %s2598_s4, %s1335_s13 }
  0x17   : > { %v1817_v27 = vld [vmem:[%s2595_s1 + $0x25c] sm:$0xf0]  ;;  %v1636_v32 = vld [vmem:[%s2595_s1 + $0x260] sm:$0xf0]  ;;  %v1786_v6 = vld [vmem:[%s2595_s1 + $0x164] sm:$0xf0] }
  0x18   : > { %v1635_v33 = vor.u32 %v1817_v27, %v1634_v26  ;;  %v1474_v35 = vld [vmem:[%s2595_s1 + $0x100] sm:$0xf]  ;;  %v1639_v38 = vor.u32 %v1813_v31, %v1636_v32  ;;  %v1773_v40 = vld [vmem:[%s2595_s1 + $0x104] sm:$0xf]  ;;  %826 = vmatpush.bf16.msra.mxu0 %v1507_v29  ;;  %854 = vmatpush.bf16.msra.mxu2 %v1511_v34  ;;  %v1340_v8 = vld [vmem:[%s2082_s30 + $0x8] sm:$0xf0]  ;;  %v1515_v17 = vor.u32 %v1786_v6, %v1514_v5 }
  0x19   : > { %v1777_v36 = vld [vmem:[%s2595_s1 + $0x11c] sm:$0xf0]  ;;  %v1476_v41 = vld [vmem:[%s2595_s1 + $0x120] sm:$0xf0]  ;;  %v1642_v11 = vld [vmem:[%s2595_s1 + $0x248] sm:$0xf] }
  0x1a   : > { %v1602_v37 = vld [vmem:[%s2595_s1 + $0x200] sm:$0xf]  ;;  %v1805_v42 = vld [vmem:[%s2595_s1 + $0x204] sm:$0xf]  ;;  %v1475_v45 = vor.u32 %v1777_v36, %v1474_v35  ;;  %844 = vmatpush.bf16.msra.mxu1 %v1635_v33  ;;  %v1479_v50 = vor.u32 %v1773_v40, %v1476_v41  ;;  %872 = vmatpush.bf16.msra.mxu3 %v1639_v38  ;;  %v1818_v14 = vld [vmem:[%s2595_s1 + $0x264] sm:$0xf0] }
  0x1b   : > { %v1809_v39 = vld [vmem:[%s2595_s1 + $0x21c] sm:$0xf0]  ;;  %v1604_v43 = vld [vmem:[%s2595_s1 + $0x220] sm:$0xf0]  ;;  %v1482_v20 = vld [vmem:[%s2595_s1 + $0x108] sm:$0xf]  ;;  %v1643_v23 = vor.u32 %v1818_v14, %v1642_v11 }
  0x1c   : > { %v1603_v49 = vor.u32 %v1809_v39, %v1602_v37  ;;  %v1442_v51 = vld [vmem:[%s2595_s1 + $0xc0] sm:$0xf]  ;;  %v1607_v53 = vor.u32 %v1805_v42, %v1604_v43  ;;  %v1765_v55 = vld [vmem:[%s2595_s1 + $0xc4] sm:$0xf]  ;;  %827 = vmatpush.bf16.msra.mxu0 %v1475_v45  ;;  %855 = vmatpush.bf16.msra.mxu2 %v1479_v50  ;;  %v1778_v21 = vld [vmem:[%s2595_s1 + $0x124] sm:$0xf0] }
  0x1d   : > { %v1769_v52 = vld [vmem:[%s2595_s1 + $0xdc] sm:$0xf0]  ;;  %v1444_v56 = vld [vmem:[%s2595_s1 + $0xe0] sm:$0xf0]  ;;  %v1610_v22 = vld [vmem:[%s2595_s1 + $0x208] sm:$0xf]  ;;  %v1483_v32 = vor.u32 %v1778_v21, %v1482_v20 }
  0x1e   : > { %v1443_v60 = vor.u32 %v1769_v52, %v1442_v51  ;;  %845 = vmatpush.bf16.msra.mxu1 %v1603_v49  ;;  %v1447_v62 = vor.u32 %v1765_v55, %v1444_v56  ;;  %v1410_v0 = vld [vmem:[%s2595_s1 + $0x80] sm:$0xf]  ;;  %873 = vmatpush.bf16.msra.mxu3 %v1607_v53  ;;  %v1757_v3 = vld [vmem:[%s2595_s1 + $0x84] sm:$0xf]  ;;  %v1810_v25 = vld [vmem:[%s2595_s1 + $0x224] sm:$0xf0] }
  0x1f   : > { %v1761_v1 = vld [vmem:[%s2595_s1 + $0x9c] sm:$0xf0]  ;;  %v1412_v4 = vld [vmem:[%s2595_s1 + $0xa0] sm:$0xf0]  ;;  %v1586_v26 = vld [vmem:[%s2595_s1 + $0x1d0] sm:$0xf]  ;;  %v1611_v39 = vor.u32 %v1810_v25, %v1610_v22 }
  0x20   : > { %828 = vmatpush.bf16.msra.mxu0 %v1443_v60  ;;  %v1739_v7 = vld [vmem:[%s2082_s30 + $0x4] sm:$0xf]  ;;  %v1411_v10 = vor.u32 %v1761_v1, %v1410_v0  ;;  %856 = vmatpush.bf16.msra.mxu2 %v1447_v62  ;;  %v1415_v13 = vor.u32 %v1757_v3, %v1412_v4  ;;  %v1378_v15 = vld [vmem:[%s2595_s1 + $0x40] sm:$0xf]  ;;  %v1803_v27 = vld [vmem:[%s2595_s1 + $0x1ec] sm:$0xf0] }
  0x21   : > { %v2095_v12 = vor.u32 %v1739_v7, %v1340_v8  ;;  %v1753_v16 = vld [vmem:[%s2595_s1 + $0x5c] sm:$0xf0]  ;;  %v1749_v18 = vld [vmem:[%s2595_s1 + $0x44] sm:$0xf]  ;;  %v1450_v34 = vld [vmem:[%s2595_s1 + $0xc8] sm:$0xf]  ;;  %v1587_v44 = vor.u32 %v1803_v27, %v1586_v26 }
  0x22   : > { %880 = vmatpush.bf16.msrb.mxu1 %v1579_v54  ;;  %898 = vmatpush.bf16.msrb.mxu3 %v1707_v57  ;;  %v1380_v19 = vld [vmem:[%s2595_s1 + $0x60] sm:$0xf0]  ;;  %v1379_v24 = vor.u32 %v1753_v16, %v1378_v15  ;;  %v1346_v29 = vld [vmem:[%s2595_s1] sm:$0xf]  ;;  %v1770_v35 = vld [vmem:[%s2595_s1 + $0xe4] sm:$0xf0] }
  0x23   : > { %1729 = vmatmul.msk.bf16.vlgmr.msra.gmra.mxu3 %vm820_vm0, %v2095_v12  ;;  %1728 = vmatmul.msk.bf16.vlgmr.msra.gmra.mxu1 %vm820_vm0, %v2095_v12  ;;  %v1383_v28 = vor.u32 %v1749_v18, %v1380_v19  ;;  %v1745_v30 = vld [vmem:[%s2595_s1 + $0x1c] sm:$0xf0]  ;;  %v1741_v31 = vld [vmem:[%s2595_s1 + $0x4] sm:$0xf]  ;;  %v1798_v36 = vld [vmem:[%s2595_s1 + $0x1cc] sm:$0xf]  ;;  %v1451_v46 = vor.u32 %v1770_v35, %v1450_v34 }
  0x24   : > { %829 = vmatpush.bf16.msra.mxu0 %v1411_v10  ;;  %857 = vmatpush.bf16.msra.mxu2 %v1415_v13  ;;  %v1348_v33 = vld [vmem:[%s2595_s1 + $0x20] sm:$0xf0]  ;;  %v1580_v37 = vld [vmem:[%s2595_s1 + $0x1e8] sm:$0xf0]  ;;  %v1347_v40 = vor.u32 %v1745_v30, %v1346_v29  ;;  %v1338_v42 = vld [vmem:[%s2082_s30] sm:$0xf] }
  0x25   : > { %v1830_v38 = vld [vmem:[%s2595_s1 + $0x2cc] sm:$0xf]  ;;  %v1740_v43 = vld [vmem:[%s2082_s30 + $0x4] sm:$0xf0]  ;;  %v1351_v45 = vor.u32 %v1741_v31, %v1348_v33  ;;  %v1583_v47 = vor.u32 %v1798_v36, %v1580_v37  ;;  %v1554_v48 = vld [vmem:[%s2595_s1 + $0x190] sm:$0xf] }
  0x26   : > { %881 = vmatpush.bf16.msrb.mxu1 %v1547_v2  ;;  %899 = vmatpush.bf16.msrb.mxu3 %v1675_v9  ;;  %v1708_v41 = vld [vmem:[%s2595_s1 + $0x2e8] sm:$0xf0]  ;;  %v1795_v49 = vld [vmem:[%s2595_s1 + $0x1ac] sm:$0xf0]  ;;  %v1418_v50 = vld [vmem:[%s2595_s1 + $0x88] sm:$0xf]  ;;  %v2175_v52 = vor.u32 %v1740_v43, %v1338_v42 }
  0x27   : > { %v1711_v51 = vor.u32 %v1830_v38, %v1708_v41  ;;  %v1762_v53 = vld [vmem:[%s2595_s1 + $0xa4] sm:$0xf0]  ;;  %v1790_v54 = vld [vmem:[%s2595_s1 + $0x18c] sm:$0xf]  ;;  %v1555_v58 = vor.u32 %v1795_v49, %v1554_v48  ;;  %v1522_v61 = vld [vmem:[%s2595_s1 + $0x150] sm:$0xf] }
  0x28   : > { %830 = vmatpush.bf16.msra.mxu0 %v1379_v24  ;;  %858 = vmatpush.bf16.msra.mxu2 %v1383_v28  ;;  %v1548_v55 = vld [vmem:[%s2595_s1 + $0x1a8] sm:$0xf0]  ;;  %v1419_v59 = vor.u32 %v1762_v53, %v1418_v50  ;;  %v1787_v62 = vld [vmem:[%s2595_s1 + $0x16c] sm:$0xf0]  ;;  %v1386_v63 = vld [vmem:[%s2595_s1 + $0x48] sm:$0xf] }
  0x29   : > { %v1822_v56 = vld [vmem:[%s2595_s1 + $0x28c] sm:$0xf]  ;;  %v1551_v60 = vor.u32 %v1790_v54, %v1548_v55  ;;  %v1754_v1 = vld [vmem:[%s2595_s1 + $0x64] sm:$0xf0]  ;;  %v1523_v6 = vor.u32 %v1787_v62, %v1522_v61  ;;  %v1490_v7 = vld [vmem:[%s2595_s1 + $0x110] sm:$0xf] }
  0x2a   : > { %882 = vmatpush.bf16.msrb.mxu1 %v1515_v17  ;;  %900 = vmatpush.bf16.msrb.mxu3 %v1643_v23  ;;  %v1676_v57 = vld [vmem:[%s2595_s1 + $0x2a8] sm:$0xf0]  ;;  %v1387_v8 = vor.u32 %v1754_v1, %v1386_v63  ;;  %v1779_v10 = vld [vmem:[%s2595_s1 + $0x12c] sm:$0xf0]  ;;  %v1354_v11 = vld [vmem:[%s2595_s1 + $0x8] sm:$0xf] }
  0x2b   : > { %v1679_v0 = vor.u32 %v1822_v56, %v1676_v57  ;;  %v1782_v2 = vld [vmem:[%s2595_s1 + $0x14c] sm:$0xf]  ;;  %v1746_v13 = vld [vmem:[%s2595_s1 + $0x24] sm:$0xf0]  ;;  %v1714_v19 = vld [vmem:[%s2595_s1 + $0x2d0] sm:$0xf]  ;;  %v1491_v21 = vor.u32 %v1779_v10, %v1490_v7 }
  0x2c   : > { %831 = vmatpush.bf16.msra.mxu0 %v1347_v40  ;;  %859 = vmatpush.bf16.msra.mxu2 %v1351_v45  ;;  %v1516_v3 = vld [vmem:[%s2595_s1 + $0x168] sm:$0xf0]  ;;  %v1835_v20 = vld [vmem:[%s2595_s1 + $0x2ec] sm:$0xf0]  ;;  %v1799_v22 = vld [vmem:[%s2595_s1 + $0x1d4] sm:$0xf]  ;;  %v1355_v24 = vor.u32 %v1746_v13, %v1354_v11 }
  0x2d   : > { %v1814_v4 = vld [vmem:[%s2595_s1 + $0x24c] sm:$0xf]  ;;  %v1519_v9 = vor.u32 %v1782_v2, %v1516_v3  ;;  %v1588_v23 = vld [vmem:[%s2595_s1 + $0x1f0] sm:$0xf0]  ;;  %v1458_v26 = vld [vmem:[%s2595_s1 + $0xd0] sm:$0xf]  ;;  %v1715_v29 = vor.u32 %v1835_v20, %v1714_v19 }
  0x2e   : > { %883 = vmatpush.bf16.msrb.mxu1 %v1483_v32  ;;  %901 = vmatpush.bf16.msrb.mxu3 %v1611_v39  ;;  %v1644_v5 = vld [vmem:[%s2595_s1 + $0x268] sm:$0xf0]  ;;  %v1771_v27 = vld [vmem:[%s2595_s1 + $0xec] sm:$0xf0]  ;;  %v1591_v32 = vor.u32 %v1799_v22, %v1588_v23  ;;  %v1791_v36 = vld [vmem:[%s2595_s1 + $0x194] sm:$0xf] }
  0x2f   : > { %832 = vmatmul.bf16.vlgmr.msra.gmra.mxu0 %v2175_v52  ;;  %860 = vmatmul.bf16.vlgmr.msra.gmra.mxu2 %v2175_v52  ;;  %v1647_v14 = vor.u32 %v1814_v4, %v1644_v5  ;;  %v1774_v15 = vld [vmem:[%s2595_s1 + $0x10c] sm:$0xf]  ;;  %v1682_v33 = vld [vmem:[%s2595_s1 + $0x290] sm:$0xf]  ;;  %v1459_v35 = vor.u32 %v1771_v27, %v1458_v26  ;;  %v1556_v37 = vld [vmem:[%s2595_s1 + $0x1b0] sm:$0xf0] }
  0x30   : > { %908 = vmatpush.bf16.msrb.mxu0 %v1583_v47  ;;  %926 = vmatpush.bf16.msrb.mxu2 %v1711_v51  ;;  %v1484_v16 = vld [vmem:[%s2595_s1 + $0x128] sm:$0xf0]  ;;  %v1827_v34 = vld [vmem:[%s2595_s1 + $0x2ac] sm:$0xf0]  ;;  %v1783_v48 = vld [vmem:[%s2595_s1 + $0x154] sm:$0xf] }
  0x31   : > { %v1806_v17 = vld [vmem:[%s2595_s1 + $0x20c] sm:$0xf]  ;;  %v1487_v25 = vor.u32 %v1774_v15, %v1484_v16  ;;  %v1426_v39 = vld [vmem:[%s2595_s1 + $0x90] sm:$0xf]  ;;  %v1683_v41 = vor.u32 %v1827_v34, %v1682_v33  ;;  %v1524_v49 = vld [vmem:[%s2595_s1 + $0x170] sm:$0xf0] }
  0x32   : > { %936 = vmatpush.bf16.msra.mxu3 %v1587_v44  ;;  %884 = vmatpush.bf16.msrb.mxu1 %v1451_v46  ;;  %v1612_v18 = vld [vmem:[%s2595_s1 + $0x228] sm:$0xf0]  ;;  %v1763_v40 = vld [vmem:[%s2595_s1 + $0xac] sm:$0xf0]  ;;  %v1559_v44 = vor.u32 %v1791_v36, %v1556_v37  ;;  %v1527_v57 = vor.u32 %v1783_v48, %v1524_v49  ;;  %v1492_v62 = vld [vmem:[%s2595_s1 + $0x130] sm:$0xf0] }
  0x33   : > { %1730 = vmatmul.msk.bf16.vlgmr.msrb.gmra.mxu3 %vm820_vm0, %v2095_v12  ;;  %v1615_v28 = vor.u32 %v1806_v17, %v1612_v18  ;;  %v1766_v30 = vld [vmem:[%s2595_s1 + $0xcc] sm:$0xf]  ;;  %v1650_v45 = vld [vmem:[%s2595_s1 + $0x250] sm:$0xf]  ;;  %v1427_v47 = vor.u32 %v1763_v40, %v1426_v39  ;;  %v1594_v63 = vld [vmem:[%s2595_s1 + $0x1d8] sm:$0xf] }
  0x34   : > { %909 = vmatpush.bf16.msrb.mxu0 %v1551_v60  ;;  %927 = vmatpush.bf16.msrb.mxu2 %v1679_v0  ;;  %v1452_v31 = vld [vmem:[%s2595_s1 + $0xe8] sm:$0xf0]  ;;  %v1819_v46 = vld [vmem:[%s2595_s1 + $0x26c] sm:$0xf0]  ;;  %v1804_v0 = vld [vmem:[%s2595_s1 + $0x1f4] sm:$0xf0] }
  0x35   : > { %v1455_v38 = vor.u32 %v1766_v30, %v1452_v31  ;;  %v1758_v42 = vld [vmem:[%s2595_s1 + $0x8c] sm:$0xf]  ;;  %v1394_v51 = vld [vmem:[%s2595_s1 + $0x50] sm:$0xf]  ;;  %v1651_v54 = vor.u32 %v1819_v46, %v1650_v45  ;;  %v1831_v7 = vld [vmem:[%s2595_s1 + $0x2d4] sm:$0xf]  ;;  %v1595_v10 = vor.u32 %v1804_v0, %v1594_v63 }
  0x36   : > { %937 = vmatpush.bf16.msra.mxu3 %v1555_v58  ;;  %885 = vmatpush.bf16.msrb.mxu1 %v1419_v59  ;;  %v1420_v43 = vld [vmem:[%s2595_s1 + $0xa8] sm:$0xf0]  ;;  %v1755_v53 = vld [vmem:[%s2595_s1 + $0x6c] sm:$0xf0]  ;;  %v1775_v58 = vld [vmem:[%s2595_s1 + $0x114] sm:$0xf] }
  0x37   : > { %v1423_v50 = vor.u32 %v1758_v42, %v1420_v43  ;;  %v1750_v55 = vld [vmem:[%s2595_s1 + $0x4c] sm:$0xf]  ;;  %v1618_v59 = vld [vmem:[%s2595_s1 + $0x210] sm:$0xf]  ;;  %v1395_v61 = vor.u32 %v1755_v53, %v1394_v51  ;;  %v1800_v11 = vld [vmem:[%s2595_s1 + $0x1dc] sm:$0xf] }
  0x38   : > { %910 = vmatpush.bf16.msrb.mxu0 %v1519_v9  ;;  %928 = vmatpush.bf16.msrb.mxu2 %v1647_v14  ;;  %v1388_v56 = vld [vmem:[%s2595_s1 + $0x68] sm:$0xf0]  ;;  %v1811_v60 = vld [vmem:[%s2595_s1 + $0x22c] sm:$0xf0]  ;;  %v1495_v9 = vor.u32 %v1775_v58, %v1492_v62  ;;  %v1596_v13 = vld [vmem:[%s2595_s1 + $0x1f8] sm:$0xf0] }
  0x39   : > { %v1391_v1 = vor.u32 %v1750_v55, %v1388_v56  ;;  %v1362_v2 = vld [vmem:[%s2595_s1 + $0x10] sm:$0xf]  ;;  %v1742_v4 = vld [vmem:[%s2595_s1 + $0xc] sm:$0xf]  ;;  %v1619_v5 = vor.u32 %v1811_v60, %v1618_v59  ;;  %v1767_v15 = vld [vmem:[%s2595_s1 + $0xd4] sm:$0xf] }
  0x3a   : > { %938 = vmatpush.bf16.msra.mxu3 %v1523_v6  ;;  %886 = vmatpush.bf16.msrb.mxu1 %v1387_v8  ;;  %v1747_v3 = vld [vmem:[%s2595_s1 + $0x2c] sm:$0xf0]  ;;  %v1356_v6 = vld [vmem:[%s2595_s1 + $0x28] sm:$0xf0]  ;;  %v1716_v8 = vld [vmem:[%s2595_s1 + $0x2f0] sm:$0xf0] }
  0x3b   : > { %v1363_v14 = vor.u32 %v1747_v3, %v1362_v2  ;;  %v1460_v16 = vld [vmem:[%s2595_s1 + $0xf0] sm:$0xf0]  ;;  %v1359_v17 = vor.u32 %v1742_v4, %v1356_v6  ;;  %v1719_v18 = vor.u32 %v1831_v7, %v1716_v8  ;;  %v1562_v19 = vld [vmem:[%s2595_s1 + $0x198] sm:$0xf]  ;;  %v1564_v26 = vld [vmem:[%s2595_s1 + $0x1b8] sm:$0xf0] }
  0x3c   : > { %911 = vmatpush.bf16.msrb.mxu0 %v1487_v25  ;;  %929 = vmatpush.bf16.msrb.mxu2 %v1615_v28  ;;  %v1796_v20 = vld [vmem:[%s2595_s1 + $0x1b4] sm:$0xf0]  ;;  %v1823_v22 = vld [vmem:[%s2595_s1 + $0x294] sm:$0xf]  ;;  %v1792_v25 = vld [vmem:[%s2595_s1 + $0x19c] sm:$0xf] }
  0x3d   : > { %v1684_v23 = vld [vmem:[%s2595_s1 + $0x2b0] sm:$0xf0]  ;;  %v1563_v27 = vor.u32 %v1796_v20, %v1562_v19  ;;  %v1530_v31 = vld [vmem:[%s2595_s1 + $0x158] sm:$0xf]  ;;  %v1567_v33 = vor.u32 %v1792_v25, %v1564_v26  ;;  %v1784_v37 = vld [vmem:[%s2595_s1 + $0x15c] sm:$0xf] }
  0x3e   : > { %939 = vmatpush.bf16.msra.mxu3 %v1491_v21  ;;  %887 = vmatpush.bf16.msrb.mxu1 %v1355_v24  ;;  %v1599_v21 = vor.u32 %v1800_v11, %v1596_v13  ;;  %v1463_v24 = vor.u32 %v1767_v15, %v1460_v16  ;;  %v1759_v28 = vld [vmem:[%s2595_s1 + $0x94] sm:$0xf]  ;;  %v1687_v30 = vor.u32 %v1823_v22, %v1684_v23  ;;  %v1498_v43 = vld [vmem:[%s2595_s1 + $0x118] sm:$0xf]  ;;  %v1776_v48 = vld [vmem:[%s2595_s1 + $0x11c] sm:$0xf] }
  0x3f   : > { %1731 = vmatmul.msk.bf16.vlgmr.msrb.gmra.mxu2 %vm820_vm0, %v2095_v12  ;;  %v1815_v34 = vld [vmem:[%s2595_s1 + $0x254] sm:$0xf]  ;;  %v1722_v51 = vld [vmem:[%s2595_s1 + $0x2d8] sm:$0xf]  ;;  %v1832_v60 = vld [vmem:[%s2595_s1 + $0x2dc] sm:$0xf] }
  0x40   : > { %964 = vmatpush.bf16.msra.mxu2 %v1591_v32  ;;  %912 = vmatpush.bf16.msrb.mxu0 %v1455_v38  ;;  %v1788_v32 = vld [vmem:[%s2595_s1 + $0x174] sm:$0xf0]  ;;  %v1532_v38 = vld [vmem:[%s2595_s1 + $0x178] sm:$0xf0]  ;;  %v1751_v40 = vld [vmem:[%s2595_s1 + $0x54] sm:$0xf] }
  0x41   : > { %888 = vmatmul.bf16.vlgmr.msrb.gmra.mxu1 %v2175_v52  ;;  %v1531_v39 = vor.u32 %v1788_v32, %v1530_v31  ;;  %v1535_v45 = vor.u32 %v1784_v37, %v1532_v38  ;;  %v1807_v46 = vld [vmem:[%s2595_s1 + $0x214] sm:$0xf]  ;;  %v1836_v53 = vld [vmem:[%s2595_s1 + $0x2f4] sm:$0xf0]  ;;  %v1468_v2 = vld [vmem:[%s2595_s1 + $0xf8] sm:$0xf0] }
  0x42   : > { %954 = vmatpush.bf16.msra.mxu1 %v1715_v29  ;;  %940 = vmatpush.bf16.msra.mxu3 %v1459_v35  ;;  %v1428_v29 = vld [vmem:[%s2595_s1 + $0xb0] sm:$0xf0]  ;;  %v1772_v59 = vld [vmem:[%s2595_s1 + $0xf4] sm:$0xf0]  ;;  %v1723_v63 = vor.u32 %v1836_v53, %v1722_v51  ;;  %v1692_v11 = vld [vmem:[%s2595_s1 + $0x2b8] sm:$0xf0] }
  0x43   : > { %v1652_v35 = vld [vmem:[%s2595_s1 + $0x270] sm:$0xf0]  ;;  %v1431_v36 = vor.u32 %v1759_v28, %v1428_v29  ;;  %v1764_v6 = vld [vmem:[%s2595_s1 + $0xb4] sm:$0xf0]  ;;  %v1760_v13 = vld [vmem:[%s2595_s1 + $0x9c] sm:$0xf] }
  0x44   : > { %965 = vmatpush.bf16.msra.mxu2 %v1559_v44  ;;  %913 = vmatpush.bf16.msrb.mxu0 %v1423_v50  ;;  %v1655_v42 = vor.u32 %v1815_v34, %v1652_v35  ;;  %v1780_v44 = vld [vmem:[%s2595_s1 + $0x134] sm:$0xf0]  ;;  %v1500_v50 = vld [vmem:[%s2595_s1 + $0x138] sm:$0xf0]  ;;  %v1743_v55 = vld [vmem:[%s2595_s1 + $0x14] sm:$0xf] }
  0x45   : > { %v1364_v56 = vld [vmem:[%s2595_s1 + $0x30] sm:$0xf0]  ;;  %v1503_v62 = vor.u32 %v1776_v48, %v1500_v50  ;;  %v1690_v7 = vld [vmem:[%s2595_s1 + $0x298] sm:$0xf]  ;;  %v1816_v23 = vld [vmem:[%s2595_s1 + $0x25c] sm:$0xf] }
  0x46   : > { %955 = vmatpush.bf16.msra.mxu1 %v1683_v41  ;;  %941 = vmatpush.bf16.msra.mxu3 %v1427_v47  ;;  %v1396_v41 = vld [vmem:[%s2595_s1 + $0x70] sm:$0xf0]  ;;  %v1367_v0 = vor.u32 %v1743_v55, %v1364_v56  ;;  %v1828_v8 = vld [vmem:[%s2595_s1 + $0x2b4] sm:$0xf0]  ;;  %v1752_v25 = vld [vmem:[%s2595_s1 + $0x5c] sm:$0xf] }
  0x47   : > { %v1620_v47 = vld [vmem:[%s2595_s1 + $0x230] sm:$0xf0]  ;;  %v1399_v49 = vor.u32 %v1751_v40, %v1396_v41  ;;  %v1691_v16 = vor.u32 %v1828_v8, %v1690_v7  ;;  %v1756_v19 = vld [vmem:[%s2595_s1 + $0x74] sm:$0xf0]  ;;  %v1404_v26 = vld [vmem:[%s2595_s1 + $0x78] sm:$0xf0] }
  0x48   : > { %966 = vmatpush.bf16.msra.mxu2 %v1527_v57  ;;  %914 = vmatpush.bf16.msrb.mxu0 %v1391_v1  ;;  %v1466_v57 = vld [vmem:[%s2595_s1 + $0xd8] sm:$0xf]  ;;  %v1623_v58 = vor.u32 %v1807_v46, %v1620_v47  ;;  %v1768_v1 = vld [vmem:[%s2595_s1 + $0xdc] sm:$0xf]  ;;  %v1407_v34 = vor.u32 %v1752_v25, %v1404_v26 }
  0x49   : > { %v1467_v3 = vor.u32 %v1772_v59, %v1466_v57  ;;  %v1658_v20 = vld [vmem:[%s2595_s1 + $0x258] sm:$0xf]  ;;  %v1808_v35 = vld [vmem:[%s2595_s1 + $0x21c] sm:$0xf] }
  0x4a   : > { %956 = vmatpush.bf16.msra.mxu1 %v1651_v54  ;;  %942 = vmatpush.bf16.msra.mxu3 %v1395_v61  ;;  %v1499_v54 = vor.u32 %v1780_v44, %v1498_v43  ;;  %v1724_v61 = vld [vmem:[%s2595_s1 + $0x2f8] sm:$0xf0]  ;;  %v1370_v29 = vld [vmem:[%s2595_s1 + $0x18] sm:$0xf] }
  0x4b   : > { %v1727_v4 = vor.u32 %v1832_v60, %v1724_v61  ;;  %v1748_v31 = vld [vmem:[%s2595_s1 + $0x34] sm:$0xf0]  ;;  %v1744_v37 = vld [vmem:[%s2595_s1 + $0x1c] sm:$0xf] }
  0x4c   : > { %967 = vmatpush.bf16.msra.mxu2 %v1495_v9  ;;  %915 = vmatpush.bf16.msrb.mxu0 %v1359_v17  ;;  %v1471_v9 = vor.u32 %v1768_v1, %v1468_v2  ;;  %v1402_v17 = vld [vmem:[%s2595_s1 + $0x58] sm:$0xf]  ;;  %v1372_v38 = vld [vmem:[%s2595_s1 + $0x38] sm:$0xf0] }
  0x4d   : > { %v1626_v32 = vld [vmem:[%s2595_s1 + $0x218] sm:$0xf] }
  0x4e   : > { %957 = vmatpush.bf16.msra.mxu1 %v1619_v5  ;;  %943 = vmatpush.bf16.msra.mxu3 %v1363_v14  ;;  %v1434_v5 = vld [vmem:[%s2595_s1 + $0x98] sm:$0xf]  ;;  %v1436_v14 = vld [vmem:[%s2595_s1 + $0xb8] sm:$0xf0] }
  0x4f   : > { %916 = vmatmul.bf16.vlgmr.msrb.gmra.mxu0 %v2175_v52  ;;  %v1435_v15 = vor.u32 %v1764_v6, %v1434_v5  ;;  %v1439_v22 = vor.u32 %v1760_v13, %v1436_v14 }
  0x50   : > { %1020 = vmatpush.bf16.msra.mxu0 %v1599_v21  ;;  %968 = vmatpush.bf16.msra.mxu2 %v1463_v24  ;;  %v1820_v21 = vld [vmem:[%s2595_s1 + $0x274] sm:$0xf0]  ;;  %v1660_v24 = vld [vmem:[%s2595_s1 + $0x278] sm:$0xf0] }
  0x51   : > { %944 = vmatmul.bf16.vlgmr.msra.gmra.mxu3 %v2175_v52  ;;  %1732 = vmatmul.msk.bf16.vlgmr.msra.gmra.mxu1 %vm820_vm0, %v2095_v12  ;;  %v1659_v28 = vor.u32 %v1820_v21, %v1658_v20 }
  0x52   : > { %992 = vmatpush.bf16.msrb.mxu1 %v1595_v10  ;;  %982 = vmatpush.bf16.msrb.mxu3 %v1719_v18  ;;  %v1824_v10 = vld [vmem:[%s2595_s1 + $0x29c] sm:$0xf] }
  0x53   : > { %v1695_v18 = vor.u32 %v1824_v10, %v1692_v11 }
  0x54   : > { %1021 = vmatpush.bf16.msra.mxu0 %v1567_v33  ;;  %969 = vmatpush.bf16.msra.mxu2 %v1431_v36  ;;  %v1812_v33 = vld [vmem:[%s2595_s1 + $0x234] sm:$0xf0]  ;;  %v1628_v36 = vld [vmem:[%s2595_s1 + $0x238] sm:$0xf0] }
  0x55   : > { %v1627_v40 = vor.u32 %v1812_v33, %v1626_v32  ;;  %v1631_v41 = vor.u32 %v1808_v35, %v1628_v36 }
  0x56   : > { %993 = vmatpush.bf16.msrb.mxu1 %v1563_v27  ;;  %983 = vmatpush.bf16.msrb.mxu3 %v1687_v30  ;;  %v1403_v27 = vor.u32 %v1756_v19, %v1402_v17  ;;  %v1663_v30 = vor.u32 %v1816_v23, %v1660_v24 }
  0x58   : > { %1022 = vmatpush.bf16.msra.mxu0 %v1535_v45  ;;  %970 = vmatpush.bf16.msra.mxu2 %v1399_v49  ;;  %v2551_v45 = vld [vmem:[%s2596_s2] sm:$0xff] }
  0x59   : > { %v1051_v49 = vperm.slane %v2551_v45, 1  ;;  %v1050_v13 = vperm.slane %v2551_v45, 0  ;;  %v1053_v26 = vperm.slane %v2551_v45, 3 }
  0x5a   : > { %994 = vmatpush.bf16.msrb.mxu1 %v1531_v39  ;;  %984 = vmatpush.bf16.msrb.mxu3 %v1655_v42  ;;  %v1371_v39 = vor.u32 %v1748_v31, %v1370_v29  ;;  %v1375_v42 = vor.u32 %v1744_v37, %v1372_v38  ;;  %v1054_v37 = vperm.slane %v2551_v45, 4 }
  0x5c   : > { %1023 = vmatpush.bf16.msra.mxu0 %v1503_v62  ;;  %971 = vmatpush.bf16.msra.mxu2 %v1367_v0 }
  0x5e   : > { %995 = vmatpush.bf16.msrb.mxu1 %v1499_v54  ;;  %985 = vmatpush.bf16.msrb.mxu3 %v1623_v58 }
  0x5f   : > { %972 = vmatmul.bf16.vlgmr.msra.gmra.mxu2 %v2175_v52 }
  0x60   : > { %1038 = vmatpush.bf16.msrb.mxu2 %v1727_v4  ;;  %1024 = vmatpush.bf16.msra.mxu0 %v1471_v9 }
  0x61   : > { %1733 = vmatmul.msk.bf16.vlgmr.msrb.gmra.mxu3 %vm820_vm0, %v2095_v12 }
  0x62   : > { %1010 = vmatpush.bf16.msra.mxu3 %v1723_v63  ;;  %996 = vmatpush.bf16.msrb.mxu1 %v1467_v3 }
  0x64   : > { %1039 = vmatpush.bf16.msrb.mxu2 %v1695_v18  ;;  %1025 = vmatpush.bf16.msra.mxu0 %v1439_v22  ;;  %v1052_v18 = vperm.slane %v2551_v45, 2 }
  0x66   : > { %997 = vmatpush.bf16.msrb.mxu1 %v1435_v15  ;;  %1011 = vmatpush.bf16.msra.mxu3 %v1691_v16 }
  0x68   : > { %1040 = vmatpush.bf16.msrb.mxu2 %v1663_v30  ;;  %1026 = vmatpush.bf16.msra.mxu0 %v1407_v34  ;;  %v1055_v34 = vperm.slane %v2551_v45, 5 }
  0x6a   : > { %998 = vmatpush.bf16.msrb.mxu1 %v1403_v27  ;;  %1012 = vmatpush.bf16.msra.mxu3 %v1659_v28 }
  0x6c   : > { %1041 = vmatpush.bf16.msrb.mxu2 %v1631_v41  ;;  %1027 = vmatpush.bf16.msra.mxu0 %v1375_v42 }
  0x6e   : > { %999 = vmatpush.bf16.msrb.mxu1 %v1371_v39  ;;  %1013 = vmatpush.bf16.msra.mxu3 %v1627_v40 }
  0x6f   : > { %1028 = vmatmul.bf16.vlgmr.msra.gmra.mxu0 %v2175_v52  ;;  %1735 = vmatmul.msk.bf16.vlgmr.msrb.gmra.mxu2 %vm820_vm0, %v2095_v12 }
  0x71   : > { %1000 = vmatmul.bf16.vlgmr.msrb.gmra.mxu1 %v2175_v52  ;;  %1734 = vmatmul.msk.bf16.vlgmr.msra.gmra.mxu3 %vm820_vm0, %v2095_v12  ;;  %v2557_v52 = vld [vmem:[%s2597_s3] sm:$0xff] }
  0x72   : > { %v1085_v12 = vperm.slane %v2557_v52, 1  ;;  %v1084_v21 = vperm.slane %v2557_v52, 0  ;;  %v1086_v29 = vperm.slane %v2557_v52, 2  ;;  %v1087_v36 = vperm.slane %v2557_v52, 3 }
  0xa0   : > { %v847_v44 = vpop.f32.mrf.mxu1 }
  0xa6   : > { %v875_v43 = vpop.f32.mrf.mxu3 }
  0xa8   : > { %v849_v50 = vpop.f32.mrf.mxu1 }
  0xac   : > { %v833_v56 = vpop.f32.mrf.mxu0 }
  0xad   : > { %v848_v11 = vadd.f32 %v847_v44, %v833_v56 }
  0xae   : > { %v877_v46 = vpop.f32.mrf.mxu3 }
  0xaf   : > { %v1066_v20 = vmul.f32 %v1050_v13, %v848_v11 }
  0xb1   : > { %v1100_v35 = vadd.f32 %v1084_v21, %v1066_v20 }
  0xb2   : > { %v861_v47 = vpop.f32.mrf.mxu2 }
  0xb3   : > { %v876_v48 = vadd.f32 %v875_v43, %v861_v47  ;;  %v1089_v47 = vperm.slane %v2557_v52, 5  ;;  %vm1116_vm3 = vcmp.ge.f32.partialorder %v1100_v35, 0.0 }
  0xb4   : > { %v835_v2 = vpop.f32.mrf.mxu0 }
  0xb5   : > { %v1067_v51 = vmul.f32 %v1051_v49, %v876_v48  ;;  %v850_v15 = vadd.f32 %v849_v50, %v835_v2  ;;  %v1132_v48 = vmul.f32 0.2, %v1100_v35 }
  0xb6   : > { %v903_v57 = vpop.f32.mrf.mxu3 }
  0xb7   : > { %v1101_v54 = vadd.f32 %v1085_v12, %v1067_v51  ;;  %v1074_v23 = vmul.f32 %v1050_v13, %v850_v15  ;;  %v1148_v2 = vsel %vm1116_vm3, %v1100_v35, %v1132_v48  ;;  %v1056_v13 = vperm.slane %v2551_v45, 6 }
  0xb8   : > { %vm1240_vm3 = vcmask 1041408  }
  0xb9   : > { %v1133_v59 = vmul.f32 0.2, %v1101_v54  ;;  %vm1117_vm1 = vcmp.ge.f32.partialorder %v1101_v54, 0.0  ;;  %v1108_v38 = vadd.f32 %v1084_v21, %v1074_v23  ;;  %v1057_v21 = vperm.slane %v2551_v45, 7 }
  0xba   : > { %v863_v53 = vpop.f32.mrf.mxu2 }
  0xbb   : > { %v878_v55 = vadd.f32 %v877_v46, %v863_v53  ;;  %v1149_v63 = vsel %vm1117_vm1, %v1101_v54, %v1133_v59  ;;  %vm1124_vm4 = vcmp.ge.f32.partialorder %v1108_v38, 0.0  ;;  %v1140_v54 = vmul.f32 0.2, %v1108_v38 }
  0xbc   : > { %vm1236_vm1 = vcmask 1040384  }
  0xbd   : > { %v1075_v58 = vmul.f32 %v1051_v49, %v878_v55  ;;  %v1088_v49 = vperm.slane %v2557_v52, 4 }
  0xbe   : > { %v889_v61 = vpop.f32.mrf.mxu1  ;;  %v905_v3 = vpop.f32.mrf.mxu3 }
  0xbf   : > { %v1109_v60 = vadd.f32 %v1085_v12, %v1075_v58  ;;  %v904_v17 = vadd.f32 %v903_v57, %v889_v61 }
  0xc1   : > { %vm1125_vm2 = vcmp.ge.f32.partialorder %v1109_v60, 0.0  ;;  %v1141_v62 = vmul.f32 0.2, %v1109_v60  ;;  %v1068_v28 = vmul.f32 %v1052_v18, %v904_v17 }
  0xc2   : > { %v931_v5 = vpop.f32.mrf.mxu2 }
  0xc3   : > { %v1157_v0 = vsel %vm1125_vm2, %v1109_v60, %v1141_v62  ;;  %v1102_v42 = vadd.f32 %v1086_v29, %v1068_v28  ;;  %vm1238_vm2 = vcmask 1042434  }
  0xc4   : > { %v2560_v1 = vmax.f32 %v1149_v63, %v1157_v0 }
  0xc5   : > { %vm1118_vm5 = vcmp.ge.f32.partialorder %v1102_v42, 0.0  ;;  %v1134_v55 = vmul.f32 0.2, %v1102_v42 }
  0xc6   : > { %v891_v4 = vpop.f32.mrf.mxu1  ;;  %v1173_v28 = vrot.slane %v2560_v1, 4 }
  0xc7   : > { %v906_v16 = vadd.f32 %v905_v3, %v891_v4  ;;  %v1156_v3 = vsel %vm1124_vm4, %v1108_v38, %v1140_v54  ;;  %v1150_v4 = vsel %vm1118_vm5, %v1102_v42, %v1134_v55  ;;  %vm1242_vm4 = vcmask 1044484  }
  0xc8   : > { %v1174_v38 = vmax.f32 %v2560_v1, %v1173_v28  ;;  %vm1244_vm5 = vcmask 1046534  }
  0xc9   : > { %v1076_v24 = vmul.f32 %v1052_v18, %v906_v16 }
  0xca   : > { %v933_v9 = vpop.f32.mrf.mxu2  ;;  %v1175_v54 = vrot.slane %v1174_v38, 2 }
  0xcb   : > { %v1110_v39 = vadd.f32 %v1086_v29, %v1076_v24 }
  0xcc   : > { %v917_v6 = vpop.f32.mrf.mxu0 }
  0xcd   : > { %v932_v25 = vadd.f32 %v931_v5, %v917_v6  ;;  %v1142_v50 = vmul.f32 0.2, %v1110_v39  ;;  %vm1126_vm6 = vcmp.ge.f32.partialorder %v1110_v39, 0.0 }
  0xce   : > { %v959_v8 = vpop.f32.mrf.mxu1 }
  0xcf   : > { %v1069_v40 = vmul.f32 %v1053_v26, %v932_v25  ;;  %v1158_v61 = vsel %vm1126_vm6, %v1110_v39, %v1142_v50  ;;  %vm1246_vm6 = vcmask 1045508  }
  0xd1   : > { %v1103_v51 = vadd.f32 %v1087_v36, %v1069_v40 }
  0xd3   : > { %v1135_v62 = vmul.f32 0.2, %v1103_v51  ;;  %vm1119_vm8 = vcmp.ge.f32.partialorder %v1103_v51, 0.0 }
  0xd4   : > { %v945_v7 = vpop.f32.mrf.mxu3  ;;  %v919_v14 = vpop.f32.mrf.mxu0 }
  0xd5   : > { %v934_v19 = vadd.f32 %v933_v9, %v919_v14  ;;  %v960_v41 = vadd.f32 %v959_v8, %v945_v7  ;;  %v1151_v14 = vsel %vm1119_vm8, %v1103_v51, %v1135_v62 }
  0xd6   : > { %v961_v22 = vpop.f32.mrf.mxu1 }
  0xd7   : > { %v1077_v31 = vmul.f32 %v1053_v26, %v934_v19  ;;  %v1070_v12 = vmul.f32 %v1054_v37, %v960_v41 }
  0xd9   : > { %v1111_v43 = vadd.f32 %v1087_v36, %v1077_v31  ;;  %v1104_v63 = vadd.f32 %v1088_v49, %v1070_v12  ;;  %v1090_v36 = vperm.slane %v2557_v52, 6 }
  0xdb   : > { %v1143_v57 = vmul.f32 0.2, %v1111_v43  ;;  %vm1127_vm7 = vcmp.ge.f32.partialorder %v1111_v43, 0.0  ;;  %v1136_v15 = vmul.f32 0.2, %v1104_v63  ;;  %vm1120_vm12 = vcmp.ge.f32.partialorder %v1104_v63, 0.0 }
  0xdc   : > { %v947_v10 = vpop.f32.mrf.mxu3 }
  0xdd   : > { %v962_v32 = vadd.f32 %v961_v22, %v947_v10  ;;  %v1159_v5 = vsel %vm1127_vm7, %v1111_v43, %v1143_v57  ;;  %v1179_v10 = vmax.f32 %v1150_v4, %v1158_v61  ;;  %v1152_v29 = vsel %vm1120_vm12, %v1104_v63, %v1136_v15 }
  0xde   : > { %v1186_v18 = vmax.f32 %v1151_v14, %v1159_v5  ;;  %vm1248_vm7 = vcmask 1043456  }
  0xdf   : > { %v1078_v44 = vmul.f32 %v1054_v37, %v962_v32 }
  0xe1   : > { %v1112_v58 = vadd.f32 %v1088_v49, %v1078_v44 }
  0xe2   : > { %v973_v27 = vpop.f32.mrf.mxu2 }
  0xe3   : > { %v1144_v6 = vmul.f32 0.2, %v1112_v58  ;;  %vm1128_vm9 = vcmp.ge.f32.partialorder %v1112_v58, 0.0 }
  0xe4   : > { %v987_v30 = vpop.f32.mrf.mxu3 }
  0xe5   : > { %v988_v33 = vadd.f32 %v987_v30, %v973_v27  ;;  %v1160_v22 = vsel %vm1128_vm9, %v1112_v58, %v1144_v6  ;;  %v1165_v27 = vmax.f32 %v1148_v2, %v1156_v3  ;;  %v1187_v30 = vrot.slane %v1186_v18, 4 }
  0xe6   : > { %v1193_v31 = vmax.f32 %v1152_v29, %v1160_v22 }
  0xe7   : > { %v1071_v46 = vmul.f32 %v1055_v34, %v988_v33  ;;  %v1091_v33 = vperm.slane %v2557_v52, 7  ;;  %v1166_v45 = vrot.slane %v1165_v27, 4  ;;  %v1188_v41 = vmax.f32 %v1186_v18, %v1187_v30 }
  0xe8   : > { %v1194_v42 = vrot.slane %v1193_v31, 4 }
  0xe9   : > { %v1105_v59 = vadd.f32 %v1089_v47, %v1071_v46  ;;  %v1189_v55 = vrot.slane %v1188_v41, 2 }
  0xea   : > { %v975_v53 = vpop.f32.mrf.mxu2 }
  0xeb   : > { %v1137_v7 = vmul.f32 0.2, %v1105_v59  ;;  %vm1121_vm10 = vcmp.ge.f32.partialorder %v1105_v59, 0.0 }
  0xec   : > { %v989_v56 = vpop.f32.mrf.mxu3  ;;  %v1029_v9 = vpop.f32.mrf.mxu0 }
  0xed   : > { %v990_v60 = vadd.f32 %v989_v56, %v975_v53  ;;  %v1153_v23 = vsel %vm1121_vm10, %v1105_v59, %v1137_v7  ;;  %v1167_v53 = vmax.f32 %v1165_v27, %v1166_v45  ;;  %v1195_v56 = vmax.f32 %v1193_v31, %v1194_v42 }
  0xee   : > { %v1001_v11 = vpop.f32.mrf.mxu1 }
  0xef   : > { %v1079_v0 = vmul.f32 %v1055_v34, %v990_v60  ;;  %v1180_v34 = vrot.slane %v1179_v10, 4  ;;  %v1196_v2 = vrot.slane %v1195_v56, 2  ;;  %v1168_v5 = vrot.slane %v1167_v53, 2 }
  0xf1   : > { %v1113_v8 = vadd.f32 %v1089_v47, %v1079_v0  ;;  %v1181_v48 = vmax.f32 %v1179_v10, %v1180_v34  ;;  %v1190_v0 = vmax.f32 %v1188_v41, %v1189_v55  ;;  %v1169_v18 = vmax.f32 %v1167_v53, %v1168_v5 }
  0xf2   : > { %v1043_v17 = vpop.f32.mrf.mxu2 }
  0xf3   : > { %vm1129_vm11 = vcmp.ge.f32.partialorder %v1113_v8, 0.0  ;;  %v1145_v16 = vmul.f32 0.2, %v1113_v8  ;;  %v1044_v20 = vadd.f32 %v1043_v17, %v1029_v9  ;;  %v1182_v58 = vrot.slane %v1181_v48, 2 }
  0xf4   : > { %v1015_v19 = vpop.f32.mrf.mxu3  ;;  %v1031_v39 = vpop.f32.mrf.mxu0  ;;  %v1176_v9 = vmax.f32 %v1174_v38, %v1175_v54  ;;  %v1191_v15 = vrot.slane %v1190_v0, 1  ;;  %v1170_v28 = vrot.slane %v1169_v18, 1 }
  0xf5   : > { %v1161_v24 = vsel %vm1129_vm11, %v1113_v8, %v1145_v16  ;;  %v1016_v25 = vadd.f32 %v1015_v19, %v1001_v11  ;;  %v1073_v32 = vmul.f32 %v1057_v21, %v1044_v20  ;;  %v1183_v10 = vmax.f32 %v1181_v48, %v1182_v58 }
  0xf6   : > { %v1200_v26 = vmax.f32 %v1153_v23, %v1161_v24  ;;  %v1003_v43 = vpop.f32.mrf.mxu1  ;;  %v1197_v16 = vmax.f32 %v1195_v56, %v1196_v2  ;;  %v1177_v20 = vrot.slane %v1176_v9, 1  ;;  %v1171_v45 = vmax.f32 %v1169_v18, %v1170_v28 }
  0xf7   : > { %v1072_v35 = vmul.f32 %v1056_v13, %v1016_v25  ;;  %v1107_v44 = vadd.f32 %v1091_v33, %v1073_v32  ;;  %v1192_v25 = vmax.f32 %v1190_v0, %v1191_v15 }
  0xf8   : > { %v1201_v37 = vrot.slane %v1200_v26, 4  ;;  %v1178_v30 = vmax.f32 %v1176_v9, %v1177_v20 }
  0xf9   : > { %v1106_v49 = vadd.f32 %v1090_v36, %v1072_v35  ;;  %v1139_v57 = vmul.f32 0.2, %v1107_v44  ;;  %vm1123_vm13 = vcmp.ge.f32.partialorder %v1107_v44, 0.0  ;;  %v1231_v35 = vrot.slane %v1192_v25, 5 }
  0xfa   : > { %v1045_v40 = vpop.f32.mrf.mxu2  ;;  %v1202_v51 = vmax.f32 %v1200_v26, %v1201_v37  ;;  %v1198_v26 = vrot.slane %v1197_v16, 1 }
  0xfb   : > { %v1046_v47 = vadd.f32 %v1045_v40, %v1031_v39  ;;  %v1138_v59 = vmul.f32 0.2, %v1106_v49  ;;  %vm1122_vm14 = vcmp.ge.f32.partialorder %v1106_v49, 0.0  ;;  %v1155_v3 = vsel %vm1123_vm13, %v1107_v44, %v1139_v57 }
  0xfc   : > { %v1017_v46 = vpop.f32.mrf.mxu3  ;;  %v1203_v61 = vrot.slane %v1202_v51, 2  ;;  %v1229_v39 = vrot.slane %v1178_v30, 7 }
  0xfd   : > { %v1018_v50 = vadd.f32 %v1017_v46, %v1003_v43  ;;  %v1081_v12 = vmul.f32 %v1057_v21, %v1046_v47  ;;  %v1154_v6 = vsel %vm1122_vm14, %v1106_v49, %v1138_v59  ;;  %v1184_v21 = vrot.slane %v1183_v10, 1 }
  0xfe   : > { %v1204_v11 = vmax.f32 %v1202_v51, %v1203_v61  ;;  %v1237_v48 = vsel %vm1236_vm1, %v1171_v45, %v1229_v39 }
  0xff   : > { %v1080_v52 = vmul.f32 %v1056_v13, %v1018_v50  ;;  %v1115_v1 = vadd.f32 %v1091_v33, %v1081_v12  ;;  %v1185_v31 = vmax.f32 %v1183_v10, %v1184_v21 }
 0x100   : > { %v1205_v22 = vrot.slane %v1204_v11, 1 }
 0x101   : > { %v1114_v60 = vadd.f32 %v1090_v36, %v1080_v52  ;;  %vm1131_vm15 = vcmp.ge.f32.partialorder %v1115_v1, 0.0  ;;  %v1147_v62 = vmul.f32 0.2, %v1115_v1  ;;  %v1199_v36 = vmax.f32 %v1197_v16, %v1198_v26 }
 0x102   : > { %v1206_v32 = vmax.f32 %v1204_v11, %v1205_v22  ;;  %v1230_v40 = vrot.slane %v1185_v31, 6 }
 0x103   : > { %vm1130_vm0 = vcmp.ge.f32.partialorder %v1114_v60, 0.0  ;;  %v1146_v63 = vmul.f32 0.2, %v1114_v60  ;;  %v1163_v4 = vsel %vm1131_vm15, %v1115_v1, %v1147_v62  ;;  %v1232_v46 = vrot.slane %v1199_v36, 4 }
 0x104   : > { %v1214_v8 = vmax.f32 %v1155_v3, %v1163_v4  ;;  %v1233_v41 = vrot.slane %v1206_v32, 3  ;;  %v1239_v44 = vsel %vm1238_vm2, %v1230_v40, %v1231_v35 }
 0x105   : > { %v1162_v7 = vsel %vm1130_vm0, %v1114_v60, %v1146_v63  ;;  %v1241_v51 = vsel %vm1240_vm3, %v1237_v48, %v1239_v44 }
 0x106   : > { %v1207_v13 = vmax.f32 %v1154_v6, %v1162_v7  ;;  %v1215_v14 = vrot.slane %v1214_v8, 4  ;;  %v1243_v49 = vsel %vm1242_vm4, %v1232_v46, %v1233_v41 }
 0x108   : > { %v1208_v17 = vrot.slane %v1207_v13, 4  ;;  %v1216_v19 = vmax.f32 %v1214_v8, %v1215_v14 }
 0x10a   : > { %v1209_v23 = vmax.f32 %v1207_v13, %v1208_v17  ;;  %v1217_v24 = vrot.slane %v1216_v19, 2 }
 0x10c   : > { %v1210_v27 = vrot.slane %v1209_v23, 2  ;;  %v1218_v29 = vmax.f32 %v1216_v19, %v1217_v24 }
 0x10e   : > { %v1211_v33 = vmax.f32 %v1209_v23, %v1210_v27  ;;  %v1219_v34 = vrot.slane %v1218_v29, 1 }
 0x110   : > { %v1212_v37 = vrot.slane %v1211_v33, 1  ;;  %v1220_v38 = vmax.f32 %v1218_v29, %v1219_v34 }
 0x112   : > { %v1213_v42 = vmax.f32 %v1211_v33, %v1212_v37  ;;  %v1235_v43 = vrot.slane %v1220_v38, 1 }
 0x114   : > { %v1234_v47 = vrot.slane %v1213_v42, 2 }
 0x116   : > { %v1245_v50 = vsel %vm1244_vm5, %v1234_v47, %v1235_v43 }
 0x117   : > { %v1247_v12 = vsel %vm1246_vm6, %v1243_v49, %v1245_v50 }
 0x118   : > { %v1249_v53 = vsel %vm1248_vm7, %v1241_v51, %v1247_v12 }
 0x119   : > { %1257 = vst [vmem:[%s226_s20] sm:$0xff] %v1249_v53 }
 0x11a PF: > { %s14_s17 = sadd.s32 1, %s1883_s17   ;;  %s2599_s15 = smov %s1879_s16 }
 0x11b   : > { %p11_p5 = scmp.ge.s32.totalorder %s14_s17, 4   ;;  %s2600_s16 = smov %s2602_s18 }
 0x11d   :  { %13 = sbr.rel (!%p11_p5) target bundleno = 2 (0x2), region = 74 }

// kernel: forward.37
= control target key start
LH: loop header
LB: loop body
LE: loop exit
PB: predicated region body
PF: predicated region fallthrough
CT: control target
= control target key end

     0   :  { %s2500_s0 = inlined_call_operand.vmem [shape: bf16[2,16,192], index: 0, kind: input, shape index: {}]   ;;  %s2501_s1 = inlined_call_operand.vmem [shape: f32[2,1,256], index: 1, kind: input, shape index: {}]   ;;  %s2502_s2 = inlined_call_operand.vmem [shape: bf16[192,256], index: 2, kind: input, shape index: {}]   ;;  %s2503_s3 = inlined_call_operand.vmem [shape: f32[1,256], index: 3, kind: input, shape index: {}]   ;;  %s2504_s4 = inlined_call_operand.vmem [shape: bf16[256,256], index: 4, kind: input, shape index: {}]   ;;  %s2505_s5 = inlined_call_operand.vmem [shape: f32[1,256], index: 5, kind: input, shape index: {}]   ;;  %s2506_s6 = inlined_call_operand.vmem [shape: f32[1,256], index: 6, kind: input, shape index: {}]   ;;  %s2507_s7 = inlined_call_operand.vmem [shape: bf16[256,128], index: 7, kind: input, shape index: {}]   ;;  %s2508_s8 = inlined_call_operand.vmem [shape: f32[1,128], index: 8, kind: input, shape index: {}]   ;;  %s2509_s9 = inlined_call_operand.vmem [shape: f32[1,128], index: 9, kind: input, shape index: {}]   ;;  %s2510_s10 = inlined_call_operand.vmem [shape: bf16[128,50], index: 10, kind: input, shape index: {}]   ;;  %s2511_s11 = inlined_call_operand.hbm [shape: f32[2,16,50], index: 11, kind: output, shape index: {}]  }
   0x1   :  { %2515 = sst [smem:[#allocation9_spill]] %s2500_s0 }
   0x2   :  { %16 = vsyncpa [#allocation3], 0 }
   0x3   :  { %18 = vsyncpa [#allocation3 + $0x1], 0  ;;  %s1965_s17 = smov 0   ;;  %s1967_s18 = smov 0  }
   0x4   :  { %s1969_s19 = smov 0   ;;  %s1971_s20 = smov 0  }
   0x5   :  { %s1973_s21 = smov 0   ;;  %s1975_s22 = smov 0  }
   0x6 LB: > { %2516 = sst [smem:[#allocation5_spill]] %s1889_s19  ;;  %s1336_s23 = sadd.s32 4294967295, %s1901_s22   ;;  %s1901_s22 = sphi %s1975_s22, %s24_s22   ;;  %s1897_s21 = sphi %s1973_s21, %s2526_s21   ;;  %s1893_s20 = sphi %s1971_s20, %s2525_s20   ;;  %s1889_s19 = sphi %s1969_s19, %s2524_s19   ;;  %s1885_s18 = sphi %s1967_s18, %s2528_s18   ;;  %s1881_s17 = sphi %s1965_s17, %s2527_s17  }
   0x7   : > { %2517 = sst [smem:[#allocation6_spill]] %s1897_s21  ;;  %s1337_s24 = sadd.s32 4294967294, %s1901_s22  }
   0x8   : > { %s36_s25 = sadd.s32 1, %s1897_s21  ;;  %s288_s26 = sadd.s32 1, %s1889_s19 }
   0x9   : > { %p38_p0 = scmp.ge.s32.totalorder %s36_s25, 2  ;;  %p298_p1 = scmp.ne.s32.totalorder %s1889_s19, %s1885_s18 }
   0xa   : > { %p299_p2 = scmp.eq.s32.totalorder %s1336_s23, 1  ;;  %p304_p3 = scmp.ne.s32.totalorder %s1885_s18, %s1881_s17 }
   0xb   : > { %s2530_s25 = smov (%p38_p0, %s36_s25), 0  ;;  %p305_p5 = scmp.eq.s32.totalorder %s1337_s24, 1 }
   0xc   : > { %2518 = sst [smem:[#allocation7_spill]] %s2530_s25  ;;  %p2005_p4 = por %p299_p2, %p298_p1 }
   0xd   : > { %s283_s28 = ssub.s32 %s1897_s21, %s2530_s25  ;;  %p1340_p6 = scmp.ge.s32.totalorder %s1901_s22, 1 }
   0xe   : > { %p286_p7 = scmp.eq.s32.totalorder %s283_s28, 0  ;;  %p2012_p8 = por %p305_p5, %p304_p3 }
   0xf   : > { %p371_p9 = scmp.lt.s32.totalorder %s1901_s22, 3 }
  0x10   : > { %s2018_s30 = scalar_select %p286_p7, %s1889_s19, %s288_s26  }
  0x11   : > { %p372_p10 = pnand %p1340_p6, %p371_p9 }
  0x12   : > { %2521 = sst [smem:[#allocation8_spill]] %s2018_s30  ;;  %p421_p11 = scmp.lt.s32.totalorder (!%p372_p10), %s1893_s20, 1 }
  0x13   : > { %375 = sbr.rel (%p372_p10) target bundleno = 650 (0x28a), region = 64  ;;  %s2522_s0 = sld [smem:[#allocation9_spill]] (!%p372_p10) }
  0x14   : > { %s1763_s23 = sshll.u32 (!%p372_p10), %s1893_s20, 4 }
  0x15   : > { %s1238_s28 = scalar_lea.hbm (!%p372_p10), %s2511_s11, %s1763_s23 }
  0x18   : > { %v1411_v0 = vld [vmem:[%s2502_s2 + $0x70] sm:$0xf]  ;;  %v1698_v1 = vld [vmem:[%s2502_s2 + $0x74] sm:$0xf0]  ;;  %v1697_v2 = vld [vmem:[%s2502_s2 + $0x74] sm:$0xf] }
  0x19   : > { %v1412_v3 = vor.u32 %v1698_v1, %v1411_v0  ;;  %v1413_v4 = vld [vmem:[%s2502_s2 + $0x78] sm:$0xf0]  ;;  %v1403_v5 = vld [vmem:[%s2502_s2 + $0x60] sm:$0xf]  ;;  %v1696_v6 = vld [vmem:[%s2502_s2 + $0x64] sm:$0xf0] }
  0x1a   : > { %v1416_v7 = vor.u32 %v1697_v2, %v1413_v4  ;;  %v1695_v8 = vld [vmem:[%s2502_s2 + $0x64] sm:$0xf]  ;;  %v1405_v9 = vld [vmem:[%s2502_s2 + $0x68] sm:$0xf0]  ;;  %v1404_v10 = vor.u32 %v1696_v6, %v1403_v5  ;;  %v1395_v11 = vld [vmem:[%s2502_s2 + $0x50] sm:$0xf] }
  0x1b   : > { %596 = vmatpush.bf16.msra.mxu0 %v1412_v3  ;;  %v1408_v12 = vor.u32 %v1695_v8, %v1405_v9  ;;  %v1694_v13 = vld [vmem:[%s2502_s2 + $0x54] sm:$0xf0]  ;;  %v1705_v14 = vld [vmem:[%s2502_s2 + $0xb4] sm:$0xf]  ;;  %v1445_v15 = vld [vmem:[%s2502_s2 + $0xb8] sm:$0xf0] }
  0x1c   : > { %624 = vmatpush.bf16.msra.mxu2 %v1416_v7  ;;  %v1693_v16 = vld [vmem:[%s2502_s2 + $0x54] sm:$0xf]  ;;  %v1397_v17 = vld [vmem:[%s2502_s2 + $0x58] sm:$0xf0]  ;;  %v1448_v18 = vor.u32 %v1705_v14, %v1445_v15  ;;  %v1703_v19 = vld [vmem:[%s2502_s2 + $0xa4] sm:$0xf]  ;;  %v1396_v21 = vor.u32 %v1694_v13, %v1395_v11 }
  0x1d   : > { %v1437_v20 = vld [vmem:[%s2502_s2 + $0xa8] sm:$0xf0]  ;;  %v1443_v23 = vld [vmem:[%s2502_s2 + $0xb0] sm:$0xf]  ;;  %v1706_v24 = vld [vmem:[%s2502_s2 + $0xb4] sm:$0xf0]  ;;  %v1400_v25 = vor.u32 %v1693_v16, %v1397_v17 }
  0x1e   : > { %642 = vmatpush.bf16.msra.mxu3 %v1448_v18  ;;  %v1440_v22 = vor.u32 %v1703_v19, %v1437_v20  ;;  %v1387_v26 = vld [vmem:[%s2502_s2 + $0x40] sm:$0xf]  ;;  %v1692_v27 = vld [vmem:[%s2502_s2 + $0x44] sm:$0xf0]  ;;  %v1444_v28 = vor.u32 %v1706_v24, %v1443_v23  ;;  %v1701_v29 = vld [vmem:[%s2502_s2 + $0x94] sm:$0xf] }
  0x1f   : > { %597 = vmatpush.bf16.msra.mxu0 %v1404_v10  ;;  %v1691_v30 = vld [vmem:[%s2502_s2 + $0x44] sm:$0xf]  ;;  %v1389_v31 = vld [vmem:[%s2502_s2 + $0x48] sm:$0xf0]  ;;  %v1429_v32 = vld [vmem:[%s2502_s2 + $0x98] sm:$0xf0]  ;;  %v1388_v35 = vor.u32 %v1692_v27, %v1387_v26 }
  0x20   : > { %625 = vmatpush.bf16.msra.mxu2 %v1408_v12  ;;  %614 = vmatpush.bf16.msra.mxu1 %v1444_v28  ;;  %v1435_v33 = vld [vmem:[%s2502_s2 + $0xa0] sm:$0xf]  ;;  %v1704_v34 = vld [vmem:[%s2502_s2 + $0xa4] sm:$0xf0]  ;;  %v1379_v36 = vld [vmem:[%s2502_s2 + $0x30] sm:$0xf]  ;;  %v1432_v39 = vor.u32 %v1701_v29, %v1429_v32  ;;  %v1392_v41 = vor.u32 %v1691_v30, %v1389_v31 }
  0x21   : > { %v1690_v37 = vld [vmem:[%s2502_s2 + $0x34] sm:$0xf0]  ;;  %v1689_v38 = vld [vmem:[%s2502_s2 + $0x34] sm:$0xf]  ;;  %v1436_v40 = vor.u32 %v1704_v34, %v1435_v33  ;;  %v1699_v42 = vld [vmem:[%s2502_s2 + $0x84] sm:$0xf] }
  0x22   : > { %643 = vmatpush.bf16.msra.mxu3 %v1440_v22  ;;  %v1421_v43 = vld [vmem:[%s2502_s2 + $0x88] sm:$0xf0]  ;;  %v1381_v44 = vld [vmem:[%s2502_s2 + $0x38] sm:$0xf0]  ;;  %v1427_v45 = vld [vmem:[%s2502_s2 + $0x90] sm:$0xf]  ;;  %v1380_v48 = vor.u32 %v1690_v37, %v1379_v36 }
  0x23   : > { %598 = vmatpush.bf16.msra.mxu0 %v1396_v21  ;;  %v1702_v46 = vld [vmem:[%s2502_s2 + $0x94] sm:$0xf0]  ;;  %s2124_s14 = scalar_select %p421_p11, %s1893_s20, 1  ;;  %v1371_v49 = vld [vmem:[%s2502_s2 + $0x20] sm:$0xf]  ;;  %v1424_v50 = vor.u32 %v1699_v42, %v1421_v43  ;;  %v1384_v53 = vor.u32 %v1689_v38, %v1381_v44  ;;  %vm592_vm0 = vcmask 523264  }
  0x24   : > { %626 = vmatpush.bf16.msra.mxu2 %v1400_v25  ;;  %615 = vmatpush.bf16.msra.mxu1 %v1436_v40  ;;  %v1428_v47 = vor.u32 %v1702_v46, %v1427_v45  ;;  %v1419_v51 = vld [vmem:[%s2502_s2 + $0x80] sm:$0xf]  ;;  %v1700_v52 = vld [vmem:[%s2502_s2 + $0x84] sm:$0xf0]  ;;  %v1687_v55 = vld [vmem:[%s2502_s2 + $0x24] sm:$0xf] }
  0x25   : > { %v1688_v54 = vld [vmem:[%s2502_s2 + $0x24] sm:$0xf0]  ;;  %s1680_s15 = sshll.u32 %s2124_s14, 4  ;;  %v1373_v56 = vld [vmem:[%s2502_s2 + $0x28] sm:$0xf0]  ;;  %v1420_v61 = vor.u32 %v1700_v52, %v1419_v51  ;;  %s1344_s30 = sshll.u32 %s2124_s14, 1 }
  0x26   : > { %644 = vmatpush.bf16.msra.mxu3 %v1432_v39  ;;  %s2148_s25 = scalar_lea.vmem %s2522_s0, %s1680_s15  ;;  %v1509_v57 = vld [vmem:[%s2504_s4 + $0x70] sm:$0xf]  ;;  %v1722_v58 = vld [vmem:[%s2504_s4 + $0x74] sm:$0xf0]  ;;  %v1372_v62 = vor.u32 %v1688_v54, %v1371_v49  ;;  %v1376_v3 = vor.u32 %v1687_v55, %v1373_v56  ;;  %v1685_v4 = vld [vmem:[%s2502_s2 + $0x14] sm:$0xf]  ;;  %s434_s15 = scalar_lea.vmem %s2501_s1, %s1344_s30 }
  0x27   : > { %599 = vmatpush.bf16.msra.mxu0 %v1388_v35  ;;  %v1681_v59 = vld [vmem:[%s2148_s25 + $0x4] sm:$0xf]  ;;  %v1349_v60 = vld [vmem:[%s2148_s25 + $0x8] sm:$0xf0]  ;;  %v1363_v0 = vld [vmem:[%s2502_s2 + $0x10] sm:$0xf]  ;;  %v1510_v2 = vor.u32 %v1722_v58, %v1509_v57 }
  0x28   : > { %627 = vmatpush.bf16.msra.mxu2 %v1392_v41  ;;  %616 = vmatpush.bf16.msra.mxu1 %v1428_v47  ;;  %v1352_v63 = vor.u32 %v1681_v59, %v1349_v60  ;;  %v1686_v1 = vld [vmem:[%s2502_s2 + $0x14] sm:$0xf0]  ;;  %v1501_v5 = vld [vmem:[%s2504_s4 + $0x60] sm:$0xf]  ;;  %v1720_v6 = vld [vmem:[%s2504_s4 + $0x64] sm:$0xf0] }
  0x29   : > { %v1365_v7 = vld [vmem:[%s2502_s2 + $0x18] sm:$0xf0]  ;;  %v1573_v8 = vld [vmem:[%s2504_s4 + $0xf0] sm:$0xf]  ;;  %v1738_v9 = vld [vmem:[%s2504_s4 + $0xf4] sm:$0xf0]  ;;  %v1364_v12 = vor.u32 %v1686_v1, %v1363_v0  ;;  %v1502_v15 = vor.u32 %v1720_v6, %v1501_v5 }
  0x2a   : > { %645 = vmatpush.bf16.msra.mxu3 %v1424_v50  ;;  %v1355_v10 = vld [vmem:[%s2502_s2] sm:$0xf]  ;;  %v1574_v11 = vor.u32 %v1738_v9, %v1573_v8  ;;  %v1684_v13 = vld [vmem:[%s2502_s2 + $0x4] sm:$0xf0]  ;;  %v1683_v14 = vld [vmem:[%s2502_s2 + $0x4] sm:$0xf]  ;;  %v1368_v16 = vor.u32 %v1685_v4, %v1365_v7 }
  0x2b   : > { %600 = vmatpush.bf16.msra.mxu0 %v1380_v48  ;;  %v1493_v17 = vld [vmem:[%s2504_s4 + $0x50] sm:$0xf]  ;;  %v1718_v18 = vld [vmem:[%s2504_s4 + $0x54] sm:$0xf0]  ;;  %v1357_v19 = vld [vmem:[%s2502_s2 + $0x8] sm:$0xf0]  ;;  %v1356_v24 = vor.u32 %v1684_v13, %v1355_v10 }
  0x2c   : > { %628 = vmatpush.bf16.msra.mxu2 %v1384_v53  ;;  %617 = vmatpush.bf16.msra.mxu1 %v1420_v61  ;;  %v1721_v20 = vld [vmem:[%s2504_s4 + $0x74] sm:$0xf]  ;;  %v1511_v21 = vld [vmem:[%s2504_s4 + $0x78] sm:$0xf0]  ;;  %v1347_v25 = vld [vmem:[%s2148_s25] sm:$0xf]  ;;  %v1494_v27 = vor.u32 %v1718_v18, %v1493_v17  ;;  %v1360_v28 = vor.u32 %v1683_v14, %v1357_v19 }
  0x2d   : > { %1450 = vmatmul.msk.bf16.vlgmr.msra.gmra.mxu3 %vm592_vm0, %v1352_v63  ;;  %v1737_v22 = vld [vmem:[%s2504_s4 + $0xf4] sm:$0xf]  ;;  %v1575_v23 = vld [vmem:[%s2504_s4 + $0xf8] sm:$0xf0]  ;;  %v1682_v26 = vld [vmem:[%s2148_s25 + $0x4] sm:$0xf0]  ;;  %v1514_v29 = vor.u32 %v1721_v20, %v1511_v21 }
  0x2e   : > { %892 = vmatpush.bf16.msrb.mxu3 %v1574_v11  ;;  %v1719_v30 = vld [vmem:[%s2504_s4 + $0x64] sm:$0xf]  ;;  %v1503_v31 = vld [vmem:[%s2504_s4 + $0x68] sm:$0xf0]  ;;  %v1578_v32 = vor.u32 %v1737_v22, %v1575_v23  ;;  %v1348_v33 = vor.u32 %v1682_v26, %v1347_v25  ;;  %v1717_v35 = vld [vmem:[%s2504_s4 + $0x54] sm:$0xf] }
  0x2f   : > { %601 = vmatpush.bf16.msra.mxu0 %v1372_v62  ;;  %1449 = vmatmul.msk.bf16.vlgmr.msra.gmra.mxu1 %vm592_vm0, %v1352_v63  ;;  %v1506_v34 = vor.u32 %v1719_v30, %v1503_v31  ;;  %v1495_v36 = vld [vmem:[%s2504_s4 + $0x58] sm:$0xf0]  ;;  %v1565_v38 = vld [vmem:[%s2504_s4 + $0xe0] sm:$0xf]  ;;  %v1736_v39 = vld [vmem:[%s2504_s4 + $0xe4] sm:$0xf0] }
  0x30   : > { %878 = vmatpush.bf16.msrb.mxu1 %v1510_v2  ;;  %629 = vmatpush.bf16.msra.mxu2 %v1376_v3  ;;  %v1498_v37 = vor.u32 %v1717_v35, %v1495_v36  ;;  %v1735_v40 = vld [vmem:[%s2504_s4 + $0xe4] sm:$0xf]  ;;  %v1566_v41 = vor.u32 %v1736_v39, %v1565_v38  ;;  %v1567_v42 = vld [vmem:[%s2504_s4 + $0xe8] sm:$0xf0]  ;;  %v1485_v44 = vld [vmem:[%s2504_s4 + $0x40] sm:$0xf] }
  0x31   : > { %v1570_v43 = vor.u32 %v1735_v40, %v1567_v42  ;;  %v1716_v45 = vld [vmem:[%s2504_s4 + $0x44] sm:$0xf0]  ;;  %v1715_v46 = vld [vmem:[%s2504_s4 + $0x44] sm:$0xf]  ;;  %v1487_v48 = vld [vmem:[%s2504_s4 + $0x48] sm:$0xf0] }
  0x32   : > { %893 = vmatpush.bf16.msrb.mxu3 %v1566_v41  ;;  %v1486_v47 = vor.u32 %v1716_v45, %v1485_v44  ;;  %v1490_v49 = vor.u32 %v1715_v46, %v1487_v48  ;;  %v1557_v50 = vld [vmem:[%s2504_s4 + $0xd0] sm:$0xf]  ;;  %v1734_v51 = vld [vmem:[%s2504_s4 + $0xd4] sm:$0xf0]  ;;  %v1733_v53 = vld [vmem:[%s2504_s4 + $0xd4] sm:$0xf] }
  0x33   : > { %602 = vmatpush.bf16.msra.mxu0 %v1364_v12  ;;  %v1558_v52 = vor.u32 %v1734_v51, %v1557_v50  ;;  %v1559_v54 = vld [vmem:[%s2504_s4 + $0xd8] sm:$0xf0]  ;;  %v1477_v56 = vld [vmem:[%s2504_s4 + $0x30] sm:$0xf]  ;;  %v1714_v57 = vld [vmem:[%s2504_s4 + $0x34] sm:$0xf0] }
  0x34   : > { %879 = vmatpush.bf16.msrb.mxu1 %v1502_v15  ;;  %630 = vmatpush.bf16.msra.mxu2 %v1368_v16  ;;  %v1562_v55 = vor.u32 %v1733_v53, %v1559_v54  ;;  %v1478_v58 = vor.u32 %v1714_v57, %v1477_v56  ;;  %v1713_v59 = vld [vmem:[%s2504_s4 + $0x34] sm:$0xf]  ;;  %v1479_v60 = vld [vmem:[%s2504_s4 + $0x38] sm:$0xf0]  ;;  %v1549_v62 = vld [vmem:[%s2504_s4 + $0xc0] sm:$0xf] }
  0x35   : > { %v1482_v61 = vor.u32 %v1713_v59, %v1479_v60  ;;  %v1732_v63 = vld [vmem:[%s2504_s4 + $0xc4] sm:$0xf0]  ;;  %v1731_v0 = vld [vmem:[%s2504_s4 + $0xc4] sm:$0xf]  ;;  %v1551_v2 = vld [vmem:[%s2504_s4 + $0xc8] sm:$0xf0] }
  0x36   : > { %894 = vmatpush.bf16.msrb.mxu3 %v1558_v52  ;;  %v1550_v1 = vor.u32 %v1732_v63, %v1549_v62  ;;  %v1554_v3 = vor.u32 %v1731_v0, %v1551_v2  ;;  %v1469_v4 = vld [vmem:[%s2504_s4 + $0x20] sm:$0xf]  ;;  %v1712_v5 = vld [vmem:[%s2504_s4 + $0x24] sm:$0xf0]  ;;  %v1711_v6 = vld [vmem:[%s2504_s4 + $0x24] sm:$0xf] }
  0x37   : > { %603 = vmatpush.bf16.msra.mxu0 %v1356_v24  ;;  %v1470_v7 = vor.u32 %v1712_v5, %v1469_v4  ;;  %v1471_v8 = vld [vmem:[%s2504_s4 + $0x28] sm:$0xf0]  ;;  %v1541_v10 = vld [vmem:[%s2504_s4 + $0xb0] sm:$0xf]  ;;  %v1730_v11 = vld [vmem:[%s2504_s4 + $0xb4] sm:$0xf0] }
  0x38   : > { %880 = vmatpush.bf16.msrb.mxu1 %v1494_v27  ;;  %631 = vmatpush.bf16.msra.mxu2 %v1360_v28  ;;  %v1474_v9 = vor.u32 %v1711_v6, %v1471_v8  ;;  %v1729_v12 = vld [vmem:[%s2504_s4 + $0xb4] sm:$0xf]  ;;  %v1542_v13 = vor.u32 %v1730_v11, %v1541_v10  ;;  %v1543_v14 = vld [vmem:[%s2504_s4 + $0xb8] sm:$0xf0]  ;;  %v1461_v16 = vld [vmem:[%s2504_s4 + $0x10] sm:$0xf] }
  0x39   : > { %v1546_v15 = vor.u32 %v1729_v12, %v1543_v14  ;;  %v1710_v17 = vld [vmem:[%s2504_s4 + $0x14] sm:$0xf0]  ;;  %v1709_v18 = vld [vmem:[%s2504_s4 + $0x14] sm:$0xf]  ;;  %v1463_v20 = vld [vmem:[%s2504_s4 + $0x18] sm:$0xf0] }
  0x3a   : > { %604 = vmatmul.bf16.vlgmr.msra.gmra.mxu0 %v1348_v33  ;;  %895 = vmatpush.bf16.msrb.mxu3 %v1550_v1  ;;  %v1462_v19 = vor.u32 %v1710_v17, %v1461_v16  ;;  %v1466_v21 = vor.u32 %v1709_v18, %v1463_v20  ;;  %v1533_v22 = vld [vmem:[%s2504_s4 + $0xa0] sm:$0xf]  ;;  %v1728_v23 = vld [vmem:[%s2504_s4 + $0xa4] sm:$0xf0]  ;;  %v1727_v24 = vld [vmem:[%s2504_s4 + $0xa4] sm:$0xf] }
  0x3b   : > { %906 = vmatpush.bf16.msrb.mxu0 %v1514_v29  ;;  %632 = vmatmul.bf16.vlgmr.msra.gmra.mxu2 %v1348_v33  ;;  %v1534_v25 = vor.u32 %v1728_v23, %v1533_v22  ;;  %v1535_v26 = vld [vmem:[%s2504_s4 + $0xa8] sm:$0xf0]  ;;  %v1453_v28 = vld [vmem:[%s2504_s4] sm:$0xf]  ;;  %v1708_v29 = vld [vmem:[%s2504_s4 + $0x4] sm:$0xf0] }
  0x3c   : > { %920 = vmatpush.bf16.msrb.mxu2 %v1578_v32  ;;  %881 = vmatpush.bf16.msrb.mxu1 %v1486_v47  ;;  %v1538_v27 = vor.u32 %v1727_v24, %v1535_v26  ;;  %v1707_v30 = vld [vmem:[%s2504_s4 + $0x4] sm:$0xf]  ;;  %v1454_v31 = vor.u32 %v1708_v29, %v1453_v28  ;;  %v1455_v32 = vld [vmem:[%s2504_s4 + $0x8] sm:$0xf0]  ;;  %v1726_v35 = vld [vmem:[%s2504_s4 + $0x94] sm:$0xf0] }
  0x3d   : > { %v1458_v33 = vor.u32 %v1707_v30, %v1455_v32  ;;  %v1725_v36 = vld [vmem:[%s2504_s4 + $0x94] sm:$0xf]  ;;  %v1527_v38 = vld [vmem:[%s2504_s4 + $0x98] sm:$0xf0]  ;;  %v1517_v40 = vld [vmem:[%s2504_s4 + $0x80] sm:$0xf] }
  0x3e   : > { %896 = vmatpush.bf16.msrb.mxu3 %v1542_v13  ;;  %v1530_v39 = vor.u32 %v1725_v36, %v1527_v38  ;;  %v1724_v41 = vld [vmem:[%s2504_s4 + $0x84] sm:$0xf0]  ;;  %v1723_v42 = vld [vmem:[%s2504_s4 + $0x84] sm:$0xf]  ;;  %v1519_v44 = vld [vmem:[%s2504_s4 + $0x88] sm:$0xf0] }
  0x3f   : > { %907 = vmatpush.bf16.msrb.mxu0 %v1506_v34  ;;  %v1525_v34 = vld [vmem:[%s2504_s4 + $0x90] sm:$0xf]  ;;  %v1522_v45 = vor.u32 %v1723_v42, %v1519_v44  ;;  %v652_v47 = vld [vmem:[%s2503_s3] sm:$0x3]  ;;  %v1746_v18 = vld [vmem:[%s2507_s7 + $0x38] sm:$0xff]  ;;  %s417_s14 = sand.u32 1, %s1885_s18  }
  0x40   : > { %921 = vmatpush.bf16.msrb.mxu2 %v1570_v43  ;;  %882 = vmatpush.bf16.msrb.mxu1 %v1478_v58  ;;  %v1518_v43 = vor.u32 %v1724_v41, %v1517_v40  ;;  %v654_v48 = vperm.slane %v652_v47, 0  ;;  %v662_v51 = vld [vmem:[%s434_s15] sm:$0x3]  ;;  %v655_v59 = vperm.slane %v652_v47, 1  ;;  %v1745_v20 = vld [vmem:[%s2507_s7 + $0x30] sm:$0xff]  ;;  %v1744_v22 = vld [vmem:[%s2507_s7 + $0x28] sm:$0xff] }
  0x41   : > { %v664_v53 = vperm.slane %v662_v51, 0  ;;  %v665_v1 = vperm.slane %v662_v51, 1  ;;  %v1752_v23 = vld [vmem:[%s2507_s7 + $0x68] sm:$0xff]  ;;  %v1743_v24 = vld [vmem:[%s2507_s7 + $0x20] sm:$0xff]  ;;  %v1742_v26 = vld [vmem:[%s2507_s7 + $0x18] sm:$0xff]  ;;  %s1341_s16 = sshll.u32 %s417_s14, 4 }
  0x42   : > { %897 = vmatpush.bf16.msrb.mxu3 %v1534_v25  ;;  %v1751_v25 = vld [vmem:[%s2507_s7 + $0x60] sm:$0xff]  ;;  %v1741_v28 = vld [vmem:[%s2507_s7 + $0x10] sm:$0xff]  ;;  %v1740_v30 = vld [vmem:[%s2507_s7 + $0x8] sm:$0xff]  ;;  %vm1221_vm11 = vcmask 408576   ;;  %s419_s0 = scalar_lea.vmem [#allocation2], %s1341_s16  ;;  %s1241_s30 = sshll.u32 %s1238_s28, 4  ;;  %s1242_s30 = int_to_ptr.hbm [resolvable:$true] %s1241_s30 }
  0x43   : > { %908 = vmatpush.bf16.msrb.mxu0 %v1498_v37  ;;  %v1526_v37 = vor.u32 %v1726_v35, %v1525_v34  ;;  %v1749_v29 = vld [vmem:[%s2507_s7 + $0x50] sm:$0xff]  ;;  %v1739_v32 = vld [vmem:[%s2507_s7] sm:$0xff]  ;;  %v1762_v34 = vld [vmem:[%s2510_s10 + $0x38] sm:$0xff]  ;;  %s1239_s26 = sshll.u32 %s419_s0, 4  ;;  %s1225_s12 = scalar_lea.sflag [#allocation3], %s417_s14  ;;  %s1240_s26 = int_to_ptr.vmem [resolvable:$true] %s1239_s26 }
  0x44   : > { %922 = vmatpush.bf16.msrb.mxu2 %v1562_v55  ;;  %883 = vmatpush.bf16.msrb.mxu1 %v1470_v7  ;;  %v1761_v35 = vld [vmem:[%s2510_s10 + $0x30] sm:$0xff]  ;;  %v934_v38 = vld [vmem:[%s2505_s5] sm:$0x3]  ;;  %s1837_s19 = sshra.s32 %s1242_s30, 4  ;;  %s1843_s15 = scalar_lea.hbm %s2511_s11, 32  ;;  %s1838_s19 = int_to_ptr.hbm [resolvable:$true] %s1837_s19 }
  0x45   : > { %v936_v42 = vperm.slane %v934_v38, 0  ;;  %v937_v44 = vperm.slane %v934_v38, 1  ;;  %s1839_s13 = scalar_lea.hbm %s1838_s19, 16  ;;  %p1844_p1 = scmp.lt.s32.totalorder %s1838_s19, %s2511_s11 }
  0x46   : > { %898 = vmatpush.bf16.msrb.mxu3 %v1526_v37  ;;  %p1840_p12 = scmp.ne.s32.totalorder %s1838_s19, %s1839_s13  ;;  %p1845_p2 = scmp.lt.s32.totalorder %s1843_s15, %s1839_s13 }
  0x47   : > { %909 = vmatpush.bf16.msrb.mxu0 %v1490_v49 }
  0x48   : > { %923 = vmatpush.bf16.msrb.mxu2 %v1554_v3  ;;  %884 = vmatpush.bf16.msrb.mxu1 %v1462_v19  ;;  %v1754_v19 = vld [vmem:[%s2507_s7 + $0x78] sm:$0xff]  ;;  %p1841_p13 = pnand %p1840_p12, %p2005_p4  ;;  %p1846_p3 = por %p1845_p2, %p1844_p1 }
  0x4a   : > { %899 = vmatpush.bf16.msrb.mxu3 %v1518_v43  ;;  %p1842_p0 = pneg %p1841_p13 }
  0x4b   : > { %910 = vmatpush.bf16.msrb.mxu0 %v1482_v61 }
  0x4c   : > { %924 = vmatpush.bf16.msrb.mxu2 %v1546_v15  ;;  %885 = vmatpush.bf16.msrb.mxu1 %v1454_v31  ;;  %v1748_v31 = vld [vmem:[%s2507_s7 + $0x48] sm:$0xff]  ;;  %p1847_p5 = pnand %p1846_p3, %p1842_p0 }
  0x4e   : > { %1110 = vmatpush.bf16.msra.mxu3 %v1754_v19  ;;  %v1822_v19 = vld [vmem:[%s2509_s9] ss:$0 sm:$0xff] }
  0x4f   : > { %911 = vmatpush.bf16.msrb.mxu0 %v1474_v9 }
  0x50   : > { %925 = vmatpush.bf16.msrb.mxu2 %v1538_v27  ;;  %1096 = vmatpush.bf16.msra.mxu1 %v1746_v18  ;;  %v1750_v27 = vld [vmem:[%s2507_s7 + $0x58] sm:$0xff] }
  0x53   : > { %912 = vmatpush.bf16.msrb.mxu0 %v1466_v21  ;;  %v1753_v21 = vld [vmem:[%s2507_s7 + $0x70] sm:$0xff] }
  0x54   : > { %926 = vmatpush.bf16.msrb.mxu2 %v1530_v39  ;;  %1097 = vmatpush.bf16.msra.mxu1 %v1745_v20 }
  0x55   : > { %1111 = vmatpush.bf16.msra.mxu3 %v1753_v21 }
  0x57   : > { %913 = vmatpush.bf16.msrb.mxu0 %v1458_v33  ;;  %v1747_v33 = vld [vmem:[%s2507_s7 + $0x40] sm:$0xff] }
  0x58   : > { %927 = vmatpush.bf16.msrb.mxu2 %v1522_v45  ;;  %1098 = vmatpush.bf16.msra.mxu1 %v1744_v22  ;;  %v944_v45 = vld [vmem:[%s2506_s6] sm:$0x3] }
  0x59   : > { %1112 = vmatpush.bf16.msra.mxu3 %v1752_v23  ;;  %v946_v47 = vperm.slane %v944_v45, 0 }
  0x5b   : > { %1207 = vmatpush.bf16.msra.mxu0 %v1762_v34 }
  0x5c   : > { %1099 = vmatpush.bf16.msra.mxu1 %v1743_v24 }
  0x5d   : > { %1113 = vmatpush.bf16.msra.mxu3 %v1751_v25 }
  0x5f   : > { %1208 = vmatpush.bf16.msra.mxu0 %v1761_v35 }
  0x60   : > { %1100 = vmatpush.bf16.msra.mxu1 %v1742_v26 }
  0x61   : > { %1114 = vmatpush.bf16.msra.mxu3 %v1750_v27 }
  0x64   : > { %1101 = vmatpush.bf16.msra.mxu1 %v1741_v28 }
  0x65   : > { %1115 = vmatpush.bf16.msra.mxu3 %v1749_v29 }
  0x68   : > { %1102 = vmatpush.bf16.msra.mxu1 %v1740_v30 }
  0x69   : > { %1116 = vmatpush.bf16.msra.mxu3 %v1748_v31 }
  0x6c   : > { %1103 = vmatpush.bf16.msra.mxu1 %v1739_v32 }
  0x6d   : > { %1117 = vmatpush.bf16.msra.mxu3 %v1747_v33 }
  0xac   : > { %v619_v46 = vpop.f32.mrf.mxu1 }
  0xb0   : > { %v647_v54 = vpop.f32.mrf.mxu3 }
  0xb4   : > { %v621_v55 = vpop.f32.mrf.mxu1 }
  0xb7   : > { %v605_v49 = vpop.f32.mrf.mxu0 }
  0xb8   : > { %v620_v50 = vadd.f32 %v619_v46, %v605_v49  ;;  %v649_v3 = vpop.f32.mrf.mxu3  ;;  %v947_v49 = vperm.slane %v944_v45, 1 }
  0xba   : > { %v658_v52 = vmul.f32 %v654_v48, %v620_v50 }
  0xbc   : > { %v668_v56 = vadd.f32 %v664_v53, %v658_v52 }
  0xbe   : > { %v633_v57 = vpop.f32.mrf.mxu2  ;;  %v676_v62 = vmul.f32 0.2, %v668_v56  ;;  %vm672_vm1 = vcmp.ge.f32.partialorder %v668_v56, 0.0 }
  0xbf   : > { %v648_v58 = vadd.f32 %v647_v54, %v633_v57  ;;  %v607_v60 = vpop.f32.mrf.mxu0 }
  0xc0   : > { %v622_v61 = vadd.f32 %v621_v55, %v607_v60  ;;  %v680_v6 = vsel %vm672_vm1, %v668_v56, %v676_v62 }
  0xc1   : > { %v659_v0 = vmul.f32 %v655_v59, %v648_v58 }
  0xc2   : > { %v660_v63 = vmul.f32 %v654_v48, %v622_v61 }
  0xc3   : > { %v669_v7 = vadd.f32 %v665_v1, %v659_v0 }
  0xc4   : > { %v670_v2 = vadd.f32 %v664_v53, %v660_v63 }
  0xc5   : > { %v677_v12 = vmul.f32 0.2, %v669_v7  ;;  %vm673_vm3 = vcmp.ge.f32.partialorder %v669_v7, 0.0 }
  0xc6   : > { %v678_v4 = vmul.f32 0.2, %v670_v2  ;;  %v635_v5 = vpop.f32.mrf.mxu2  ;;  %vm674_vm2 = vcmp.ge.f32.partialorder %v670_v2, 0.0 }
  0xc7   : > { %v650_v8 = vadd.f32 %v649_v3, %v635_v5  ;;  %v681_v15 = vsel %vm673_vm3, %v669_v7, %v677_v12  ;;  %v1756_v12 = vld [vmem:[%s2510_s10 + $0x8] sm:$0xff] }
  0xc8   : > { %v682_v9 = vsel %vm674_vm2, %v670_v2, %v678_v4 }
  0xc9   : > { %v661_v10 = vmul.f32 %v655_v59, %v650_v8  ;;  %v684_v11 = vpack.c.bf16 %v682_v9, %v680_v6  ;;  %v1760_v8 = vld [vmem:[%s2510_s10 + $0x28] sm:$0xff]  ;;  %v1759_v9 = vld [vmem:[%s2510_s10 + $0x20] sm:$0xff] }
  0xca   : > { %1209 = vmatpush.bf16.msra.mxu0 %v1760_v8 }
  0xcb   : > { %v671_v13 = vadd.f32 %v665_v1, %v661_v10  ;;  %886 = vmatmul.bf16.vlgmr.msrb.gmra.mxu1 %v684_v11  ;;  %914 = vmatmul.bf16.vlgmr.msrb.gmra.mxu0 %v684_v11  ;;  %v1758_v10 = vld [vmem:[%s2510_s10 + $0x18] sm:$0xff]  ;;  %v1757_v11 = vld [vmem:[%s2510_s10 + $0x10] sm:$0xff] }
  0xcd   : > { %v679_v14 = vmul.f32 0.2, %v671_v13  ;;  %vm675_vm4 = vcmp.ge.f32.partialorder %v671_v13, 0.0 }
  0xce   : > { %1210 = vmatpush.bf16.msra.mxu0 %v1759_v9 }
  0xcf   : > { %v683_v16 = vsel %vm675_vm4, %v671_v13, %v679_v14  ;;  %v1755_v13 = vld [vmem:[%s2510_s10] sm:$0xff] }
  0xd0   : > { %v685_v17 = vpack.c.bf16 %v683_v16, %v681_v15 }
  0xd2   : > { %900 = vmatmul.bf16.vlgmr.msrb.gmra.mxu3 %v685_v17  ;;  %928 = vmatmul.bf16.vlgmr.msrb.gmra.mxu2 %v685_v17  ;;  %v1821_v17 = vld [vmem:[%s2508_s8] ss:$0 sm:$0xff] }
  0xd3   : > { %1211 = vmatpush.bf16.msra.mxu0 %v1758_v10 }
  0xd7   : > { %1212 = vmatpush.bf16.msra.mxu0 %v1757_v11 }
  0xdb   : > { %1213 = vmatpush.bf16.msra.mxu0 %v1756_v12 }
  0xdf   : > { %1214 = vmatpush.bf16.msra.mxu0 %v1755_v13 }
 0x148   : > { %v887_v36 = vpop.f32.mrf.mxu1  ;;  %v915_v37 = vpop.f32.mrf.mxu0 }
 0x150   : > { %v889_v50 = vpop.f32.mrf.mxu1  ;;  %v917_v51 = vpop.f32.mrf.mxu0 }
 0x155   : > { %v901_v39 = vpop.f32.mrf.mxu3  ;;  %v929_v40 = vpop.f32.mrf.mxu2 }
 0x156   : > { %v902_v41 = vadd.f32 %v901_v39, %v887_v36  ;;  %v930_v43 = vadd.f32 %v929_v40, %v915_v37 }
 0x158   : > { %v940_v46 = vmul.f32 %v936_v42, %v902_v41  ;;  %v941_v48 = vmul.f32 %v937_v44, %v930_v43 }
 0x15a   : > { %v950_v54 = vadd.f32 %v946_v47, %v940_v46  ;;  %v951_v55 = vadd.f32 %v947_v49, %v941_v48 }
 0x15c   : > { %v958_v60 = vmul.f32 0.2, %v950_v54  ;;  %v959_v61 = vmul.f32 0.2, %v951_v55  ;;  %vm954_vm5 = vcmp.ge.f32.partialorder %v950_v54, 0.0  ;;  %vm955_vm6 = vcmp.ge.f32.partialorder %v951_v55, 0.0 }
 0x15d   : > { %v903_v52 = vpop.f32.mrf.mxu3  ;;  %v931_v53 = vpop.f32.mrf.mxu2 }
 0x15e   : > { %v904_v56 = vadd.f32 %v903_v52, %v889_v50  ;;  %v932_v57 = vadd.f32 %v931_v53, %v917_v51  ;;  %v962_v2 = vsel %vm954_vm5, %v950_v54, %v958_v60  ;;  %v963_v4 = vsel %vm955_vm6, %v951_v55, %v959_v61 }
 0x160   : > { %v942_v58 = vmul.f32 %v936_v42, %v904_v56  ;;  %v943_v59 = vmul.f32 %v937_v44, %v932_v57 }
 0x162   : > { %v952_v62 = vadd.f32 %v946_v47, %v942_v58  ;;  %v953_v63 = vadd.f32 %v947_v49, %v943_v59 }
 0x164   : > { %vm956_vm7 = vcmp.ge.f32.partialorder %v952_v62, 0.0  ;;  %v960_v0 = vmul.f32 0.2, %v952_v62  ;;  %vm957_vm8 = vcmp.ge.f32.partialorder %v953_v63, 0.0  ;;  %v961_v1 = vmul.f32 0.2, %v953_v63 }
 0x166   : > { %v964_v3 = vsel %vm956_vm7, %v952_v62, %v960_v0  ;;  %v965_v5 = vsel %vm957_vm8, %v953_v63, %v961_v1 }
 0x167   : > { %v966_v6 = vpack.c.bf16 %v964_v3, %v962_v2  ;;  %v967_v7 = vpack.c.bf16 %v965_v5, %v963_v4 }
 0x169   : > { %1104 = vmatmul.bf16.vlgmr.msra.gmra.mxu1 %v966_v6  ;;  %1118 = vmatmul.bf16.vlgmr.msra.gmra.mxu3 %v967_v7 }
 0x1e6   : > { %v1105_v14 = vpop.f32.mrf.mxu1 }
 0x1ec   : > { %v1119_v15 = vpop.f32.mrf.mxu3 }
 0x1ed   : > { %v1120_v16 = vadd.f32 %v1119_v15, %v1105_v14 }
 0x1ee   : > { %v1107_v20 = vpop.f32.mrf.mxu1 }
 0x1ef   : > { %v1128_v18 = vmul.f32 %v1821_v17, %v1120_v16 }
 0x1f1   : > { %v1134_v22 = vadd.f32 %v1822_v19, %v1128_v18 }
 0x1f3   : > { %v1138_v25 = vmul.f32 0.2, %v1134_v22  ;;  %vm1136_vm9 = vcmp.ge.f32.partialorder %v1134_v22, 0.0 }
 0x1f4   : > { %v1121_v21 = vpop.f32.mrf.mxu3 }
 0x1f5   : > { %v1122_v23 = vadd.f32 %v1121_v21, %v1107_v20  ;;  %v1140_v28 = vsel %vm1136_vm9, %v1134_v22, %v1138_v25 }
 0x1f7   : > { %v1129_v24 = vmul.f32 %v1821_v17, %v1122_v23 }
 0x1f9   : > { %v1135_v26 = vadd.f32 %v1822_v19, %v1129_v24 }
 0x1fb   : > { %vm1137_vm10 = vcmp.ge.f32.partialorder %v1135_v26, 0.0  ;;  %v1139_v27 = vmul.f32 0.2, %v1135_v26 }
 0x1fd   : > { %v1141_v29 = vsel %vm1137_vm10, %v1135_v26, %v1139_v27 }
 0x1fe   : > { %v1142_v30 = vpack.c.bf16 %v1141_v29, %v1140_v28 }
 0x200   : > { %1215 = vmatmul.bf16.vlgmr.msra.gmra.mxu0 %v1142_v30 }
 0x27d   : > { %v1216_v31 = vpop.f32.mrf.mxu0 }
 0x27e   : > { %1222 = vst.msk [vmem:[%s419_s0] sm:$0xff] %vm1221_vm11, %v1216_v31 }
 0x285   : > { %v1218_v32 = vpop.f32.mrf.mxu0 }
 0x286   : > { %1223 = vst.msk [vmem:[%s419_s0 + $0x8] sm:$0xff] %vm1221_vm11, %v1218_v32 }
 0x287   : > { %1850 = shalt.err (!%p1847_p5)
}
 0x288   : > { %s1903_s14 = smov 128   ;;  %s1904_s24 = smov 8  }
 0x289   : > { %1764 = dma.vmem_to_hbm [thread:$0]  (%p2005_p4), %s1240_s26, 256, %s1242_s30, %s1225_s12, %s1903_s14, %s1903_s14, %s1904_s24  }
 0x28a PF: > { %p1770_p6 = scmp.ge.s32.totalorder %s1901_s22, 2  ;;  %s1256_s21 = sand.u32 1, %s1881_s17  }
 0x28b   : > { %s1257_s28 = scalar_lea.sflag [#allocation3], %s1256_s21 }
 0x28c   : > { %p1767_p7 = pnand %p1770_p6, %p2012_p8 }
 0x28e   : > { %p1768_p9 = pneg %p1767_p7 }
 0x290   : > { %1876 = dma.done.wait (%p1768_p9), %s1257_s28, 256  }
 0x291   : > { %1878 = vsyncadd (%p1768_p9), %s1257_s28, 4294967040  ;;  %s24_s22 = sadd.s32 1, %s1901_s22   ;;  %s2523_s0 = sld [smem:[#allocation5_spill]] }
 0x292   : > { %p21_p10 = scmp.ge.s32.totalorder %s24_s22, 4   ;;  %s2524_s19 = sld [smem:[#allocation8_spill]] }
 0x293   : > { %s2525_s20 = sld [smem:[#allocation6_spill]]  ;;  %s2527_s17 = smov %s1885_s18 }
 0x294   : > { %s2526_s21 = sld [smem:[#allocation7_spill]]  ;;  %23 = sbr.rel (!%p21_p10) target bundleno = 6 (0x6), region = 102 }
 0x297   : > { %s2528_s18 = smov %s2523_s0 }
 0x299   :  { %1263 = vsyncpa [#allocation3], 1 }
 0x29a   :  { %1265 = vsyncpa [#allocation3 + $0x1], 1 }

</bundles_post_ra>
